<compile_context>
chip_gen: v6e
topology: v6e:2x2x1
jax: 0.10.0
libtpu: 0.0.40
codegen_flags: <defaults>
</compile_context>

<pallas_src>
import jax
import jax.numpy as jnp
from jax.experimental import pallas as pl
from jax.experimental.pallas import tpu as pltpu


CP = 128  # lane-padded channel width used for all activations / weights / biases

# Tap tables: (dh, dw, channel_offset) into the kernel's input block.
#  - stride-1 layer reads the spatially padded activation directly.
#  - stride-2 layers read a space-to-depth activation: phase (a,b) = (kh%2, kw%2)
#    lives in channel slab (a*2+b)*CP at spatial offset (kh//2, kw//2).
_TAPS_S1 = tuple((kh, kw, 0) for kh in range(3) for kw in range(3))
_TAPS_S2 = tuple((kh // 2, kw // 2, ((kh % 2) * 2 + (kw % 2)) * CP)
                 for kh in range(3) for kw in range(3))


# ---------------------------------------------------------------------------
# Pallas kernel: direct 3x3 conv (9 tap-GEMMs) + bias + ReLU for one image
# ---------------------------------------------------------------------------
def _make_conv_kernel(taps, ho, wo):
    """Build a conv3x3(+bias+ReLU) kernel body.

    Kernel signature: (x_ref, w_ref, b_ref, o_ref)
      x_ref: (1, Hin, Win, Cblk)  padded / space-to-depth activation (f32)
      w_ref: (9, CP, CP)          per-tap weight matrices (zero-padded)
      b_ref: (1, CP)              zero-padded bias
      o_ref: (1, ho, wo, CP)
    """
    flatten = (wo % 8 == 0)  # keep reshapes sublane-aligned

    def kernel(x_ref, w_ref, b_ref, o_ref):
        if flatten:
            acc = jnp.zeros((ho * wo, CP), jnp.float32)
            for t, (dh, dw, c0) in enumerate(taps):
                tap = x_ref[0, dh:dh + ho, dw:dw + wo, c0:c0 + CP]   # (ho,wo,CP)
                acc = acc + jnp.dot(tap.reshape(ho * wo, CP), w_ref[t],
                                    preferred_element_type=jnp.float32)
            y = jnp.maximum(acc + b_ref[...], 0.0)
            o_ref[0] = y.reshape(ho, wo, CP).astype(o_ref.dtype)
        else:
            # Small spatial output (wo < 8): per-output-row accumulation keeps
            # every value 2-D and avoids sub-8-sublane reshapes.
            for oh in range(ho):
                acc = jnp.zeros((wo, CP), jnp.float32)
                for t, (dh, dw, c0) in enumerate(taps):
                    tap = x_ref[0, oh + dh, dw:dw + wo, c0:c0 + CP]  # (wo, CP)
                    acc = acc + jnp.dot(tap, w_ref[t],
                                        preferred_element_type=jnp.float32)
                o_ref[0, oh] = jnp.maximum(acc + b_ref[...], 0.0).astype(o_ref.dtype)

    return kernel


def _conv_layer(x_block, w9, bias2d, taps, ho, wo):
    """x_block: (N, Hin, Win, Cblk) f32; w9: (9, CP, CP); bias2d: (1, CP)."""
    n, hin, win, cblk = x_block.shape
    kernel = _make_conv_kernel(taps, ho, wo)
    flops = int(2 * n * ho * wo * 9 * CP * CP)
    bytes_accessed = int(4 * (x_block.size + w9.size + bias2d.size + n * ho * wo * CP))
    return pl.pallas_call(
        kernel,
        out_shape=jax.ShapeDtypeStruct((n, ho, wo, CP), jnp.float32),
        grid=(n,),
        in_specs=[
            pl.BlockSpec((1, hin, win, cblk), lambda i: (i, 0, 0, 0)),
            pl.BlockSpec((9, CP, CP), lambda i: (0, 0, 0)),   # weights stay resident
            pl.BlockSpec((1, CP), lambda i: (0, 0)),
        ],
        out_specs=pl.BlockSpec((1, ho, wo, CP), lambda i: (i, 0, 0, 0)),
        compiler_params=pltpu.CompilerParams(
            dimension_semantics=("parallel",),
            vmem_limit_bytes=32 * 1024 * 1024,
        ),
        cost_estimate=pl.CostEstimate(
            flops=flops, transcendentals=0, bytes_accessed=bytes_accessed),
    )(x_block, w9, bias2d)


# ---------------------------------------------------------------------------
# Wrapper-side layout helpers (tiny XLA glue, no data blowup)
# ---------------------------------------------------------------------------
def _pad_params(w_hwio, b):
    """(3,3,Cin,Cout) HWIO weight + (Cout,) bias -> (9,CP,CP), (1,CP) zero-padded."""
    cin, cout = w_hwio.shape[2], w_hwio.shape[3]
    w9 = w_hwio.reshape(9, cin, cout)                 # t = kh*3 + kw (matches taps)
    w_p = jnp.zeros((9, CP, CP), jnp.float32).at[:, :cin, :cout].set(w9)
    b_p = jnp.zeros((1, CP), jnp.float32).at[0, :cout].set(b)
    return w_p, b_p


def _space_to_depth2(x_padded):
    """(N, 2R, 2S, C) -> (N, R, S, 4C); phase order (a,b) = (0,0),(0,1),(1,0),(1,1)."""
    phases = [x_padded[:, a::2, b::2, :] for a in (0, 1) for b in (0, 1)]
    return jnp.concatenate(phases, axis=-1)


# ---------------------------------------------------------------------------
# SimpleConv: parameters + forward
# ---------------------------------------------------------------------------
def init_simple_conv_params(hidden_size, key):
    """Deterministic init (uniform fan-in bound, like PyTorch's default)."""
    shapes = [
        (3, 3, 3, hidden_size),                       # conv1: Cin=3
        (3, 3, hidden_size, 2 * hidden_size),         # conv2
        (3, 3, 2 * hidden_size, 2 * hidden_size),     # conv3
    ]
    params = []
    for shape in shapes:
        key, kw, kb = jax.random.split(key, 3)
        fan_in = shape[0] * shape[1] * shape[2]
        bound = 1.0 / jnp.sqrt(fan_in)
        w = jax.random.uniform(kw, shape, jnp.float32, -bound, bound)
        b = jax.random.uniform(kb, (shape[3],), jnp.float32, -bound, bound)
        params.append((w, b))
    return params


@jax.jit
def simple_conv_forward(x_nchw, params):
    """Input/output in NCHW to match the PyTorch module."""
    (w1, b1), (w2, b2), (w3, b3) = params
    n, _, h, w = x_nchw.shape
    assert h % 4 == 0 and w % 4 == 0, "spatial dims must be divisible by 4"

    x = jnp.transpose(x_nchw, (0, 2, 3, 1)).astype(jnp.float32)       # NCHW -> NHWC

    # --- Layer 1 (stride 1): pad spatially (+1) and channels (Cin -> CP). ---
    xp = jnp.pad(x, ((0, 0), (1, 1), (1, 1), (0, CP - x.shape[-1])))
    w1p, b1p = _pad_params(w1, b1)
    y1 = _conv_layer(xp, w1p, b1p, _TAPS_S1, h, w)                    # (N,H,W,CP)

    # --- Layer 2 (stride 2): spatial pad + space-to-depth, contiguous taps. ---
    h2, wo2 = h // 2, w // 2
    sd1 = _space_to_depth2(jnp.pad(y1, ((0, 0), (1, 1), (1, 1), (0, 0))))
    w2p, b2p = _pad_params(w2, b2)
    y2 = _conv_layer(sd1, w2p, b2p, _TAPS_S2, h2, wo2)                # (N,H/2,W/2,CP)

    # --- Layer 3 (stride 2): same scheme. ---
    h3, wo3 = h2 // 2, wo2 // 2
    sd2 = _space_to_depth2(jnp.pad(y2, ((0, 0), (1, 1), (1, 1), (0, 0))))
    w3p, b3p = _pad_params(w3, b3)
    y3 = _conv_layer(sd2, w3p, b3p, _TAPS_S2, h3, wo3)                # (N,H/4,W/4,CP)

    cout = w3.shape[-1]
    return jnp.transpose(y3[..., :cout], (0, 3, 1, 2))                # NHWC -> NCHW


# ---------------------------------------------------------------------------
# Pure-JAX reference (lax conv) for correctness check
# ---------------------------------------------------------------------------
def _ref_forward(x_nchw, params):
    x = x_nchw
    strides = (1, 2, 2)
    for (w, b), s in zip(params, strides):
        w_oihw = jnp.transpose(w, (3, 2, 0, 1))       # HWIO -> OIHW
        x = jax.lax.conv_general_dilated(
            x, w_oihw, window_strides=(s, s), padding=((1, 1), (1, 1)),
            dimension_numbers=("NCHW", "OIHW", "NCHW"))
        x = jnp.maximum(x + b.reshape(1, -1, 1, 1), 0.0)
    return x


if __name__ == "__main__":
    hidden_size = 8
    key = jax.random.PRNGKey(0)
    k_x, k_p = jax.random.split(key)

    x = jax.random.normal(k_x, (2, 3, 16, 16), jnp.float32)   # NCHW
    params = init_simple_conv_params(hidden_size, k_p)

    out = simple_conv_forward(x, params)
    out = jax.block_until_ready(out)

    ref = _ref_forward(x, params)
    assert out.shape == (2, 2 * hidden_size, 4, 4), out.shape
    assert jnp.allclose(out, ref, atol=1e-4, rtol=1e-4)

    print("KERNEL_OK")
</pallas_src>

<mosaic_0001>
module attributes {stable_mosaic.version = 11 : i64} {
  func.func @kernel(%arg0: i32, %arg1: memref<1x18x18x128xf32, #tpu.memory_space<vmem>>, %arg2: memref<9x128x128xf32, #tpu.memory_space<vmem>>, %arg3: memref<1x128xf32, #tpu.memory_space<vmem>>, %arg4: memref<1x16x16x128xf32, #tpu.memory_space<vmem>>) attributes {dimension_semantics = [#tpu.dimension_semantics<parallel>], iteration_bounds = array<i64: 2>, scalar_prefetch = 0 : i64, scratch_operands = 0 : i64, tpu.core_type = #tpu.core_type<tc>, window_params = [{transform_indices = @transform_0, window_bounds = array<i64: 1, 18, 18, 128>}, {pipeline_mode = #tpu.pipeline_mode<synchronous>, transform_indices = @transform_1, window_bounds = array<i64: 9, 128, 128>}, {pipeline_mode = #tpu.pipeline_mode<synchronous>, transform_indices = @transform_2, window_bounds = array<i64: 1, 128>}, {transform_indices = @transform_3, window_bounds = array<i64: 1, 16, 16, 128>}]} {
    %cst = arith.constant 0.000000e+00 : f32
    %0 = vector.broadcast %cst : f32 to vector<256x128xf32>
    %c0 = arith.constant 0 : index
    %c0_0 = arith.constant 0 : index
    %c0_1 = arith.constant 0 : index
    %c0_2 = arith.constant 0 : index
    %1 = vector.load %arg1[%c0, %c0_0, %c0_1, %c0_2] : memref<1x18x18x128xf32, #tpu.memory_space<vmem>>, vector<1x16x16x128xf32>
    %2 = vector.shape_cast %1 : vector<1x16x16x128xf32> to vector<16x16x128xf32>
    %3 = vector.shape_cast %2 : vector<16x16x128xf32> to vector<256x128xf32>
    %c0_3 = arith.constant 0 : index
    %c0_4 = arith.constant 0 : index
    %c0_5 = arith.constant 0 : index
    %4 = vector.load %arg2[%c0_3, %c0_4, %c0_5] : memref<9x128x128xf32, #tpu.memory_space<vmem>>, vector<1x128x128xf32>
    %5 = vector.shape_cast %4 : vector<1x128x128xf32> to vector<128x128xf32>
    %cst_6 = arith.constant dense<0.000000e+00> : vector<256x128xf32>
    %6 = tpu.matmul %3, %5, %cst_6 {dimension_numbers = #tpu.dot_dimension_numbers<[1], [0], [0], [1], [0, 0, 1, 1], [], []>} : vector<256x128xf32>, vector<128x128xf32>, vector<256x128xf32> -> vector<256x128xf32>
    %7 = arith.addf %0, %6 : vector<256x128xf32>
    %c0_7 = arith.constant 0 : index
    %c0_8 = arith.constant 0 : index
    %c1 = arith.constant 1 : index
    %c0_9 = arith.constant 0 : index
    %8 = vector.load %arg1[%c0_7, %c0_8, %c1, %c0_9] : memref<1x18x18x128xf32, #tpu.memory_space<vmem>>, vector<1x16x16x128xf32>
    %9 = vector.shape_cast %8 : vector<1x16x16x128xf32> to vector<16x16x128xf32>
    %10 = vector.shape_cast %9 : vector<16x16x128xf32> to vector<256x128xf32>
    %c1_10 = arith.constant 1 : index
    %c0_11 = arith.constant 0 : index
    %c0_12 = arith.constant 0 : index
    %11 = vector.load %arg2[%c1_10, %c0_11, %c0_12] : memref<9x128x128xf32, #tpu.memory_space<vmem>>, vector<1x128x128xf32>
    %12 = vector.shape_cast %11 : vector<1x128x128xf32> to vector<128x128xf32>
    %cst_13 = arith.constant dense<0.000000e+00> : vector<256x128xf32>
    %13 = tpu.matmul %10, %12, %cst_13 {dimension_numbers = #tpu.dot_dimension_numbers<[1], [0], [0], [1], [0, 0, 1, 1], [], []>} : vector<256x128xf32>, vector<128x128xf32>, vector<256x128xf32> -> vector<256x128xf32>
    %14 = arith.addf %7, %13 : vector<256x128xf32>
    %c0_14 = arith.constant 0 : index
    %c0_15 = arith.constant 0 : index
    %c2 = arith.constant 2 : index
    %c0_16 = arith.constant 0 : index
    %15 = vector.load %arg1[%c0_14, %c0_15, %c2, %c0_16] : memref<1x18x18x128xf32, #tpu.memory_space<vmem>>, vector<1x16x16x128xf32>
    %16 = vector.shape_cast %15 : vector<1x16x16x128xf32> to vector<16x16x128xf32>
    %17 = vector.shape_cast %16 : vector<16x16x128xf32> to vector<256x128xf32>
    %c2_17 = arith.constant 2 : index
    %c0_18 = arith.constant 0 : index
    %c0_19 = arith.constant 0 : index
    %18 = vector.load %arg2[%c2_17, %c0_18, %c0_19] : memref<9x128x128xf32, #tpu.memory_space<vmem>>, vector<1x128x128xf32>
    %19 = vector.shape_cast %18 : vector<1x128x128xf32> to vector<128x128xf32>
    %cst_20 = arith.constant dense<0.000000e+00> : vector<256x128xf32>
    %20 = tpu.matmul %17, %19, %cst_20 {dimension_numbers = #tpu.dot_dimension_numbers<[1], [0], [0], [1], [0, 0, 1, 1], [], []>} : vector<256x128xf32>, vector<128x128xf32>, vector<256x128xf32> -> vector<256x128xf32>
    %21 = arith.addf %14, %20 : vector<256x128xf32>
    %c0_21 = arith.constant 0 : index
    %c1_22 = arith.constant 1 : index
    %c0_23 = arith.constant 0 : index
    %c0_24 = arith.constant 0 : index
    %22 = vector.load %arg1[%c0_21, %c1_22, %c0_23, %c0_24] : memref<1x18x18x128xf32, #tpu.memory_space<vmem>>, vector<1x16x16x128xf32>
    %23 = vector.shape_cast %22 : vector<1x16x16x128xf32> to vector<16x16x128xf32>
    %24 = vector.shape_cast %23 : vector<16x16x128xf32> to vector<256x128xf32>
    %c3 = arith.constant 3 : index
    %c0_25 = arith.constant 0 : index
    %c0_26 = arith.constant 0 : index
    %25 = vector.load %arg2[%c3, %c0_25, %c0_26] : memref<9x128x128xf32, #tpu.memory_space<vmem>>, vector<1x128x128xf32>
    %26 = vector.shape_cast %25 : vector<1x128x128xf32> to vector<128x128xf32>
    %cst_27 = arith.constant dense<0.000000e+00> : vector<256x128xf32>
    %27 = tpu.matmul %24, %26, %cst_27 {dimension_numbers = #tpu.dot_dimension_numbers<[1], [0], [0], [1], [0, 0, 1, 1], [], []>} : vector<256x128xf32>, vector<128x128xf32>, vector<256x128xf32> -> vector<256x128xf32>
    %28 = arith.addf %21, %27 : vector<256x128xf32>
    %c0_28 = arith.constant 0 : index
    %c1_29 = arith.constant 1 : index
    %c1_30 = arith.constant 1 : index
    %c0_31 = arith.constant 0 : index
    %29 = vector.load %arg1[%c0_28, %c1_29, %c1_30, %c0_31] : memref<1x18x18x128xf32, #tpu.memory_space<vmem>>, vector<1x16x16x128xf32>
    %30 = vector.shape_cast %29 : vector<1x16x16x128xf32> to vector<16x16x128xf32>
    %31 = vector.shape_cast %30 : vector<16x16x128xf32> to vector<256x128xf32>
    %c4 = arith.constant 4 : index
    %c0_32 = arith.constant 0 : index
    %c0_33 = arith.constant 0 : index
    %32 = vector.load %arg2[%c4, %c0_32, %c0_33] : memref<9x128x128xf32, #tpu.memory_space<vmem>>, vector<1x128x128xf32>
    %33 = vector.shape_cast %32 : vector<1x128x128xf32> to vector<128x128xf32>
    %cst_34 = arith.constant dense<0.000000e+00> : vector<256x128xf32>
    %34 = tpu.matmul %31, %33, %cst_34 {dimension_numbers = #tpu.dot_dimension_numbers<[1], [0], [0], [1], [0, 0, 1, 1], [], []>} : vector<256x128xf32>, vector<128x128xf32>, vector<256x128xf32> -> vector<256x128xf32>
    %35 = arith.addf %28, %34 : vector<256x128xf32>
    %c0_35 = arith.constant 0 : index
    %c1_36 = arith.constant 1 : index
    %c2_37 = arith.constant 2 : index
    %c0_38 = arith.constant 0 : index
    %36 = vector.load %arg1[%c0_35, %c1_36, %c2_37, %c0_38] : memref<1x18x18x128xf32, #tpu.memory_space<vmem>>, vector<1x16x16x128xf32>
    %37 = vector.shape_cast %36 : vector<1x16x16x128xf32> to vector<16x16x128xf32>
    %38 = vector.shape_cast %37 : vector<16x16x128xf32> to vector<256x128xf32>
    %c5 = arith.constant 5 : index
    %c0_39 = arith.constant 0 : index
    %c0_40 = arith.constant 0 : index
    %39 = vector.load %arg2[%c5, %c0_39, %c0_40] : memref<9x128x128xf32, #tpu.memory_space<vmem>>, vector<1x128x128xf32>
    %40 = vector.shape_cast %39 : vector<1x128x128xf32> to vector<128x128xf32>
    %cst_41 = arith.constant dense<0.000000e+00> : vector<256x128xf32>
    %41 = tpu.matmul %38, %40, %cst_41 {dimension_numbers = #tpu.dot_dimension_numbers<[1], [0], [0], [1], [0, 0, 1, 1], [], []>} : vector<256x128xf32>, vector<128x128xf32>, vector<256x128xf32> -> vector<256x128xf32>
    %42 = arith.addf %35, %41 : vector<256x128xf32>
    %c0_42 = arith.constant 0 : index
    %c2_43 = arith.constant 2 : index
    %c0_44 = arith.constant 0 : index
    %c0_45 = arith.constant 0 : index
    %43 = vector.load %arg1[%c0_42, %c2_43, %c0_44, %c0_45] : memref<1x18x18x128xf32, #tpu.memory_space<vmem>>, vector<1x16x16x128xf32>
    %44 = vector.shape_cast %43 : vector<1x16x16x128xf32> to vector<16x16x128xf32>
    %45 = vector.shape_cast %44 : vector<16x16x128xf32> to vector<256x128xf32>
    %c6 = arith.constant 6 : index
    %c0_46 = arith.constant 0 : index
    %c0_47 = arith.constant 0 : index
    %46 = vector.load %arg2[%c6, %c0_46, %c0_47] : memref<9x128x128xf32, #tpu.memory_space<vmem>>, vector<1x128x128xf32>
    %47 = vector.shape_cast %46 : vector<1x128x128xf32> to vector<128x128xf32>
    %cst_48 = arith.constant dense<0.000000e+00> : vector<256x128xf32>
    %48 = tpu.matmul %45, %47, %cst_48 {dimension_numbers = #tpu.dot_dimension_numbers<[1], [0], [0], [1], [0, 0, 1, 1], [], []>} : vector<256x128xf32>, vector<128x128xf32>, vector<256x128xf32> -> vector<256x128xf32>
    %49 = arith.addf %42, %48 : vector<256x128xf32>
    %c0_49 = arith.constant 0 : index
    %c2_50 = arith.constant 2 : index
    %c1_51 = arith.constant 1 : index
    %c0_52 = arith.constant 0 : index
    %50 = vector.load %arg1[%c0_49, %c2_50, %c1_51, %c0_52] : memref<1x18x18x128xf32, #tpu.memory_space<vmem>>, vector<1x16x16x128xf32>
    %51 = vector.shape_cast %50 : vector<1x16x16x128xf32> to vector<16x16x128xf32>
    %52 = vector.shape_cast %51 : vector<16x16x128xf32> to vector<256x128xf32>
    %c7 = arith.constant 7 : index
    %c0_53 = arith.constant 0 : index
    %c0_54 = arith.constant 0 : index
    %53 = vector.load %arg2[%c7, %c0_53, %c0_54] : memref<9x128x128xf32, #tpu.memory_space<vmem>>, vector<1x128x128xf32>
    %54 = vector.shape_cast %53 : vector<1x128x128xf32> to vector<128x128xf32>
    %cst_55 = arith.constant dense<0.000000e+00> : vector<256x128xf32>
    %55 = tpu.matmul %52, %54, %cst_55 {dimension_numbers = #tpu.dot_dimension_numbers<[1], [0], [0], [1], [0, 0, 1, 1], [], []>} : vector<256x128xf32>, vector<128x128xf32>, vector<256x128xf32> -> vector<256x128xf32>
    %56 = arith.addf %49, %55 : vector<256x128xf32>
    %c0_56 = arith.constant 0 : index
    %c2_57 = arith.constant 2 : index
    %c2_58 = arith.constant 2 : index
    %c0_59 = arith.constant 0 : index
    %57 = vector.load %arg1[%c0_56, %c2_57, %c2_58, %c0_59] : memref<1x18x18x128xf32, #tpu.memory_space<vmem>>, vector<1x16x16x128xf32>
    %58 = vector.shape_cast %57 : vector<1x16x16x128xf32> to vector<16x16x128xf32>
    %59 = vector.shape_cast %58 : vector<16x16x128xf32> to vector<256x128xf32>
    %c8 = arith.constant 8 : index
    %c0_60 = arith.constant 0 : index
    %c0_61 = arith.constant 0 : index
    %60 = vector.load %arg2[%c8, %c0_60, %c0_61] : memref<9x128x128xf32, #tpu.memory_space<vmem>>, vector<1x128x128xf32>
    %61 = vector.shape_cast %60 : vector<1x128x128xf32> to vector<128x128xf32>
    %cst_62 = arith.constant dense<0.000000e+00> : vector<256x128xf32>
    %62 = tpu.matmul %59, %61, %cst_62 {dimension_numbers = #tpu.dot_dimension_numbers<[1], [0], [0], [1], [0, 0, 1, 1], [], []>} : vector<256x128xf32>, vector<128x128xf32>, vector<256x128xf32> -> vector<256x128xf32>
    %63 = arith.addf %56, %62 : vector<256x128xf32>
    %c0_63 = arith.constant 0 : index
    %c0_64 = arith.constant 0 : index
    %64 = vector.load %arg3[%c0_63, %c0_64] : memref<1x128xf32, #tpu.memory_space<vmem>>, vector<1x128xf32>
    %65 = vector.broadcast %64 : vector<1x128xf32> to vector<256x128xf32>
    %66 = arith.addf %63, %65 : vector<256x128xf32>
    %cst_65 = arith.constant 0.000000e+00 : f32
    %67 = vector.broadcast %cst_65 : f32 to vector<256x128xf32>
    %68 = arith.maximumf %66, %67 : vector<256x128xf32>
    %69 = vector.shape_cast %68 : vector<256x128xf32> to vector<16x16x128xf32>
    %c0_66 = arith.constant 0 : index
    %c0_67 = arith.constant 0 : index
    %c0_68 = arith.constant 0 : index
    %c0_69 = arith.constant 0 : index
    %70 = vector.load %arg4[%c0_66, %c0_67, %c0_68, %c0_69] : memref<1x16x16x128xf32, #tpu.memory_space<vmem>>, vector<1x16x16x128xf32>
    %71 = vector.shape_cast %70 : vector<1x16x16x128xf32> to vector<16x16x128xf32>
    %72 = vector.shape_cast %69 : vector<16x16x128xf32> to vector<1x16x16x128xf32>
    tpu.vector_store %arg4[%c0_66, %c0_67, %c0_68, %c0_69], %72 {strides = array<i32>} : memref<1x16x16x128xf32, #tpu.memory_space<vmem>>, vector<1x16x16x128xf32>,
    return
  }
  func.func @transform_0(%arg0: i32) -> (i32, i32, i32, i32) {
    %c0_i32 = arith.constant 0 : i32
    %c0_i32_0 = arith.constant 0 : i32
    %c0_i32_1 = arith.constant 0 : i32
    %c0_i32_2 = arith.constant 0 : i32
    return %arg0, %c0_i32, %c0_i32_0, %c0_i32_1 : i32, i32, i32, i32
  }
  func.func @transform_1(%arg0: i32) -> (i32, i32, i32) {
    %c0_i32 = arith.constant 0 : i32
    %c0_i32_0 = arith.constant 0 : i32
    %c0_i32_1 = arith.constant 0 : i32
    %c0_i32_2 = arith.constant 0 : i32
    return %c0_i32, %c0_i32_0, %c0_i32_1 : i32, i32, i32
  }
  func.func @transform_2(%arg0: i32) -> (i32, i32) {
    %c0_i32 = arith.constant 0 : i32
    %c0_i32_0 = arith.constant 0 : i32
    %c0_i32_1 = arith.constant 0 : i32
    return %c0_i32, %c0_i32_0 : i32, i32
  }
  func.func @transform_3(%arg0: i32) -> (i32, i32, i32, i32) {
    %c0_i32 = arith.constant 0 : i32
    %c0_i32_0 = arith.constant 0 : i32
    %c0_i32_1 = arith.constant 0 : i32
    %c0_i32_2 = arith.constant 0 : i32
    return %arg0, %c0_i32, %c0_i32_0, %c0_i32_1 : i32, i32, i32, i32
  }
}

module attributes {stable_mosaic.version = 11 : i64} {
  func.func @kernel(%arg0: i32, %arg1: memref<1x9x9x512xf32, #tpu.memory_space<vmem>>, %arg2: memref<9x128x128xf32, #tpu.memory_space<vmem>>, %arg3: memref<1x128xf32, #tpu.memory_space<vmem>>, %arg4: memref<1x8x8x128xf32, #tpu.memory_space<vmem>>) attributes {dimension_semantics = [#tpu.dimension_semantics<parallel>], iteration_bounds = array<i64: 2>, scalar_prefetch = 0 : i64, scratch_operands = 0 : i64, tpu.core_type = #tpu.core_type<tc>, window_params = [{transform_indices = @transform_0, window_bounds = array<i64: 1, 9, 9, 512>}, {pipeline_mode = #tpu.pipeline_mode<synchronous>, transform_indices = @transform_1, window_bounds = array<i64: 9, 128, 128>}, {pipeline_mode = #tpu.pipeline_mode<synchronous>, transform_indices = @transform_2, window_bounds = array<i64: 1, 128>}, {transform_indices = @transform_3, window_bounds = array<i64: 1, 8, 8, 128>}]} {
    %cst = arith.constant 0.000000e+00 : f32
    %0 = vector.broadcast %cst : f32 to vector<64x128xf32>
    %c0 = arith.constant 0 : index
    %c0_0 = arith.constant 0 : index
    %c0_1 = arith.constant 0 : index
    %c0_2 = arith.constant 0 : index
    %1 = vector.load %arg1[%c0, %c0_0, %c0_1, %c0_2] : memref<1x9x9x512xf32, #tpu.memory_space<vmem>>, vector<1x8x8x128xf32>
    %2 = vector.shape_cast %1 : vector<1x8x8x128xf32> to vector<8x8x128xf32>
    %3 = vector.shape_cast %2 : vector<8x8x128xf32> to vector<64x128xf32>
    %c0_3 = arith.constant 0 : index
    %c0_4 = arith.constant 0 : index
    %c0_5 = arith.constant 0 : index
    %4 = vector.load %arg2[%c0_3, %c0_4, %c0_5] : memref<9x128x128xf32, #tpu.memory_space<vmem>>, vector<1x128x128xf32>
    %5 = vector.shape_cast %4 : vector<1x128x128xf32> to vector<128x128xf32>
    %cst_6 = arith.constant dense<0.000000e+00> : vector<64x128xf32>
    %6 = tpu.matmul %3, %5, %cst_6 {dimension_numbers = #tpu.dot_dimension_numbers<[1], [0], [0], [1], [0, 0, 1, 1], [], []>} : vector<64x128xf32>, vector<128x128xf32>, vector<64x128xf32> -> vector<64x128xf32>
    %7 = arith.addf %0, %6 : vector<64x128xf32>
    %c0_7 = arith.constant 0 : index
    %c0_8 = arith.constant 0 : index
    %c0_9 = arith.constant 0 : index
    %c128 = arith.constant 128 : index
    %8 = vector.load %arg1[%c0_7, %c0_8, %c0_9, %c128] : memref<1x9x9x512xf32, #tpu.memory_space<vmem>>, vector<1x8x8x128xf32>
    %9 = vector.shape_cast %8 : vector<1x8x8x128xf32> to vector<8x8x128xf32>
    %10 = vector.shape_cast %9 : vector<8x8x128xf32> to vector<64x128xf32>
    %c1 = arith.constant 1 : index
    %c0_10 = arith.constant 0 : index
    %c0_11 = arith.constant 0 : index
    %11 = vector.load %arg2[%c1, %c0_10, %c0_11] : memref<9x128x128xf32, #tpu.memory_space<vmem>>, vector<1x128x128xf32>
    %12 = vector.shape_cast %11 : vector<1x128x128xf32> to vector<128x128xf32>
    %cst_12 = arith.constant dense<0.000000e+00> : vector<64x128xf32>
    %13 = tpu.matmul %10, %12, %cst_12 {dimension_numbers = #tpu.dot_dimension_numbers<[1], [0], [0], [1], [0, 0, 1, 1], [], []>} : vector<64x128xf32>, vector<128x128xf32>, vector<64x128xf32> -> vector<64x128xf32>
    %14 = arith.addf %7, %13 : vector<64x128xf32>
    %c0_13 = arith.constant 0 : index
    %c0_14 = arith.constant 0 : index
    %c1_15 = arith.constant 1 : index
    %c0_16 = arith.constant 0 : index
    %15 = vector.load %arg1[%c0_13, %c0_14, %c1_15, %c0_16] : memref<1x9x9x512xf32, #tpu.memory_space<vmem>>, vector<1x8x8x128xf32>
    %16 = vector.shape_cast %15 : vector<1x8x8x128xf32> to vector<8x8x128xf32>
    %17 = vector.shape_cast %16 : vector<8x8x128xf32> to vector<64x128xf32>
    %c2 = arith.constant 2 : index
    %c0_17 = arith.constant 0 : index
    %c0_18 = arith.constant 0 : index
    %18 = vector.load %arg2[%c2, %c0_17, %c0_18] : memref<9x128x128xf32, #tpu.memory_space<vmem>>, vector<1x128x128xf32>
    %19 = vector.shape_cast %18 : vector<1x128x128xf32> to vector<128x128xf32>
    %cst_19 = arith.constant dense<0.000000e+00> : vector<64x128xf32>
    %20 = tpu.matmul %17, %19, %cst_19 {dimension_numbers = #tpu.dot_dimension_numbers<[1], [0], [0], [1], [0, 0, 1, 1], [], []>} : vector<64x128xf32>, vector<128x128xf32>, vector<64x128xf32> -> vector<64x128xf32>
    %21 = arith.addf %14, %20 : vector<64x128xf32>
    %c0_20 = arith.constant 0 : index
    %c0_21 = arith.constant 0 : index
    %c0_22 = arith.constant 0 : index
    %c256 = arith.constant 256 : index
    %22 = vector.load %arg1[%c0_20, %c0_21, %c0_22, %c256] : memref<1x9x9x512xf32, #tpu.memory_space<vmem>>, vector<1x8x8x128xf32>
    %23 = vector.shape_cast %22 : vector<1x8x8x128xf32> to vector<8x8x128xf32>
    %24 = vector.shape_cast %23 : vector<8x8x128xf32> to vector<64x128xf32>
    %c3 = arith.constant 3 : index
    %c0_23 = arith.constant 0 : index
    %c0_24 = arith.constant 0 : index
    %25 = vector.load %arg2[%c3, %c0_23, %c0_24] : memref<9x128x128xf32, #tpu.memory_space<vmem>>, vector<1x128x128xf32>
    %26 = vector.shape_cast %25 : vector<1x128x128xf32> to vector<128x128xf32>
    %cst_25 = arith.constant dense<0.000000e+00> : vector<64x128xf32>
    %27 = tpu.matmul %24, %26, %cst_25 {dimension_numbers = #tpu.dot_dimension_numbers<[1], [0], [0], [1], [0, 0, 1, 1], [], []>} : vector<64x128xf32>, vector<128x128xf32>, vector<64x128xf32> -> vector<64x128xf32>
    %28 = arith.addf %21, %27 : vector<64x128xf32>
    %c0_26 = arith.constant 0 : index
    %c0_27 = arith.constant 0 : index
    %c0_28 = arith.constant 0 : index
    %c384 = arith.constant 384 : index
    %29 = vector.load %arg1[%c0_26, %c0_27, %c0_28, %c384] : memref<1x9x9x512xf32, #tpu.memory_space<vmem>>, vector<1x8x8x128xf32>
    %30 = vector.shape_cast %29 : vector<1x8x8x128xf32> to vector<8x8x128xf32>
    %31 = vector.shape_cast %30 : vector<8x8x128xf32> to vector<64x128xf32>
    %c4 = arith.constant 4 : index
    %c0_29 = arith.constant 0 : index
    %c0_30 = arith.constant 0 : index
    %32 = vector.load %arg2[%c4, %c0_29, %c0_30] : memref<9x128x128xf32, #tpu.memory_space<vmem>>, vector<1x128x128xf32>
    %33 = vector.shape_cast %32 : vector<1x128x128xf32> to vector<128x128xf32>
    %cst_31 = arith.constant dense<0.000000e+00> : vector<64x128xf32>
    %34 = tpu.matmul %31, %33, %cst_31 {dimension_numbers = #tpu.dot_dimension_numbers<[1], [0], [0], [1], [0, 0, 1, 1], [], []>} : vector<64x128xf32>, vector<128x128xf32>, vector<64x128xf32> -> vector<64x128xf32>
    %35 = arith.addf %28, %34 : vector<64x128xf32>
    %c0_32 = arith.constant 0 : index
    %c0_33 = arith.constant 0 : index
    %c1_34 = arith.constant 1 : index
    %c256_35 = arith.constant 256 : index
    %36 = vector.load %arg1[%c0_32, %c0_33, %c1_34, %c256_35] : memref<1x9x9x512xf32, #tpu.memory_space<vmem>>, vector<1x8x8x128xf32>
    %37 = vector.shape_cast %36 : vector<1x8x8x128xf32> to vector<8x8x128xf32>
    %38 = vector.shape_cast %37 : vector<8x8x128xf32> to vector<64x128xf32>
    %c5 = arith.constant 5 : index
    %c0_36 = arith.constant 0 : index
    %c0_37 = arith.constant 0 : index
    %39 = vector.load %arg2[%c5, %c0_36, %c0_37] : memref<9x128x128xf32, #tpu.memory_space<vmem>>, vector<1x128x128xf32>
    %40 = vector.shape_cast %39 : vector<1x128x128xf32> to vector<128x128xf32>
    %cst_38 = arith.constant dense<0.000000e+00> : vector<64x128xf32>
    %41 = tpu.matmul %38, %40, %cst_38 {dimension_numbers = #tpu.dot_dimension_numbers<[1], [0], [0], [1], [0, 0, 1, 1], [], []>} : vector<64x128xf32>, vector<128x128xf32>, vector<64x128xf32> -> vector<64x128xf32>
    %42 = arith.addf %35, %41 : vector<64x128xf32>
    %c0_39 = arith.constant 0 : index
    %c1_40 = arith.constant 1 : index
    %c0_41 = arith.constant 0 : index
    %c0_42 = arith.constant 0 : index
    %43 = vector.load %arg1[%c0_39, %c1_40, %c0_41, %c0_42] : memref<1x9x9x512xf32, #tpu.memory_space<vmem>>, vector<1x8x8x128xf32>
    %44 = vector.shape_cast %43 : vector<1x8x8x128xf32> to vector<8x8x128xf32>
    %45 = vector.shape_cast %44 : vector<8x8x128xf32> to vector<64x128xf32>
    %c6 = arith.constant 6 : index
    %c0_43 = arith.constant 0 : index
    %c0_44 = arith.constant 0 : index
    %46 = vector.load %arg2[%c6, %c0_43, %c0_44] : memref<9x128x128xf32, #tpu.memory_space<vmem>>, vector<1x128x128xf32>
    %47 = vector.shape_cast %46 : vector<1x128x128xf32> to vector<128x128xf32>
    %cst_45 = arith.constant dense<0.000000e+00> : vector<64x128xf32>
    %48 = tpu.matmul %45, %47, %cst_45 {dimension_numbers = #tpu.dot_dimension_numbers<[1], [0], [0], [1], [0, 0, 1, 1], [], []>} : vector<64x128xf32>, vector<128x128xf32>, vector<64x128xf32> -> vector<64x128xf32>
    %49 = arith.addf %42, %48 : vector<64x128xf32>
    %c0_46 = arith.constant 0 : index
    %c1_47 = arith.constant 1 : index
    %c0_48 = arith.constant 0 : index
    %c128_49 = arith.constant 128 : index
    %50 = vector.load %arg1[%c0_46, %c1_47, %c0_48, %c128_49] : memref<1x9x9x512xf32, #tpu.memory_space<vmem>>, vector<1x8x8x128xf32>
    %51 = vector.shape_cast %50 : vector<1x8x8x128xf32> to vector<8x8x128xf32>
    %52 = vector.shape_cast %51 : vector<8x8x128xf32> to vector<64x128xf32>
    %c7 = arith.constant 7 : index
    %c0_50 = arith.constant 0 : index
    %c0_51 = arith.constant 0 : index
    %53 = vector.load %arg2[%c7, %c0_50, %c0_51] : memref<9x128x128xf32, #tpu.memory_space<vmem>>, vector<1x128x128xf32>
    %54 = vector.shape_cast %53 : vector<1x128x128xf32> to vector<128x128xf32>
    %cst_52 = arith.constant dense<0.000000e+00> : vector<64x128xf32>
    %55 = tpu.matmul %52, %54, %cst_52 {dimension_numbers = #tpu.dot_dimension_numbers<[1], [0], [0], [1], [0, 0, 1, 1], [], []>} : vector<64x128xf32>, vector<128x128xf32>, vector<64x128xf32> -> vector<64x128xf32>
    %56 = arith.addf %49, %55 : vector<64x128xf32>
    %c0_53 = arith.constant 0 : index
    %c1_54 = arith.constant 1 : index
    %c1_55 = arith.constant 1 : index
    %c0_56 = arith.constant 0 : index
    %57 = vector.load %arg1[%c0_53, %c1_54, %c1_55, %c0_56] : memref<1x9x9x512xf32, #tpu.memory_space<vmem>>, vector<1x8x8x128xf32>
    %58 = vector.shape_cast %57 : vector<1x8x8x128xf32> to vector<8x8x128xf32>
    %59 = vector.shape_cast %58 : vector<8x8x128xf32> to vector<64x128xf32>
    %c8 = arith.constant 8 : index
    %c0_57 = arith.constant 0 : index
    %c0_58 = arith.constant 0 : index
    %60 = vector.load %arg2[%c8, %c0_57, %c0_58] : memref<9x128x128xf32, #tpu.memory_space<vmem>>, vector<1x128x128xf32>
    %61 = vector.shape_cast %60 : vector<1x128x128xf32> to vector<128x128xf32>
    %cst_59 = arith.constant dense<0.000000e+00> : vector<64x128xf32>
    %62 = tpu.matmul %59, %61, %cst_59 {dimension_numbers = #tpu.dot_dimension_numbers<[1], [0], [0], [1], [0, 0, 1, 1], [], []>} : vector<64x128xf32>, vector<128x128xf32>, vector<64x128xf32> -> vector<64x128xf32>
    %63 = arith.addf %56, %62 : vector<64x128xf32>
    %c0_60 = arith.constant 0 : index
    %c0_61 = arith.constant 0 : index
    %64 = vector.load %arg3[%c0_60, %c0_61] : memref<1x128xf32, #tpu.memory_space<vmem>>, vector<1x128xf32>
    %65 = vector.broadcast %64 : vector<1x128xf32> to vector<64x128xf32>
    %66 = arith.addf %63, %65 : vector<64x128xf32>
    %cst_62 = arith.constant 0.000000e+00 : f32
    %67 = vector.broadcast %cst_62 : f32 to vector<64x128xf32>
    %68 = arith.maximumf %66, %67 : vector<64x128xf32>
    %69 = vector.shape_cast %68 : vector<64x128xf32> to vector<8x8x128xf32>
    %c0_63 = arith.constant 0 : index
    %c0_64 = arith.constant 0 : index
    %c0_65 = arith.constant 0 : index
    %c0_66 = arith.constant 0 : index
    %70 = vector.load %arg4[%c0_63, %c0_64, %c0_65, %c0_66] : memref<1x8x8x128xf32, #tpu.memory_space<vmem>>, vector<1x8x8x128xf32>
    %71 = vector.shape_cast %70 : vector<1x8x8x128xf32> to vector<8x8x128xf32>
    %72 = vector.shape_cast %69 : vector<8x8x128xf32> to vector<1x8x8x128xf32>
    tpu.vector_store %arg4[%c0_63, %c0_64, %c0_65, %c0_66], %72 {strides = array<i32>} : memref<1x8x8x128xf32, #tpu.memory_space<vmem>>, vector<1x8x8x128xf32>,
    return
  }
  func.func @transform_0(%arg0: i32) -> (i32, i32, i32, i32) {
    %c0_i32 = arith.constant 0 : i32
    %c0_i32_0 = arith.constant 0 : i32
    %c0_i32_1 = arith.constant 0 : i32
    %c0_i32_2 = arith.constant 0 : i32
    return %arg0, %c0_i32, %c0_i32_0, %c0_i32_1 : i32, i32, i32, i32
  }
  func.func @transform_1(%arg0: i32) -> (i32, i32, i32) {
    %c0_i32 = arith.constant 0 : i32
    %c0_i32_0 = arith.constant 0 : i32
    %c0_i32_1 = arith.constant 0 : i32
    %c0_i32_2 = arith.constant 0 : i32
    return %c0_i32, %c0_i32_0, %c0_i32_1 : i32, i32, i32
  }
  func.func @transform_2(%arg0: i32) -> (i32, i32) {
    %c0_i32 = arith.constant 0 : i32
    %c0_i32_0 = arith.constant 0 : i32
    %c0_i32_1 = arith.constant 0 : i32
    return %c0_i32, %c0_i32_0 : i32, i32
  }
  func.func @transform_3(%arg0: i32) -> (i32, i32, i32, i32) {
    %c0_i32 = arith.constant 0 : i32
    %c0_i32_0 = arith.constant 0 : i32
    %c0_i32_1 = arith.constant 0 : i32
    %c0_i32_2 = arith.constant 0 : i32
    return %arg0, %c0_i32, %c0_i32_0, %c0_i32_1 : i32, i32, i32, i32
  }
}

module attributes {stable_mosaic.version = 11 : i64} {
  func.func @kernel(%arg0: i32, %arg1: memref<1x5x5x512xf32, #tpu.memory_space<vmem>>, %arg2: memref<9x128x128xf32, #tpu.memory_space<vmem>>, %arg3: memref<1x128xf32, #tpu.memory_space<vmem>>, %arg4: memref<1x4x4x128xf32, #tpu.memory_space<vmem>>) attributes {dimension_semantics = [#tpu.dimension_semantics<parallel>], iteration_bounds = array<i64: 2>, scalar_prefetch = 0 : i64, scratch_operands = 0 : i64, tpu.core_type = #tpu.core_type<tc>, window_params = [{transform_indices = @transform_0, window_bounds = array<i64: 1, 5, 5, 512>}, {pipeline_mode = #tpu.pipeline_mode<synchronous>, transform_indices = @transform_1, window_bounds = array<i64: 9, 128, 128>}, {pipeline_mode = #tpu.pipeline_mode<synchronous>, transform_indices = @transform_2, window_bounds = array<i64: 1, 128>}, {transform_indices = @transform_3, window_bounds = array<i64: 1, 4, 4, 128>}]} {
    %cst = arith.constant 0.000000e+00 : f32
    %0 = vector.broadcast %cst : f32 to vector<4x128xf32>
    %c0 = arith.constant 0 : index
    %c0_0 = arith.constant 0 : index
    %c0_1 = arith.constant 0 : index
    %c0_2 = arith.constant 0 : index
    %1 = vector.load %arg1[%c0, %c0_0, %c0_1, %c0_2] : memref<1x5x5x512xf32, #tpu.memory_space<vmem>>, vector<1x1x4x128xf32>
    %2 = vector.shape_cast %1 : vector<1x1x4x128xf32> to vector<4x128xf32>
    %c0_3 = arith.constant 0 : index
    %c0_4 = arith.constant 0 : index
    %c0_5 = arith.constant 0 : index
    %3 = vector.load %arg2[%c0_3, %c0_4, %c0_5] : memref<9x128x128xf32, #tpu.memory_space<vmem>>, vector<1x128x128xf32>
    %4 = vector.shape_cast %3 : vector<1x128x128xf32> to vector<128x128xf32>
    %cst_6 = arith.constant dense<0.000000e+00> : vector<4x128xf32>
    %5 = tpu.matmul %2, %4, %cst_6 {dimension_numbers = #tpu.dot_dimension_numbers<[1], [0], [0], [1], [0, 0, 1, 1], [], []>} : vector<4x128xf32>, vector<128x128xf32>, vector<4x128xf32> -> vector<4x128xf32>
    %6 = arith.addf %0, %5 : vector<4x128xf32>
    %c0_7 = arith.constant 0 : index
    %c0_8 = arith.constant 0 : index
    %c0_9 = arith.constant 0 : index
    %c128 = arith.constant 128 : index
    %7 = vector.load %arg1[%c0_7, %c0_8, %c0_9, %c128] : memref<1x5x5x512xf32, #tpu.memory_space<vmem>>, vector<1x1x4x128xf32>
    %8 = vector.shape_cast %7 : vector<1x1x4x128xf32> to vector<4x128xf32>
    %c1 = arith.constant 1 : index
    %c0_10 = arith.constant 0 : index
    %c0_11 = arith.constant 0 : index
    %9 = vector.load %arg2[%c1, %c0_10, %c0_11] : memref<9x128x128xf32, #tpu.memory_space<vmem>>, vector<1x128x128xf32>
    %10 = vector.shape_cast %9 : vector<1x128x128xf32> to vector<128x128xf32>
    %cst_12 = arith.constant dense<0.000000e+00> : vector<4x128xf32>
    %11 = tpu.matmul %8, %10, %cst_12 {dimension_numbers = #tpu.dot_dimension_numbers<[1], [0], [0], [1], [0, 0, 1, 1], [], []>} : vector<4x128xf32>, vector<128x128xf32>, vector<4x128xf32> -> vector<4x128xf32>
    %12 = arith.addf %6, %11 : vector<4x128xf32>
    %c0_13 = arith.constant 0 : index
    %c0_14 = arith.constant 0 : index
    %c1_15 = arith.constant 1 : index
    %c0_16 = arith.constant 0 : index
    %13 = vector.load %arg1[%c0_13, %c0_14, %c1_15, %c0_16] : memref<1x5x5x512xf32, #tpu.memory_space<vmem>>, vector<1x1x4x128xf32>
    %14 = vector.shape_cast %13 : vector<1x1x4x128xf32> to vector<4x128xf32>
    %c2 = arith.constant 2 : index
    %c0_17 = arith.constant 0 : index
    %c0_18 = arith.constant 0 : index
    %15 = vector.load %arg2[%c2, %c0_17, %c0_18] : memref<9x128x128xf32, #tpu.memory_space<vmem>>, vector<1x128x128xf32>
    %16 = vector.shape_cast %15 : vector<1x128x128xf32> to vector<128x128xf32>
    %cst_19 = arith.constant dense<0.000000e+00> : vector<4x128xf32>
    %17 = tpu.matmul %14, %16, %cst_19 {dimension_numbers = #tpu.dot_dimension_numbers<[1], [0], [0], [1], [0, 0, 1, 1], [], []>} : vector<4x128xf32>, vector<128x128xf32>, vector<4x128xf32> -> vector<4x128xf32>
    %18 = arith.addf %12, %17 : vector<4x128xf32>
    %c0_20 = arith.constant 0 : index
    %c0_21 = arith.constant 0 : index
    %c0_22 = arith.constant 0 : index
    %c256 = arith.constant 256 : index
    %19 = vector.load %arg1[%c0_20, %c0_21, %c0_22, %c256] : memref<1x5x5x512xf32, #tpu.memory_space<vmem>>, vector<1x1x4x128xf32>
    %20 = vector.shape_cast %19 : vector<1x1x4x128xf32> to vector<4x128xf32>
    %c3 = arith.constant 3 : index
    %c0_23 = arith.constant 0 : index
    %c0_24 = arith.constant 0 : index
    %21 = vector.load %arg2[%c3, %c0_23, %c0_24] : memref<9x128x128xf32, #tpu.memory_space<vmem>>, vector<1x128x128xf32>
    %22 = vector.shape_cast %21 : vector<1x128x128xf32> to vector<128x128xf32>
    %cst_25 = arith.constant dense<0.000000e+00> : vector<4x128xf32>
    %23 = tpu.matmul %20, %22, %cst_25 {dimension_numbers = #tpu.dot_dimension_numbers<[1], [0], [0], [1], [0, 0, 1, 1], [], []>} : vector<4x128xf32>, vector<128x128xf32>, vector<4x128xf32> -> vector<4x128xf32>
    %24 = arith.addf %18, %23 : vector<4x128xf32>
    %c0_26 = arith.constant 0 : index
    %c0_27 = arith.constant 0 : index
    %c0_28 = arith.constant 0 : index
    %c384 = arith.constant 384 : index
    %25 = vector.load %arg1[%c0_26, %c0_27, %c0_28, %c384] : memref<1x5x5x512xf32, #tpu.memory_space<vmem>>, vector<1x1x4x128xf32>
    %26 = vector.shape_cast %25 : vector<1x1x4x128xf32> to vector<4x128xf32>
    %c4 = arith.constant 4 : index
    %c0_29 = arith.constant 0 : index
    %c0_30 = arith.constant 0 : index
    %27 = vector.load %arg2[%c4, %c0_29, %c0_30] : memref<9x128x128xf32, #tpu.memory_space<vmem>>, vector<1x128x128xf32>
    %28 = vector.shape_cast %27 : vector<1x128x128xf32> to vector<128x128xf32>
    %cst_31 = arith.constant dense<0.000000e+00> : vector<4x128xf32>
    %29 = tpu.matmul %26, %28, %cst_31 {dimension_numbers = #tpu.dot_dimension_numbers<[1], [0], [0], [1], [0, 0, 1, 1], [], []>} : vector<4x128xf32>, vector<128x128xf32>, vector<4x128xf32> -> vector<4x128xf32>
    %30 = arith.addf %24, %29 : vector<4x128xf32>
    %c0_32 = arith.constant 0 : index
    %c0_33 = arith.constant 0 : index
    %c1_34 = arith.constant 1 : index
    %c256_35 = arith.constant 256 : index
    %31 = vector.load %arg1[%c0_32, %c0_33, %c1_34, %c256_35] : memref<1x5x5x512xf32, #tpu.memory_space<vmem>>, vector<1x1x4x128xf32>
    %32 = vector.shape_cast %31 : vector<1x1x4x128xf32> to vector<4x128xf32>
    %c5 = arith.constant 5 : index
    %c0_36 = arith.constant 0 : index
    %c0_37 = arith.constant 0 : index
    %33 = vector.load %arg2[%c5, %c0_36, %c0_37] : memref<9x128x128xf32, #tpu.memory_space<vmem>>, vector<1x128x128xf32>
    %34 = vector.shape_cast %33 : vector<1x128x128xf32> to vector<128x128xf32>
    %cst_38 = arith.constant dense<0.000000e+00> : vector<4x128xf32>
    %35 = tpu.matmul %32, %34, %cst_38 {dimension_numbers = #tpu.dot_dimension_numbers<[1], [0], [0], [1], [0, 0, 1, 1], [], []>} : vector<4x128xf32>, vector<128x128xf32>, vector<4x128xf32> -> vector<4x128xf32>
    %36 = arith.addf %30, %35 : vector<4x128xf32>
    %c0_39 = arith.constant 0 : index
    %c1_40 = arith.constant 1 : index
    %c0_41 = arith.constant 0 : index
    %c0_42 = arith.constant 0 : index
    %37 = vector.load %arg1[%c0_39, %c1_40, %c0_41, %c0_42] : memref<1x5x5x512xf32, #tpu.memory_space<vmem>>, vector<1x1x4x128xf32>
    %38 = vector.shape_cast %37 : vector<1x1x4x128xf32> to vector<4x128xf32>
    %c6 = arith.constant 6 : index
    %c0_43 = arith.constant 0 : index
    %c0_44 = arith.constant 0 : index
    %39 = vector.load %arg2[%c6, %c0_43, %c0_44] : memref<9x128x128xf32, #tpu.memory_space<vmem>>, vector<1x128x128xf32>
    %40 = vector.shape_cast %39 : vector<1x128x128xf32> to vector<128x128xf32>
    %cst_45 = arith.constant dense<0.000000e+00> : vector<4x128xf32>
    %41 = tpu.matmul %38, %40, %cst_45 {dimension_numbers = #tpu.dot_dimension_numbers<[1], [0], [0], [1], [0, 0, 1, 1], [], []>} : vector<4x128xf32>, vector<128x128xf32>, vector<4x128xf32> -> vector<4x128xf32>
    %42 = arith.addf %36, %41 : vector<4x128xf32>
    %c0_46 = arith.constant 0 : index
    %c1_47 = arith.constant 1 : index
    %c0_48 = arith.constant 0 : index
    %c128_49 = arith.constant 128 : index
    %43 = vector.load %arg1[%c0_46, %c1_47, %c0_48, %c128_49] : memref<1x5x5x512xf32, #tpu.memory_space<vmem>>, vector<1x1x4x128xf32>
    %44 = vector.shape_cast %43 : vector<1x1x4x128xf32> to vector<4x128xf32>
    %c7 = arith.constant 7 : index
    %c0_50 = arith.constant 0 : index
    %c0_51 = arith.constant 0 : index
    %45 = vector.load %arg2[%c7, %c0_50, %c0_51] : memref<9x128x128xf32, #tpu.memory_space<vmem>>, vector<1x128x128xf32>
    %46 = vector.shape_cast %45 : vector<1x128x128xf32> to vector<128x128xf32>
    %cst_52 = arith.constant dense<0.000000e+00> : vector<4x128xf32>
    %47 = tpu.matmul %44, %46, %cst_52 {dimension_numbers = #tpu.dot_dimension_numbers<[1], [0], [0], [1], [0, 0, 1, 1], [], []>} : vector<4x128xf32>, vector<128x128xf32>, vector<4x128xf32> -> vector<4x128xf32>
    %48 = arith.addf %42, %47 : vector<4x128xf32>
    %c0_53 = arith.constant 0 : index
    %c1_54 = arith.constant 1 : index
    %c1_55 = arith.constant 1 : index
    %c0_56 = arith.constant 0 : index
    %49 = vector.load %arg1[%c0_53, %c1_54, %c1_55, %c0_56] : memref<1x5x5x512xf32, #tpu.memory_space<vmem>>, vector<1x1x4x128xf32>
    %50 = vector.shape_cast %49 : vector<1x1x4x128xf32> to vector<4x128xf32>
    %c8 = arith.constant 8 : index
    %c0_57 = arith.constant 0 : index
    %c0_58 = arith.constant 0 : index
    %51 = vector.load %arg2[%c8, %c0_57, %c0_58] : memref<9x128x128xf32, #tpu.memory_space<vmem>>, vector<1x128x128xf32>
    %52 = vector.shape_cast %51 : vector<1x128x128xf32> to vector<128x128xf32>
    %cst_59 = arith.constant dense<0.000000e+00> : vector<4x128xf32>
    %53 = tpu.matmul %50, %52, %cst_59 {dimension_numbers = #tpu.dot_dimension_numbers<[1], [0], [0], [1], [0, 0, 1, 1], [], []>} : vector<4x128xf32>, vector<128x128xf32>, vector<4x128xf32> -> vector<4x128xf32>
    %54 = arith.addf %48, %53 : vector<4x128xf32>
    %c0_60 = arith.constant 0 : index
    %c0_61 = arith.constant 0 : index
    %55 = vector.load %arg3[%c0_60, %c0_61] : memref<1x128xf32, #tpu.memory_space<vmem>>, vector<1x128xf32>
    %56 = vector.broadcast %55 : vector<1x128xf32> to vector<4x128xf32>
    %57 = arith.addf %54, %56 : vector<4x128xf32>
    %cst_62 = arith.constant 0.000000e+00 : f32
    %58 = vector.broadcast %cst_62 : f32 to vector<4x128xf32>
    %59 = arith.maximumf %57, %58 : vector<4x128xf32>
    %c0_63 = arith.constant 0 : index
    %c0_64 = arith.constant 0 : index
    %c0_65 = arith.constant 0 : index
    %c0_66 = arith.constant 0 : index
    %60 = vector.load %arg4[%c0_63, %c0_64, %c0_65, %c0_66] : memref<1x4x4x128xf32, #tpu.memory_space<vmem>>, vector<1x1x4x128xf32>
    %61 = vector.shape_cast %60 : vector<1x1x4x128xf32> to vector<4x128xf32>
    %62 = vector.shape_cast %59 : vector<4x128xf32> to vector<1x1x4x128xf32>
    tpu.vector_store %arg4[%c0_63, %c0_64, %c0_65, %c0_66], %62 {strides = array<i32>} : memref<1x4x4x128xf32, #tpu.memory_space<vmem>>, vector<1x1x4x128xf32>,
    %cst_67 = arith.constant 0.000000e+00 : f32
    %63 = vector.broadcast %cst_67 : f32 to vector<4x128xf32>
    %c0_68 = arith.constant 0 : index
    %c1_69 = arith.constant 1 : index
    %c0_70 = arith.constant 0 : index
    %c0_71 = arith.constant 0 : index
    %64 = vector.load %arg1[%c0_68, %c1_69, %c0_70, %c0_71] : memref<1x5x5x512xf32, #tpu.memory_space<vmem>>, vector<1x1x4x128xf32>
    %65 = vector.shape_cast %64 : vector<1x1x4x128xf32> to vector<4x128xf32>
    %c0_72 = arith.constant 0 : index
    %c0_73 = arith.constant 0 : index
    %c0_74 = arith.constant 0 : index
    %66 = vector.load %arg2[%c0_72, %c0_73, %c0_74] : memref<9x128x128xf32, #tpu.memory_space<vmem>>, vector<1x128x128xf32>
    %67 = vector.shape_cast %66 : vector<1x128x128xf32> to vector<128x128xf32>
    %cst_75 = arith.constant dense<0.000000e+00> : vector<4x128xf32>
    %68 = tpu.matmul %65, %67, %cst_75 {dimension_numbers = #tpu.dot_dimension_numbers<[1], [0], [0], [1], [0, 0, 1, 1], [], []>} : vector<4x128xf32>, vector<128x128xf32>, vector<4x128xf32> -> vector<4x128xf32>
    %69 = arith.addf %63, %68 : vector<4x128xf32>
    %c0_76 = arith.constant 0 : index
    %c1_77 = arith.constant 1 : index
    %c0_78 = arith.constant 0 : index
    %c128_79 = arith.constant 128 : index
    %70 = vector.load %arg1[%c0_76, %c1_77, %c0_78, %c128_79] : memref<1x5x5x512xf32, #tpu.memory_space<vmem>>, vector<1x1x4x128xf32>
    %71 = vector.shape_cast %70 : vector<1x1x4x128xf32> to vector<4x128xf32>
    %c1_80 = arith.constant 1 : index
    %c0_81 = arith.constant 0 : index
    %c0_82 = arith.constant 0 : index
    %72 = vector.load %arg2[%c1_80, %c0_81, %c0_82] : memref<9x128x128xf32, #tpu.memory_space<vmem>>, vector<1x128x128xf32>
    %73 = vector.shape_cast %72 : vector<1x128x128xf32> to vector<128x128xf32>
    %cst_83 = arith.constant dense<0.000000e+00> : vector<4x128xf32>
    %74 = tpu.matmul %71, %73, %cst_83 {dimension_numbers = #tpu.dot_dimension_numbers<[1], [0], [0], [1], [0, 0, 1, 1], [], []>} : vector<4x128xf32>, vector<128x128xf32>, vector<4x128xf32> -> vector<4x128xf32>
    %75 = arith.addf %69, %74 : vector<4x128xf32>
    %c0_84 = arith.constant 0 : index
    %c1_85 = arith.constant 1 : index
    %c1_86 = arith.constant 1 : index
    %c0_87 = arith.constant 0 : index
    %76 = vector.load %arg1[%c0_84, %c1_85, %c1_86, %c0_87] : memref<1x5x5x512xf32, #tpu.memory_space<vmem>>, vector<1x1x4x128xf32>
    %77 = vector.shape_cast %76 : vector<1x1x4x128xf32> to vector<4x128xf32>
    %c2_88 = arith.constant 2 : index
    %c0_89 = arith.constant 0 : index
    %c0_90 = arith.constant 0 : index
    %78 = vector.load %arg2[%c2_88, %c0_89, %c0_90] : memref<9x128x128xf32, #tpu.memory_space<vmem>>, vector<1x128x128xf32>
    %79 = vector.shape_cast %78 : vector<1x128x128xf32> to vector<128x128xf32>
    %cst_91 = arith.constant dense<0.000000e+00> : vector<4x128xf32>
    %80 = tpu.matmul %77, %79, %cst_91 {dimension_numbers = #tpu.dot_dimension_numbers<[1], [0], [0], [1], [0, 0, 1, 1], [], []>} : vector<4x128xf32>, vector<128x128xf32>, vector<4x128xf32> -> vector<4x128xf32>
    %81 = arith.addf %75, %80 : vector<4x128xf32>
    %c0_92 = arith.constant 0 : index
    %c1_93 = arith.constant 1 : index
    %c0_94 = arith.constant 0 : index
    %c256_95 = arith.constant 256 : index
    %82 = vector.load %arg1[%c0_92, %c1_93, %c0_94, %c256_95] : memref<1x5x5x512xf32, #tpu.memory_space<vmem>>, vector<1x1x4x128xf32>
    %83 = vector.shape_cast %82 : vector<1x1x4x128xf32> to vector<4x128xf32>
    %c3_96 = arith.constant 3 : index
    %c0_97 = arith.constant 0 : index
    %c0_98 = arith.constant 0 : index
    %84 = vector.load %arg2[%c3_96, %c0_97, %c0_98] : memref<9x128x128xf32, #tpu.memory_space<vmem>>, vector<1x128x128xf32>
    %85 = vector.shape_cast %84 : vector<1x128x128xf32> to vector<128x128xf32>
    %cst_99 = arith.constant dense<0.000000e+00> : vector<4x128xf32>
    %86 = tpu.matmul %83, %85, %cst_99 {dimension_numbers = #tpu.dot_dimension_numbers<[1], [0], [0], [1], [0, 0, 1, 1], [], []>} : vector<4x128xf32>, vector<128x128xf32>, vector<4x128xf32> -> vector<4x128xf32>
    %87 = arith.addf %81, %86 : vector<4x128xf32>
    %c0_100 = arith.constant 0 : index
    %c1_101 = arith.constant 1 : index
    %c0_102 = arith.constant 0 : index
    %c384_103 = arith.constant 384 : index
    %88 = vector.load %arg1[%c0_100, %c1_101, %c0_102, %c384_103] : memref<1x5x5x512xf32, #tpu.memory_space<vmem>>, vector<1x1x4x128xf32>
    %89 = vector.shape_cast %88 : vector<1x1x4x128xf32> to vector<4x128xf32>
    %c4_104 = arith.constant 4 : index
    %c0_105 = arith.constant 0 : index
    %c0_106 = arith.constant 0 : index
    %90 = vector.load %arg2[%c4_104, %c0_105, %c0_106] : memref<9x128x128xf32, #tpu.memory_space<vmem>>, vector<1x128x128xf32>
    %91 = vector.shape_cast %90 : vector<1x128x128xf32> to vector<128x128xf32>
    %cst_107 = arith.constant dense<0.000000e+00> : vector<4x128xf32>
    %92 = tpu.matmul %89, %91, %cst_107 {dimension_numbers = #tpu.dot_dimension_numbers<[1], [0], [0], [1], [0, 0, 1, 1], [], []>} : vector<4x128xf32>, vector<128x128xf32>, vector<4x128xf32> -> vector<4x128xf32>
    %93 = arith.addf %87, %92 : vector<4x128xf32>
    %c0_108 = arith.constant 0 : index
    %c1_109 = arith.constant 1 : index
    %c1_110 = arith.constant 1 : index
    %c256_111 = arith.constant 256 : index
    %94 = vector.load %arg1[%c0_108, %c1_109, %c1_110, %c256_111] : memref<1x5x5x512xf32, #tpu.memory_space<vmem>>, vector<1x1x4x128xf32>
    %95 = vector.shape_cast %94 : vector<1x1x4x128xf32> to vector<4x128xf32>
    %c5_112 = arith.constant 5 : index
    %c0_113 = arith.constant 0 : index
    %c0_114 = arith.constant 0 : index
    %96 = vector.load %arg2[%c5_112, %c0_113, %c0_114] : memref<9x128x128xf32, #tpu.memory_space<vmem>>, vector<1x128x128xf32>
    %97 = vector.shape_cast %96 : vector<1x128x128xf32> to vector<128x128xf32>
    %cst_115 = arith.constant dense<0.000000e+00> : vector<4x128xf32>
    %98 = tpu.matmul %95, %97, %cst_115 {dimension_numbers = #tpu.dot_dimension_numbers<[1], [0], [0], [1], [0, 0, 1, 1], [], []>} : vector<4x128xf32>, vector<128x128xf32>, vector<4x128xf32> -> vector<4x128xf32>
    %99 = arith.addf %93, %98 : vector<4x128xf32>
    %c0_116 = arith.constant 0 : index
    %c2_117 = arith.constant 2 : index
    %c0_118 = arith.constant 0 : index
    %c0_119 = arith.constant 0 : index
    %100 = vector.load %arg1[%c0_116, %c2_117, %c0_118, %c0_119] : memref<1x5x5x512xf32, #tpu.memory_space<vmem>>, vector<1x1x4x128xf32>
    %101 = vector.shape_cast %100 : vector<1x1x4x128xf32> to vector<4x128xf32>
    %c6_120 = arith.constant 6 : index
    %c0_121 = arith.constant 0 : index
    %c0_122 = arith.constant 0 : index
    %102 = vector.load %arg2[%c6_120, %c0_121, %c0_122] : memref<9x128x128xf32, #tpu.memory_space<vmem>>, vector<1x128x128xf32>
    %103 = vector.shape_cast %102 : vector<1x128x128xf32> to vector<128x128xf32>
    %cst_123 = arith.constant dense<0.000000e+00> : vector<4x128xf32>
    %104 = tpu.matmul %101, %103, %cst_123 {dimension_numbers = #tpu.dot_dimension_numbers<[1], [0], [0], [1], [0, 0, 1, 1], [], []>} : vector<4x128xf32>, vector<128x128xf32>, vector<4x128xf32> -> vector<4x128xf32>
    %105 = arith.addf %99, %104 : vector<4x128xf32>
    %c0_124 = arith.constant 0 : index
    %c2_125 = arith.constant 2 : index
    %c0_126 = arith.constant 0 : index
    %c128_127 = arith.constant 128 : index
    %106 = vector.load %arg1[%c0_124, %c2_125, %c0_126, %c128_127] : memref<1x5x5x512xf32, #tpu.memory_space<vmem>>, vector<1x1x4x128xf32>
    %107 = vector.shape_cast %106 : vector<1x1x4x128xf32> to vector<4x128xf32>
    %c7_128 = arith.constant 7 : index
    %c0_129 = arith.constant 0 : index
    %c0_130 = arith.constant 0 : index
    %108 = vector.load %arg2[%c7_128, %c0_129, %c0_130] : memref<9x128x128xf32, #tpu.memory_space<vmem>>, vector<1x128x128xf32>
    %109 = vector.shape_cast %108 : vector<1x128x128xf32> to vector<128x128xf32>
    %cst_131 = arith.constant dense<0.000000e+00> : vector<4x128xf32>
    %110 = tpu.matmul %107, %109, %cst_131 {dimension_numbers = #tpu.dot_dimension_numbers<[1], [0], [0], [1], [0, 0, 1, 1], [], []>} : vector<4x128xf32>, vector<128x128xf32>, vector<4x128xf32> -> vector<4x128xf32>
    %111 = arith.addf %105, %110 : vector<4x128xf32>
    %c0_132 = arith.constant 0 : index
    %c2_133 = arith.constant 2 : index
    %c1_134 = arith.constant 1 : index
    %c0_135 = arith.constant 0 : index
    %112 = vector.load %arg1[%c0_132, %c2_133, %c1_134, %c0_135] : memref<1x5x5x512xf32, #tpu.memory_space<vmem>>, vector<1x1x4x128xf32>
    %113 = vector.shape_cast %112 : vector<1x1x4x128xf32> to vector<4x128xf32>
    %c8_136 = arith.constant 8 : index
    %c0_137 = arith.constant 0 : index
    %c0_138 = arith.constant 0 : index
    %114 = vector.load %arg2[%c8_136, %c0_137, %c0_138] : memref<9x128x128xf32, #tpu.memory_space<vmem>>, vector<1x128x128xf32>
    %115 = vector.shape_cast %114 : vector<1x128x128xf32> to vector<128x128xf32>
    %cst_139 = arith.constant dense<0.000000e+00> : vector<4x128xf32>
    %116 = tpu.matmul %113, %115, %cst_139 {dimension_numbers = #tpu.dot_dimension_numbers<[1], [0], [0], [1], [0, 0, 1, 1], [], []>} : vector<4x128xf32>, vector<128x128xf32>, vector<4x128xf32> -> vector<4x128xf32>
    %117 = arith.addf %111, %116 : vector<4x128xf32>
    %c0_140 = arith.constant 0 : index
    %c0_141 = arith.constant 0 : index
    %118 = vector.load %arg3[%c0_140, %c0_141] : memref<1x128xf32, #tpu.memory_space<vmem>>, vector<1x128xf32>
    %119 = vector.broadcast %118 : vector<1x128xf32> to vector<4x128xf32>
    %120 = arith.addf %117, %119 : vector<4x128xf32>
    %cst_142 = arith.constant 0.000000e+00 : f32
    %121 = vector.broadcast %cst_142 : f32 to vector<4x128xf32>
    %122 = arith.maximumf %120, %121 : vector<4x128xf32>
    %c0_143 = arith.constant 0 : index
    %c1_144 = arith.constant 1 : index
    %c0_145 = arith.constant 0 : index
    %c0_146 = arith.constant 0 : index
    %123 = vector.load %arg4[%c0_143, %c1_144, %c0_145, %c0_146] : memref<1x4x4x128xf32, #tpu.memory_space<vmem>>, vector<1x1x4x128xf32>
    %124 = vector.shape_cast %123 : vector<1x1x4x128xf32> to vector<4x128xf32>
    %125 = vector.shape_cast %122 : vector<4x128xf32> to vector<1x1x4x128xf32>
    tpu.vector_store %arg4[%c0_143, %c1_144, %c0_145, %c0_146], %125 {strides = array<i32>} : memref<1x4x4x128xf32, #tpu.memory_space<vmem>>, vector<1x1x4x128xf32>,
    %cst_147 = arith.constant 0.000000e+00 : f32
    %126 = vector.broadcast %cst_147 : f32 to vector<4x128xf32>
    %c0_148 = arith.constant 0 : index
    %c2_149 = arith.constant 2 : index
    %c0_150 = arith.constant 0 : index
    %c0_151 = arith.constant 0 : index
    %127 = vector.load %arg1[%c0_148, %c2_149, %c0_150, %c0_151] : memref<1x5x5x512xf32, #tpu.memory_space<vmem>>, vector<1x1x4x128xf32>
    %128 = vector.shape_cast %127 : vector<1x1x4x128xf32> to vector<4x128xf32>
    %c0_152 = arith.constant 0 : index
    %c0_153 = arith.constant 0 : index
    %c0_154 = arith.constant 0 : index
    %129 = vector.load %arg2[%c0_152, %c0_153, %c0_154] : memref<9x128x128xf32, #tpu.memory_space<vmem>>, vector<1x128x128xf32>
    %130 = vector.shape_cast %129 : vector<1x128x128xf32> to vector<128x128xf32>
    %cst_155 = arith.constant dense<0.000000e+00> : vector<4x128xf32>
    %131 = tpu.matmul %128, %130, %cst_155 {dimension_numbers = #tpu.dot_dimension_numbers<[1], [0], [0], [1], [0, 0, 1, 1], [], []>} : vector<4x128xf32>, vector<128x128xf32>, vector<4x128xf32> -> vector<4x128xf32>
    %132 = arith.addf %126, %131 : vector<4x128xf32>
    %c0_156 = arith.constant 0 : index
    %c2_157 = arith.constant 2 : index
    %c0_158 = arith.constant 0 : index
    %c128_159 = arith.constant 128 : index
    %133 = vector.load %arg1[%c0_156, %c2_157, %c0_158, %c128_159] : memref<1x5x5x512xf32, #tpu.memory_space<vmem>>, vector<1x1x4x128xf32>
    %134 = vector.shape_cast %133 : vector<1x1x4x128xf32> to vector<4x128xf32>
    %c1_160 = arith.constant 1 : index
    %c0_161 = arith.constant 0 : index
    %c0_162 = arith.constant 0 : index
    %135 = vector.load %arg2[%c1_160, %c0_161, %c0_162] : memref<9x128x128xf32, #tpu.memory_space<vmem>>, vector<1x128x128xf32>
    %136 = vector.shape_cast %135 : vector<1x128x128xf32> to vector<128x128xf32>
    %cst_163 = arith.constant dense<0.000000e+00> : vector<4x128xf32>
    %137 = tpu.matmul %134, %136, %cst_163 {dimension_numbers = #tpu.dot_dimension_numbers<[1], [0], [0], [1], [0, 0, 1, 1], [], []>} : vector<4x128xf32>, vector<128x128xf32>, vector<4x128xf32> -> vector<4x128xf32>
    %138 = arith.addf %132, %137 : vector<4x128xf32>
    %c0_164 = arith.constant 0 : index
    %c2_165 = arith.constant 2 : index
    %c1_166 = arith.constant 1 : index
    %c0_167 = arith.constant 0 : index
    %139 = vector.load %arg1[%c0_164, %c2_165, %c1_166, %c0_167] : memref<1x5x5x512xf32, #tpu.memory_space<vmem>>, vector<1x1x4x128xf32>
    %140 = vector.shape_cast %139 : vector<1x1x4x128xf32> to vector<4x128xf32>
    %c2_168 = arith.constant 2 : index
    %c0_169 = arith.constant 0 : index
    %c0_170 = arith.constant 0 : index
    %141 = vector.load %arg2[%c2_168, %c0_169, %c0_170] : memref<9x128x128xf32, #tpu.memory_space<vmem>>, vector<1x128x128xf32>
    %142 = vector.shape_cast %141 : vector<1x128x128xf32> to vector<128x128xf32>
    %cst_171 = arith.constant dense<0.000000e+00> : vector<4x128xf32>
    %143 = tpu.matmul %140, %142, %cst_171 {dimension_numbers = #tpu.dot_dimension_numbers<[1], [0], [0], [1], [0, 0, 1, 1], [], []>} : vector<4x128xf32>, vector<128x128xf32>, vector<4x128xf32> -> vector<4x128xf32>
    %144 = arith.addf %138, %143 : vector<4x128xf32>
    %c0_172 = arith.constant 0 : index
    %c2_173 = arith.constant 2 : index
    %c0_174 = arith.constant 0 : index
    %c256_175 = arith.constant 256 : index
    %145 = vector.load %arg1[%c0_172, %c2_173, %c0_174, %c256_175] : memref<1x5x5x512xf32, #tpu.memory_space<vmem>>, vector<1x1x4x128xf32>
    %146 = vector.shape_cast %145 : vector<1x1x4x128xf32> to vector<4x128xf32>
    %c3_176 = arith.constant 3 : index
    %c0_177 = arith.constant 0 : index
    %c0_178 = arith.constant 0 : index
    %147 = vector.load %arg2[%c3_176, %c0_177, %c0_178] : memref<9x128x128xf32, #tpu.memory_space<vmem>>, vector<1x128x128xf32>
    %148 = vector.shape_cast %147 : vector<1x128x128xf32> to vector<128x128xf32>
    %cst_179 = arith.constant dense<0.000000e+00> : vector<4x128xf32>
    %149 = tpu.matmul %146, %148, %cst_179 {dimension_numbers = #tpu.dot_dimension_numbers<[1], [0], [0], [1], [0, 0, 1, 1], [], []>} : vector<4x128xf32>, vector<128x128xf32>, vector<4x128xf32> -> vector<4x128xf32>
    %150 = arith.addf %144, %149 : vector<4x128xf32>
    %c0_180 = arith.constant 0 : index
    %c2_181 = arith.constant 2 : index
    %c0_182 = arith.constant 0 : index
    %c384_183 = arith.constant 384 : index
    %151 = vector.load %arg1[%c0_180, %c2_181, %c0_182, %c384_183] : memref<1x5x5x512xf32, #tpu.memory_space<vmem>>, vector<1x1x4x128xf32>
    %152 = vector.shape_cast %151 : vector<1x1x4x128xf32> to vector<4x128xf32>
    %c4_184 = arith.constant 4 : index
    %c0_185 = arith.constant 0 : index
    %c0_186 = arith.constant 0 : index
    %153 = vector.load %arg2[%c4_184, %c0_185, %c0_186] : memref<9x128x128xf32, #tpu.memory_space<vmem>>, vector<1x128x128xf32>
    %154 = vector.shape_cast %153 : vector<1x128x128xf32> to vector<128x128xf32>
    %cst_187 = arith.constant dense<0.000000e+00> : vector<4x128xf32>
    %155 = tpu.matmul %152, %154, %cst_187 {dimension_numbers = #tpu.dot_dimension_numbers<[1], [0], [0], [1], [0, 0, 1, 1], [], []>} : vector<4x128xf32>, vector<128x128xf32>, vector<4x128xf32> -> vector<4x128xf32>
    %156 = arith.addf %150, %155 : vector<4x128xf32>
    %c0_188 = arith.constant 0 : index
    %c2_189 = arith.constant 2 : index
    %c1_190 = arith.constant 1 : index
    %c256_191 = arith.constant 256 : index
    %157 = vector.load %arg1[%c0_188, %c2_189, %c1_190, %c256_191] : memref<1x5x5x512xf32, #tpu.memory_space<vmem>>, vector<1x1x4x128xf32>
    %158 = vector.shape_cast %157 : vector<1x1x4x128xf32> to vector<4x128xf32>
    %c5_192 = arith.constant 5 : index
    %c0_193 = arith.constant 0 : index
    %c0_194 = arith.constant 0 : index
    %159 = vector.load %arg2[%c5_192, %c0_193, %c0_194] : memref<9x128x128xf32, #tpu.memory_space<vmem>>, vector<1x128x128xf32>
    %160 = vector.shape_cast %159 : vector<1x128x128xf32> to vector<128x128xf32>
    %cst_195 = arith.constant dense<0.000000e+00> : vector<4x128xf32>
    %161 = tpu.matmul %158, %160, %cst_195 {dimension_numbers = #tpu.dot_dimension_numbers<[1], [0], [0], [1], [0, 0, 1, 1], [], []>} : vector<4x128xf32>, vector<128x128xf32>, vector<4x128xf32> -> vector<4x128xf32>
    %162 = arith.addf %156, %161 : vector<4x128xf32>
    %c0_196 = arith.constant 0 : index
    %c3_197 = arith.constant 3 : index
    %c0_198 = arith.constant 0 : index
    %c0_199 = arith.constant 0 : index
    %163 = vector.load %arg1[%c0_196, %c3_197, %c0_198, %c0_199] : memref<1x5x5x512xf32, #tpu.memory_space<vmem>>, vector<1x1x4x128xf32>
    %164 = vector.shape_cast %163 : vector<1x1x4x128xf32> to vector<4x128xf32>
    %c6_200 = arith.constant 6 : index
    %c0_201 = arith.constant 0 : index
    %c0_202 = arith.constant 0 : index
    %165 = vector.load %arg2[%c6_200, %c0_201, %c0_202] : memref<9x128x128xf32, #tpu.memory_space<vmem>>, vector<1x128x128xf32>
    %166 = vector.shape_cast %165 : vector<1x128x128xf32> to vector<128x128xf32>
    %cst_203 = arith.constant dense<0.000000e+00> : vector<4x128xf32>
    %167 = tpu.matmul %164, %166, %cst_203 {dimension_numbers = #tpu.dot_dimension_numbers<[1], [0], [0], [1], [0, 0, 1, 1], [], []>} : vector<4x128xf32>, vector<128x128xf32>, vector<4x128xf32> -> vector<4x128xf32>
    %168 = arith.addf %162, %167 : vector<4x128xf32>
    %c0_204 = arith.constant 0 : index
    %c3_205 = arith.constant 3 : index
    %c0_206 = arith.constant 0 : index
    %c128_207 = arith.constant 128 : index
    %169 = vector.load %arg1[%c0_204, %c3_205, %c0_206, %c128_207] : memref<1x5x5x512xf32, #tpu.memory_space<vmem>>, vector<1x1x4x128xf32>
    %170 = vector.shape_cast %169 : vector<1x1x4x128xf32> to vector<4x128xf32>
    %c7_208 = arith.constant 7 : index
    %c0_209 = arith.constant 0 : index
    %c0_210 = arith.constant 0 : index
    %171 = vector.load %arg2[%c7_208, %c0_209, %c0_210] : memref<9x128x128xf32, #tpu.memory_space<vmem>>, vector<1x128x128xf32>
    %172 = vector.shape_cast %171 : vector<1x128x128xf32> to vector<128x128xf32>
    %cst_211 = arith.constant dense<0.000000e+00> : vector<4x128xf32>
    %173 = tpu.matmul %170, %172, %cst_211 {dimension_numbers = #tpu.dot_dimension_numbers<[1], [0], [0], [1], [0, 0, 1, 1], [], []>} : vector<4x128xf32>, vector<128x128xf32>, vector<4x128xf32> -> vector<4x128xf32>
    %174 = arith.addf %168, %173 : vector<4x128xf32>
    %c0_212 = arith.constant 0 : index
    %c3_213 = arith.constant 3 : index
    %c1_214 = arith.constant 1 : index
    %c0_215 = arith.constant 0 : index
    %175 = vector.load %arg1[%c0_212, %c3_213, %c1_214, %c0_215] : memref<1x5x5x512xf32, #tpu.memory_space<vmem>>, vector<1x1x4x128xf32>
    %176 = vector.shape_cast %175 : vector<1x1x4x128xf32> to vector<4x128xf32>
    %c8_216 = arith.constant 8 : index
    %c0_217 = arith.constant 0 : index
    %c0_218 = arith.constant 0 : index
    %177 = vector.load %arg2[%c8_216, %c0_217, %c0_218] : memref<9x128x128xf32, #tpu.memory_space<vmem>>, vector<1x128x128xf32>
    %178 = vector.shape_cast %177 : vector<1x128x128xf32> to vector<128x128xf32>
    %cst_219 = arith.constant dense<0.000000e+00> : vector<4x128xf32>
    %179 = tpu.matmul %176, %178, %cst_219 {dimension_numbers = #tpu.dot_dimension_numbers<[1], [0], [0], [1], [0, 0, 1, 1], [], []>} : vector<4x128xf32>, vector<128x128xf32>, vector<4x128xf32> -> vector<4x128xf32>
    %180 = arith.addf %174, %179 : vector<4x128xf32>
    %c0_220 = arith.constant 0 : index
    %c0_221 = arith.constant 0 : index
    %181 = vector.load %arg3[%c0_220, %c0_221] : memref<1x128xf32, #tpu.memory_space<vmem>>, vector<1x128xf32>
    %182 = vector.broadcast %181 : vector<1x128xf32> to vector<4x128xf32>
    %183 = arith.addf %180, %182 : vector<4x128xf32>
    %cst_222 = arith.constant 0.000000e+00 : f32
    %184 = vector.broadcast %cst_222 : f32 to vector<4x128xf32>
    %185 = arith.maximumf %183, %184 : vector<4x128xf32>
    %c0_223 = arith.constant 0 : index
    %c2_224 = arith.constant 2 : index
    %c0_225 = arith.constant 0 : index
    %c0_226 = arith.constant 0 : index
    %186 = vector.load %arg4[%c0_223, %c2_224, %c0_225, %c0_226] : memref<1x4x4x128xf32, #tpu.memory_space<vmem>>, vector<1x1x4x128xf32>
    %187 = vector.shape_cast %186 : vector<1x1x4x128xf32> to vector<4x128xf32>
    %188 = vector.shape_cast %185 : vector<4x128xf32> to vector<1x1x4x128xf32>
    tpu.vector_store %arg4[%c0_223, %c2_224, %c0_225, %c0_226], %188 {strides = array<i32>} : memref<1x4x4x128xf32, #tpu.memory_space<vmem>>, vector<1x1x4x128xf32>,
    %cst_227 = arith.constant 0.000000e+00 : f32
    %189 = vector.broadcast %cst_227 : f32 to vector<4x128xf32>
    %c0_228 = arith.constant 0 : index
    %c3_229 = arith.constant 3 : index
    %c0_230 = arith.constant 0 : index
    %c0_231 = arith.constant 0 : index
    %190 = vector.load %arg1[%c0_228, %c3_229, %c0_230, %c0_231] : memref<1x5x5x512xf32, #tpu.memory_space<vmem>>, vector<1x1x4x128xf32>
    %191 = vector.shape_cast %190 : vector<1x1x4x128xf32> to vector<4x128xf32>
    %c0_232 = arith.constant 0 : index
    %c0_233 = arith.constant 0 : index
    %c0_234 = arith.constant 0 : index
    %192 = vector.load %arg2[%c0_232, %c0_233, %c0_234] : memref<9x128x128xf32, #tpu.memory_space<vmem>>, vector<1x128x128xf32>
    %193 = vector.shape_cast %192 : vector<1x128x128xf32> to vector<128x128xf32>
    %cst_235 = arith.constant dense<0.000000e+00> : vector<4x128xf32>
    %194 = tpu.matmul %191, %193, %cst_235 {dimension_numbers = #tpu.dot_dimension_numbers<[1], [0], [0], [1], [0, 0, 1, 1], [], []>} : vector<4x128xf32>, vector<128x128xf32>, vector<4x128xf32> -> vector<4x128xf32>
    %195 = arith.addf %189, %194 : vector<4x128xf32>
    %c0_236 = arith.constant 0 : index
    %c3_237 = arith.constant 3 : index
    %c0_238 = arith.constant 0 : index
    %c128_239 = arith.constant 128 : index
    %196 = vector.load %arg1[%c0_236, %c3_237, %c0_238, %c128_239] : memref<1x5x5x512xf32, #tpu.memory_space<vmem>>, vector<1x1x4x128xf32>
    %197 = vector.shape_cast %196 : vector<1x1x4x128xf32> to vector<4x128xf32>
    %c1_240 = arith.constant 1 : index
    %c0_241 = arith.constant 0 : index
    %c0_242 = arith.constant 0 : index
    %198 = vector.load %arg2[%c1_240, %c0_241, %c0_242] : memref<9x128x128xf32, #tpu.memory_space<vmem>>, vector<1x128x128xf32>
    %199 = vector.shape_cast %198 : vector<1x128x128xf32> to vector<128x128xf32>
    %cst_243 = arith.constant dense<0.000000e+00> : vector<4x128xf32>
    %200 = tpu.matmul %197, %199, %cst_243 {dimension_numbers = #tpu.dot_dimension_numbers<[1], [0], [0], [1], [0, 0, 1, 1], [], []>} : vector<4x128xf32>, vector<128x128xf32>, vector<4x128xf32> -> vector<4x128xf32>
    %201 = arith.addf %195, %200 : vector<4x128xf32>
    %c0_244 = arith.constant 0 : index
    %c3_245 = arith.constant 3 : index
    %c1_246 = arith.constant 1 : index
    %c0_247 = arith.constant 0 : index
    %202 = vector.load %arg1[%c0_244, %c3_245, %c1_246, %c0_247] : memref<1x5x5x512xf32, #tpu.memory_space<vmem>>, vector<1x1x4x128xf32>
    %203 = vector.shape_cast %202 : vector<1x1x4x128xf32> to vector<4x128xf32>
    %c2_248 = arith.constant 2 : index
    %c0_249 = arith.constant 0 : index
    %c0_250 = arith.constant 0 : index
    %204 = vector.load %arg2[%c2_248, %c0_249, %c0_250] : memref<9x128x128xf32, #tpu.memory_space<vmem>>, vector<1x128x128xf32>
    %205 = vector.shape_cast %204 : vector<1x128x128xf32> to vector<128x128xf32>
    %cst_251 = arith.constant dense<0.000000e+00> : vector<4x128xf32>
    %206 = tpu.matmul %203, %205, %cst_251 {dimension_numbers = #tpu.dot_dimension_numbers<[1], [0], [0], [1], [0, 0, 1, 1], [], []>} : vector<4x128xf32>, vector<128x128xf32>, vector<4x128xf32> -> vector<4x128xf32>
    %207 = arith.addf %201, %206 : vector<4x128xf32>
    %c0_252 = arith.constant 0 : index
    %c3_253 = arith.constant 3 : index
    %c0_254 = arith.constant 0 : index
    %c256_255 = arith.constant 256 : index
    %208 = vector.load %arg1[%c0_252, %c3_253, %c0_254, %c256_255] : memref<1x5x5x512xf32, #tpu.memory_space<vmem>>, vector<1x1x4x128xf32>
    %209 = vector.shape_cast %208 : vector<1x1x4x128xf32> to vector<4x128xf32>
    %c3_256 = arith.constant 3 : index
    %c0_257 = arith.constant 0 : index
    %c0_258 = arith.constant 0 : index
    %210 = vector.load %arg2[%c3_256, %c0_257, %c0_258] : memref<9x128x128xf32, #tpu.memory_space<vmem>>, vector<1x128x128xf32>
    %211 = vector.shape_cast %210 : vector<1x128x128xf32> to vector<128x128xf32>
    %cst_259 = arith.constant dense<0.000000e+00> : vector<4x128xf32>
    %212 = tpu.matmul %209, %211, %cst_259 {dimension_numbers = #tpu.dot_dimension_numbers<[1], [0], [0], [1], [0, 0, 1, 1], [], []>} : vector<4x128xf32>, vector<128x128xf32>, vector<4x128xf32> -> vector<4x128xf32>
    %213 = arith.addf %207, %212 : vector<4x128xf32>
    %c0_260 = arith.constant 0 : index
    %c3_261 = arith.constant 3 : index
    %c0_262 = arith.constant 0 : index
    %c384_263 = arith.constant 384 : index
    %214 = vector.load %arg1[%c0_260, %c3_261, %c0_262, %c384_263] : memref<1x5x5x512xf32, #tpu.memory_space<vmem>>, vector<1x1x4x128xf32>
    %215 = vector.shape_cast %214 : vector<1x1x4x128xf32> to vector<4x128xf32>
    %c4_264 = arith.constant 4 : index
    %c0_265 = arith.constant 0 : index
    %c0_266 = arith.constant 0 : index
    %216 = vector.load %arg2[%c4_264, %c0_265, %c0_266] : memref<9x128x128xf32, #tpu.memory_space<vmem>>, vector<1x128x128xf32>
    %217 = vector.shape_cast %216 : vector<1x128x128xf32> to vector<128x128xf32>
    %cst_267 = arith.constant dense<0.000000e+00> : vector<4x128xf32>
    %218 = tpu.matmul %215, %217, %cst_267 {dimension_numbers = #tpu.dot_dimension_numbers<[1], [0], [0], [1], [0, 0, 1, 1], [], []>} : vector<4x128xf32>, vector<128x128xf32>, vector<4x128xf32> -> vector<4x128xf32>
    %219 = arith.addf %213, %218 : vector<4x128xf32>
    %c0_268 = arith.constant 0 : index
    %c3_269 = arith.constant 3 : index
    %c1_270 = arith.constant 1 : index
    %c256_271 = arith.constant 256 : index
    %220 = vector.load %arg1[%c0_268, %c3_269, %c1_270, %c256_271] : memref<1x5x5x512xf32, #tpu.memory_space<vmem>>, vector<1x1x4x128xf32>
    %221 = vector.shape_cast %220 : vector<1x1x4x128xf32> to vector<4x128xf32>
    %c5_272 = arith.constant 5 : index
    %c0_273 = arith.constant 0 : index
    %c0_274 = arith.constant 0 : index
    %222 = vector.load %arg2[%c5_272, %c0_273, %c0_274] : memref<9x128x128xf32, #tpu.memory_space<vmem>>, vector<1x128x128xf32>
    %223 = vector.shape_cast %222 : vector<1x128x128xf32> to vector<128x128xf32>
    %cst_275 = arith.constant dense<0.000000e+00> : vector<4x128xf32>
    %224 = tpu.matmul %221, %223, %cst_275 {dimension_numbers = #tpu.dot_dimension_numbers<[1], [0], [0], [1], [0, 0, 1, 1], [], []>} : vector<4x128xf32>, vector<128x128xf32>, vector<4x128xf32> -> vector<4x128xf32>
    %225 = arith.addf %219, %224 : vector<4x128xf32>
    %c0_276 = arith.constant 0 : index
    %c4_277 = arith.constant 4 : index
    %c0_278 = arith.constant 0 : index
    %c0_279 = arith.constant 0 : index
    %226 = vector.load %arg1[%c0_276, %c4_277, %c0_278, %c0_279] : memref<1x5x5x512xf32, #tpu.memory_space<vmem>>, vector<1x1x4x128xf32>
    %227 = vector.shape_cast %226 : vector<1x1x4x128xf32> to vector<4x128xf32>
    %c6_280 = arith.constant 6 : index
    %c0_281 = arith.constant 0 : index
    %c0_282 = arith.constant 0 : index
    %228 = vector.load %arg2[%c6_280, %c0_281, %c0_282] : memref<9x128x128xf32, #tpu.memory_space<vmem>>, vector<1x128x128xf32>
    %229 = vector.shape_cast %228 : vector<1x128x128xf32> to vector<128x128xf32>
    %cst_283 = arith.constant dense<0.000000e+00> : vector<4x128xf32>
    %230 = tpu.matmul %227, %229, %cst_283 {dimension_numbers = #tpu.dot_dimension_numbers<[1], [0], [0], [1], [0, 0, 1, 1], [], []>} : vector<4x128xf32>, vector<128x128xf32>, vector<4x128xf32> -> vector<4x128xf32>
    %231 = arith.addf %225, %230 : vector<4x128xf32>
    %c0_284 = arith.constant 0 : index
    %c4_285 = arith.constant 4 : index
    %c0_286 = arith.constant 0 : index
    %c128_287 = arith.constant 128 : index
    %232 = vector.load %arg1[%c0_284, %c4_285, %c0_286, %c128_287] : memref<1x5x5x512xf32, #tpu.memory_space<vmem>>, vector<1x1x4x128xf32>
    %233 = vector.shape_cast %232 : vector<1x1x4x128xf32> to vector<4x128xf32>
    %c7_288 = arith.constant 7 : index
    %c0_289 = arith.constant 0 : index
    %c0_290 = arith.constant 0 : index
    %234 = vector.load %arg2[%c7_288, %c0_289, %c0_290] : memref<9x128x128xf32, #tpu.memory_space<vmem>>, vector<1x128x128xf32>
    %235 = vector.shape_cast %234 : vector<1x128x128xf32> to vector<128x128xf32>
    %cst_291 = arith.constant dense<0.000000e+00> : vector<4x128xf32>
    %236 = tpu.matmul %233, %235, %cst_291 {dimension_numbers = #tpu.dot_dimension_numbers<[1], [0], [0], [1], [0, 0, 1, 1], [], []>} : vector<4x128xf32>, vector<128x128xf32>, vector<4x128xf32> -> vector<4x128xf32>
    %237 = arith.addf %231, %236 : vector<4x128xf32>
    %c0_292 = arith.constant 0 : index
    %c4_293 = arith.constant 4 : index
    %c1_294 = arith.constant 1 : index
    %c0_295 = arith.constant 0 : index
    %238 = vector.load %arg1[%c0_292, %c4_293, %c1_294, %c0_295] : memref<1x5x5x512xf32, #tpu.memory_space<vmem>>, vector<1x1x4x128xf32>
    %239 = vector.shape_cast %238 : vector<1x1x4x128xf32> to vector<4x128xf32>
    %c8_296 = arith.constant 8 : index
    %c0_297 = arith.constant 0 : index
    %c0_298 = arith.constant 0 : index
    %240 = vector.load %arg2[%c8_296, %c0_297, %c0_298] : memref<9x128x128xf32, #tpu.memory_space<vmem>>, vector<1x128x128xf32>
    %241 = vector.shape_cast %240 : vector<1x128x128xf32> to vector<128x128xf32>
    %cst_299 = arith.constant dense<0.000000e+00> : vector<4x128xf32>
    %242 = tpu.matmul %239, %241, %cst_299 {dimension_numbers = #tpu.dot_dimension_numbers<[1], [0], [0], [1], [0, 0, 1, 1], [], []>} : vector<4x128xf32>, vector<128x128xf32>, vector<4x128xf32> -> vector<4x128xf32>
    %243 = arith.addf %237, %242 : vector<4x128xf32>
    %c0_300 = arith.constant 0 : index
    %c0_301 = arith.constant 0 : index
    %244 = vector.load %arg3[%c0_300, %c0_301] : memref<1x128xf32, #tpu.memory_space<vmem>>, vector<1x128xf32>
    %245 = vector.broadcast %244 : vector<1x128xf32> to vector<4x128xf32>
    %246 = arith.addf %243, %245 : vector<4x128xf32>
    %cst_302 = arith.constant 0.000000e+00 : f32
    %247 = vector.broadcast %cst_302 : f32 to vector<4x128xf32>
    %248 = arith.maximumf %246, %247 : vector<4x128xf32>
    %c0_303 = arith.constant 0 : index
    %c3_304 = arith.constant 3 : index
    %c0_305 = arith.constant 0 : index
    %c0_306 = arith.constant 0 : index
    %249 = vector.load %arg4[%c0_303, %c3_304, %c0_305, %c0_306] : memref<1x4x4x128xf32, #tpu.memory_space<vmem>>, vector<1x1x4x128xf32>
    %250 = vector.shape_cast %249 : vector<1x1x4x128xf32> to vector<4x128xf32>
    %251 = vector.shape_cast %248 : vector<4x128xf32> to vector<1x1x4x128xf32>
    tpu.vector_store %arg4[%c0_303, %c3_304, %c0_305, %c0_306], %251 {strides = array<i32>} : memref<1x4x4x128xf32, #tpu.memory_space<vmem>>, vector<1x1x4x128xf32>,
    return
  }
  func.func @transform_0(%arg0: i32) -> (i32, i32, i32, i32) {
    %c0_i32 = arith.constant 0 : i32
    %c0_i32_0 = arith.constant 0 : i32
    %c0_i32_1 = arith.constant 0 : i32
    %c0_i32_2 = arith.constant 0 : i32
    return %arg0, %c0_i32, %c0_i32_0, %c0_i32_1 : i32, i32, i32, i32
  }
  func.func @transform_1(%arg0: i32) -> (i32, i32, i32) {
    %c0_i32 = arith.constant 0 : i32
    %c0_i32_0 = arith.constant 0 : i32
    %c0_i32_1 = arith.constant 0 : i32
    %c0_i32_2 = arith.constant 0 : i32
    return %c0_i32, %c0_i32_0, %c0_i32_1 : i32, i32, i32
  }
  func.func @transform_2(%arg0: i32) -> (i32, i32) {
    %c0_i32 = arith.constant 0 : i32
    %c0_i32_0 = arith.constant 0 : i32
    %c0_i32_1 = arith.constant 0 : i32
    return %c0_i32, %c0_i32_0 : i32, i32
  }
  func.func @transform_3(%arg0: i32) -> (i32, i32, i32, i32) {
    %c0_i32 = arith.constant 0 : i32
    %c0_i32_0 = arith.constant 0 : i32
    %c0_i32_1 = arith.constant 0 : i32
    %c0_i32_2 = arith.constant 0 : i32
    return %arg0, %c0_i32, %c0_i32_0, %c0_i32_1 : i32, i32, i32, i32
  }
}

</mosaic_0001>

<bundles_post_ra>
// kernel: simple_conv_forward.4
= control target key start
LH: loop header
LB: loop body
LE: loop exit
PB: predicated region body
PF: predicated region fallthrough
CT: control target
= control target key end

     0   :  { %s2505_s12 = smov 0   ;;  %s3147_s0 = inlined_call_operand.vmem [shape: f32[2,9,9,512], index: 0, kind: input, shape index: {}]   ;;  %s3148_s1 = inlined_call_operand.vmem [shape: f32[9,128,128], index: 1, kind: input, shape index: {}]   ;;  %s3149_s2 = inlined_call_operand.vmem [shape: f32[1,128], index: 2, kind: input, shape index: {}]   ;;  %s3150_s3 = inlined_call_operand.vmem [shape: f32[2,8,8,128], index: 3, kind: output, shape index: {}]  }
   0x1 LB: > { %s1652_s13 = sadd.s32 4294967295, %s2483_s12   ;;  %p1656_p0 = scmp.ge.s32.totalorder %s2483_s12, 1  ;;  %s2483_s12 = sphi %s2505_s12, %s13_s12  }
   0x2   : > { %p137_p1 = scmp.lt.s32.totalorder %s2483_s12, 3 }
   0x4   : > { %p138_p2 = pnand %p1656_p0, %p137_p1 }
   0x6   : > { %141 = sbr.rel (%p138_p2) target bundleno = 412 (0x19c), region = 32 }
   0xb   : > { %v1675_v0 = vld [vmem:[%s3148_s1 + $0xf8] sm:$0xff]  ;;  %v1674_v2 = vld [vmem:[%s3148_s1 + $0xf0] sm:$0xff]  ;;  %v1673_v4 = vld [vmem:[%s3148_s1 + $0xe8] sm:$0xff]  ;;  %p161_p3 = scmp.lt.s32.totalorder %s1652_s13, 1  ;;  %vm462_vm0 = vcmask 1046528  }
   0xc   : > { %v194_v1 = vld [vmem:[%s3148_s1 + $0x78] sm:$0xff]  ;;  %2040 = vmatprep.subr.mxu0 %v1675_v0  ;;  %v193_v3 = vld [vmem:[%s3148_s1 + $0x70] sm:$0xff]  ;;  %v192_v5 = vld [vmem:[%s3148_s1 + $0x68] sm:$0xff] }
   0xd   : > { %2084 = vmatprep.subr.mxu1 %v194_v1  ;;  %2041 = vmatpush3.msra.mxu0 %v1675_v0  ;;  %v1672_v6 = vld [vmem:[%s3148_s1 + $0xe0] sm:$0xff]  ;;  %v1671_v8 = vld [vmem:[%s3148_s1 + $0xd8] sm:$0xff]  ;;  %v1670_v10 = vld [vmem:[%s3148_s1 + $0xd0] sm:$0xff]  ;;  %s3162_s13 = smov (!%p161_p3, %s1652_s13), 1 }
   0xe   : > { %2085 = vmatpush3.msra.mxu1 %v194_v1  ;;  %2042 = vmatprep.subr.mxu0 %v1674_v2  ;;  %v191_v7 = vld [vmem:[%s3148_s1 + $0x60] sm:$0xff]  ;;  %v190_v9 = vld [vmem:[%s3148_s1 + $0x58] sm:$0xff]  ;;  %v189_v11 = vld [vmem:[%s3148_s1 + $0x50] sm:$0xff]  ;;  %s2468_s16 = smul.u32 576, %s3162_s13 }
   0xf   : > { %2086 = vmatprep.subr.mxu1 %v193_v3  ;;  %2043 = vmatpush3.msra.mxu0 %v1674_v2  ;;  %v1669_v12 = vld [vmem:[%s3148_s1 + $0xc8] sm:$0xff]  ;;  %v1668_v14 = vld [vmem:[%s3148_s1 + $0xc0] sm:$0xff]  ;;  %v1667_v16 = vld [vmem:[%s3148_s1 + $0xb8] sm:$0xff] }
  0x10   : > { %2087 = vmatpush3.msra.mxu1 %v193_v3  ;;  %2044 = vmatprep.subr.mxu0 %v1673_v4  ;;  %v188_v13 = vld [vmem:[%s3148_s1 + $0x48] sm:$0xff]  ;;  %v187_v15 = vld [vmem:[%s3148_s1 + $0x40] sm:$0xff]  ;;  %v186_v17 = vld [vmem:[%s3148_s1 + $0x38] sm:$0xff]  ;;  %s2613_s27 = scalar_lea.vmem %s3147_s0, %s2468_s16  ;;  %s1823_s16 = sshll.u32 %s3162_s13, 6 }
  0x11   : > { %2088 = vmatprep.subr.mxu1 %v192_v5  ;;  %2045 = vmatpush3.msra.mxu0 %v1673_v4  ;;  %v1666_v18 = vld [vmem:[%s3148_s1 + $0xb0] sm:$0xff]  ;;  %v1665_v20 = vld [vmem:[%s3148_s1 + $0xa8] sm:$0xff]  ;;  %v1664_v22 = vld [vmem:[%s3148_s1 + $0xa0] sm:$0xff]  ;;  %s170_s19 = scalar_lea.vmem %s3150_s3, %s1823_s16 }
  0x12   : > { %2089 = vmatpush3.msra.mxu1 %v192_v5  ;;  %2046 = vmatprep.subr.mxu0 %v1672_v6  ;;  %v185_v19 = vld [vmem:[%s3148_s1 + $0x30] sm:$0xff]  ;;  %v184_v21 = vld [vmem:[%s3148_s1 + $0x28] sm:$0xff]  ;;  %v183_v23 = vld [vmem:[%s3148_s1 + $0x20] sm:$0xff] }
  0x13   : > { %2090 = vmatprep.subr.mxu1 %v191_v7  ;;  %2047 = vmatpush3.msra.mxu0 %v1672_v6  ;;  %v1663_v24 = vld [vmem:[%s3148_s1 + $0x98] sm:$0xff]  ;;  %v1662_v26 = vld [vmem:[%s3148_s1 + $0x90] sm:$0xff]  ;;  %v1661_v28 = vld [vmem:[%s3148_s1 + $0x88] sm:$0xff] }
  0x14   : > { %2091 = vmatpush3.msra.mxu1 %v191_v7  ;;  %2048 = vmatprep.subr.mxu0 %v1671_v8  ;;  %v182_v25 = vld [vmem:[%s3148_s1 + $0x18] sm:$0xff]  ;;  %v181_v27 = vld [vmem:[%s3148_s1 + $0x10] sm:$0xff]  ;;  %v180_v29 = vld [vmem:[%s3148_s1 + $0x8] sm:$0xff] }
  0x15   : > { %2092 = vmatprep.subr.mxu1 %v190_v9  ;;  %2049 = vmatpush3.msra.mxu0 %v1671_v8  ;;  %v1660_v30 = vld [vmem:[%s3148_s1 + $0x80] sm:$0xff]  ;;  %v195_v32 = vld [vmem:[%s2613_s27 + $0x8] sm:$0xff]  ;;  %v1691_v36 = vld [vmem:[%s3148_s1 + $0x178] sm:$0xff] }
  0x16   : > { %2093 = vmatpush3.msra.mxu1 %v190_v9  ;;  %2050 = vmatprep.subr.mxu0 %v1670_v10  ;;  %v179_v31 = vld [vmem:[%s3148_s1] sm:$0xff]  ;;  %v2624_v34 = vld [vmem:[%s2613_s27 + $0x48] sm:$0xff]  ;;  %v1707_v37 = vld [vmem:[%s3148_s1 + $0x1f8] sm:$0xff] }
  0x17   : > { %2094 = vmatprep.subr.mxu1 %v189_v11  ;;  %2051 = vmatpush3.msra.mxu0 %v1670_v10  ;;  %v171_v33 = vld [vmem:[%s2613_s27] sm:$0xff]  ;;  %v1690_v38 = vld [vmem:[%s3148_s1 + $0x170] sm:$0xff]  ;;  %v1689_v40 = vld [vmem:[%s3148_s1 + $0x168] sm:$0xff] }
  0x18   : > { %2095 = vmatpush3.msra.mxu1 %v189_v11  ;;  %2052 = vmatprep.subr.mxu0 %v1669_v12  ;;  %v2627_v35 = vld [vmem:[%s2613_s27 + $0x40] sm:$0xff]  ;;  %v1706_v39 = vld [vmem:[%s3148_s1 + $0x1f0] sm:$0xff]  ;;  %v1705_v41 = vld [vmem:[%s3148_s1 + $0x1e8] sm:$0xff] }
  0x19   : > { %2096 = vmatprep.subr.mxu1 %v188_v13  ;;  %2053 = vmatpush3.msra.mxu0 %v1669_v12  ;;  %v1688_v42 = vld [vmem:[%s3148_s1 + $0x160] sm:$0xff]  ;;  %v1687_v44 = vld [vmem:[%s3148_s1 + $0x158] sm:$0xff]  ;;  %v1686_v46 = vld [vmem:[%s3148_s1 + $0x150] sm:$0xff] }
  0x1a   : > { %2097 = vmatpush3.msra.mxu1 %v188_v13  ;;  %2054 = vmatprep.subr.mxu0 %v1668_v14  ;;  %v1704_v43 = vld [vmem:[%s3148_s1 + $0x1e0] sm:$0xff]  ;;  %v1703_v45 = vld [vmem:[%s3148_s1 + $0x1d8] sm:$0xff]  ;;  %v1702_v47 = vld [vmem:[%s3148_s1 + $0x1d0] sm:$0xff] }
  0x1b   : > { %2098 = vmatprep.subr.mxu1 %v187_v15  ;;  %2055 = vmatpush3.msra.mxu0 %v1668_v14  ;;  %v1685_v48 = vld [vmem:[%s3148_s1 + $0x148] sm:$0xff]  ;;  %v1684_v50 = vld [vmem:[%s3148_s1 + $0x140] sm:$0xff]  ;;  %v1683_v52 = vld [vmem:[%s3148_s1 + $0x138] sm:$0xff] }
  0x1c   : > { %2099 = vmatpush3.msra.mxu1 %v187_v15  ;;  %2056 = vmatprep.subr.mxu0 %v1667_v16  ;;  %v1701_v49 = vld [vmem:[%s3148_s1 + $0x1c8] sm:$0xff]  ;;  %v1700_v51 = vld [vmem:[%s3148_s1 + $0x1c0] sm:$0xff]  ;;  %v1699_v53 = vld [vmem:[%s3148_s1 + $0x1b8] sm:$0xff] }
  0x1d   : > { %2100 = vmatprep.subr.mxu1 %v186_v17  ;;  %2057 = vmatpush3.msra.mxu0 %v1667_v16  ;;  %v2686_v54 = vld [vmem:[%s2613_s27 + $0x88] sm:$0xff]  ;;  %v2689_v55 = vld [vmem:[%s2613_s27 + $0x80] sm:$0xff]  ;;  %v1682_v56 = vld [vmem:[%s3148_s1 + $0x130] sm:$0xff] }
  0x1e   : > { %2101 = vmatpush3.msra.mxu1 %v186_v17  ;;  %2058 = vmatprep.subr.mxu0 %v1666_v18  ;;  %v1698_v57 = vld [vmem:[%s3148_s1 + $0x1b0] sm:$0xff]  ;;  %v2698_v58 = vld [vmem:[%s2613_s27 + $0xc8] sm:$0xff]  ;;  %v2701_v59 = vld [vmem:[%s2613_s27 + $0xc0] sm:$0xff] }
  0x1f   : > { %2102 = vmatprep.subr.mxu1 %v185_v19  ;;  %2059 = vmatpush3.msra.mxu0 %v1666_v18  ;;  %v1681_v60 = vld [vmem:[%s3148_s1 + $0x128] sm:$0xff]  ;;  %v2717_v63 = vld [vmem:[%s2613_s27 + $0x100] sm:$0xff]  ;;  %v1679_v4 = vld [vmem:[%s3148_s1 + $0x118] sm:$0xff] }
  0x20   : > { %2103 = vmatpush3.msra.mxu1 %v185_v19  ;;  %2060 = vmatprep.subr.mxu0 %v1665_v20  ;;  %v1697_v61 = vld [vmem:[%s3148_s1 + $0x1a8] sm:$0xff]  ;;  %v1680_v0 = vld [vmem:[%s3148_s1 + $0x120] sm:$0xff]  ;;  %v1695_v5 = vld [vmem:[%s3148_s1 + $0x198] sm:$0xff] }
  0x21   : > { %2104 = vmatprep.subr.mxu1 %v184_v21  ;;  %2061 = vmatpush3.msra.mxu0 %v1665_v20  ;;  %v2714_v62 = vld [vmem:[%s2613_s27 + $0x108] sm:$0xff]  ;;  %v1696_v1 = vld [vmem:[%s3148_s1 + $0x1a0] sm:$0xff]  ;;  %v1678_v10 = vld [vmem:[%s3148_s1 + $0x110] sm:$0xff] }
  0x22   : > { %2105 = vmatpush3.msra.mxu1 %v184_v21  ;;  %2062 = vmatprep.subr.mxu0 %v1664_v22  ;;  %v2726_v2 = vld [vmem:[%s2613_s27 + $0x148] sm:$0xff]  ;;  %v2729_v3 = vld [vmem:[%s2613_s27 + $0x140] sm:$0xff]  ;;  %v1694_v11 = vld [vmem:[%s3148_s1 + $0x190] sm:$0xff] }
  0x23   : > { %2106 = vmatprep.subr.mxu1 %v183_v23  ;;  %2063 = vmatpush3.msra.mxu0 %v1664_v22  ;;  %v2742_v6 = vld [vmem:[%s2613_s27 + $0x188] sm:$0xff]  ;;  %v2745_v7 = vld [vmem:[%s2613_s27 + $0x180] sm:$0xff] }
  0x24   : > { %2107 = vmatpush3.msra.mxu1 %v183_v23  ;;  %2064 = vmatprep.subr.mxu0 %v1663_v24  ;;  %v430_v8 = vld [vmem:[%s2613_s27] sm:$0xfe]  ;;  %v431_v9 = vld [vmem:[%s2613_s27 + $0x20] sm:$0x1]  ;;  %v2756_v12 = vld [vmem:[%s2613_s27 + $0x1c8] sm:$0xff] }
  0x25   : > { %2108 = vmatprep.subr.mxu1 %v182_v25  ;;  %2065 = vmatpush3.msra.mxu0 %v1663_v24  ;;  %v2759_v13 = vld [vmem:[%s2613_s27 + $0x1c0] sm:$0xff]  ;;  %v463_v16 = vrot.slane %v430_v8, 1  ;;  %v464_v17 = vrot.slane %v431_v9, 1  ;;  %v1677_v18 = vld [vmem:[%s3148_s1 + $0x108] sm:$0xff] }
  0x26   : > { %2109 = vmatpush3.msra.mxu1 %v182_v25  ;;  %2066 = vmatprep.subr.mxu0 %v1662_v26  ;;  %v432_v14 = vld [vmem:[%s2613_s27 + $0x40] sm:$0xfe]  ;;  %v433_v15 = vld [vmem:[%s2613_s27 + $0x60] sm:$0x1]  ;;  %v1693_v19 = vld [vmem:[%s3148_s1 + $0x188] sm:$0xff] }
  0x27   : > { %2110 = vmatprep.subr.mxu1 %v181_v27  ;;  %2067 = vmatpush3.msra.mxu0 %v1662_v26  ;;  %v1676_v20 = vld [vmem:[%s3148_s1 + $0x100] sm:$0xff]  ;;  %v466_v21 = vrot.slane %v432_v14, 1  ;;  %v467_v22 = vrot.slane %v433_v15, 1  ;;  %v465_v26 = vsel %vm462_vm0, %v463_v16, %v464_v17  ;;  %v629_v16 = vld [vmem:[%s2613_s27 + $0x110] sm:$0xff] }
  0x28   : > { %2111 = vmatpush3.msra.mxu1 %v181_v27  ;;  %2068 = vmatprep.subr.mxu0 %v1661_v28  ;;  %v1692_v23 = vld [vmem:[%s3148_s1 + $0x180] sm:$0xff] }
  0x29   : > { %2112 = vmatprep.subr.mxu1 %v180_v29  ;;  %2069 = vmatpush3.msra.mxu0 %v1661_v28  ;;  %v434_v24 = vld [vmem:[%s2613_s27 + $0x80] sm:$0xfe]  ;;  %v435_v25 = vld [vmem:[%s2613_s27 + $0xa0] sm:$0x1] }
  0x2a   : > { %2113 = vmatpush3.msra.mxu1 %v180_v29  ;;  %2070 = vmatprep.subr.mxu0 %v1660_v30  ;;  %v436_v27 = vld [vmem:[%s2613_s27 + $0xc0] sm:$0xfe]  ;;  %v437_v28 = vld [vmem:[%s2613_s27 + $0xe0] sm:$0x1]  ;;  %v625_v29 = vld [vmem:[%s2613_s27 + $0x10] sm:$0xff] }
  0x2b   : > { %2114 = vmatprep.subr.mxu1 %v179_v31  ;;  %2071 = vmatpush3.msra.mxu0 %v1660_v30  ;;  %v468_v30 = vsel %vm462_vm0, %v466_v21, %v467_v22  ;;  %v445_v8 = vld [vmem:[%s2613_s27 + $0x1e0] sm:$0x1]  ;;  %v1734_v21 = vld [vmem:[%s3148_s1 + $0x2d0] sm:$0xff] }
  0x2c   : > { %2072 = vmatprep.mubr.f32.mxu0 %v195_v32  ;;  %2115 = vmatpush3.msra.mxu1 %v179_v31  ;;  %v626_v31 = vld [vmem:[%s2613_s27 + $0x50] sm:$0xff]  ;;  %v469_v32 = vrot.slane %v434_v24, 1  ;;  %v1717_v24 = vld [vmem:[%s3148_s1 + $0x248] sm:$0xff] }
  0x2d   : > { %2116 = vmatprep.mubr.f32.mxu1 %v171_v33  ;;  %2073 = vmatmul.mubr.f32.vlgmr.msra.gmra.mxu0 %v2624_v34  ;;  %v470_v33 = vrot.slane %v435_v25, 1  ;;  %v1733_v25 = vld [vmem:[%s3148_s1 + $0x2c8] sm:$0xff] }
  0x2e   : > { %2117 = vmatmul.mubr.f32.vlgmr.msra.gmra.mxu1 %v2627_v35  ;;  %2128 = vmatprep.subr.mxu0 %v1691_v36 }
  0x2f   : > { %2172 = vmatprep.subr.mxu1 %v1707_v37  ;;  %2129 = vmatpush3.msra.mxu0 %v1691_v36  ;;  %v1723_v36 = vld [vmem:[%s3148_s1 + $0x278] sm:$0xff] }
  0x30   : > { %2173 = vmatpush3.msra.mxu1 %v1707_v37  ;;  %2130 = vmatprep.subr.mxu0 %v1690_v38  ;;  %v1739_v37 = vld [vmem:[%s3148_s1 + $0x2f8] sm:$0xff] }
  0x31   : > { %2174 = vmatprep.subr.mxu1 %v1706_v39  ;;  %2131 = vmatpush3.msra.mxu0 %v1690_v38  ;;  %v472_v38 = vrot.slane %v436_v27, 1  ;;  %v1716_v27 = vld [vmem:[%s3148_s1 + $0x240] sm:$0xff] }
  0x32   : > { %2175 = vmatpush3.msra.mxu1 %v1706_v39  ;;  %2132 = vmatprep.subr.mxu0 %v1689_v40  ;;  %v473_v39 = vrot.slane %v437_v28, 1  ;;  %v632_v28 = vld [vmem:[%s2613_s27 + $0x1d0] sm:$0xff] }
  0x33   : > { %2176 = vmatprep.subr.mxu1 %v1705_v41  ;;  %2133 = vmatpush3.msra.mxu0 %v1689_v40  ;;  %v1722_v40 = vld [vmem:[%s3148_s1 + $0x270] sm:$0xff] }
  0x34   : > { %2177 = vmatpush3.msra.mxu1 %v1705_v41  ;;  %2134 = vmatprep.subr.mxu0 %v1688_v42  ;;  %v1738_v41 = vld [vmem:[%s3148_s1 + $0x2f0] sm:$0xff] }
  0x35   : > { %2178 = vmatprep.subr.mxu1 %v1704_v43  ;;  %2135 = vmatpush3.msra.mxu0 %v1688_v42  ;;  %v438_v42 = vld [vmem:[%s2613_s27 + $0x100] sm:$0xfe] }
  0x36   : > { %2179 = vmatpush3.msra.mxu1 %v1704_v43  ;;  %2136 = vmatprep.subr.mxu0 %v1687_v44  ;;  %v439_v43 = vld [vmem:[%s2613_s27 + $0x120] sm:$0x1] }
  0x37   : > { %2180 = vmatprep.subr.mxu1 %v1703_v45  ;;  %2137 = vmatpush3.msra.mxu0 %v1687_v44  ;;  %v471_v44 = vsel %vm462_vm0, %v469_v32, %v470_v33  ;;  %v1714_v32 = vld [vmem:[%s3148_s1 + $0x230] sm:$0xff] }
  0x38   : > { %2181 = vmatpush3.msra.mxu1 %v1703_v45  ;;  %2138 = vmatprep.subr.mxu0 %v1686_v46  ;;  %v440_v45 = vld [vmem:[%s2613_s27 + $0x140] sm:$0xfe]  ;;  %v1730_v33 = vld [vmem:[%s3148_s1 + $0x2b0] sm:$0xff] }
  0x39   : > { %2182 = vmatprep.subr.mxu1 %v1702_v47  ;;  %2139 = vmatpush3.msra.mxu0 %v1686_v46  ;;  %v441_v46 = vld [vmem:[%s2613_s27 + $0x160] sm:$0x1] }
  0x3a   : > { %2183 = vmatpush3.msra.mxu1 %v1702_v47  ;;  %2140 = vmatprep.subr.mxu0 %v1685_v48  ;;  %v474_v47 = vsel %vm462_vm0, %v472_v38, %v473_v39  ;;  %v1712_v38 = vld [vmem:[%s3148_s1 + $0x220] sm:$0xff] }
  0x3b   : > { %2184 = vmatprep.subr.mxu1 %v1701_v49  ;;  %2141 = vmatpush3.msra.mxu0 %v1685_v48  ;;  %v1721_v48 = vld [vmem:[%s3148_s1 + $0x268] sm:$0xff]  ;;  %v1728_v39 = vld [vmem:[%s3148_s1 + $0x2a0] sm:$0xff] }
  0x3c   : > { %2185 = vmatpush3.msra.mxu1 %v1701_v49  ;;  %2142 = vmatprep.subr.mxu0 %v1684_v50  ;;  %v1737_v49 = vld [vmem:[%s3148_s1 + $0x2e8] sm:$0xff] }
  0x3d   : > { %2186 = vmatprep.subr.mxu1 %v1700_v51  ;;  %2143 = vmatpush3.msra.mxu0 %v1684_v50  ;;  %v475_v50 = vrot.slane %v438_v42, 1  ;;  %v1710_v42 = vld [vmem:[%s3148_s1 + $0x210] sm:$0xff] }
  0x3e   : > { %2187 = vmatpush3.msra.mxu1 %v1700_v51  ;;  %2144 = vmatprep.subr.mxu0 %v1683_v52  ;;  %v476_v51 = vrot.slane %v439_v43, 1  ;;  %v901_v43 = vld [vmem:[%s2613_s27 + $0x10] sm:$0xfe] }
  0x3f   : > { %2188 = vmatprep.subr.mxu1 %v1699_v53  ;;  %2145 = vmatpush3.msra.mxu0 %v1683_v52  ;;  %v627_v52 = vld [vmem:[%s2613_s27 + $0x90] sm:$0xff] }
  0x40   : > { %2189 = vmatpush3.msra.mxu1 %v1699_v53  ;;  %2075 = vmatprep.mubr.f32.mxu0 %v2686_v54  ;;  %v478_v53 = vrot.slane %v440_v45, 1  ;;  %v1726_v45 = vld [vmem:[%s3148_s1 + $0x290] sm:$0xff] }
  0x41   : > { %2119 = vmatprep.mubr.f32.mxu1 %v2689_v55  ;;  %2146 = vmatprep.subr.mxu0 %v1682_v56 }
  0x42   : > { %2190 = vmatprep.subr.mxu1 %v1698_v57  ;;  %2076 = vmatmul.mubr.f32.gmra.mxu0 %v2698_v58 }
  0x43   : > { %2120 = vmatmul.mubr.f32.gmra.mxu1 %v2701_v59  ;;  %2147 = vmatpush3.msra.mxu0 %v1682_v56  ;;  %v479_v56 = vrot.slane %v441_v46, 1  ;;  %v903_v46 = vld [vmem:[%s2613_s27 + $0x50] sm:$0xfe] }
  0x44   : > { %2191 = vmatpush3.msra.mxu1 %v1698_v57  ;;  %2148 = vmatprep.subr.mxu0 %v1681_v60  ;;  %v628_v57 = vld [vmem:[%s2613_s27 + $0xd0] sm:$0xff] }
  0x45   : > { %2192 = vmatprep.subr.mxu1 %v1697_v61  ;;  %2149 = vmatpush3.msra.mxu0 %v1681_v60  ;;  %v1720_v60 = vld [vmem:[%s3148_s1 + $0x260] sm:$0xff]  ;;  %v480_v9 = vsel %vm462_vm0, %v478_v53, %v479_v56 }
  0x46   : > { %2193 = vmatpush3.msra.mxu1 %v1697_v61  ;;  %2078 = vmatprep.mubr.f32.mxu0 %v2714_v62  ;;  %v1736_v61 = vld [vmem:[%s3148_s1 + $0x2e0] sm:$0xff] }
  0x47   : > { %2122 = vmatprep.mubr.f32.mxu1 %v2717_v63  ;;  %2150 = vmatprep.subr.mxu0 %v1680_v0  ;;  %v1708_v56 = vld [vmem:[%s3148_s1 + $0x200] sm:$0xff] }
  0x48   : > { %2194 = vmatprep.subr.mxu1 %v1696_v1  ;;  %2079 = vmatmul.mubr.f32.gmra.mxu0 %v2726_v2 }
  0x49   : > { %2123 = vmatmul.mubr.f32.gmra.mxu1 %v2729_v3  ;;  %2151 = vmatpush3.msra.mxu0 %v1680_v0  ;;  %v442_v0 = vld [vmem:[%s2613_s27 + $0x180] sm:$0xfe] }
  0x4a   : > { %2195 = vmatpush3.msra.mxu1 %v1696_v1  ;;  %2152 = vmatprep.subr.mxu0 %v1679_v4  ;;  %v443_v1 = vld [vmem:[%s2613_s27 + $0x1a0] sm:$0x1]  ;;  %v481_v14 = vrot.slane %v442_v0, 1  ;;  %v764_v0 = vld [vmem:[%s2613_s27 + $0x58] sm:$0xff] }
  0x4b   : > { %2196 = vmatprep.subr.mxu1 %v1695_v5  ;;  %2153 = vmatpush3.msra.mxu0 %v1679_v4  ;;  %v477_v4 = vsel %vm462_vm0, %v475_v50, %v476_v51  ;;  %v482_v15 = vrot.slane %v443_v1, 1  ;;  %v933_v50 = vrot.slane %v901_v43, 1  ;;  %v914_v43 = vld [vmem:[%s2613_s27 + $0x1b0] sm:$0x1] }
  0x4c   : > { %2197 = vmatpush3.msra.mxu1 %v1695_v5  ;;  %2081 = vmatprep.mubr.f32.mxu0 %v2742_v6  ;;  %v444_v5 = vld [vmem:[%s2613_s27 + $0x1c0] sm:$0xfe] }
  0x4d   : > { %2125 = vmatprep.mubr.f32.mxu1 %v2745_v7  ;;  %2154 = vmatprep.subr.mxu0 %v1678_v10  ;;  %v484_v17 = vrot.slane %v444_v5, 1  ;;  %v483_v22 = vsel %vm462_vm0, %v481_v14, %v482_v15  ;;  %v906_v5 = vld [vmem:[%s2613_s27 + $0xb0] sm:$0x1] }
  0x4e   : > { %2198 = vmatprep.subr.mxu1 %v1694_v11  ;;  %2082 = vmatmul.mubr.f32.gmra.mxu0 %v2756_v12  ;;  %v1762_v14 = vld [vmem:[%s3148_s1 + $0x370] sm:$0xff] }
  0x4f   : > { %2126 = vmatmul.mubr.f32.gmra.mxu1 %v2759_v13  ;;  %2155 = vmatpush3.msra.mxu0 %v1678_v10  ;;  %v1719_v10 = vld [vmem:[%s3148_s1 + $0x258] sm:$0xff]  ;;  %v1786_v15 = vld [vmem:[%s3148_s1 + $0x3f0] sm:$0xff] }
  0x50   : > { %2199 = vmatpush3.msra.mxu1 %v1694_v11  ;;  %2156 = vmatprep.subr.mxu0 %v1677_v18  ;;  %v1735_v11 = vld [vmem:[%s3148_s1 + $0x2d8] sm:$0xff] }
  0x51   : > { %2200 = vmatprep.subr.mxu1 %v1693_v19  ;;  %2157 = vmatpush3.msra.mxu0 %v1677_v18  ;;  %v485_v18 = vrot.slane %v445_v8, 1  ;;  %v1763_v8 = vld [vmem:[%s3148_s1 + $0x378] sm:$0xff] }
  0x52   : > { %2201 = vmatpush3.msra.mxu1 %v1693_v19  ;;  %2158 = vmatprep.subr.mxu0 %v1676_v20  ;;  %v1718_v19 = vld [vmem:[%s3148_s1 + $0x250] sm:$0xff] }
  0x53   : > { %2202 = vmatprep.subr.mxu1 %v1692_v23  ;;  %2159 = vmatpush3.msra.mxu0 %v1676_v20  ;;  %v630_v20 = vld [vmem:[%s2613_s27 + $0x150] sm:$0xff] }
  0x54   : > { %2160 = vmatprep.mubr.f32.mxu0 %v465_v26  ;;  %2203 = vmatpush3.msra.mxu1 %v1692_v23  ;;  %v486_v23 = vsel %vm462_vm0, %v484_v17, %v485_v18  ;;  %v631_v26 = vld [vmem:[%s2613_s27 + $0x190] sm:$0xff]  ;;  %v940_v17 = vrot.slane %v906_v5, 1  ;;  %v765_v18 = vld [vmem:[%s2613_s27 + $0x98] sm:$0xff]  ;;  %v1780_v5 = vld [vmem:[%s3148_s1 + $0x3c0] sm:$0xff] }
  0x55   : > { %2204 = vmatprep.mubr.f32.mxu1 %v625_v29  ;;  %2161 = vmatmul.mubr.f32.vlgmr.msra.gmra.mxu0 %v468_v30  ;;  %v1732_v29 = vld [vmem:[%s3148_s1 + $0x2c0] sm:$0xff]  ;;  %v1715_v30 = vld [vmem:[%s3148_s1 + $0x238] sm:$0xff] }
  0x56   : > { %2205 = vmatmul.mubr.f32.vlgmr.msra.gmra.mxu1 %v626_v31  ;;  %2216 = vmatprep.subr.mxu0 %v1723_v36  ;;  %v1731_v31 = vld [vmem:[%s3148_s1 + $0x2b8] sm:$0xff] }
  0x57   : > { %2260 = vmatprep.subr.mxu1 %v1739_v37  ;;  %2217 = vmatpush3.msra.mxu0 %v1723_v36  ;;  %v1713_v36 = vld [vmem:[%s3148_s1 + $0x228] sm:$0xff] }
  0x58   : > { %2261 = vmatpush3.msra.mxu1 %v1739_v37  ;;  %2218 = vmatprep.subr.mxu0 %v1722_v40  ;;  %v1729_v37 = vld [vmem:[%s3148_s1 + $0x2a8] sm:$0xff] }
  0x59   : > { %2262 = vmatprep.subr.mxu1 %v1738_v41  ;;  %2163 = vmatprep.mubr.f32.mxu0 %v471_v44  ;;  %v902_v44 = vld [vmem:[%s2613_s27 + $0x30] sm:$0x1] }
  0x5a   : > { %2219 = vmatpush3.msra.mxu0 %v1722_v40  ;;  %2263 = vmatpush3.msra.mxu1 %v1738_v41  ;;  %v1711_v40 = vld [vmem:[%s3148_s1 + $0x218] sm:$0xff]  ;;  %v934_v51 = vrot.slane %v902_v44, 1 }
  0x5b   : > { %2164 = vmatmul.mubr.f32.gmra.mxu0 %v474_v47  ;;  %2220 = vmatprep.subr.mxu0 %v1721_v48  ;;  %v1727_v41 = vld [vmem:[%s3148_s1 + $0x298] sm:$0xff]  ;;  %v904_v47 = vld [vmem:[%s2613_s27 + $0x70] sm:$0x1] }
  0x5c   : > { %2264 = vmatprep.subr.mxu1 %v1737_v49  ;;  %2207 = vmatprep.mubr.f32.mxu1 %v627_v52  ;;  %v936_v52 = vrot.slane %v903_v46, 1  ;;  %v937_v53 = vrot.slane %v904_v47, 1  ;;  %v915_v46 = vld [vmem:[%s2613_s27 + $0x1d0] sm:$0xfe]  ;;  %v916_v47 = vld [vmem:[%s2613_s27 + $0x1f0] sm:$0x1] }
  0x5d   : > { %2221 = vmatpush3.msra.mxu0 %v1721_v48  ;;  %2265 = vmatpush3.msra.mxu1 %v1737_v49  ;;  %v1709_v48 = vld [vmem:[%s3148_s1 + $0x208] sm:$0xff] }
  0x5e   : > { %2222 = vmatprep.subr.mxu0 %v1720_v60  ;;  %2208 = vmatmul.mubr.f32.gmra.mxu1 %v628_v57  ;;  %v1725_v49 = vld [vmem:[%s3148_s1 + $0x288] sm:$0xff]  ;;  %v1724_v57 = vld [vmem:[%s3148_s1 + $0x280] sm:$0xff]  ;;  %v938_v1 = vsel %vm462_vm0, %v936_v52, %v937_v53  ;;  %v769_v52 = vld [vmem:[%s2613_s27 + $0x198] sm:$0xff] }
  0x5f   : > { %2266 = vmatprep.subr.mxu1 %v1736_v61  ;;  %2166 = vmatprep.mubr.f32.mxu0 %v477_v4  ;;  %v905_v4 = vld [vmem:[%s2613_s27 + $0x90] sm:$0xfe]  ;;  %v770_v53 = vld [vmem:[%s2613_s27 + $0x1d8] sm:$0xff] }
  0x60   : > { %2223 = vmatpush3.msra.mxu0 %v1720_v60  ;;  %2267 = vmatpush3.msra.mxu1 %v1736_v61  ;;  %v763_v60 = vld [vmem:[%s2613_s27 + $0x18] sm:$0xff]  ;;  %v935_v61 = vsel %vm462_vm0, %v933_v50, %v934_v51  ;;  %v952_v51 = vrot.slane %v914_v43, 1 }
  0x61   : > { %2167 = vmatmul.mubr.f32.gmra.mxu0 %v480_v9  ;;  %2224 = vmatprep.subr.mxu0 %v1719_v10  ;;  %v1787_v9 = vld [vmem:[%s3148_s1 + $0x3f8] sm:$0xff] }
  0x62   : > { %2268 = vmatprep.subr.mxu1 %v1735_v11  ;;  %2210 = vmatprep.mubr.f32.mxu1 %v629_v16  ;;  %v939_v16 = vrot.slane %v905_v4, 1 }
  0x63   : > { %2225 = vmatpush3.msra.mxu0 %v1719_v10  ;;  %2269 = vmatpush3.msra.mxu1 %v1735_v11  ;;  %v907_v10 = vld [vmem:[%s2613_s27 + $0xd0] sm:$0xfe]  ;;  %v908_v11 = vld [vmem:[%s2613_s27 + $0xf0] sm:$0x1] }
  0x64   : > { %2226 = vmatprep.subr.mxu0 %v1718_v19  ;;  %2211 = vmatmul.mubr.f32.gmra.mxu1 %v630_v20  ;;  %v1761_v20 = vld [vmem:[%s3148_s1 + $0x368] sm:$0xff] }
  0x65   : > { %2270 = vmatprep.subr.mxu1 %v1734_v21  ;;  %2169 = vmatprep.mubr.f32.mxu0 %v483_v22  ;;  %v943_v22 = vrot.slane %v908_v11, 1  ;;  %v1778_v11 = vld [vmem:[%s3148_s1 + $0x3b0] sm:$0xff] }
  0x66   : > { %2227 = vmatpush3.msra.mxu0 %v1718_v19  ;;  %2271 = vmatpush3.msra.mxu1 %v1734_v21  ;;  %v766_v19 = vld [vmem:[%s2613_s27 + $0xd8] sm:$0xff]  ;;  %v942_v21 = vrot.slane %v907_v10, 1  ;;  %v1754_v10 = vld [vmem:[%s3148_s1 + $0x330] sm:$0xff] }
  0x67   : > { %2170 = vmatmul.mubr.f32.gmra.mxu0 %v486_v23  ;;  %2228 = vmatprep.subr.mxu0 %v1717_v24  ;;  %v1785_v23 = vld [vmem:[%s3148_s1 + $0x3e8] sm:$0xff] }
  0x68   : > { %2272 = vmatprep.subr.mxu1 %v1733_v25  ;;  %2213 = vmatprep.mubr.f32.mxu1 %v631_v26  ;;  %v941_v26 = vsel %vm462_vm0, %v939_v16, %v940_v17  ;;  %v1752_v16 = vld [vmem:[%s3148_s1 + $0x320] sm:$0xff] }
  0x69   : > { %2229 = vmatpush3.msra.mxu0 %v1717_v24  ;;  %2273 = vmatpush3.msra.mxu1 %v1733_v25  ;;  %v909_v24 = vld [vmem:[%s2613_s27 + $0x110] sm:$0xfe]  ;;  %v910_v25 = vld [vmem:[%s2613_s27 + $0x130] sm:$0x1]  ;;  %v1776_v17 = vld [vmem:[%s3148_s1 + $0x3a0] sm:$0xff] }
  0x6a   : > { %2230 = vmatprep.subr.mxu0 %v1716_v27  ;;  %2214 = vmatmul.mubr.f32.gmra.mxu1 %v632_v28  ;;  %v911_v28 = vld [vmem:[%s2613_s27 + $0x150] sm:$0xfe] }
  0x6b   : > { %2274 = vmatprep.subr.mxu1 %v1732_v29  ;;  %2231 = vmatpush3.msra.mxu0 %v1716_v27  ;;  %v1760_v27 = vld [vmem:[%s3148_s1 + $0x360] sm:$0xff] }
  0x6c   : > { %2275 = vmatpush3.msra.mxu1 %v1732_v29  ;;  %2232 = vmatprep.subr.mxu0 %v1715_v30  ;;  %v912_v29 = vld [vmem:[%s2613_s27 + $0x170] sm:$0x1] }
  0x6d   : > { %2276 = vmatprep.subr.mxu1 %v1731_v31  ;;  %2233 = vmatpush3.msra.mxu0 %v1715_v30  ;;  %v944_v30 = vsel %vm462_vm0, %v942_v21, %v943_v22  ;;  %v1774_v21 = vld [vmem:[%s3148_s1 + $0x390] sm:$0xff]  ;;  %v1749_v22 = vld [vmem:[%s3148_s1 + $0x308] sm:$0xff] }
  0x6e   : > { %2277 = vmatpush3.msra.mxu1 %v1731_v31  ;;  %2234 = vmatprep.subr.mxu0 %v1714_v32  ;;  %v1784_v31 = vld [vmem:[%s3148_s1 + $0x3e0] sm:$0xff] }
  0x6f   : > { %2278 = vmatprep.subr.mxu1 %v1730_v33  ;;  %2235 = vmatpush3.msra.mxu0 %v1714_v32  ;;  %v945_v32 = vrot.slane %v909_v24, 1  ;;  %v1748_v24 = vld [vmem:[%s3148_s1 + $0x300] sm:$0xff] }
  0x70   : > { %2279 = vmatpush3.msra.mxu1 %v1730_v33  ;;  %2236 = vmatprep.subr.mxu0 %v1713_v36  ;;  %v946_v33 = vrot.slane %v910_v25, 1  ;;  %v1772_v25 = vld [vmem:[%s3148_s1 + $0x380] sm:$0xff] }
  0x71   : > { %2280 = vmatprep.subr.mxu1 %v1729_v37  ;;  %2237 = vmatpush3.msra.mxu0 %v1713_v36  ;;  %v767_v36 = vld [vmem:[%s2613_s27 + $0x118] sm:$0xff] }
  0x72   : > { %2281 = vmatpush3.msra.mxu1 %v1729_v37  ;;  %2238 = vmatprep.subr.mxu0 %v1712_v38  ;;  %v768_v37 = vld [vmem:[%s2613_s27 + $0x158] sm:$0xff]  ;;  %v947_v44 = vsel %vm462_vm0, %v945_v32, %v946_v33  ;;  %v1790_v32 = vld [vmem:[%s2613_s27 + $0x80] sm:$0xfe]  ;;  %v1791_v33 = vld [vmem:[%s2613_s27 + $0xa0] sm:$0x1] }
  0x73   : > { %2282 = vmatprep.subr.mxu1 %v1728_v39  ;;  %2239 = vmatpush3.msra.mxu0 %v1712_v38  ;;  %v1759_v38 = vld [vmem:[%s3148_s1 + $0x358] sm:$0xff] }
  0x74   : > { %2283 = vmatpush3.msra.mxu1 %v1728_v39  ;;  %2240 = vmatprep.subr.mxu0 %v1711_v40  ;;  %v948_v39 = vrot.slane %v911_v28, 1  ;;  %v1789_v28 = vld [vmem:[%s2613_s27 + $0x60] sm:$0x1] }
  0x75   : > { %2284 = vmatprep.subr.mxu1 %v1727_v41  ;;  %2241 = vmatpush3.msra.mxu0 %v1711_v40  ;;  %v949_v40 = vrot.slane %v912_v29, 1  ;;  %v1796_v29 = vld [vmem:[%s2613_s27 + $0x140] sm:$0xfe]  ;;  %v1405_v43 = vrot.slane %v1789_v28, 1 }
  0x76   : > { %2285 = vmatpush3.msra.mxu1 %v1727_v41  ;;  %2242 = vmatprep.subr.mxu0 %v1710_v42  ;;  %v1783_v41 = vld [vmem:[%s3148_s1 + $0x3d8] sm:$0xff] }
  0x77   : > { %2286 = vmatprep.subr.mxu1 %v1726_v45  ;;  %2243 = vmatpush3.msra.mxu0 %v1710_v42  ;;  %v913_v42 = vld [vmem:[%s2613_s27 + $0x190] sm:$0xfe] }
  0x78   : > { %2287 = vmatpush3.msra.mxu1 %v1726_v45  ;;  %2244 = vmatprep.subr.mxu0 %v1709_v48  ;;  %v1758_v45 = vld [vmem:[%s3148_s1 + $0x350] sm:$0xff]  ;;  %v951_v50 = vrot.slane %v913_v42, 1 }
  0x79   : > { %2288 = vmatprep.subr.mxu1 %v1725_v49  ;;  %2245 = vmatpush3.msra.mxu0 %v1709_v48  ;;  %v950_v48 = vsel %vm462_vm0, %v948_v39, %v949_v40  ;;  %v1793_v39 = vld [vmem:[%s2613_s27 + $0xe0] sm:$0x1]  ;;  %v1800_v40 = vld [vmem:[%s2613_s27 + $0x1c0] sm:$0xfe] }
  0x7a   : > { %2289 = vmatpush3.msra.mxu1 %v1725_v49  ;;  %2246 = vmatprep.subr.mxu0 %v1708_v56  ;;  %v1782_v49 = vld [vmem:[%s3148_s1 + $0x3d0] sm:$0xff] }
  0x7b   : > { %2290 = vmatprep.subr.mxu1 %v1724_v57  ;;  %2247 = vmatpush3.msra.mxu0 %v1708_v56  ;;  %v954_v56 = vrot.slane %v915_v46, 1  ;;  %v1805_v46 = vld [vmem:[%s3148_s1 + $0x408] sm:$0xff] }
  0x7c   : > { %2248 = vmatprep.mubr.f32.mxu0 %v763_v60  ;;  %2291 = vmatpush3.msra.mxu1 %v1724_v57  ;;  %v955_v57 = vrot.slane %v916_v47, 1  ;;  %v1757_v60 = vld [vmem:[%s3148_s1 + $0x348] sm:$0xff]  ;;  %v1804_v47 = vld [vmem:[%s3148_s1 + $0x400] sm:$0xff] }
  0x7d   : > { %2292 = vmatprep.mubr.f32.mxu1 %v935_v61  ;;  %2249 = vmatmul.mubr.f32.vlgmr.msra.gmra.mxu0 %v764_v0  ;;  %v1781_v61 = vld [vmem:[%s3148_s1 + $0x3c8] sm:$0xff]  ;;  %v953_v0 = vsel %vm462_vm0, %v951_v50, %v952_v51 }
  0x7e   : > { %2293 = vmatmul.mubr.f32.vlgmr.msra.gmra.mxu1 %v938_v1  ;;  %2304 = vmatprep.subr.mxu0 %v1763_v8  ;;  %v1756_v1 = vld [vmem:[%s3148_s1 + $0x340] sm:$0xff]  ;;  %v956_v4 = vsel %vm462_vm0, %v954_v56, %v955_v57  ;;  %v1422_v56 = vrot.slane %v1800_v40, 1 }
  0x7f   : > { %2348 = vmatprep.subr.mxu1 %v1787_v9  ;;  %2305 = vmatpush3.msra.mxu0 %v1763_v8  ;;  %v1755_v8 = vld [vmem:[%s3148_s1 + $0x338] sm:$0xff] }
  0x80   : > { %2349 = vmatpush3.msra.mxu1 %v1787_v9  ;;  %2306 = vmatprep.subr.mxu0 %v1762_v14  ;;  %v1779_v9 = vld [vmem:[%s3148_s1 + $0x3b8] sm:$0xff] }
  0x81   : > { %2350 = vmatprep.subr.mxu1 %v1786_v15  ;;  %2251 = vmatprep.mubr.f32.mxu0 %v765_v18  ;;  %v1751_v18 = vld [vmem:[%s3148_s1 + $0x318] sm:$0xff] }
  0x82   : > { %2307 = vmatpush3.msra.mxu0 %v1762_v14  ;;  %2351 = vmatpush3.msra.mxu1 %v1786_v15  ;;  %v1753_v14 = vld [vmem:[%s3148_s1 + $0x328] sm:$0xff] }
  0x83   : > { %2252 = vmatmul.mubr.f32.gmra.mxu0 %v766_v19  ;;  %2308 = vmatprep.subr.mxu0 %v1761_v20  ;;  %v1777_v15 = vld [vmem:[%s3148_s1 + $0x3a8] sm:$0xff]  ;;  %v1775_v19 = vld [vmem:[%s3148_s1 + $0x398] sm:$0xff] }
  0x84   : > { %2352 = vmatprep.subr.mxu1 %v1785_v23  ;;  %2295 = vmatprep.mubr.f32.mxu1 %v941_v26  ;;  %v1819_v26 = vld [vmem:[%s3148_s1 + $0x478] sm:$0xff] }
  0x85   : > { %2309 = vmatpush3.msra.mxu0 %v1761_v20  ;;  %2353 = vmatpush3.msra.mxu1 %v1785_v23  ;;  %v1750_v20 = vld [vmem:[%s3148_s1 + $0x310] sm:$0xff]  ;;  %v1773_v23 = vld [vmem:[%s3148_s1 + $0x388] sm:$0xff] }
  0x86   : > { %2310 = vmatprep.subr.mxu0 %v1760_v27  ;;  %2296 = vmatmul.mubr.f32.gmra.mxu1 %v944_v30  ;;  %v1806_v30 = vld [vmem:[%s3148_s1 + $0x410] sm:$0xff] }
  0x87   : > { %2354 = vmatprep.subr.mxu1 %v1784_v31  ;;  %2254 = vmatprep.mubr.f32.mxu0 %v767_v36  ;;  %v1798_v36 = vld [vmem:[%s2613_s27 + $0x180] sm:$0xfe] }
  0x88   : > { %2311 = vmatpush3.msra.mxu0 %v1760_v27  ;;  %2355 = vmatpush3.msra.mxu1 %v1784_v31  ;;  %v1818_v27 = vld [vmem:[%s3148_s1 + $0x470] sm:$0xff]  ;;  %v1797_v31 = vld [vmem:[%s2613_s27 + $0x160] sm:$0x1]  ;;  %v1419_v50 = vrot.slane %v1798_v36, 1 }
  0x89   : > { %2255 = vmatmul.mubr.f32.gmra.mxu0 %v768_v37  ;;  %2312 = vmatprep.subr.mxu0 %v1759_v38  ;;  %v1799_v37 = vld [vmem:[%s2613_s27 + $0x1a0] sm:$0x1] }
  0x8a   : > { %2356 = vmatprep.subr.mxu1 %v1783_v41  ;;  %2298 = vmatprep.mubr.f32.mxu1 %v947_v44  ;;  %v1416_v44 = vrot.slane %v1796_v29, 1  ;;  %v1420_v51 = vrot.slane %v1799_v37, 1 }
  0x8b   : > { %2313 = vmatpush3.msra.mxu0 %v1759_v38  ;;  %2357 = vmatpush3.msra.mxu1 %v1783_v41  ;;  %v1792_v38 = vld [vmem:[%s2613_s27 + $0xc0] sm:$0xfe]  ;;  %v1801_v41 = vld [vmem:[%s2613_s27 + $0x1e0] sm:$0x1] }
  0x8c   : > { %2314 = vmatprep.subr.mxu0 %v1758_v45  ;;  %2299 = vmatmul.mubr.f32.gmra.mxu1 %v950_v48  ;;  %v1407_v48 = vrot.slane %v1790_v32, 1  ;;  %v1423_v57 = vrot.slane %v1801_v41, 1 }
  0x8d   : > { %2358 = vmatprep.subr.mxu1 %v1782_v49  ;;  %2257 = vmatprep.mubr.f32.mxu0 %v769_v52  ;;  %v1410_v52 = vrot.slane %v1792_v38, 1 }
  0x8e   : > { %2315 = vmatpush3.msra.mxu0 %v1758_v45  ;;  %2359 = vmatpush3.msra.mxu1 %v1782_v49  ;;  %v1417_v45 = vrot.slane %v1797_v31, 1  ;;  %v1408_v49 = vrot.slane %v1791_v33, 1 }
  0x8f   : > { %2258 = vmatmul.mubr.f32.gmra.mxu0 %v770_v53  ;;  %2316 = vmatprep.subr.mxu0 %v1757_v60  ;;  %v1411_v53 = vrot.slane %v1793_v39, 1 }
  0x90   : > { %2360 = vmatprep.subr.mxu1 %v1781_v61  ;;  %2301 = vmatprep.mubr.f32.mxu1 %v953_v0  ;;  %v1802_v0 = vld [vmem:[%s2613_s27 + $0x200] sm:$0xfe] }
  0x91   : > { %2317 = vmatpush3.msra.mxu0 %v1757_v60  ;;  %2361 = vmatpush3.msra.mxu1 %v1781_v61  ;;  %v1794_v60 = vld [vmem:[%s2613_s27 + $0x100] sm:$0xfe]  ;;  %v1795_v61 = vld [vmem:[%s2613_s27 + $0x120] sm:$0x1] }
  0x92   : > { %2318 = vmatprep.subr.mxu0 %v1756_v1  ;;  %2302 = vmatmul.mubr.f32.gmra.mxu1 %v956_v4 }
  0x93   : > { %2362 = vmatprep.subr.mxu1 %v1780_v5  ;;  %2319 = vmatpush3.msra.mxu0 %v1756_v1  ;;  %v1803_v1 = vld [vmem:[%s2613_s27 + $0x220] sm:$0x1] }
  0x94   : > { %2363 = vmatpush3.msra.mxu1 %v1780_v5  ;;  %2320 = vmatprep.subr.mxu0 %v1755_v8  ;;  %v1418_v5 = vsel %vm462_vm0, %v1416_v44, %v1417_v45 }
  0x95   : > { %2364 = vmatprep.subr.mxu1 %v1779_v9  ;;  %2321 = vmatpush3.msra.mxu0 %v1755_v8  ;;  %v1409_v8 = vsel %vm462_vm0, %v1407_v48, %v1408_v49 }
  0x96   : > { %2365 = vmatpush3.msra.mxu1 %v1779_v9  ;;  %2322 = vmatprep.subr.mxu0 %v1754_v10  ;;  %v1421_v9 = vsel %vm462_vm0, %v1419_v50, %v1420_v51 }
  0x97   : > { %2366 = vmatprep.subr.mxu1 %v1778_v11  ;;  %2323 = vmatpush3.msra.mxu0 %v1754_v10  ;;  %v1413_v10 = vrot.slane %v1794_v60, 1 }
  0x98   : > { %2367 = vmatpush3.msra.mxu1 %v1778_v11  ;;  %2324 = vmatprep.subr.mxu0 %v1753_v14  ;;  %v1414_v11 = vrot.slane %v1795_v61, 1 }
  0x99   : > { %2368 = vmatprep.subr.mxu1 %v1777_v15  ;;  %2325 = vmatpush3.msra.mxu0 %v1753_v14  ;;  %v1425_v14 = vrot.slane %v1802_v0, 1 }
  0x9a   : > { %2369 = vmatpush3.msra.mxu1 %v1777_v15  ;;  %2326 = vmatprep.subr.mxu0 %v1752_v16  ;;  %v1426_v15 = vrot.slane %v1803_v1, 1 }
  0x9b   : > { %2370 = vmatprep.subr.mxu1 %v1776_v17  ;;  %2327 = vmatpush3.msra.mxu0 %v1752_v16  ;;  %v1412_v16 = vsel %vm462_vm0, %v1410_v52, %v1411_v53 }
  0x9c   : > { %2371 = vmatpush3.msra.mxu1 %v1776_v17  ;;  %2328 = vmatprep.subr.mxu0 %v1751_v18  ;;  %v1424_v17 = vsel %vm462_vm0, %v1422_v56, %v1423_v57 }
  0x9d   : > { %2372 = vmatprep.subr.mxu1 %v1775_v19  ;;  %2329 = vmatpush3.msra.mxu0 %v1751_v18  ;;  %v1415_v18 = vsel %vm462_vm0, %v1413_v10, %v1414_v11 }
  0x9e   : > { %2373 = vmatpush3.msra.mxu1 %v1775_v19  ;;  %2330 = vmatprep.subr.mxu0 %v1750_v20  ;;  %v1427_v19 = vsel %vm462_vm0, %v1425_v14, %v1426_v15 }
  0x9f   : > { %2374 = vmatprep.subr.mxu1 %v1774_v21  ;;  %2331 = vmatpush3.msra.mxu0 %v1750_v20 }
  0xa0   : > { %2375 = vmatpush3.msra.mxu1 %v1774_v21  ;;  %2332 = vmatprep.subr.mxu0 %v1749_v22 }
  0xa1   : > { %2376 = vmatprep.subr.mxu1 %v1773_v23  ;;  %2333 = vmatpush3.msra.mxu0 %v1749_v22 }
  0xa2   : > { %2377 = vmatpush3.msra.mxu1 %v1773_v23  ;;  %2334 = vmatprep.subr.mxu0 %v1748_v24 }
  0xa3   : > { %2378 = vmatprep.subr.mxu1 %v1772_v25  ;;  %2335 = vmatpush3.msra.mxu0 %v1748_v24 }
  0xa4   : > { %2336 = vmatprep.mubr.f32.mxu0 %v2627_v35  ;;  %2379 = vmatpush3.msra.mxu1 %v1772_v25  ;;  %v1817_v35 = vld [vmem:[%s3148_s1 + $0x468] sm:$0xff] }
  0xa5   : > { %2380 = vmatprep.mubr.f32.mxu1 %v2624_v34  ;;  %2337 = vmatmul.mubr.f32.vlgmr.msra.gmra.mxu0 %v2689_v55  ;;  %v1816_v34 = vld [vmem:[%s3148_s1 + $0x460] sm:$0xff]  ;;  %v1814_v55 = vld [vmem:[%s3148_s1 + $0x450] sm:$0xff] }
  0xa6   : > { %2381 = vmatmul.mubr.f32.vlgmr.msra.gmra.mxu1 %v2686_v54  ;;  %2392 = vmatprep.subr.mxu0 %v1819_v26  ;;  %v1815_v54 = vld [vmem:[%s3148_s1 + $0x458] sm:$0xff] }
  0xa7   : > { %2436 = vmatprep.subr.mxu1 %v1819_v26  ;;  %2393 = vmatpush3.msra.mxu0 %v1819_v26 }
  0xa8   : > { %2452 = vmatpush3.msra.mxu1 %v1819_v26  ;;  %2394 = vmatprep.subr.mxu0 %v1818_v27 }
  0xa9   : > { %2437 = vmatprep.subr.mxu1 %v1818_v27  ;;  %2339 = vmatprep.mubr.f32.mxu0 %v2701_v59  ;;  %v1813_v59 = vld [vmem:[%s3148_s1 + $0x448] sm:$0xff] }
  0xaa   : > { %2395 = vmatpush3.msra.mxu0 %v1818_v27  ;;  %2453 = vmatpush3.msra.mxu1 %v1818_v27 }
  0xab   : > { %2340 = vmatmul.mubr.f32.gmra.mxu0 %v2717_v63  ;;  %2396 = vmatprep.subr.mxu0 %v1817_v35  ;;  %v1771_v63 = vld [vmem:[%s2613_s27 + $0x208] sm:$0xff] }
  0xac   : > { %2438 = vmatprep.subr.mxu1 %v1817_v35  ;;  %2383 = vmatprep.mubr.f32.mxu1 %v2698_v58  ;;  %v1747_v58 = vld [vmem:[%s2613_s27 + $0x200] sm:$0xff] }
  0xad   : > { %2397 = vmatpush3.msra.mxu0 %v1817_v35  ;;  %2454 = vmatpush3.msra.mxu1 %v1817_v35 }
  0xae   : > { %2398 = vmatprep.subr.mxu0 %v1816_v34  ;;  %2384 = vmatmul.mubr.f32.gmra.mxu1 %v2714_v62  ;;  %v1812_v62 = vld [vmem:[%s3148_s1 + $0x440] sm:$0xff] }
  0xaf   : > { %2439 = vmatprep.subr.mxu1 %v1816_v34  ;;  %2342 = vmatprep.mubr.f32.mxu0 %v2729_v3  ;;  %v1810_v3 = vld [vmem:[%s3148_s1 + $0x430] sm:$0xff] }
  0xb0   : > { %2399 = vmatpush3.msra.mxu0 %v1816_v34  ;;  %2455 = vmatpush3.msra.mxu1 %v1816_v34 }
  0xb1   : > { %2343 = vmatmul.mubr.f32.gmra.mxu0 %v2745_v7  ;;  %2400 = vmatprep.subr.mxu0 %v1815_v54  ;;  %v1808_v7 = vld [vmem:[%s3148_s1 + $0x420] sm:$0xff] }
  0xb2   : > { %2440 = vmatprep.subr.mxu1 %v1815_v54  ;;  %2386 = vmatprep.mubr.f32.mxu1 %v2726_v2  ;;  %v1811_v2 = vld [vmem:[%s3148_s1 + $0x438] sm:$0xff] }
  0xb3   : > { %2401 = vmatpush3.msra.mxu0 %v1815_v54  ;;  %2456 = vmatpush3.msra.mxu1 %v1815_v54 }
  0xb4   : > { %2402 = vmatprep.subr.mxu0 %v1814_v55  ;;  %2387 = vmatmul.mubr.f32.gmra.mxu1 %v2742_v6  ;;  %v1809_v6 = vld [vmem:[%s3148_s1 + $0x428] sm:$0xff] }
  0xb5   : > { %2441 = vmatprep.subr.mxu1 %v1814_v55  ;;  %2345 = vmatprep.mubr.f32.mxu0 %v2759_v13  ;;  %v1788_v13 = vld [vmem:[%s2613_s27 + $0x40] sm:$0xfe] }
  0xb6   : > { %2403 = vmatpush3.msra.mxu0 %v1814_v55  ;;  %2457 = vmatpush3.msra.mxu1 %v1814_v55  ;;  %v1404_v42 = vrot.slane %v1788_v13, 1 }
  0xb7   : > { %2346 = vmatmul.mubr.f32.gmra.mxu0 %v1747_v58  ;;  %2404 = vmatprep.subr.mxu0 %v1813_v59 }
  0xb8   : > { %2442 = vmatprep.subr.mxu1 %v1813_v59  ;;  %2389 = vmatprep.mubr.f32.mxu1 %v2756_v12  ;;  %v1807_v12 = vld [vmem:[%s3148_s1 + $0x418] sm:$0xff]  ;;  %v1406_v4 = vsel %vm462_vm0, %v1404_v42, %v1405_v43 }
  0xb9   : > { %2405 = vmatpush3.msra.mxu0 %v1813_v59  ;;  %2458 = vmatpush3.msra.mxu1 %v1813_v59 }
  0xba   : > { %2406 = vmatprep.subr.mxu0 %v1812_v62  ;;  %2390 = vmatmul.mubr.f32.gmra.mxu1 %v1771_v63 }
  0xbb   : > { %2443 = vmatprep.subr.mxu1 %v1812_v62  ;;  %2407 = vmatpush3.msra.mxu0 %v1812_v62 }
  0xbc   : > { %2459 = vmatpush3.msra.mxu1 %v1812_v62  ;;  %2408 = vmatprep.subr.mxu0 %v1811_v2 }
  0xbd   : > { %2444 = vmatprep.subr.mxu1 %v1811_v2  ;;  %2409 = vmatpush3.msra.mxu0 %v1811_v2 }
  0xbe   : > { %2460 = vmatpush3.msra.mxu1 %v1811_v2  ;;  %2410 = vmatprep.subr.mxu0 %v1810_v3 }
  0xbf   : > { %2445 = vmatprep.subr.mxu1 %v1810_v3  ;;  %2411 = vmatpush3.msra.mxu0 %v1810_v3 }
  0xc0   : > { %2461 = vmatpush3.msra.mxu1 %v1810_v3  ;;  %2412 = vmatprep.subr.mxu0 %v1809_v6 }
  0xc1   : > { %2446 = vmatprep.subr.mxu1 %v1809_v6  ;;  %2413 = vmatpush3.msra.mxu0 %v1809_v6 }
  0xc2   : > { %2462 = vmatpush3.msra.mxu1 %v1809_v6  ;;  %2414 = vmatprep.subr.mxu0 %v1808_v7 }
  0xc3   : > { %2447 = vmatprep.subr.mxu1 %v1808_v7  ;;  %2415 = vmatpush3.msra.mxu0 %v1808_v7 }
  0xc4   : > { %2463 = vmatpush3.msra.mxu1 %v1808_v7  ;;  %2416 = vmatprep.subr.mxu0 %v1807_v12 }
  0xc5   : > { %2448 = vmatprep.subr.mxu1 %v1807_v12  ;;  %2417 = vmatpush3.msra.mxu0 %v1807_v12 }
  0xc6   : > { %2464 = vmatpush3.msra.mxu1 %v1807_v12  ;;  %2418 = vmatprep.subr.mxu0 %v1806_v30 }
  0xc7   : > { %2449 = vmatprep.subr.mxu1 %v1806_v30  ;;  %2419 = vmatpush3.msra.mxu0 %v1806_v30 }
  0xc8   : > { %2465 = vmatpush3.msra.mxu1 %v1806_v30  ;;  %2420 = vmatprep.subr.mxu0 %v1805_v46 }
  0xc9   : > { %2450 = vmatprep.subr.mxu1 %v1805_v46  ;;  %2421 = vmatpush3.msra.mxu0 %v1805_v46 }
  0xca   : > { %2466 = vmatpush3.msra.mxu1 %v1805_v46  ;;  %2422 = vmatprep.subr.mxu0 %v1804_v47 }
  0xcb   : > { %2451 = vmatprep.subr.mxu1 %v1804_v47  ;;  %2423 = vmatpush3.msra.mxu0 %v1804_v47 }
  0xcc   : > { %2467 = vmatpush3.msra.mxu1 %v1804_v47  ;;  %2424 = vmatprep.mubr.f32.mxu0 %v1406_v4 }
  0xcd   : > { %2430 = vmatprep.mubr.f32.mxu1 %v1418_v5  ;;  %2425 = vmatmul.mubr.f32.vlgmr.msra.gmra.mxu0 %v1409_v8 }
  0xce   : > { %2431 = vmatmul.mubr.f32.vlgmr.msra.gmra.mxu1 %v1421_v9  ;;  %2427 = vmatprep.mubr.f32.mxu0 %v1412_v16 }
  0xcf   : > { %2433 = vmatprep.mubr.f32.mxu1 %v1424_v17 }
  0xd1   : > { %2428 = vmatmul.mubr.f32.gmra.mxu0 %v1415_v18 }
  0xd2   : > { %2434 = vmatmul.mubr.f32.gmra.mxu1 %v1427_v19 }
  0xed   : > { %v2074_v20 = vpop.f32.mrf.mxu0 }
  0xee   : > { %v2118_v23 = vpop.f32.mrf.mxu1 }
  0xef   : > { %v286_v21 = vpop.f32.mrf.mxu0  ;;  %v397_v8 = vadd.f32 %v2118_v23, %v2074_v20 }
  0xf0   : > { %v391_v25 = vpop.f32.mrf.mxu1 }
  0xf1   : > { %v392_v14 = vadd.f32 %v391_v25, %v286_v21 }
 0x102   : > { %v3119_v22 = vpop.f32.mrf.mxu0 }
 0x103   : > { %v2121_v26 = vpop.f32.mrf.mxu1 }
 0x104   : > { %v296_v24 = vpop.f32.mrf.mxu0 }
 0x105   : > { %v401_v35 = vpop.f32.mrf.mxu1 }
 0x108   : > { %v2080_v27 = vpop.f32.mrf.mxu0 }
 0x109   : > { %v2124_v54 = vpop.f32.mrf.mxu1 }
 0x10a   : > { %v306_v34 = vpop.f32.mrf.mxu0  ;;  %v417_v9 = vadd.f32 %v2124_v54, %v2080_v27 }
 0x10b   : > { %v411_v58 = vpop.f32.mrf.mxu1 }
 0x10c   : > { %v412_v15 = vadd.f32 %v411_v58, %v306_v34 }
 0x10e   : > { %v2083_v55 = vpop.f32.mrf.mxu0 }
 0x10f   : > { %v2127_v62 = vpop.f32.mrf.mxu1 }
 0x110   : > { %v316_v59 = vpop.f32.mrf.mxu0 }
 0x111   : > { %v421_v2 = vpop.f32.mrf.mxu1 }
 0x112   : > { %v422_v20 = vadd.f32 %v421_v2, %v316_v59 }
 0x115   : > { %v2162_v63 = vpop.f32.mrf.mxu0 }
 0x116   : > { %v2206_v6 = vpop.f32.mrf.mxu1  ;;  %v618_v16 = vadd.f32 %v2162_v63, %v397_v8 }
 0x117   : > { %v578_v3 = vpop.f32.mrf.mxu0 }
 0x118   : > { %v716_v12 = vpop.f32.mrf.mxu1  ;;  %v617_v18 = vadd.f32 %v578_v3, %v392_v14  ;;  %v756_v27 = vadd.f32 %v2206_v6, %v618_v16 }
 0x11a   : > { %v755_v58 = vadd.f32 %v716_v12, %v617_v18 }
 0x11b   : > { %v2165_v7 = vpop.f32.mrf.mxu0 }
 0x11d   : > { %v588_v13 = vpop.f32.mrf.mxu0 }
 0x11e   : > { %v2209_v28 = vpop.f32.mrf.mxu1 }
 0x120   : > { %v726_v30 = vpop.f32.mrf.mxu1 }
 0x121   : > { %v2168_v29 = vpop.f32.mrf.mxu0 }
 0x122   : > { %v622_v17 = vadd.f32 %v2168_v29, %v417_v9 }
 0x123   : > { %v598_v31 = vpop.f32.mrf.mxu0 }
 0x124   : > { %v2212_v32 = vpop.f32.mrf.mxu1  ;;  %v621_v19 = vadd.f32 %v598_v31, %v412_v15 }
 0x125   : > { %v760_v54 = vadd.f32 %v2212_v32, %v622_v17 }
 0x126   : > { %v736_v36 = vpop.f32.mrf.mxu1 }
 0x127   : > { %v2171_v33 = vpop.f32.mrf.mxu0  ;;  %v759_v8 = vadd.f32 %v736_v36, %v621_v19 }
 0x129   : > { %v608_v37 = vpop.f32.mrf.mxu0 }
 0x12a   : > { %v2215_v38 = vpop.f32.mrf.mxu1  ;;  %v623_v34 = vadd.f32 %v608_v37, %v422_v20 }
 0x12c   : > { %v746_v40 = vpop.f32.mrf.mxu1 }
 0x13d   : > { %v2250_v39 = vpop.f32.mrf.mxu0 }
 0x13e   : > { %v2294_v42 = vpop.f32.mrf.mxu1  ;;  %v894_v63 = vadd.f32 %v2250_v39, %v756_v27 }
 0x13f   : > { %v854_v41 = vpop.f32.mrf.mxu0 }
 0x140   : > { %v1048_v44 = vpop.f32.mrf.mxu1  ;;  %v893_v31 = vadd.f32 %v854_v41, %v755_v58 }
 0x142   : > { %v1087_v12 = vadd.f32 %v1048_v44, %v893_v31 }
 0x143   : > { %v2253_v43 = vpop.f32.mrf.mxu0 }
 0x145   : > { %v864_v46 = vpop.f32.mrf.mxu0 }
 0x146   : > { %v3121_v45 = vpop.f32.mrf.mxu1 }
 0x147   : > { %3151 = vst [vmem:[#allocation2_spill] sm:$0xff] %v3121_v45  ;;  %v407_v45 = vadd.f32 %v2121_v26, %v3119_v22  ;;  %v761_v26 = vadd.f32 %v746_v40, %v623_v34 }
 0x148   : > { %v3123_v47 = vpop.f32.mrf.mxu1 }
 0x149   : > { %3152 = vst [vmem:[#allocation3_spill] sm:$0xff] %v3123_v47  ;;  %v2256_v48 = vpop.f32.mrf.mxu0 }
 0x14a   : > { %v898_v9 = vadd.f32 %v2256_v48, %v760_v54 }
 0x14b   : > { %v874_v50 = vpop.f32.mrf.mxu0 }
 0x14c   : > { %v2300_v49 = vpop.f32.mrf.mxu1  ;;  %v897_v14 = vadd.f32 %v874_v50, %v759_v8 }
 0x14e   : > { %v1068_v51 = vpop.f32.mrf.mxu1 }
 0x14f   : > { %v2259_v52 = vpop.f32.mrf.mxu0  ;;  %v1091_v32 = vadd.f32 %v1068_v51, %v897_v14 }
 0x151   : > { %v884_v56 = vpop.f32.mrf.mxu0 }
 0x152   : > { %v2303_v53 = vpop.f32.mrf.mxu1 }
 0x154   : > { %v1078_v60 = vpop.f32.mrf.mxu1 }
 0x165   : > { %v2338_v57 = vpop.f32.mrf.mxu0 }
 0x166   : > { %v2382_v61 = vpop.f32.mrf.mxu1 }
 0x167   : > { %v1187_v0 = vpop.f32.mrf.mxu0 }
 0x168   : > { %v3125_v1 = vpop.f32.mrf.mxu1  ;;  %v1226_v37 = vadd.f32 %v1187_v0, %v1087_v12 }
 0x169   : > { %3153 = vst [vmem:[#allocation4_spill] sm:$0xff] %v3125_v1  ;;  %v402_v1 = vadd.f32 %v401_v35, %v296_v24  ;;  %v1088_v35 = vadd.f32 %v2294_v42, %v894_v63 }
 0x16b   : > { %v2341_v4 = vpop.f32.mrf.mxu0  ;;  %v619_v21 = vadd.f32 %v588_v13, %v402_v1 }
 0x16d   : > { %v1197_v10 = vpop.f32.mrf.mxu0  ;;  %v757_v22 = vadd.f32 %v726_v30, %v619_v21  ;;  %v3157_v30 = vld [vmem:[#allocation3_spill] sm:$0xff] }
 0x16e   : > { %v3127_v5 = vpop.f32.mrf.mxu1 }
 0x16f   : > { %3154 = vst [vmem:[#allocation5_spill] sm:$0xff] %v3127_v5  ;;  %v427_v5 = vadd.f32 %v2127_v62, %v2083_v55  ;;  %v1092_v55 = vadd.f32 %v2300_v49, %v898_v9  ;;  %v895_v2 = vadd.f32 %v864_v46, %v757_v22 }
 0x170   : > { %v3129_v11 = vpop.f32.mrf.mxu1 }
 0x171   : > { %3155 = vst [vmem:[#allocation6_spill] sm:$0xff] %v3129_v11  ;;  %v2344_v47 = vpop.f32.mrf.mxu0  ;;  %v620_v11 = vadd.f32 %v2165_v7, %v407_v45  ;;  %v624_v25 = vadd.f32 %v2171_v33, %v427_v5  ;;  %v899_v7 = vadd.f32 %v884_v56, %v761_v26  ;;  %v1227_v33 = vadd.f32 %v2338_v57, %v1088_v35  ;;  %v3156_v45 = vld [vmem:[#allocation2_spill] sm:$0xff]  ;;  %v3158_v57 = vld [vmem:[#allocation4_spill] sm:$0xff] }
 0x172   : > { %v1231_v36 = vadd.f32 %v2344_v47, %v1092_v55  ;;  %v1820_v47 = vld [vmem:[%s3149_s2] ss:$0 sm:$0xff]  ;;  %v1364_v0 = vadd.f32 %v3158_v57, %v1226_v37 }
 0x173   : > { %v1207_v29 = vpop.f32.mrf.mxu0  ;;  %v758_v15 = vadd.f32 %v2209_v28, %v620_v11  ;;  %v762_v24 = vadd.f32 %v2215_v38, %v624_v25  ;;  %v1089_v38 = vadd.f32 %v3157_v30, %v895_v2  ;;  %v1093_v42 = vadd.f32 %v1078_v60, %v899_v7 }
 0x174   : > { %v2388_v23 = vpop.f32.mrf.mxu1  ;;  %v1230_v39 = vadd.f32 %v1207_v29, %v1091_v32 }
 0x175   : > { %v896_v62 = vadd.f32 %v2253_v43, %v758_v15  ;;  %v900_v6 = vadd.f32 %v2259_v52, %v762_v24  ;;  %v1365_v43 = vadd.f32 %v2382_v61, %v1227_v33  ;;  %v1369_v46 = vadd.f32 %v2388_v23, %v1231_v36 }
 0x176   : > { %v1345_v3 = vpop.f32.mrf.mxu1  ;;  %v1228_v50 = vadd.f32 %v1197_v10, %v1089_v38  ;;  %v3159_v17 = vld [vmem:[#allocation5_spill] sm:$0xff] }
 0x177   : > { %v2347_v59 = vpop.f32.mrf.mxu0  ;;  %v1090_v28 = vadd.f32 %v3156_v45, %v896_v62  ;;  %v1094_v40 = vadd.f32 %v2303_v53, %v900_v6  ;;  %v1368_v1 = vadd.f32 %v1345_v3, %v1230_v39 }
 0x178   : > { %v3160_v19 = vld [vmem:[#allocation6_spill] sm:$0xff] }
 0x179   : > { %v1217_v41 = vpop.f32.mrf.mxu0  ;;  %v1229_v49 = vadd.f32 %v2341_v4, %v1090_v28  ;;  %v1233_v52 = vadd.f32 %v2347_v59, %v1094_v40  ;;  %v1366_v20 = vadd.f32 %v3160_v19, %v1228_v50 }
 0x17a   : > { %v2391_v13 = vpop.f32.mrf.mxu1  ;;  %v1232_v44 = vadd.f32 %v1217_v41, %v1093_v42 }
 0x17b   : > { %v1367_v18 = vadd.f32 %v3159_v17, %v1229_v49  ;;  %v1371_v23 = vadd.f32 %v2391_v13, %v1233_v52 }
 0x17c   : > { %v1355_v48 = vpop.f32.mrf.mxu1 }
 0x17d   : > { %v1370_v27 = vadd.f32 %v1355_v48, %v1232_v44 }
 0x18d   : > { %v2426_v51 = vpop.f32.mrf.mxu0 }
 0x18e   : > { %v2432_v56 = vpop.f32.mrf.mxu1  ;;  %v1559_v5 = vadd.f32 %v2426_v51, %v1365_v43 }
 0x18f   : > { %v1563_v53 = vadd.f32 %v2432_v56, %v1369_v46  ;;  %v1519_v60 = vpop.f32.mrf.mxu0 }
 0x190   : > { %v1539_v11 = vpop.f32.mrf.mxu1  ;;  %v1574_v61 = vadd.f32 %v1820_v47, %v1559_v5  ;;  %v1558_v4 = vadd.f32 %v1519_v60, %v1364_v0 }
 0x191   : > { %v1578_v16 = vadd.f32 %v1820_v47, %v1563_v53  ;;  %v1562_v10 = vadd.f32 %v1539_v11, %v1368_v1  ;;  %v2429_v54 = vpop.f32.mrf.mxu0 }
 0x192   : > { %v2435_v21 = vpop.f32.mrf.mxu1  ;;  %v1582_v25 = vmax.f32 %v1574_v61, 0.0  ;;  %v1573_v58 = vadd.f32 %v1820_v47, %v1558_v4  ;;  %v1561_v63 = vadd.f32 %v2429_v54, %v1367_v18 }
 0x193   : > { %v1586_v34 = vmax.f32 %v1578_v16, 0.0  ;;  %v1577_v8 = vadd.f32 %v1820_v47, %v1562_v10  ;;  %v1565_v9 = vadd.f32 %v2435_v21, %v1371_v23  ;;  %v1529_v29 = vpop.f32.mrf.mxu0 }
 0x194   : > { %v1549_v3 = vpop.f32.mrf.mxu1  ;;  %1590 = vst [vmem:[%s170_s19 + $0x8] sm:$0xff] %v1582_v25  ;;  %v1581_v31 = vmax.f32 %v1573_v58, 0.0  ;;  %v1560_v15 = vadd.f32 %v1529_v29, %v1366_v20  ;;  %v1576_v24 = vadd.f32 %v1820_v47, %v1561_v63 }
 0x195   : > { %1594 = vst [vmem:[%s170_s19 + $0x28] sm:$0xff] %v1586_v34  ;;  %v1585_v14 = vmax.f32 %v1577_v8, 0.0  ;;  %v1564_v22 = vadd.f32 %v1549_v3, %v1370_v27  ;;  %v1580_v26 = vadd.f32 %v1820_v47, %v1565_v9 }
 0x196   : > { %1589 = vst [vmem:[%s170_s19] sm:$0xff] %v1581_v31  ;;  %v1575_v35 = vadd.f32 %v1820_v47, %v1560_v15  ;;  %v1584_v59 = vmax.f32 %v1576_v24, 0.0 }
 0x197   : > { %1593 = vst [vmem:[%s170_s19 + $0x20] sm:$0xff] %v1585_v14  ;;  %v1579_v55 = vadd.f32 %v1820_v47, %v1564_v22  ;;  %v1588_v62 = vmax.f32 %v1580_v26, 0.0 }
 0x198   : > { %v1583_v2 = vmax.f32 %v1575_v35, 0.0  ;;  %1592 = vst [vmem:[%s170_s19 + $0x18] sm:$0xff] %v1584_v59 }
 0x199   : > { %v1587_v6 = vmax.f32 %v1579_v55, 0.0  ;;  %1596 = vst [vmem:[%s170_s19 + $0x38] sm:$0xff] %v1588_v62 }
 0x19a   : > { %1591 = vst [vmem:[%s170_s19 + $0x10] sm:$0xff] %v1583_v2 }
 0x19b   : > { %1595 = vst [vmem:[%s170_s19 + $0x30] sm:$0xff] %v1587_v6 }
 0x19c PF: > { %s13_s12 = sadd.s32 1, %s2483_s12  }
 0x19d   : > { %p10_p4 = scmp.ge.s32.totalorder %s13_s12, 4  }
 0x19f   :  { %12 = sbr.rel (!%p10_p4) target bundleno = 1 (0x1), region = 71 }

// kernel: simple_conv_forward.3
= control target key start
LH: loop header
LB: loop body
LE: loop exit
PB: predicated region body
PF: predicated region fallthrough
CT: control target
= control target key end

     0   :  { %s4573_s12 = smov 0   ;;  %s6150_s0 = inlined_call_operand.vmem [shape: f32[2,18,18,128], index: 0, kind: input, shape index: {}]   ;;  %s6151_s1 = inlined_call_operand.vmem [shape: f32[9,128,128], index: 1, kind: input, shape index: {}]   ;;  %s6152_s2 = inlined_call_operand.vmem [shape: f32[1,128], index: 2, kind: input, shape index: {}]   ;;  %s6153_s3 = inlined_call_operand.vmem [shape: f32[2,16,16,128], index: 3, kind: output, shape index: {}]  }
   0x1 LB: > { %s3020_s13 = sadd.s32 4294967295, %s4551_s12   ;;  %p3024_p0 = scmp.ge.s32.totalorder %s4551_s12, 1  ;;  %s4551_s12 = sphi %s4573_s12, %s13_s12  }
   0x2   : > { %p137_p1 = scmp.lt.s32.totalorder %s4551_s12, 3 }
   0x4   : > { %p138_p2 = pnand %p3024_p0, %p137_p1 }
   0x6   : > { %141 = sbr.rel (%p138_p2) target bundleno = 548 (0x224), region = 32 }
   0xb   : > { %v3043_v0 = vld [vmem:[%s6151_s1 + $0xf8] sm:$0xff]  ;;  %v3042_v1 = vld [vmem:[%s6151_s1 + $0xf0] sm:$0xff]  ;;  %v3041_v2 = vld [vmem:[%s6151_s1 + $0xe8] sm:$0xff]  ;;  %p161_p3 = scmp.lt.s32.totalorder %s3020_s13, 1 }
   0xc   : > { %4504 = vmatprep.subr.mxu1 %v3043_v0  ;;  %3784 = vmatprep.subr.mxu0 %v3043_v0  ;;  %v3040_v3 = vld [vmem:[%s6151_s1 + $0xe0] sm:$0xff]  ;;  %v3039_v4 = vld [vmem:[%s6151_s1 + $0xd8] sm:$0xff]  ;;  %v3038_v5 = vld [vmem:[%s6151_s1 + $0xd0] sm:$0xff] }
   0xd   : > { %4520 = vmatpush3.msra.mxu1 %v3043_v0  ;;  %3785 = vmatpush3.msra.mxu0 %v3043_v0  ;;  %v3037_v6 = vld [vmem:[%s6151_s1 + $0xc8] sm:$0xff]  ;;  %v3036_v7 = vld [vmem:[%s6151_s1 + $0xc0] sm:$0xff]  ;;  %v3035_v8 = vld [vmem:[%s6151_s1 + $0xb8] sm:$0xff]  ;;  %s6325_s13 = smov (!%p161_p3, %s3020_s13), 1 }
   0xe   : > { %4505 = vmatprep.subr.mxu1 %v3042_v1  ;;  %3786 = vmatprep.subr.mxu0 %v3042_v1  ;;  %v3034_v9 = vld [vmem:[%s6151_s1 + $0xb0] sm:$0xff]  ;;  %v3033_v10 = vld [vmem:[%s6151_s1 + $0xa8] sm:$0xff]  ;;  %v3032_v11 = vld [vmem:[%s6151_s1 + $0xa0] sm:$0xff]  ;;  %s4536_s15 = smul.u32 432, %s6325_s13  ;;  %s3351_s17 = sshll.u32 %s6325_s13, 8 }
   0xf   : > { %4521 = vmatpush3.msra.mxu1 %v3042_v1  ;;  %3787 = vmatpush3.msra.mxu0 %v3042_v1  ;;  %v3031_v12 = vld [vmem:[%s6151_s1 + $0x98] sm:$0xff]  ;;  %v3030_v13 = vld [vmem:[%s6151_s1 + $0x90] sm:$0xff]  ;;  %v3029_v14 = vld [vmem:[%s6151_s1 + $0x88] sm:$0xff]  ;;  %s6005_s19 = scalar_lea.vmem %s6153_s3, %s3351_s17 }
  0x10   : > { %4506 = vmatprep.subr.mxu1 %v3041_v2  ;;  %3788 = vmatprep.subr.mxu0 %v3041_v2  ;;  %s4636_s22 = scalar_lea.vmem %s6150_s0, %s4536_s15  ;;  %v3028_v15 = vld [vmem:[%s6151_s1 + $0x80] sm:$0xff]  ;;  %v218_v19 = vld [vmem:[%s6151_s1 + $0x78] sm:$0xff]  ;;  %v217_v22 = vld [vmem:[%s6151_s1 + $0x70] sm:$0xff] }
  0x11   : > { %4522 = vmatpush3.msra.mxu1 %v3041_v2  ;;  %3789 = vmatpush3.msra.mxu0 %v3041_v2  ;;  %v4642_v16 = vld [vmem:[%s4636_s22 + $0xc1] sm:$0xff]  ;;  %v4646_v18 = vld [vmem:[%s4636_s22 + $0xc9] sm:$0xff]  ;;  %v3059_v21 = vld [vmem:[%s6151_s1 + $0x178] sm:$0xff] }
  0x12   : > { %4507 = vmatprep.subr.mxu1 %v3040_v3  ;;  %3790 = vmatprep.subr.mxu0 %v3040_v3  ;;  %v219_v17 = vld [vmem:[%s4636_s22 + $0x1] sm:$0xff]  ;;  %v220_v20 = vld [vmem:[%s4636_s22 + $0x9] sm:$0xff]  ;;  %v4661_v23 = vld [vmem:[%s4636_s22 + $0xd9] sm:$0xff] }
  0x13   : > { %4523 = vmatpush3.msra.mxu1 %v3040_v3  ;;  %3791 = vmatpush3.msra.mxu0 %v3040_v3  ;;  %v3058_v24 = vld [vmem:[%s6151_s1 + $0x170] sm:$0xff]  ;;  %v4667_v25 = vld [vmem:[%s4636_s22 + $0x19] sm:$0xff]  ;;  %v4670_v26 = vld [vmem:[%s4636_s22 + $0xe1] sm:$0xff] }
  0x14   : > { %4508 = vmatprep.subr.mxu1 %v3039_v4  ;;  %3792 = vmatprep.subr.mxu0 %v3039_v4  ;;  %v216_v27 = vld [vmem:[%s6151_s1 + $0x68] sm:$0xff]  ;;  %v215_v30 = vld [vmem:[%s6151_s1 + $0x60] sm:$0xff]  ;;  %v4688_v31 = vld [vmem:[%s4636_s22 + $0xf1] sm:$0xff] }
  0x15   : > { %4524 = vmatpush3.msra.mxu1 %v3039_v4  ;;  %3793 = vmatpush3.msra.mxu0 %v3039_v4  ;;  %v4677_v28 = vld [vmem:[%s4636_s22 + $0x21] sm:$0xff]  ;;  %v4695_v33 = vld [vmem:[%s4636_s22 + $0x31] sm:$0xff]  ;;  %v4698_v34 = vld [vmem:[%s4636_s22 + $0xf9] sm:$0xff] }
  0x16   : > { %4509 = vmatprep.subr.mxu1 %v3038_v5  ;;  %3794 = vmatprep.subr.mxu0 %v3038_v5  ;;  %v3057_v29 = vld [vmem:[%s6151_s1 + $0x168] sm:$0xff]  ;;  %v3056_v32 = vld [vmem:[%s6151_s1 + $0x160] sm:$0xff]  ;;  %v214_v35 = vld [vmem:[%s6151_s1 + $0x58] sm:$0xff] }
  0x17   : > { %4525 = vmatpush3.msra.mxu1 %v3038_v5  ;;  %3795 = vmatpush3.msra.mxu0 %v3038_v5  ;;  %v4705_v36 = vld [vmem:[%s4636_s22 + $0x39] sm:$0xff]  ;;  %v213_v38 = vld [vmem:[%s6151_s1 + $0x50] sm:$0xff]  ;;  %v212_v43 = vld [vmem:[%s6151_s1 + $0x48] sm:$0xff] }
  0x18   : > { %4510 = vmatprep.subr.mxu1 %v3037_v6  ;;  %3796 = vmatprep.subr.mxu0 %v3037_v6  ;;  %v3055_v37 = vld [vmem:[%s6151_s1 + $0x158] sm:$0xff]  ;;  %v4716_v39 = vld [vmem:[%s4636_s22 + $0x109] sm:$0xff]  ;;  %v211_v46 = vld [vmem:[%s6151_s1 + $0x40] sm:$0xff] }
  0x19   : > { %4526 = vmatpush3.msra.mxu1 %v3037_v6  ;;  %3797 = vmatpush3.msra.mxu0 %v3037_v6  ;;  %v3054_v40 = vld [vmem:[%s6151_s1 + $0x150] sm:$0xff]  ;;  %v3053_v45 = vld [vmem:[%s6151_s1 + $0x148] sm:$0xff]  ;;  %v3052_v48 = vld [vmem:[%s6151_s1 + $0x140] sm:$0xff] }
  0x1a   : > { %4511 = vmatprep.subr.mxu1 %v3036_v7  ;;  %3798 = vmatprep.subr.mxu0 %v3036_v7  ;;  %v4723_v41 = vld [vmem:[%s4636_s22 + $0x49] sm:$0xff]  ;;  %v4726_v42 = vld [vmem:[%s4636_s22 + $0x111] sm:$0xff]  ;;  %v4744_v47 = vld [vmem:[%s4636_s22 + $0x121] sm:$0xff] }
  0x1b   : > { %4527 = vmatpush3.msra.mxu1 %v3036_v7  ;;  %3799 = vmatpush3.msra.mxu0 %v3036_v7  ;;  %v4733_v44 = vld [vmem:[%s4636_s22 + $0x51] sm:$0xff]  ;;  %v4751_v49 = vld [vmem:[%s4636_s22 + $0x61] sm:$0xff]  ;;  %v4754_v50 = vld [vmem:[%s4636_s22 + $0x129] sm:$0xff] }
  0x1c   : > { %4512 = vmatprep.subr.mxu1 %v3035_v8  ;;  %3800 = vmatprep.subr.mxu0 %v3035_v8  ;;  %v210_v51 = vld [vmem:[%s6151_s1 + $0x38] sm:$0xff]  ;;  %v4761_v52 = vld [vmem:[%s4636_s22 + $0x69] sm:$0xff]  ;;  %v4782_v58 = vld [vmem:[%s4636_s22 + $0x141] sm:$0xff] }
  0x1d   : > { %4528 = vmatpush3.msra.mxu1 %v3035_v8  ;;  %3801 = vmatpush3.msra.mxu0 %v3035_v8  ;;  %v3051_v53 = vld [vmem:[%s6151_s1 + $0x138] sm:$0xff]  ;;  %v209_v54 = vld [vmem:[%s6151_s1 + $0x30] sm:$0xff]  ;;  %v208_v59 = vld [vmem:[%s6151_s1 + $0x28] sm:$0xff] }
  0x1e   : > { %4513 = vmatprep.subr.mxu1 %v3034_v9  ;;  %3802 = vmatprep.subr.mxu0 %v3034_v9  ;;  %v4772_v55 = vld [vmem:[%s4636_s22 + $0x139] sm:$0xff]  ;;  %v3050_v56 = vld [vmem:[%s6151_s1 + $0x130] sm:$0xff]  ;;  %v4789_v60 = vld [vmem:[%s4636_s22 + $0x81] sm:$0xff] }
  0x1f   : > { %4529 = vmatpush3.msra.mxu1 %v3034_v9  ;;  %3803 = vmatpush3.msra.mxu0 %v3034_v9  ;;  %v4779_v57 = vld [vmem:[%s4636_s22 + $0x79] sm:$0xff]  ;;  %v3049_v61 = vld [vmem:[%s6151_s1 + $0x128] sm:$0xff]  ;;  %v4800_v63 = vld [vmem:[%s4636_s22 + $0x151] sm:$0xff] }
  0x20   : > { %4514 = vmatprep.subr.mxu1 %v3033_v10  ;;  %3804 = vmatprep.subr.mxu0 %v3033_v10  ;;  %v207_v62 = vld [vmem:[%s6151_s1 + $0x20] sm:$0xff]  ;;  %v4807_v1 = vld [vmem:[%s4636_s22 + $0x91] sm:$0xff]  ;;  %v4828_v7 = vld [vmem:[%s4636_s22 + $0x169] sm:$0xff] }
  0x21   : > { %4530 = vmatpush3.msra.mxu1 %v3033_v10  ;;  %3805 = vmatpush3.msra.mxu0 %v3033_v10  ;;  %v3048_v0 = vld [vmem:[%s6151_s1 + $0x120] sm:$0xff]  ;;  %v206_v3 = vld [vmem:[%s6151_s1 + $0x18] sm:$0xff]  ;;  %v205_v6 = vld [vmem:[%s6151_s1 + $0x10] sm:$0xff]  ;;  %6185 = vst [vmem:[#allocation3_spill] sm:$0xff] %v4828_v7 }
  0x22   : > { %4515 = vmatprep.subr.mxu1 %v3032_v11  ;;  %3806 = vmatprep.subr.mxu0 %v3032_v11  ;;  %v4810_v2 = vld [vmem:[%s4636_s22 + $0x159] sm:$0xff]  ;;  %v3046_v8 = vld [vmem:[%s6151_s1 + $0x110] sm:$0xff] }
  0x23   : > { %4531 = vmatpush3.msra.mxu1 %v3032_v11  ;;  %3807 = vmatpush3.msra.mxu0 %v3032_v11  ;;  %6184 = vst [vmem:[#allocation2_spill] sm:$0xff] %v4810_v2  ;;  %v4817_v4 = vld [vmem:[%s4636_s22 + $0x99] sm:$0xff]  ;;  %v4835_v9 = vld [vmem:[%s4636_s22 + $0xa9] sm:$0xff]  ;;  %v4838_v10 = vld [vmem:[%s4636_s22 + $0x171] sm:$0xff] }
  0x24   : > { %4516 = vmatprep.subr.mxu1 %v3031_v12  ;;  %3808 = vmatprep.subr.mxu0 %v3031_v12  ;;  %v3047_v5 = vld [vmem:[%s6151_s1 + $0x118] sm:$0xff]  ;;  %6186 = vst [vmem:[#allocation4_spill] sm:$0xff] %v4838_v10  ;;  %v204_v11 = vld [vmem:[%s6151_s1 + $0x8] sm:$0xff] }
  0x25   : > { %4532 = vmatpush3.msra.mxu1 %v3031_v12  ;;  %3809 = vmatpush3.msra.mxu0 %v3031_v12  ;;  %v4845_v12 = vld [vmem:[%s4636_s22 + $0xb1] sm:$0xff] }
  0x26   : > { %4517 = vmatprep.subr.mxu1 %v3030_v13  ;;  %3810 = vmatprep.subr.mxu0 %v3030_v13 }
  0x27   : > { %4533 = vmatpush3.msra.mxu1 %v3030_v13  ;;  %3811 = vmatpush3.msra.mxu0 %v3030_v13  ;;  %v3045_v13 = vld [vmem:[%s6151_s1 + $0x108] sm:$0xff] }
  0x28   : > { %4518 = vmatprep.subr.mxu1 %v3029_v14  ;;  %3812 = vmatprep.subr.mxu0 %v3029_v14 }
  0x29   : > { %4534 = vmatpush3.msra.mxu1 %v3029_v14  ;;  %3813 = vmatpush3.msra.mxu0 %v3029_v14  ;;  %v203_v14 = vld [vmem:[%s6151_s1] sm:$0xff] }
  0x2a   : > { %4519 = vmatprep.subr.mxu1 %v3028_v15  ;;  %3814 = vmatprep.subr.mxu0 %v3028_v15 }
  0x2b   : > { %4535 = vmatpush3.msra.mxu1 %v3028_v15  ;;  %3840 = vmatprep.mubr.f32.mxu1 %v4642_v16 }
  0x2c   : > { %3815 = vmatpush3.msra.mxu0 %v3028_v15  ;;  %3816 = vmatprep.mubr.f32.mxu0 %v219_v17  ;;  %v171_v15 = vld [vmem:[%s4636_s22] sm:$0xff] }
  0x2d   : > { %3841 = vmatmul.mubr.f32.vlgmr.msra.gmra.mxu1 %v4646_v18  ;;  %3864 = vmatprep.subr.mxu1 %v218_v19  ;;  %v3044_v17 = vld [vmem:[%s6151_s1 + $0x100] sm:$0xff] }
  0x2e   : > { %3817 = vmatmul.mubr.f32.vlgmr.msra.gmra.mxu0 %v220_v20  ;;  %3865 = vmatpush3.msra.mxu1 %v218_v19  ;;  %v172_v19 = vld [vmem:[%s4636_s22 + $0x8] sm:$0xff] }
  0x2f   : > { %3944 = vmatprep.subr.mxu0 %v3059_v21  ;;  %3866 = vmatprep.subr.mxu1 %v217_v22  ;;  %v718_v20 = vld [vmem:[%s4636_s22 + $0x2] sm:$0xff] }
  0x30   : > { %3945 = vmatpush3.msra.mxu0 %v3059_v21  ;;  %3843 = vmatprep.mubr.f32.mxu1 %v4661_v23  ;;  %v3107_v21 = vld [vmem:[%s6151_s1 + $0x1f8] sm:$0xff] }
  0x31   : > { %3867 = vmatpush3.msra.mxu1 %v217_v22  ;;  %3946 = vmatprep.subr.mxu0 %v3058_v24  ;;  %v719_v22 = vld [vmem:[%s4636_s22 + $0xa] sm:$0xff] }
  0x32   : > { %3819 = vmatprep.mubr.f32.mxu0 %v4667_v25  ;;  %3844 = vmatmul.mubr.f32.gmra.mxu1 %v4670_v26 }
  0x33   : > { %3868 = vmatprep.subr.mxu1 %v216_v27  ;;  %3947 = vmatpush3.msra.mxu0 %v3058_v24  ;;  %v3155_v24 = vld [vmem:[%s6151_s1 + $0x278] sm:$0xff] }
  0x34   : > { %3820 = vmatmul.mubr.f32.gmra.mxu0 %v4677_v28  ;;  %3869 = vmatpush3.msra.mxu1 %v216_v27  ;;  %v4870_v27 = vld [vmem:[%s4636_s22 + $0x18] sm:$0xff] }
  0x35   : > { %3948 = vmatprep.subr.mxu0 %v3057_v29  ;;  %3870 = vmatprep.subr.mxu1 %v215_v30 }
  0x36   : > { %3949 = vmatpush3.msra.mxu0 %v3057_v29  ;;  %3846 = vmatprep.mubr.f32.mxu1 %v4688_v31  ;;  %v4873_v29 = vld [vmem:[%s4636_s22 + $0x20] sm:$0xff] }
  0x37   : > { %3871 = vmatpush3.msra.mxu1 %v215_v30  ;;  %3950 = vmatprep.subr.mxu0 %v3056_v32  ;;  %v4876_v30 = vld [vmem:[%s4636_s22 + $0x1a] sm:$0xff] }
  0x38   : > { %3822 = vmatprep.mubr.f32.mxu0 %v4695_v33  ;;  %3847 = vmatmul.mubr.f32.gmra.mxu1 %v4698_v34  ;;  %6187 = vst [vmem:[#allocation5_spill] sm:$0xff] %v4876_v30 }
  0x39   : > { %3872 = vmatprep.subr.mxu1 %v214_v35  ;;  %3951 = vmatpush3.msra.mxu0 %v3056_v32  ;;  %v3106_v32 = vld [vmem:[%s6151_s1 + $0x1f0] sm:$0xff] }
  0x3a   : > { %3823 = vmatmul.mubr.f32.gmra.mxu0 %v4705_v36  ;;  %3873 = vmatpush3.msra.mxu1 %v214_v35  ;;  %v4883_v35 = vld [vmem:[%s4636_s22 + $0x22] sm:$0xff] }
  0x3b   : > { %3952 = vmatprep.subr.mxu0 %v3055_v37  ;;  %3874 = vmatprep.subr.mxu1 %v213_v38  ;;  %6188 = vst [vmem:[#allocation6_spill] sm:$0xff] %v4883_v35 }
  0x3c   : > { %3953 = vmatpush3.msra.mxu0 %v3055_v37  ;;  %3849 = vmatprep.mubr.f32.mxu1 %v4716_v39  ;;  %v3154_v37 = vld [vmem:[%s6151_s1 + $0x270] sm:$0xff] }
  0x3d   : > { %3875 = vmatpush3.msra.mxu1 %v213_v38  ;;  %3954 = vmatprep.subr.mxu0 %v3054_v40  ;;  %v4890_v38 = vld [vmem:[%s4636_s22 + $0x30] sm:$0xff] }
  0x3e   : > { %3825 = vmatprep.mubr.f32.mxu0 %v4723_v41  ;;  %3850 = vmatmul.mubr.f32.gmra.mxu1 %v4726_v42 }
  0x3f   : > { %3876 = vmatprep.subr.mxu1 %v212_v43  ;;  %3955 = vmatpush3.msra.mxu0 %v3054_v40  ;;  %v4894_v40 = vld [vmem:[%s4636_s22 + $0x38] sm:$0xff] }
  0x40   : > { %3826 = vmatmul.mubr.f32.gmra.mxu0 %v4733_v44  ;;  %3877 = vmatpush3.msra.mxu1 %v212_v43  ;;  %v4898_v43 = vld [vmem:[%s4636_s22 + $0x32] sm:$0xff] }
  0x41   : > { %3956 = vmatprep.subr.mxu0 %v3053_v45  ;;  %3878 = vmatprep.subr.mxu1 %v211_v46  ;;  %6189 = vst [vmem:[#allocation7_spill] sm:$0xff] %v4898_v43 }
  0x42   : > { %3957 = vmatpush3.msra.mxu0 %v3053_v45  ;;  %3852 = vmatprep.mubr.f32.mxu1 %v4744_v47  ;;  %v3105_v45 = vld [vmem:[%s6151_s1 + $0x1e8] sm:$0xff] }
  0x43   : > { %3879 = vmatpush3.msra.mxu1 %v211_v46  ;;  %3958 = vmatprep.subr.mxu0 %v3052_v48  ;;  %v4905_v46 = vld [vmem:[%s4636_s22 + $0x3a] sm:$0xff] }
  0x44   : > { %3828 = vmatprep.mubr.f32.mxu0 %v4751_v49  ;;  %3853 = vmatmul.mubr.f32.gmra.mxu1 %v4754_v50  ;;  %6190 = vst [vmem:[#allocation8_spill] sm:$0xff] %v4905_v46 }
  0x45   : > { %3880 = vmatprep.subr.mxu1 %v210_v51  ;;  %3959 = vmatpush3.msra.mxu0 %v3052_v48  ;;  %v3153_v48 = vld [vmem:[%s6151_s1 + $0x268] sm:$0xff] }
  0x46   : > { %3829 = vmatmul.mubr.f32.gmra.mxu0 %v4761_v52  ;;  %3881 = vmatpush3.msra.mxu1 %v210_v51  ;;  %v4912_v51 = vld [vmem:[%s4636_s22 + $0x48] sm:$0xff] }
  0x47   : > { %3960 = vmatprep.subr.mxu0 %v3051_v53  ;;  %3882 = vmatprep.subr.mxu1 %v209_v54 }
  0x48   : > { %3961 = vmatpush3.msra.mxu0 %v3051_v53  ;;  %3855 = vmatprep.mubr.f32.mxu1 %v4772_v55  ;;  %v4916_v53 = vld [vmem:[%s4636_s22 + $0x50] sm:$0xff] }
  0x49   : > { %3883 = vmatpush3.msra.mxu1 %v209_v54  ;;  %3962 = vmatprep.subr.mxu0 %v3050_v56  ;;  %v4920_v54 = vld [vmem:[%s4636_s22 + $0x4a] sm:$0xff] }
  0x4a   : > { %3831 = vmatprep.mubr.f32.mxu0 %v4779_v57  ;;  %3856 = vmatmul.mubr.f32.gmra.mxu1 %v4782_v58  ;;  %6191 = vst [vmem:[#allocation9_spill] sm:$0xff] %v4920_v54 }
  0x4b   : > { %3884 = vmatprep.subr.mxu1 %v208_v59  ;;  %3963 = vmatpush3.msra.mxu0 %v3050_v56  ;;  %v3104_v56 = vld [vmem:[%s6151_s1 + $0x1e0] sm:$0xff] }
  0x4c   : > { %3832 = vmatmul.mubr.f32.gmra.mxu0 %v4789_v60  ;;  %3885 = vmatpush3.msra.mxu1 %v208_v59  ;;  %v4927_v59 = vld [vmem:[%s4636_s22 + $0x52] sm:$0xff] }
  0x4d   : > { %3964 = vmatprep.subr.mxu0 %v3049_v61  ;;  %3886 = vmatprep.subr.mxu1 %v207_v62  ;;  %6192 = vst [vmem:[#allocation10_spill] sm:$0xff] %v4927_v59 }
  0x4e   : > { %3965 = vmatpush3.msra.mxu0 %v3049_v61  ;;  %3858 = vmatprep.mubr.f32.mxu1 %v4800_v63  ;;  %v3152_v61 = vld [vmem:[%s6151_s1 + $0x260] sm:$0xff] }
  0x4f   : > { %3887 = vmatpush3.msra.mxu1 %v207_v62  ;;  %3966 = vmatprep.subr.mxu0 %v3048_v0  ;;  %v4934_v62 = vld [vmem:[%s4636_s22 + $0x60] sm:$0xff] }
  0x50   : > { %3834 = vmatprep.mubr.f32.mxu0 %v4807_v1  ;;  %3859 = vmatmul.mubr.f32.gmra.mxu1 %v4810_v2  ;;  %v5191_v2 = vld [vmem:[%s4636_s22 + $0x172] sm:$0xff] }
  0x51   : > { %3888 = vmatprep.subr.mxu1 %v206_v3  ;;  %3967 = vmatpush3.msra.mxu0 %v3048_v0  ;;  %v4938_v0 = vld [vmem:[%s4636_s22 + $0x68] sm:$0xff] }
  0x52   : > { %3835 = vmatmul.mubr.f32.gmra.mxu0 %v4817_v4  ;;  %3889 = vmatpush3.msra.mxu1 %v206_v3  ;;  %v4942_v3 = vld [vmem:[%s4636_s22 + $0x62] sm:$0xff] }
  0x53   : > { %3968 = vmatprep.subr.mxu0 %v3047_v5  ;;  %3890 = vmatprep.subr.mxu1 %v205_v6  ;;  %6193 = vst [vmem:[#allocation11_spill] sm:$0xff] %v4942_v3 }
  0x54   : > { %3969 = vmatpush3.msra.mxu0 %v3047_v5  ;;  %3861 = vmatprep.mubr.f32.mxu1 %v4828_v7  ;;  %v3103_v5 = vld [vmem:[%s6151_s1 + $0x1d8] sm:$0xff]  ;;  %v5184_v7 = vld [vmem:[%s4636_s22 + $0x16a] sm:$0xff] }
  0x55   : > { %3891 = vmatpush3.msra.mxu1 %v205_v6  ;;  %3970 = vmatprep.subr.mxu0 %v3046_v8  ;;  %v4949_v6 = vld [vmem:[%s4636_s22 + $0x6a] sm:$0xff] }
  0x56   : > { %3837 = vmatprep.mubr.f32.mxu0 %v4835_v9  ;;  %3862 = vmatmul.mubr.f32.gmra.mxu1 %v4838_v10  ;;  %6194 = vst [vmem:[#allocation12_spill] sm:$0xff] %v4949_v6  ;;  %v5169_v10 = vld [vmem:[%s4636_s22 + $0x15a] sm:$0xff] }
  0x57   : > { %3892 = vmatprep.subr.mxu1 %v204_v11  ;;  %3971 = vmatpush3.msra.mxu0 %v3046_v8  ;;  %v3151_v8 = vld [vmem:[%s6151_s1 + $0x258] sm:$0xff] }
  0x58   : > { %3838 = vmatmul.mubr.f32.gmra.mxu0 %v4845_v12  ;;  %3893 = vmatpush3.msra.mxu1 %v204_v11  ;;  %v4956_v11 = vld [vmem:[%s4636_s22 + $0x78] sm:$0xff] }
  0x59   : > { %3972 = vmatprep.subr.mxu0 %v3045_v13  ;;  %3894 = vmatprep.subr.mxu1 %v203_v14 }
  0x5a   : > { %3973 = vmatpush3.msra.mxu0 %v3045_v13  ;;  %3895 = vmatpush3.msra.mxu1 %v203_v14  ;;  %v4960_v13 = vld [vmem:[%s4636_s22 + $0x80] sm:$0xff] }
  0x5b   : > { %3896 = vmatprep.mubr.f32.mxu1 %v171_v15  ;;  %3974 = vmatprep.subr.mxu0 %v3044_v17  ;;  %v4964_v14 = vld [vmem:[%s4636_s22 + $0x7a] sm:$0xff]  ;;  %v3102_v15 = vld [vmem:[%s6151_s1 + $0x1d0] sm:$0xff] }
  0x5c   : > { %3897 = vmatmul.mubr.f32.vlgmr.msra.gmra.mxu1 %v172_v19  ;;  %3975 = vmatpush3.msra.mxu0 %v3044_v17  ;;  %6195 = vst [vmem:[#allocation13_spill] sm:$0xff] %v4964_v14  ;;  %v4971_v17 = vld [vmem:[%s4636_s22 + $0x82] sm:$0xff]  ;;  %v3150_v19 = vld [vmem:[%s6151_s1 + $0x250] sm:$0xff] }
  0x5d   : > { %3976 = vmatprep.mubr.f32.mxu0 %v718_v20  ;;  %4024 = vmatprep.subr.mxu1 %v3107_v21  ;;  %6196 = vst [vmem:[#allocation14_spill] sm:$0xff] %v4971_v17  ;;  %v4978_v20 = vld [vmem:[%s4636_s22 + $0x90] sm:$0xff] }
  0x5e   : > { %3977 = vmatmul.mubr.f32.vlgmr.msra.gmra.mxu0 %v719_v22  ;;  %4025 = vmatpush3.msra.mxu1 %v3107_v21  ;;  %v4982_v21 = vld [vmem:[%s4636_s22 + $0x98] sm:$0xff] }
  0x5f   : > { %4104 = vmatprep.subr.mxu0 %v3155_v24  ;;  %3899 = vmatprep.mubr.f32.mxu1 %v4870_v27  ;;  %v4986_v22 = vld [vmem:[%s4636_s22 + $0x92] sm:$0xff] }
  0x60   : > { %4105 = vmatpush3.msra.mxu0 %v3155_v24  ;;  %3900 = vmatmul.mubr.f32.gmra.mxu1 %v4873_v29  ;;  %6197 = vst [vmem:[#allocation15_spill] sm:$0xff] %v4986_v22  ;;  %v3101_v24 = vld [vmem:[%s6151_s1 + $0x1c8] sm:$0xff] }
  0x61   : > { %3979 = vmatprep.mubr.f32.mxu0 %v4876_v30  ;;  %4026 = vmatprep.subr.mxu1 %v3106_v32  ;;  %v3093_v30 = vld [vmem:[%s6151_s1 + $0x188] sm:$0xff] }
  0x62   : > { %3980 = vmatmul.mubr.f32.gmra.mxu0 %v4883_v35  ;;  %4027 = vmatpush3.msra.mxu1 %v3106_v32  ;;  %v4993_v32 = vld [vmem:[%s4636_s22 + $0x9a] sm:$0xff]  ;;  %v5147_v35 = vld [vmem:[%s4636_s22 + $0x142] sm:$0xff] }
  0x63   : > { %4106 = vmatprep.subr.mxu0 %v3154_v37  ;;  %3902 = vmatprep.mubr.f32.mxu1 %v4890_v38  ;;  %6198 = vst [vmem:[#allocation16_spill] sm:$0xff] %v4993_v32  ;;  %6212 = vst [vmem:[#allocation30_spill] sm:$0xff] %v5147_v35 }
  0x64   : > { %4107 = vmatpush3.msra.mxu0 %v3154_v37  ;;  %3903 = vmatmul.mubr.f32.gmra.mxu1 %v4894_v40  ;;  %v3149_v37 = vld [vmem:[%s6151_s1 + $0x248] sm:$0xff] }
  0x65   : > { %3982 = vmatprep.mubr.f32.mxu0 %v4898_v43  ;;  %4028 = vmatprep.subr.mxu1 %v3105_v45  ;;  %v3094_v43 = vld [vmem:[%s6151_s1 + $0x190] sm:$0xff] }
  0x66   : > { %3983 = vmatmul.mubr.f32.gmra.mxu0 %v4905_v46  ;;  %4029 = vmatpush3.msra.mxu1 %v3105_v45  ;;  %v5000_v45 = vld [vmem:[%s4636_s22 + $0xa8] sm:$0xff] }
  0x67   : > { %4108 = vmatprep.subr.mxu0 %v3153_v48  ;;  %3905 = vmatprep.mubr.f32.mxu1 %v4912_v51  ;;  %v5125_v46 = vld [vmem:[%s4636_s22 + $0x12a] sm:$0xff] }
  0x68   : > { %4109 = vmatpush3.msra.mxu0 %v3153_v48  ;;  %3906 = vmatmul.mubr.f32.gmra.mxu1 %v4916_v53  ;;  %v5004_v48 = vld [vmem:[%s4636_s22 + $0xb0] sm:$0xff]  ;;  %6210 = vst [vmem:[#allocation28_spill] sm:$0xff] %v5125_v46 }
  0x69   : > { %3985 = vmatprep.mubr.f32.mxu0 %v4920_v54  ;;  %4030 = vmatprep.subr.mxu1 %v3104_v56  ;;  %v3095_v54 = vld [vmem:[%s6151_s1 + $0x198] sm:$0xff] }
  0x6a   : > { %3986 = vmatmul.mubr.f32.gmra.mxu0 %v4927_v59  ;;  %4031 = vmatpush3.msra.mxu1 %v3104_v56  ;;  %v5008_v56 = vld [vmem:[%s4636_s22 + $0xaa] sm:$0xff]  ;;  %v5103_v59 = vld [vmem:[%s4636_s22 + $0x112] sm:$0xff] }
  0x6b   : > { %4110 = vmatprep.subr.mxu0 %v3152_v61  ;;  %3908 = vmatprep.mubr.f32.mxu1 %v4934_v62  ;;  %6199 = vst [vmem:[#allocation17_spill] sm:$0xff] %v5008_v56  ;;  %6208 = vst [vmem:[#allocation26_spill] sm:$0xff] %v5103_v59 }
  0x6c   : > { %4111 = vmatpush3.msra.mxu0 %v3152_v61  ;;  %3909 = vmatmul.mubr.f32.gmra.mxu1 %v4938_v0  ;;  %v3100_v61 = vld [vmem:[%s6151_s1 + $0x1c0] sm:$0xff] }
  0x6d   : > { %3988 = vmatprep.mubr.f32.mxu0 %v4942_v3  ;;  %4032 = vmatprep.subr.mxu1 %v3103_v5  ;;  %v3096_v3 = vld [vmem:[%s6151_s1 + $0x1a0] sm:$0xff] }
  0x6e   : > { %3989 = vmatmul.mubr.f32.gmra.mxu0 %v4949_v6  ;;  %4033 = vmatpush3.msra.mxu1 %v3103_v5  ;;  %v5015_v5 = vld [vmem:[%s4636_s22 + $0xb2] sm:$0xff]  ;;  %v5081_v6 = vld [vmem:[%s4636_s22 + $0xfa] sm:$0xff] }
  0x6f   : > { %4112 = vmatprep.subr.mxu0 %v3151_v8  ;;  %3911 = vmatprep.mubr.f32.mxu1 %v4956_v11  ;;  %6200 = vst [vmem:[#allocation18_spill] sm:$0xff] %v5015_v5  ;;  %6206 = vst [vmem:[#allocation24_spill] sm:$0xff] %v5081_v6 }
  0x70   : > { %4113 = vmatpush3.msra.mxu0 %v3151_v8  ;;  %3912 = vmatmul.mubr.f32.gmra.mxu1 %v4960_v13  ;;  %v3148_v8 = vld [vmem:[%s6151_s1 + $0x240] sm:$0xff] }
  0x71   : > { %3991 = vmatprep.mubr.f32.mxu0 %v4964_v14  ;;  %4034 = vmatprep.subr.mxu1 %v3102_v15  ;;  %v3097_v14 = vld [vmem:[%s6151_s1 + $0x1a8] sm:$0xff] }
  0x72   : > { %3992 = vmatmul.mubr.f32.gmra.mxu0 %v4971_v17  ;;  %4035 = vmatpush3.msra.mxu1 %v3102_v15  ;;  %v5022_v15 = vld [vmem:[%s4636_s22 + $0xc0] sm:$0xff] }
  0x73   : > { %4114 = vmatprep.subr.mxu0 %v3150_v19  ;;  %3914 = vmatprep.mubr.f32.mxu1 %v4978_v20  ;;  %v5059_v17 = vld [vmem:[%s4636_s22 + $0xe2] sm:$0xff] }
  0x74   : > { %4115 = vmatpush3.msra.mxu0 %v3150_v19  ;;  %3915 = vmatmul.mubr.f32.gmra.mxu1 %v4982_v21  ;;  %v5026_v19 = vld [vmem:[%s4636_s22 + $0xc8] sm:$0xff]  ;;  %6204 = vst [vmem:[#allocation22_spill] sm:$0xff] %v5059_v17 }
  0x75   : > { %3994 = vmatprep.mubr.f32.mxu0 %v4986_v22  ;;  %4036 = vmatprep.subr.mxu1 %v3101_v24  ;;  %v3098_v22 = vld [vmem:[%s6151_s1 + $0x1b0] sm:$0xff] }
  0x76   : > { %3995 = vmatmul.mubr.f32.gmra.mxu0 %v4993_v32  ;;  %4037 = vmatpush3.msra.mxu1 %v3101_v24  ;;  %v5030_v24 = vld [vmem:[%s4636_s22 + $0xc2] sm:$0xff]  ;;  %v5037_v32 = vld [vmem:[%s4636_s22 + $0xca] sm:$0xff] }
  0x77   : > { %4116 = vmatprep.subr.mxu0 %v3149_v37  ;;  %3917 = vmatprep.mubr.f32.mxu1 %v5000_v45  ;;  %6201 = vst [vmem:[#allocation19_spill] sm:$0xff] %v5030_v24  ;;  %6202 = vst [vmem:[#allocation20_spill] sm:$0xff] %v5037_v32 }
  0x78   : > { %4117 = vmatpush3.msra.mxu0 %v3149_v37  ;;  %3918 = vmatmul.mubr.f32.gmra.mxu1 %v5004_v48  ;;  %v3099_v37 = vld [vmem:[%s6151_s1 + $0x1b8] sm:$0xff] }
  0x79   : > { %3997 = vmatprep.mubr.f32.mxu0 %v5008_v56  ;;  %4038 = vmatprep.subr.mxu1 %v3100_v61  ;;  %v5048_v56 = vld [vmem:[%s4636_s22 + $0xe0] sm:$0xff] }
  0x7a   : > { %3998 = vmatmul.mubr.f32.gmra.mxu0 %v5015_v5  ;;  %4039 = vmatpush3.msra.mxu1 %v3100_v61  ;;  %v3147_v61 = vld [vmem:[%s6151_s1 + $0x238] sm:$0xff] }
  0x7b   : > { %4118 = vmatprep.subr.mxu0 %v3148_v8  ;;  %3920 = vmatprep.mubr.f32.mxu1 %v5022_v15  ;;  %v5044_v5 = vld [vmem:[%s4636_s22 + $0xd8] sm:$0xff] }
  0x7c   : > { %4119 = vmatpush3.msra.mxu0 %v3148_v8  ;;  %3921 = vmatmul.mubr.f32.gmra.mxu1 %v5026_v19  ;;  %v5052_v8 = vld [vmem:[%s4636_s22 + $0xda] sm:$0xff] }
  0x7d   : > { %4000 = vmatprep.mubr.f32.mxu0 %v5030_v24  ;;  %4040 = vmatprep.subr.mxu1 %v3099_v37  ;;  %6203 = vst [vmem:[#allocation21_spill] sm:$0xff] %v5052_v8  ;;  %v5070_v24 = vld [vmem:[%s4636_s22 + $0xf8] sm:$0xff] }
  0x7e   : > { %4001 = vmatmul.mubr.f32.gmra.mxu0 %v5037_v32  ;;  %4041 = vmatpush3.msra.mxu1 %v3099_v37  ;;  %v3146_v37 = vld [vmem:[%s6151_s1 + $0x230] sm:$0xff] }
  0x7f   : > { %4120 = vmatprep.subr.mxu0 %v3147_v61  ;;  %3923 = vmatprep.mubr.f32.mxu1 %v5044_v5  ;;  %v5066_v32 = vld [vmem:[%s4636_s22 + $0xf0] sm:$0xff] }
  0x80   : > { %4121 = vmatpush3.msra.mxu0 %v3147_v61  ;;  %3924 = vmatmul.mubr.f32.gmra.mxu1 %v5048_v56  ;;  %v5074_v61 = vld [vmem:[%s4636_s22 + $0xf2] sm:$0xff] }
  0x81   : > { %4003 = vmatprep.mubr.f32.mxu0 %v5052_v8  ;;  %4042 = vmatprep.subr.mxu1 %v3098_v22  ;;  %6205 = vst [vmem:[#allocation23_spill] sm:$0xff] %v5074_v61  ;;  %v5092_v8 = vld [vmem:[%s4636_s22 + $0x110] sm:$0xff] }
  0x82   : > { %4004 = vmatmul.mubr.f32.gmra.mxu0 %v5059_v17  ;;  %4043 = vmatpush3.msra.mxu1 %v3098_v22  ;;  %v3145_v22 = vld [vmem:[%s6151_s1 + $0x228] sm:$0xff] }
  0x83   : > { %4122 = vmatprep.subr.mxu0 %v3146_v37  ;;  %3926 = vmatprep.mubr.f32.mxu1 %v5066_v32  ;;  %v5088_v17 = vld [vmem:[%s4636_s22 + $0x108] sm:$0xff] }
  0x84   : > { %4123 = vmatpush3.msra.mxu0 %v3146_v37  ;;  %3927 = vmatmul.mubr.f32.gmra.mxu1 %v5070_v24  ;;  %v5096_v37 = vld [vmem:[%s4636_s22 + $0x10a] sm:$0xff] }
  0x85   : > { %4006 = vmatprep.mubr.f32.mxu0 %v5074_v61  ;;  %4044 = vmatprep.subr.mxu1 %v3097_v14  ;;  %6207 = vst [vmem:[#allocation25_spill] sm:$0xff] %v5096_v37  ;;  %v5114_v61 = vld [vmem:[%s4636_s22 + $0x128] sm:$0xff] }
  0x86   : > { %4007 = vmatmul.mubr.f32.gmra.mxu0 %v5081_v6  ;;  %4045 = vmatpush3.msra.mxu1 %v3097_v14  ;;  %v3144_v14 = vld [vmem:[%s6151_s1 + $0x220] sm:$0xff] }
  0x87   : > { %4124 = vmatprep.subr.mxu0 %v3145_v22  ;;  %3929 = vmatprep.mubr.f32.mxu1 %v5088_v17  ;;  %v5110_v6 = vld [vmem:[%s4636_s22 + $0x120] sm:$0xff] }
  0x88   : > { %4125 = vmatpush3.msra.mxu0 %v3145_v22  ;;  %3930 = vmatmul.mubr.f32.gmra.mxu1 %v5092_v8  ;;  %v5118_v22 = vld [vmem:[%s4636_s22 + $0x122] sm:$0xff] }
  0x89   : > { %4009 = vmatprep.mubr.f32.mxu0 %v5096_v37  ;;  %4046 = vmatprep.subr.mxu1 %v3096_v3  ;;  %6209 = vst [vmem:[#allocation27_spill] sm:$0xff] %v5118_v22  ;;  %v5136_v37 = vld [vmem:[%s4636_s22 + $0x140] sm:$0xff] }
  0x8a   : > { %4010 = vmatmul.mubr.f32.gmra.mxu0 %v5103_v59  ;;  %4047 = vmatpush3.msra.mxu1 %v3096_v3  ;;  %v3143_v3 = vld [vmem:[%s6151_s1 + $0x218] sm:$0xff] }
  0x8b   : > { %4126 = vmatprep.subr.mxu0 %v3144_v14  ;;  %3932 = vmatprep.mubr.f32.mxu1 %v5110_v6  ;;  %v5132_v59 = vld [vmem:[%s4636_s22 + $0x138] sm:$0xff] }
  0x8c   : > { %4127 = vmatpush3.msra.mxu0 %v3144_v14  ;;  %3933 = vmatmul.mubr.f32.gmra.mxu1 %v5114_v61  ;;  %v5140_v14 = vld [vmem:[%s4636_s22 + $0x13a] sm:$0xff] }
  0x8d   : > { %4012 = vmatprep.mubr.f32.mxu0 %v5118_v22  ;;  %4048 = vmatprep.subr.mxu1 %v3095_v54  ;;  %6211 = vst [vmem:[#allocation29_spill] sm:$0xff] %v5140_v14  ;;  %v5158_v22 = vld [vmem:[%s4636_s22 + $0x158] sm:$0xff] }
  0x8e   : > { %4013 = vmatmul.mubr.f32.gmra.mxu0 %v5125_v46  ;;  %4049 = vmatpush3.msra.mxu1 %v3095_v54  ;;  %v3142_v54 = vld [vmem:[%s6151_s1 + $0x210] sm:$0xff] }
  0x8f   : > { %4128 = vmatprep.subr.mxu0 %v3143_v3  ;;  %3935 = vmatprep.mubr.f32.mxu1 %v5132_v59  ;;  %v5154_v46 = vld [vmem:[%s4636_s22 + $0x150] sm:$0xff] }
  0x90   : > { %4129 = vmatpush3.msra.mxu0 %v3143_v3  ;;  %3936 = vmatmul.mubr.f32.gmra.mxu1 %v5136_v37  ;;  %v5162_v3 = vld [vmem:[%s4636_s22 + $0x152] sm:$0xff] }
  0x91   : > { %4015 = vmatprep.mubr.f32.mxu0 %v5140_v14  ;;  %4050 = vmatprep.subr.mxu1 %v3094_v43  ;;  %6213 = vst [vmem:[#allocation31_spill] sm:$0xff] %v5162_v3  ;;  %v5180_v14 = vld [vmem:[%s4636_s22 + $0x170] sm:$0xff] }
  0x92   : > { %4016 = vmatmul.mubr.f32.gmra.mxu0 %v5147_v35  ;;  %4051 = vmatpush3.msra.mxu1 %v3094_v43  ;;  %v3141_v35 = vld [vmem:[%s6151_s1 + $0x208] sm:$0xff] }
  0x93   : > { %4130 = vmatprep.subr.mxu0 %v3142_v54  ;;  %3938 = vmatprep.mubr.f32.mxu1 %v5154_v46  ;;  %v5176_v43 = vld [vmem:[%s4636_s22 + $0x168] sm:$0xff] }
  0x94   : > { %4131 = vmatpush3.msra.mxu0 %v3142_v54  ;;  %3939 = vmatmul.mubr.f32.gmra.mxu1 %v5158_v22  ;;  %v3092_v54 = vld [vmem:[%s6151_s1 + $0x180] sm:$0xff] }
  0x95   : > { %4018 = vmatprep.mubr.f32.mxu0 %v5162_v3  ;;  %4052 = vmatprep.subr.mxu1 %v3093_v30  ;;  %v3140_v3 = vld [vmem:[%s6151_s1 + $0x200] sm:$0xff] }
  0x96   : > { %4019 = vmatmul.mubr.f32.gmra.mxu0 %v5169_v10  ;;  %4053 = vmatpush3.msra.mxu1 %v3093_v30  ;;  %v3203_v30 = vld [vmem:[%s6151_s1 + $0x2f8] sm:$0xff] }
  0x97   : > { %4132 = vmatprep.subr.mxu0 %v3141_v35  ;;  %3941 = vmatprep.mubr.f32.mxu1 %v5176_v43 }
  0x98   : > { %4133 = vmatpush3.msra.mxu0 %v3141_v35  ;;  %3942 = vmatmul.mubr.f32.gmra.mxu1 %v5180_v14  ;;  %v3251_v35 = vld [vmem:[%s6151_s1 + $0x378] sm:$0xff] }
  0x99   : > { %4021 = vmatprep.mubr.f32.mxu0 %v5184_v7  ;;  %4054 = vmatprep.subr.mxu1 %v3092_v54 }
  0x9a   : > { %4022 = vmatmul.mubr.f32.gmra.mxu0 %v5191_v2  ;;  %4055 = vmatpush3.msra.mxu1 %v3092_v54  ;;  %v3202_v54 = vld [vmem:[%s6151_s1 + $0x2f0] sm:$0xff] }
  0x9b   : > { %4134 = vmatprep.subr.mxu0 %v3140_v3  ;;  %4056 = vmatprep.mubr.f32.mxu1 %v4870_v27  ;;  %v3250_v27 = vld [vmem:[%s6151_s1 + $0x370] sm:$0xff] }
  0x9c   : > { %4135 = vmatpush3.msra.mxu0 %v3140_v3  ;;  %4057 = vmatmul.mubr.f32.vlgmr.msra.gmra.mxu1 %v4873_v29  ;;  %v5348_v29 = vld [vmem:[%s4636_s22 + $0x180] sm:$0xff]  ;;  %v6215_v3 = vld [vmem:[#allocation3_spill] sm:$0xff] }
  0x9d   : > { %4136 = vmatprep.mubr.f32.mxu0 %v4667_v25  ;;  %4184 = vmatprep.subr.mxu1 %v3203_v30  ;;  %v3201_v25 = vld [vmem:[%s6151_s1 + $0x2e8] sm:$0xff] }
  0x9e   : > { %4137 = vmatmul.mubr.f32.vlgmr.msra.gmra.mxu0 %v4677_v28  ;;  %4185 = vmatpush3.msra.mxu1 %v3203_v30  ;;  %v3249_v28 = vld [vmem:[%s6151_s1 + $0x368] sm:$0xff] }
  0x9f   : > { %4264 = vmatprep.subr.mxu0 %v3251_v35  ;;  %4059 = vmatprep.mubr.f32.mxu1 %v4890_v38  ;;  %v5352_v30 = vld [vmem:[%s4636_s22 + $0x188] sm:$0xff] }
  0xa0   : > { %4265 = vmatpush3.msra.mxu0 %v3251_v35  ;;  %4060 = vmatmul.mubr.f32.gmra.mxu1 %v4894_v40  ;;  %v6216_v35 = vld [vmem:[#allocation4_spill] sm:$0xff] }
  0xa1   : > { %4139 = vmatprep.mubr.f32.mxu0 %v4695_v33  ;;  %4186 = vmatprep.subr.mxu1 %v3202_v54  ;;  %v3200_v33 = vld [vmem:[%s6151_s1 + $0x2e0] sm:$0xff] }
  0xa2   : > { %4140 = vmatmul.mubr.f32.gmra.mxu0 %v4705_v36  ;;  %4187 = vmatpush3.msra.mxu1 %v3202_v54  ;;  %v3248_v36 = vld [vmem:[%s6151_s1 + $0x360] sm:$0xff] }
  0xa3   : > { %4266 = vmatprep.subr.mxu0 %v3250_v27  ;;  %4062 = vmatprep.mubr.f32.mxu1 %v4912_v51  ;;  %v5356_v54 = vld [vmem:[%s4636_s22 + $0x181] sm:$0xff] }
  0xa4   : > { %4267 = vmatpush3.msra.mxu0 %v3250_v27  ;;  %4063 = vmatmul.mubr.f32.gmra.mxu1 %v4916_v53  ;;  %v3188_v27 = vld [vmem:[%s6151_s1 + $0x280] sm:$0xff] }
  0xa5   : > { %4142 = vmatprep.mubr.f32.mxu0 %v4723_v41  ;;  %4188 = vmatprep.subr.mxu1 %v3201_v25  ;;  %v3199_v41 = vld [vmem:[%s6151_s1 + $0x2d8] sm:$0xff] }
  0xa6   : > { %4143 = vmatmul.mubr.f32.gmra.mxu0 %v4733_v44  ;;  %4189 = vmatpush3.msra.mxu1 %v3201_v25  ;;  %v3247_v44 = vld [vmem:[%s6151_s1 + $0x358] sm:$0xff]  ;;  %v5363_v25 = vld [vmem:[%s4636_s22 + $0x189] sm:$0xff] }
  0xa7   : > { %4268 = vmatprep.subr.mxu0 %v3249_v28  ;;  %4065 = vmatprep.mubr.f32.mxu1 %v4934_v62 }
  0xa8   : > { %4269 = vmatpush3.msra.mxu0 %v3249_v28  ;;  %4066 = vmatmul.mubr.f32.gmra.mxu1 %v4938_v0  ;;  %v3236_v28 = vld [vmem:[%s6151_s1 + $0x300] sm:$0xff] }
  0xa9   : > { %4145 = vmatprep.mubr.f32.mxu0 %v4751_v49  ;;  %4190 = vmatprep.subr.mxu1 %v3200_v33  ;;  %v3198_v49 = vld [vmem:[%s6151_s1 + $0x2d0] sm:$0xff] }
  0xaa   : > { %4146 = vmatmul.mubr.f32.gmra.mxu0 %v4761_v52  ;;  %4191 = vmatpush3.msra.mxu1 %v3200_v33  ;;  %v3246_v52 = vld [vmem:[%s6151_s1 + $0x350] sm:$0xff]  ;;  %v3299_v33 = vld [vmem:[%s6151_s1 + $0x3f8] sm:$0xff] }
  0xab   : > { %4270 = vmatprep.subr.mxu0 %v3248_v36  ;;  %4068 = vmatprep.mubr.f32.mxu1 %v4956_v11 }
  0xac   : > { %4271 = vmatpush3.msra.mxu0 %v3248_v36  ;;  %4069 = vmatmul.mubr.f32.gmra.mxu1 %v4960_v13  ;;  %v6217_v36 = vld [vmem:[#allocation5_spill] sm:$0xff] }
  0xad   : > { %4148 = vmatprep.mubr.f32.mxu0 %v4779_v57  ;;  %4192 = vmatprep.subr.mxu1 %v3199_v41  ;;  %v3197_v57 = vld [vmem:[%s6151_s1 + $0x2c8] sm:$0xff] }
  0xae   : > { %4149 = vmatmul.mubr.f32.gmra.mxu0 %v4789_v60  ;;  %4193 = vmatpush3.msra.mxu1 %v3199_v41  ;;  %v3245_v60 = vld [vmem:[%s6151_s1 + $0x348] sm:$0xff]  ;;  %v6218_v41 = vld [vmem:[#allocation6_spill] sm:$0xff] }
  0xaf   : > { %4272 = vmatprep.subr.mxu0 %v3247_v44  ;;  %4071 = vmatprep.mubr.f32.mxu1 %v4978_v20 }
  0xb0   : > { %4273 = vmatpush3.msra.mxu0 %v3247_v44  ;;  %4072 = vmatmul.mubr.f32.gmra.mxu1 %v4982_v21  ;;  %v3347_v44 = vld [vmem:[%s6151_s1 + $0x478] sm:$0xff] }
  0xb1   : > { %4151 = vmatprep.mubr.f32.mxu0 %v4807_v1  ;;  %4194 = vmatprep.subr.mxu1 %v3198_v49  ;;  %v3196_v1 = vld [vmem:[%s6151_s1 + $0x2c0] sm:$0xff] }
  0xb2   : > { %4152 = vmatmul.mubr.f32.gmra.mxu0 %v4817_v4  ;;  %4195 = vmatpush3.msra.mxu1 %v3198_v49  ;;  %v3244_v4 = vld [vmem:[%s6151_s1 + $0x340] sm:$0xff]  ;;  %v3298_v49 = vld [vmem:[%s6151_s1 + $0x3f0] sm:$0xff] }
  0xb3   : > { %4274 = vmatprep.subr.mxu0 %v3246_v52  ;;  %4074 = vmatprep.mubr.f32.mxu1 %v5000_v45 }
  0xb4   : > { %4275 = vmatpush3.msra.mxu0 %v3246_v52  ;;  %4075 = vmatmul.mubr.f32.gmra.mxu1 %v5004_v48  ;;  %v6219_v52 = vld [vmem:[#allocation7_spill] sm:$0xff] }
  0xb5   : > { %4154 = vmatprep.mubr.f32.mxu0 %v4835_v9  ;;  %4196 = vmatprep.subr.mxu1 %v3197_v57  ;;  %v3195_v9 = vld [vmem:[%s6151_s1 + $0x2b8] sm:$0xff] }
  0xb6   : > { %4155 = vmatmul.mubr.f32.gmra.mxu0 %v4845_v12  ;;  %4197 = vmatpush3.msra.mxu1 %v3197_v57  ;;  %v3243_v12 = vld [vmem:[%s6151_s1 + $0x338] sm:$0xff]  ;;  %v6220_v57 = vld [vmem:[#allocation8_spill] sm:$0xff] }
  0xb7   : > { %4276 = vmatprep.subr.mxu0 %v3245_v60  ;;  %4077 = vmatprep.mubr.f32.mxu1 %v5022_v15 }
  0xb8   : > { %4277 = vmatpush3.msra.mxu0 %v3245_v60  ;;  %4078 = vmatmul.mubr.f32.gmra.mxu1 %v5026_v19  ;;  %v3346_v60 = vld [vmem:[%s6151_s1 + $0x470] sm:$0xff] }
  0xb9   : > { %4157 = vmatprep.mubr.f32.mxu0 %v4642_v16  ;;  %4198 = vmatprep.subr.mxu1 %v3196_v1  ;;  %v3194_v16 = vld [vmem:[%s6151_s1 + $0x2b0] sm:$0xff] }
  0xba   : > { %4158 = vmatmul.mubr.f32.gmra.mxu0 %v4646_v18  ;;  %4199 = vmatpush3.msra.mxu1 %v3196_v1  ;;  %v3242_v18 = vld [vmem:[%s6151_s1 + $0x330] sm:$0xff]  ;;  %v6222_v1 = vld [vmem:[#allocation10_spill] sm:$0xff] }
  0xbb   : > { %4278 = vmatprep.subr.mxu0 %v3244_v4  ;;  %4080 = vmatprep.mubr.f32.mxu1 %v5044_v5 }
  0xbc   : > { %4279 = vmatpush3.msra.mxu0 %v3244_v4  ;;  %4081 = vmatmul.mubr.f32.gmra.mxu1 %v5048_v56  ;;  %v3345_v4 = vld [vmem:[%s6151_s1 + $0x468] sm:$0xff] }
  0xbd   : > { %4160 = vmatprep.mubr.f32.mxu0 %v4661_v23  ;;  %4200 = vmatprep.subr.mxu1 %v3195_v9  ;;  %v3193_v23 = vld [vmem:[%s6151_s1 + $0x2a8] sm:$0xff] }
  0xbe   : > { %4161 = vmatmul.mubr.f32.gmra.mxu0 %v4670_v26  ;;  %4201 = vmatpush3.msra.mxu1 %v3195_v9  ;;  %v3241_v26 = vld [vmem:[%s6151_s1 + $0x328] sm:$0xff]  ;;  %v6224_v9 = vld [vmem:[#allocation12_spill] sm:$0xff] }
  0xbf   : > { %4280 = vmatprep.subr.mxu0 %v3243_v12  ;;  %4083 = vmatprep.mubr.f32.mxu1 %v5066_v32 }
  0xc0   : > { %4281 = vmatpush3.msra.mxu0 %v3243_v12  ;;  %4084 = vmatmul.mubr.f32.gmra.mxu1 %v5070_v24  ;;  %v3344_v12 = vld [vmem:[%s6151_s1 + $0x460] sm:$0xff] }
  0xc1   : > { %4163 = vmatprep.mubr.f32.mxu0 %v4688_v31  ;;  %4202 = vmatprep.subr.mxu1 %v3194_v16  ;;  %v3192_v31 = vld [vmem:[%s6151_s1 + $0x2a0] sm:$0xff] }
  0xc2   : > { %4164 = vmatmul.mubr.f32.gmra.mxu0 %v4698_v34  ;;  %4203 = vmatpush3.msra.mxu1 %v3194_v16  ;;  %v3240_v34 = vld [vmem:[%s6151_s1 + $0x320] sm:$0xff] }
  0xc3   : > { %4282 = vmatprep.subr.mxu0 %v3242_v18  ;;  %4086 = vmatprep.mubr.f32.mxu1 %v5088_v17  ;;  %v6226_v16 = vld [vmem:[#allocation14_spill] sm:$0xff] }
  0xc4   : > { %4283 = vmatpush3.msra.mxu0 %v3242_v18  ;;  %4087 = vmatmul.mubr.f32.gmra.mxu1 %v5092_v8  ;;  %v3343_v18 = vld [vmem:[%s6151_s1 + $0x458] sm:$0xff] }
  0xc5   : > { %4166 = vmatprep.mubr.f32.mxu0 %v4716_v39  ;;  %4204 = vmatprep.subr.mxu1 %v3193_v23  ;;  %v3191_v39 = vld [vmem:[%s6151_s1 + $0x298] sm:$0xff] }
  0xc6   : > { %4167 = vmatmul.mubr.f32.gmra.mxu0 %v4726_v42  ;;  %4205 = vmatpush3.msra.mxu1 %v3193_v23  ;;  %v3239_v42 = vld [vmem:[%s6151_s1 + $0x318] sm:$0xff] }
  0xc7   : > { %4284 = vmatprep.subr.mxu0 %v3241_v26  ;;  %4089 = vmatprep.mubr.f32.mxu1 %v5110_v6 }
  0xc8   : > { %4285 = vmatpush3.msra.mxu0 %v3241_v26  ;;  %4090 = vmatmul.mubr.f32.gmra.mxu1 %v5114_v61  ;;  %v6227_v26 = vld [vmem:[#allocation15_spill] sm:$0xff] }
  0xc9   : > { %4169 = vmatprep.mubr.f32.mxu0 %v4744_v47  ;;  %4206 = vmatprep.subr.mxu1 %v3192_v31  ;;  %v3190_v47 = vld [vmem:[%s6151_s1 + $0x290] sm:$0xff] }
  0xca   : > { %4170 = vmatmul.mubr.f32.gmra.mxu0 %v4754_v50  ;;  %4207 = vmatpush3.msra.mxu1 %v3192_v31  ;;  %v3238_v50 = vld [vmem:[%s6151_s1 + $0x310] sm:$0xff] }
  0xcb   : > { %4286 = vmatprep.subr.mxu0 %v3240_v34  ;;  %4092 = vmatprep.mubr.f32.mxu1 %v5132_v59 }
  0xcc   : > { %4287 = vmatpush3.msra.mxu0 %v3240_v34  ;;  %4093 = vmatmul.mubr.f32.gmra.mxu1 %v5136_v37  ;;  %v6228_v34 = vld [vmem:[#allocation16_spill] sm:$0xff] }
  0xcd   : > { %4172 = vmatprep.mubr.f32.mxu0 %v4772_v55  ;;  %4208 = vmatprep.subr.mxu1 %v3191_v39  ;;  %v6214_v55 = vld [vmem:[#allocation2_spill] sm:$0xff] }
  0xce   : > { %4173 = vmatmul.mubr.f32.gmra.mxu0 %v4782_v58  ;;  %4209 = vmatpush3.msra.mxu1 %v3191_v39  ;;  %v3189_v58 = vld [vmem:[%s6151_s1 + $0x288] sm:$0xff] }
  0xcf   : > { %4288 = vmatprep.subr.mxu0 %v3239_v42  ;;  %4095 = vmatprep.mubr.f32.mxu1 %v5154_v46  ;;  %v3293_v39 = vld [vmem:[%s6151_s1 + $0x3c8] sm:$0xff] }
  0xd0   : > { %4289 = vmatpush3.msra.mxu0 %v3239_v42  ;;  %4096 = vmatmul.mubr.f32.gmra.mxu1 %v5158_v22 }
  0xd1   : > { %4175 = vmatprep.mubr.f32.mxu0 %v4800_v63  ;;  %4210 = vmatprep.subr.mxu1 %v3190_v47  ;;  %v3237_v63 = vld [vmem:[%s6151_s1 + $0x308] sm:$0xff] }
  0xd2   : > { %4176 = vmatmul.mubr.f32.gmra.mxu0 %v6214_v55  ;;  %4211 = vmatpush3.msra.mxu1 %v3190_v47  ;;  %v6229_v47 = vld [vmem:[#allocation17_spill] sm:$0xff] }
  0xd3   : > { %4290 = vmatprep.subr.mxu0 %v3238_v50  ;;  %4098 = vmatprep.mubr.f32.mxu1 %v5176_v43 }
  0xd4   : > { %4291 = vmatpush3.msra.mxu0 %v3238_v50  ;;  %4099 = vmatmul.mubr.f32.gmra.mxu1 %v5180_v14  ;;  %v6230_v50 = vld [vmem:[#allocation18_spill] sm:$0xff] }
  0xd5   : > { %4178 = vmatprep.mubr.f32.mxu0 %v6215_v3  ;;  %4212 = vmatprep.subr.mxu1 %v3189_v58  ;;  %v6231_v3 = vld [vmem:[#allocation19_spill] sm:$0xff] }
  0xd6   : > { %4179 = vmatmul.mubr.f32.gmra.mxu0 %v6216_v35  ;;  %4213 = vmatpush3.msra.mxu1 %v3189_v58  ;;  %v3292_v58 = vld [vmem:[%s6151_s1 + $0x3c0] sm:$0xff]  ;;  %v6232_v35 = vld [vmem:[#allocation20_spill] sm:$0xff] }
  0xd7   : > { %4292 = vmatprep.subr.mxu0 %v3237_v63  ;;  %4101 = vmatprep.mubr.f32.mxu1 %v5348_v29 }
  0xd8   : > { %4293 = vmatpush3.msra.mxu0 %v3237_v63  ;;  %4102 = vmatmul.mubr.f32.gmra.mxu1 %v5352_v30 }
  0xd9   : > { %4181 = vmatprep.mubr.f32.mxu0 %v5356_v54  ;;  %4214 = vmatprep.subr.mxu1 %v3188_v27 }
  0xda   : > { %4182 = vmatmul.mubr.f32.gmra.mxu0 %v5363_v25  ;;  %4215 = vmatpush3.msra.mxu1 %v3188_v27 }
  0xdb   : > { %4294 = vmatprep.subr.mxu0 %v3236_v28  ;;  %4216 = vmatprep.mubr.f32.mxu1 %v6217_v36  ;;  %v6233_v36 = vld [vmem:[#allocation21_spill] sm:$0xff] }
  0xdc   : > { %4295 = vmatpush3.msra.mxu0 %v3236_v28  ;;  %4217 = vmatmul.mubr.f32.vlgmr.msra.gmra.mxu1 %v6218_v41  ;;  %v6234_v41 = vld [vmem:[#allocation22_spill] sm:$0xff] }
  0xdd   : > { %4296 = vmatprep.mubr.f32.mxu0 %v4890_v38  ;;  %4344 = vmatprep.subr.mxu1 %v3299_v33  ;;  %v3297_v38 = vld [vmem:[%s6151_s1 + $0x3e8] sm:$0xff] }
  0xde   : > { %4297 = vmatmul.mubr.f32.vlgmr.msra.gmra.mxu0 %v4894_v40  ;;  %4345 = vmatpush3.msra.mxu1 %v3299_v33  ;;  %v6221_v40 = vld [vmem:[#allocation9_spill] sm:$0xff] }
  0xdf   : > { %4424 = vmatprep.subr.mxu0 %v3347_v44  ;;  %4219 = vmatprep.mubr.f32.mxu1 %v6219_v52  ;;  %v6235_v52 = vld [vmem:[#allocation23_spill] sm:$0xff] }
  0xe0   : > { %4425 = vmatpush3.msra.mxu0 %v3347_v44  ;;  %4220 = vmatmul.mubr.f32.gmra.mxu1 %v6220_v57  ;;  %v3290_v44 = vld [vmem:[%s6151_s1 + $0x3b0] sm:$0xff] }
  0xe1   : > { %4299 = vmatprep.mubr.f32.mxu0 %v4912_v51  ;;  %4346 = vmatprep.subr.mxu1 %v3298_v49  ;;  %v3296_v51 = vld [vmem:[%s6151_s1 + $0x3e0] sm:$0xff]  ;;  %v6236_v57 = vld [vmem:[#allocation24_spill] sm:$0xff] }
  0xe2   : > { %4300 = vmatmul.mubr.f32.gmra.mxu0 %v4916_v53  ;;  %4347 = vmatpush3.msra.mxu1 %v3298_v49  ;;  %v6223_v53 = vld [vmem:[#allocation11_spill] sm:$0xff] }
  0xe3   : > { %4426 = vmatprep.subr.mxu0 %v3346_v60  ;;  %4222 = vmatprep.mubr.f32.mxu1 %v6221_v40 }
  0xe4   : > { %4427 = vmatpush3.msra.mxu0 %v3346_v60  ;;  %4223 = vmatmul.mubr.f32.gmra.mxu1 %v6222_v1  ;;  %v6237_v1 = vld [vmem:[#allocation25_spill] sm:$0xff] }
  0xe5   : > { %4302 = vmatprep.mubr.f32.mxu0 %v4934_v62  ;;  %4348 = vmatprep.subr.mxu1 %v3297_v38  ;;  %v3295_v62 = vld [vmem:[%s6151_s1 + $0x3d8] sm:$0xff] }
  0xe6   : > { %4303 = vmatmul.mubr.f32.gmra.mxu0 %v4938_v0  ;;  %4349 = vmatpush3.msra.mxu1 %v3297_v38  ;;  %v6225_v0 = vld [vmem:[#allocation13_spill] sm:$0xff]  ;;  %v3289_v38 = vld [vmem:[%s6151_s1 + $0x3a8] sm:$0xff] }
  0xe7   : > { %4428 = vmatprep.subr.mxu0 %v3345_v4  ;;  %4225 = vmatprep.mubr.f32.mxu1 %v6223_v53 }
  0xe8   : > { %4429 = vmatpush3.msra.mxu0 %v3345_v4  ;;  %4226 = vmatmul.mubr.f32.gmra.mxu1 %v6224_v9  ;;  %v6238_v4 = vld [vmem:[#allocation26_spill] sm:$0xff] }
  0xe9   : > { %4305 = vmatprep.mubr.f32.mxu0 %v4956_v11  ;;  %4350 = vmatprep.subr.mxu1 %v3296_v51 }
  0xea   : > { %4306 = vmatmul.mubr.f32.gmra.mxu0 %v4960_v13  ;;  %4351 = vmatpush3.msra.mxu1 %v3296_v51  ;;  %v3294_v13 = vld [vmem:[%s6151_s1 + $0x3d0] sm:$0xff] }
  0xeb   : > { %4430 = vmatprep.subr.mxu0 %v3344_v12  ;;  %4228 = vmatprep.mubr.f32.mxu1 %v6225_v0  ;;  %v3287_v0 = vld [vmem:[%s6151_s1 + $0x398] sm:$0xff] }
  0xec   : > { %4431 = vmatpush3.msra.mxu0 %v3344_v12  ;;  %4229 = vmatmul.mubr.f32.gmra.mxu1 %v6226_v16  ;;  %v6239_v12 = vld [vmem:[#allocation27_spill] sm:$0xff] }
  0xed   : > { %4308 = vmatprep.mubr.f32.mxu0 %v4978_v20  ;;  %4352 = vmatprep.subr.mxu1 %v3295_v62  ;;  %v5420_v11 = vpop.f32.mrf.mxu1  ;;  %v3342_v20 = vld [vmem:[%s6151_s1 + $0x450] sm:$0xff] }
  0xee   : > { %4309 = vmatmul.mubr.f32.gmra.mxu0 %v4982_v21  ;;  %4353 = vmatpush3.msra.mxu1 %v3295_v62  ;;  %v5426_v23 = vpop.f32.mrf.mxu0  ;;  %v6240_v62 = vld [vmem:[#allocation28_spill] sm:$0xff] }
  0xef   : > { %4432 = vmatprep.subr.mxu0 %v3343_v18  ;;  %4231 = vmatprep.mubr.f32.mxu1 %v6227_v26  ;;  %v5429_v31 = vpop.f32.mrf.mxu1 }
  0xf0   : > { %4433 = vmatpush3.msra.mxu0 %v3343_v18  ;;  %4232 = vmatmul.mubr.f32.gmra.mxu1 %v6228_v34  ;;  %v5435_v21 = vpop.f32.mrf.mxu0  ;;  %v6241_v18 = vld [vmem:[#allocation29_spill] sm:$0xff]  ;;  %v3286_v34 = vld [vmem:[%s6151_s1 + $0x390] sm:$0xff] }
  0xf1   : > { %4311 = vmatprep.mubr.f32.mxu0 %v5000_v45  ;;  %4354 = vmatprep.subr.mxu1 %v3294_v13  ;;  %v3341_v45 = vld [vmem:[%s6151_s1 + $0x448] sm:$0xff] }
  0xf2   : > { %4312 = vmatmul.mubr.f32.gmra.mxu0 %v5004_v48  ;;  %4355 = vmatpush3.msra.mxu1 %v3294_v13  ;;  %v5442_v42 = vpop.f32.mrf.mxu1  ;;  %v6242_v13 = vld [vmem:[#allocation30_spill] sm:$0xff] }
  0xf3   : > { %4434 = vmatprep.subr.mxu0 %v3342_v20  ;;  %4234 = vmatprep.mubr.f32.mxu1 %v6229_v47 }
  0xf4   : > { %4435 = vmatpush3.msra.mxu0 %v3342_v20  ;;  %4235 = vmatmul.mubr.f32.gmra.mxu1 %v6230_v50  ;;  %v5449_v55 = vpop.f32.mrf.mxu0  ;;  %v5451_v48 = vpop.f32.mrf.mxu1 }
  0xf5   : > { %4314 = vmatprep.mubr.f32.mxu0 %v5022_v15  ;;  %4356 = vmatprep.subr.mxu1 %v3293_v39  ;;  %v3340_v15 = vld [vmem:[%s6151_s1 + $0x440] sm:$0xff] }
  0xf6   : > { %4315 = vmatmul.mubr.f32.gmra.mxu0 %v5026_v19  ;;  %4357 = vmatpush3.msra.mxu1 %v3293_v39  ;;  %v5458_v63 = vpop.f32.mrf.mxu0  ;;  %v3291_v19 = vld [vmem:[%s6151_s1 + $0x3b8] sm:$0xff]  ;;  %v6243_v39 = vld [vmem:[#allocation31_spill] sm:$0xff] }
  0xf7   : > { %4436 = vmatprep.subr.mxu0 %v3341_v45  ;;  %4237 = vmatprep.mubr.f32.mxu1 %v6231_v3  ;;  %v3284_v3 = vld [vmem:[%s6151_s1 + $0x380] sm:$0xff] }
  0xf8   : > { %4437 = vmatpush3.msra.mxu0 %v3341_v45  ;;  %4238 = vmatmul.mubr.f32.gmra.mxu1 %v6232_v35  ;;  %v5465_v27 = vpop.f32.mrf.mxu1  ;;  %v5576_v45 = vld [vmem:[%s4636_s22 + $0x182] sm:$0xff] }
  0xf9   : > { %4317 = vmatprep.mubr.f32.mxu0 %v5044_v5  ;;  %4358 = vmatprep.subr.mxu1 %v3292_v58  ;;  %v3339_v5 = vld [vmem:[%s6151_s1 + $0x438] sm:$0xff] }
  0xfa   : > { %4318 = vmatmul.mubr.f32.gmra.mxu0 %v5048_v56  ;;  %4359 = vmatpush3.msra.mxu1 %v3292_v58  ;;  %v5472_v28 = vpop.f32.mrf.mxu0  ;;  %v5474_v33 = vpop.f32.mrf.mxu1  ;;  %v5580_v58 = vld [vmem:[%s4636_s22 + $0x18a] sm:$0xff] }
  0xfb   : > { %4438 = vmatprep.subr.mxu0 %v3340_v15  ;;  %4240 = vmatprep.mubr.f32.mxu1 %v6233_v36  ;;  %v3253_v36 = vld [vmem:[%s4636_s22 + $0x39] sm:$0xff] }
  0xfc   : > { %4439 = vmatpush3.msra.mxu0 %v3340_v15  ;;  %4241 = vmatmul.mubr.f32.gmra.mxu1 %v6234_v41  ;;  %v5481_v56 = vpop.f32.mrf.mxu0  ;;  %v3332_v15 = vld [vmem:[%s6151_s1 + $0x400] sm:$0xff] }
  0xfd   : > { %4320 = vmatprep.mubr.f32.mxu0 %v5066_v32  ;;  %4360 = vmatprep.subr.mxu1 %v3291_v19  ;;  %v3338_v32 = vld [vmem:[%s6151_s1 + $0x430] sm:$0xff] }
  0xfe   : > { %4321 = vmatmul.mubr.f32.gmra.mxu0 %v5070_v24  ;;  %4361 = vmatpush3.msra.mxu1 %v3291_v19  ;;  %v5488_v49 = vpop.f32.mrf.mxu1  ;;  %v3252_v19 = vld [vmem:[%s4636_s22 + $0x31] sm:$0xff] }
  0xff   : > { %4440 = vmatprep.subr.mxu0 %v3339_v5  ;;  %4243 = vmatprep.mubr.f32.mxu1 %v6235_v52  ;;  %v3301_v52 = vld [vmem:[%s4636_s22 + $0x3a] sm:$0xff] }
 0x100   : > { %4441 = vmatpush3.msra.mxu0 %v3339_v5  ;;  %4244 = vmatmul.mubr.f32.gmra.mxu1 %v6236_v57  ;;  %v5495_v60 = vpop.f32.mrf.mxu0  ;;  %v5497_v24 = vpop.f32.mrf.mxu1  ;;  %v3300_v5 = vld [vmem:[%s4636_s22 + $0x32] sm:$0xff] }
 0x101   : > { %4323 = vmatprep.mubr.f32.mxu0 %v5088_v17  ;;  %4362 = vmatprep.subr.mxu1 %v3290_v44  ;;  %v3337_v17 = vld [vmem:[%s6151_s1 + $0x428] sm:$0xff] }
 0x102   : > { %4324 = vmatmul.mubr.f32.gmra.mxu0 %v5092_v8  ;;  %4363 = vmatpush3.msra.mxu1 %v3290_v44  ;;  %v5504_v40 = vpop.f32.mrf.mxu0  ;;  %v3288_v8 = vld [vmem:[%s6151_s1 + $0x3a0] sm:$0xff]  ;;  %v3254_v44 = vld [vmem:[%s4636_s22 + $0x49] sm:$0xff] }
 0x103   : > { %4442 = vmatprep.subr.mxu0 %v3338_v32  ;;  %4246 = vmatprep.mubr.f32.mxu1 %v6237_v1  ;;  %v3255_v1 = vld [vmem:[%s4636_s22 + $0x51] sm:$0xff] }
 0x104   : > { %4443 = vmatpush3.msra.mxu0 %v3338_v32  ;;  %4247 = vmatmul.mubr.f32.gmra.mxu1 %v6238_v4  ;;  %v5511_v51 = vpop.f32.mrf.mxu1  ;;  %v3302_v32 = vld [vmem:[%s4636_s22 + $0x4a] sm:$0xff] }
 0x105   : > { %4326 = vmatprep.mubr.f32.mxu0 %v5110_v6  ;;  %4364 = vmatprep.subr.mxu1 %v3289_v38  ;;  %v3336_v6 = vld [vmem:[%s6151_s1 + $0x420] sm:$0xff] }
 0x106   : > { %4327 = vmatmul.mubr.f32.gmra.mxu0 %v5114_v61  ;;  %4365 = vmatpush3.msra.mxu1 %v3289_v38  ;;  %v5518_v53 = vpop.f32.mrf.mxu0  ;;  %v5520_v9 = vpop.f32.mrf.mxu1 }
 0x107   : > { %4444 = vmatprep.subr.mxu0 %v3337_v17  ;;  %4249 = vmatprep.mubr.f32.mxu1 %v6239_v12 }
 0x108   : > { %4445 = vmatpush3.msra.mxu0 %v3337_v17  ;;  %4250 = vmatmul.mubr.f32.gmra.mxu1 %v6240_v62  ;;  %v5527_v61 = vpop.f32.mrf.mxu0 }
 0x109   : > { %4329 = vmatprep.mubr.f32.mxu0 %v5132_v59  ;;  %4366 = vmatprep.subr.mxu1 %v3288_v8  ;;  %v3335_v59 = vld [vmem:[%s6151_s1 + $0x418] sm:$0xff] }
 0x10a   : > { %4330 = vmatmul.mubr.f32.gmra.mxu0 %v5136_v37  ;;  %4367 = vmatpush3.msra.mxu1 %v3288_v8  ;;  %v5534_v16 = vpop.f32.mrf.mxu1  ;;  %v3256_v8 = vld [vmem:[%s4636_s22 + $0x61] sm:$0xff] }
 0x10b   : > { %4446 = vmatprep.subr.mxu0 %v3336_v6  ;;  %4252 = vmatprep.mubr.f32.mxu1 %v6241_v18 }
 0x10c   : > { %4447 = vmatpush3.msra.mxu0 %v3336_v6  ;;  %4253 = vmatmul.mubr.f32.gmra.mxu1 %v6242_v13  ;;  %v5541_v26 = vpop.f32.mrf.mxu0  ;;  %v5543_v37 = vpop.f32.mrf.mxu1  ;;  %v3303_v6 = vld [vmem:[%s4636_s22 + $0x52] sm:$0xff] }
 0x10d   : > { %4332 = vmatprep.mubr.f32.mxu0 %v5154_v46  ;;  %4368 = vmatprep.subr.mxu1 %v3287_v0  ;;  %v3334_v46 = vld [vmem:[%s6151_s1 + $0x410] sm:$0xff] }
 0x10e   : > { %4333 = vmatmul.mubr.f32.gmra.mxu0 %v5158_v22  ;;  %4369 = vmatpush3.msra.mxu1 %v3287_v0  ;;  %v5550_v20 = vpop.f32.mrf.mxu0  ;;  %v3285_v22 = vld [vmem:[%s6151_s1 + $0x388] sm:$0xff] }
 0x10f   : > { %4448 = vmatprep.subr.mxu0 %v3335_v59  ;;  %4255 = vmatprep.mubr.f32.mxu1 %v6243_v39 }
 0x110   : > { %4449 = vmatpush3.msra.mxu0 %v3335_v59  ;;  %4256 = vmatmul.mubr.f32.gmra.mxu1 %v5169_v10  ;;  %v5557_v47 = vpop.f32.mrf.mxu1 }
 0x111   : > { %4335 = vmatprep.mubr.f32.mxu0 %v5176_v43  ;;  %4370 = vmatprep.subr.mxu1 %v3286_v34 }
 0x112   : > { %4336 = vmatmul.mubr.f32.gmra.mxu0 %v5180_v14  ;;  %4371 = vmatpush3.msra.mxu1 %v3286_v34  ;;  %v5564_v10 = vpop.f32.mrf.mxu0  ;;  %v5566_v50 = vpop.f32.mrf.mxu1  ;;  %v3333_v14 = vld [vmem:[%s6151_s1 + $0x408] sm:$0xff] }
 0x113   : > { %4450 = vmatprep.subr.mxu0 %v3334_v46  ;;  %4258 = vmatprep.mubr.f32.mxu1 %v5184_v7  ;;  %v3257_v34 = vld [vmem:[%s4636_s22 + $0x69] sm:$0xff] }
 0x114   : > { %4451 = vmatpush3.msra.mxu0 %v3334_v46  ;;  %4259 = vmatmul.mubr.f32.gmra.mxu1 %v5191_v2  ;;  %v5573_v43 = vpop.f32.mrf.mxu0  ;;  %v3234_v2 = vld [vmem:[%s4636_s22 + $0x198] sm:$0xff] }
 0x115   : > { %4338 = vmatprep.mubr.f32.mxu0 %v5348_v29  ;;  %4372 = vmatprep.subr.mxu1 %v3285_v22  ;;  %v3235_v29 = vld [vmem:[%s4636_s22 + $0x1a0] sm:$0xff] }
 0x116   : > { %4339 = vmatmul.mubr.f32.gmra.mxu0 %v5352_v30  ;;  %4373 = vmatpush3.msra.mxu1 %v3285_v22  ;;  %v5583_v7 = vpop.f32.mrf.mxu1  ;;  %v3258_v22 = vld [vmem:[%s4636_s22 + $0x79] sm:$0xff] }
 0x117   : > { %4452 = vmatprep.subr.mxu0 %v3333_v14  ;;  %4261 = vmatprep.mubr.f32.mxu1 %v5576_v45 }
 0x118   : > { %4453 = vmatpush3.msra.mxu0 %v3333_v14  ;;  %4262 = vmatmul.mubr.f32.gmra.mxu1 %v5580_v58  ;;  %v5592_v30 = vpop.f32.mrf.mxu0  ;;  %v5594_v35 = vpop.f32.mrf.mxu1 }
 0x119   : > { %4341 = vmatprep.mubr.f32.mxu0 %v3234_v2  ;;  %4374 = vmatprep.subr.mxu1 %v3284_v3  ;;  %v3305_v2 = vld [vmem:[%s4636_s22 + $0x6a] sm:$0xff] }
 0x11a   : > { %4342 = vmatmul.mubr.f32.gmra.mxu0 %v3235_v29  ;;  %4375 = vmatpush3.msra.mxu1 %v3284_v3  ;;  %v5601_v41 = vpop.f32.mrf.mxu0 }
 0x11b   : > { %4454 = vmatprep.subr.mxu0 %v3332_v15  ;;  %4376 = vmatprep.mubr.f32.mxu1 %v3252_v19 }
 0x11c   : > { %4455 = vmatpush3.msra.mxu0 %v3332_v15  ;;  %v3898_v57 = vpop.f32.mrf.mxu1  ;;  %4377 = vmatmul.mubr.f32.vlgmr.msra.gmra.mxu1 %v3253_v36  ;;  %v3306_v15 = vld [vmem:[%s4636_s22 + $0x7a] sm:$0xff] }
 0x11d   : > { %v565_v38 = vadd.f32 %v3898_v57, %v5426_v23  ;;  %4456 = vmatprep.mubr.f32.mxu0 %v3300_v5  ;;  %4379 = vmatprep.mubr.f32.mxu1 %v3254_v44  ;;  %v3304_v23 = vld [vmem:[%s4636_s22 + $0x62] sm:$0xff] }
 0x11e   : > { %v3978_v4 = vpop.f32.mrf.mxu0  ;;  %4457 = vmatmul.mubr.f32.vlgmr.msra.gmra.mxu0 %v3301_v52  ;;  %v559_v17 = vpop.f32.mrf.mxu1  ;;  %v3259_v36 = vld [vmem:[%s4636_s22 + $0x81] sm:$0xff]  ;;  %v3260_v52 = vld [vmem:[%s4636_s22 + $0x91] sm:$0xff] }
 0x11f   : > { %v5610_v12 = vadd.f32 %v3978_v4, %v565_v38  ;;  %v560_v62 = vadd.f32 %v559_v17, %v5435_v21  ;;  %4459 = vmatprep.mubr.f32.mxu0 %v3302_v32  ;;  %v3307_v32 = vld [vmem:[%s4636_s22 + $0x82] sm:$0xff]  ;;  %v3308_v4 = vld [vmem:[%s4636_s22 + $0x92] sm:$0xff] }
 0x120   : > { %v833_v0 = vpop.f32.mrf.mxu0  ;;  %v3901_v18 = vpop.f32.mrf.mxu1  ;;  %4380 = vmatmul.mubr.f32.gmra.mxu1 %v3255_v1 }
 0x121   : > { %v5615_v13 = vadd.f32 %v833_v0, %v560_v62  ;;  %v575_v59 = vadd.f32 %v3901_v18, %v5449_v55  ;;  %4382 = vmatprep.mubr.f32.mxu1 %v3256_v8  ;;  %v3261_v8 = vld [vmem:[%s4636_s22 + $0x99] sm:$0xff]  ;;  %v3262_v0 = vld [vmem:[%s4636_s22 + $0xa9] sm:$0xff] }
 0x122   : > { %v3981_v39 = vpop.f32.mrf.mxu0  ;;  %4460 = vmatmul.mubr.f32.gmra.mxu0 %v3303_v6  ;;  %v569_v46 = vpop.f32.mrf.mxu1 }
 0x123   : > { %v5620_v21 = vadd.f32 %v3981_v39, %v575_v59  ;;  %v570_v14 = vadd.f32 %v569_v46, %v5458_v63  ;;  %4462 = vmatprep.mubr.f32.mxu0 %v3304_v23  ;;  %v3309_v23 = vld [vmem:[%s4636_s22 + $0x9a] sm:$0xff]  ;;  %v3310_v39 = vld [vmem:[%s4636_s22 + $0xaa] sm:$0xff] }
 0x124   : > { %v843_v3 = vpop.f32.mrf.mxu0  ;;  %v3904_v29 = vpop.f32.mrf.mxu1  ;;  %4383 = vmatmul.mubr.f32.gmra.mxu1 %v3257_v34 }
 0x125   : > { %v5625_v55 = vadd.f32 %v843_v3, %v570_v14  ;;  %v585_v19 = vadd.f32 %v3904_v29, %v5472_v28  ;;  %4385 = vmatprep.mubr.f32.mxu1 %v3258_v22  ;;  %v3263_v22 = vld [vmem:[%s4636_s22 + $0xb1] sm:$0xff]  ;;  %v3264_v3 = vld [vmem:[%s4636_s22 + $0xc1] sm:$0xff] }
 0x126   : > { %v3984_v5 = vpop.f32.mrf.mxu0  ;;  %4463 = vmatmul.mubr.f32.gmra.mxu0 %v3305_v2  ;;  %v579_v44 = vpop.f32.mrf.mxu1 }
 0x127   : > { %v5630_v63 = vadd.f32 %v3984_v5, %v585_v19  ;;  %v580_v57 = vadd.f32 %v579_v44, %v5481_v56  ;;  %4465 = vmatprep.mubr.f32.mxu0 %v3306_v15  ;;  %v3311_v15 = vld [vmem:[%s4636_s22 + $0xb2] sm:$0xff]  ;;  %v3312_v5 = vld [vmem:[%s4636_s22 + $0xc2] sm:$0xff] }
 0x128   : > { %v853_v38 = vpop.f32.mrf.mxu0  ;;  %v3907_v1 = vpop.f32.mrf.mxu1  ;;  %4386 = vmatmul.mubr.f32.gmra.mxu1 %v3259_v36 }
 0x129   : > { %v5635_v28 = vadd.f32 %v853_v38, %v580_v57  ;;  %v595_v17 = vadd.f32 %v3907_v1, %v5495_v60  ;;  %4388 = vmatprep.mubr.f32.mxu1 %v3260_v52  ;;  %v3265_v52 = vld [vmem:[%s4636_s22 + $0xc9] sm:$0xff]  ;;  %v3266_v38 = vld [vmem:[%s4636_s22 + $0xd9] sm:$0xff] }
 0x12a   : > { %v3987_v62 = vpop.f32.mrf.mxu0  ;;  %4466 = vmatmul.mubr.f32.gmra.mxu0 %v3307_v32  ;;  %v589_v6 = vpop.f32.mrf.mxu1 }
 0x12b   : > { %v5640_v56 = vadd.f32 %v3987_v62, %v595_v17  ;;  %v590_v18 = vadd.f32 %v589_v6, %v5504_v40  ;;  %4468 = vmatprep.mubr.f32.mxu0 %v3308_v4  ;;  %v3313_v4 = vld [vmem:[%s4636_s22 + $0xca] sm:$0xff]  ;;  %v3314_v62 = vld [vmem:[%s4636_s22 + $0xda] sm:$0xff] }
 0x12c   : > { %v863_v59 = vpop.f32.mrf.mxu0  ;;  %v3910_v34 = vpop.f32.mrf.mxu1  ;;  %4389 = vmatmul.mubr.f32.gmra.mxu1 %v3261_v8 }
 0x12d   : > { %v5645_v60 = vadd.f32 %v863_v59, %v590_v18  ;;  %v605_v46 = vadd.f32 %v3910_v34, %v5518_v53  ;;  %4391 = vmatprep.mubr.f32.mxu1 %v3262_v0  ;;  %v3267_v0 = vld [vmem:[%s4636_s22 + $0xe1] sm:$0xff]  ;;  %v3268_v59 = vld [vmem:[%s4636_s22 + $0xf1] sm:$0xff] }
 0x12e   : > { %v3990_v14 = vpop.f32.mrf.mxu0  ;;  %4469 = vmatmul.mubr.f32.gmra.mxu0 %v3309_v23  ;;  %v599_v2 = vpop.f32.mrf.mxu1 }
 0x12f   : > { %v5650_v40 = vadd.f32 %v3990_v14, %v605_v46  ;;  %v600_v29 = vadd.f32 %v599_v2, %v5527_v61  ;;  %4471 = vmatprep.mubr.f32.mxu0 %v3310_v39  ;;  %v3315_v39 = vld [vmem:[%s4636_s22 + $0xe2] sm:$0xff]  ;;  %v3316_v14 = vld [vmem:[%s4636_s22 + $0xf2] sm:$0xff] }
 0x130   : > { %v873_v19 = vpop.f32.mrf.mxu0  ;;  %v3913_v36 = vpop.f32.mrf.mxu1  ;;  %4392 = vmatmul.mubr.f32.gmra.mxu1 %v3263_v22 }
 0x131   : > { %v5655_v53 = vadd.f32 %v873_v19, %v600_v29  ;;  %v615_v44 = vadd.f32 %v3913_v36, %v5541_v26  ;;  %4394 = vmatprep.mubr.f32.mxu1 %v3264_v3  ;;  %v3269_v3 = vld [vmem:[%s4636_s22 + $0xf9] sm:$0xff]  ;;  %v3270_v19 = vld [vmem:[%s4636_s22 + $0x109] sm:$0xff] }
 0x132   : > { %v3993_v57 = vpop.f32.mrf.mxu0  ;;  %4472 = vmatmul.mubr.f32.gmra.mxu0 %v3311_v15  ;;  %v609_v32 = vpop.f32.mrf.mxu1 }
 0x133   : > { %v5660_v61 = vadd.f32 %v3993_v57, %v615_v44  ;;  %v610_v1 = vadd.f32 %v609_v32, %v5550_v20  ;;  %4474 = vmatprep.mubr.f32.mxu0 %v3312_v5  ;;  %v3317_v5 = vld [vmem:[%s4636_s22 + $0xfa] sm:$0xff]  ;;  %v3318_v57 = vld [vmem:[%s4636_s22 + $0x10a] sm:$0xff] }
 0x134   : > { %v883_v17 = vpop.f32.mrf.mxu0  ;;  %v3916_v8 = vpop.f32.mrf.mxu1  ;;  %4395 = vmatmul.mubr.f32.gmra.mxu1 %v3265_v52 }
 0x135   : > { %v5665_v26 = vadd.f32 %v883_v17, %v610_v1  ;;  %v625_v6 = vadd.f32 %v3916_v8, %v5564_v10  ;;  %4397 = vmatprep.mubr.f32.mxu1 %v3266_v38  ;;  %v3271_v38 = vld [vmem:[%s4636_s22 + $0x111] sm:$0xff]  ;;  %v3272_v17 = vld [vmem:[%s4636_s22 + $0x121] sm:$0xff] }
 0x136   : > { %v3996_v18 = vpop.f32.mrf.mxu0  ;;  %4475 = vmatmul.mubr.f32.gmra.mxu0 %v3313_v4  ;;  %v619_v23 = vpop.f32.mrf.mxu1 }
 0x137   : > { %v5670_v20 = vadd.f32 %v3996_v18, %v625_v6  ;;  %v620_v34 = vadd.f32 %v619_v23, %v5573_v43  ;;  %4477 = vmatprep.mubr.f32.mxu0 %v3314_v62  ;;  %v3319_v62 = vld [vmem:[%s4636_s22 + $0x112] sm:$0xff]  ;;  %v3320_v18 = vld [vmem:[%s4636_s22 + $0x122] sm:$0xff] }
 0x138   : > { %v893_v46 = vpop.f32.mrf.mxu0  ;;  %v3919_v22 = vpop.f32.mrf.mxu1  ;;  %4398 = vmatmul.mubr.f32.gmra.mxu1 %v3267_v0 }
 0x139   : > { %v5675_v10 = vadd.f32 %v893_v46, %v620_v34  ;;  %v635_v2 = vadd.f32 %v3919_v22, %v5592_v30  ;;  %4400 = vmatprep.mubr.f32.mxu1 %v3268_v59  ;;  %v3273_v59 = vld [vmem:[%s4636_s22 + $0x129] sm:$0xff]  ;;  %v3274_v46 = vld [vmem:[%s4636_s22 + $0x139] sm:$0xff] }
 0x13a   : > { %v3999_v29 = vpop.f32.mrf.mxu0  ;;  %4478 = vmatmul.mubr.f32.gmra.mxu0 %v3315_v39  ;;  %v629_v15 = vpop.f32.mrf.mxu1 }
 0x13b   : > { %v5680_v43 = vadd.f32 %v3999_v29, %v635_v2  ;;  %v630_v36 = vadd.f32 %v629_v15, %v5601_v41  ;;  %4480 = vmatprep.mubr.f32.mxu0 %v3316_v14  ;;  %v3321_v14 = vld [vmem:[%s4636_s22 + $0x12a] sm:$0xff]  ;;  %v3322_v29 = vld [vmem:[%s4636_s22 + $0x13a] sm:$0xff] }
 0x13c   : > { %v903_v44 = vpop.f32.mrf.mxu0  ;;  %v3922_v52 = vpop.f32.mrf.mxu1  ;;  %4401 = vmatmul.mubr.f32.gmra.mxu1 %v3269_v3 }
 0x13d   : > { %v5685_v30 = vadd.f32 %v903_v44, %v630_v36  ;;  %v645_v32 = vadd.f32 %v3922_v52, %v5420_v11  ;;  %4403 = vmatprep.mubr.f32.mxu1 %v3270_v19  ;;  %v3275_v19 = vld [vmem:[%s4636_s22 + $0x141] sm:$0xff]  ;;  %v3276_v44 = vld [vmem:[%s4636_s22 + $0x151] sm:$0xff] }
 0x13e   : > { %v4002_v1 = vpop.f32.mrf.mxu0  ;;  %4481 = vmatmul.mubr.f32.gmra.mxu0 %v3317_v5  ;;  %v639_v4 = vpop.f32.mrf.mxu1 }
 0x13f   : > { %v5690_v41 = vadd.f32 %v4002_v1, %v645_v32  ;;  %v640_v8 = vadd.f32 %v639_v4, %v5429_v31  ;;  %4483 = vmatprep.mubr.f32.mxu0 %v3318_v57  ;;  %v3323_v57 = vld [vmem:[%s4636_s22 + $0x142] sm:$0xff]  ;;  %v3324_v1 = vld [vmem:[%s4636_s22 + $0x152] sm:$0xff] }
 0x140   : > { %v913_v6 = vpop.f32.mrf.mxu0  ;;  %v3925_v0 = vpop.f32.mrf.mxu1  ;;  %4404 = vmatmul.mubr.f32.gmra.mxu1 %v3271_v38 }
 0x141   : > { %v5695_v11 = vadd.f32 %v913_v6, %v640_v8  ;;  %v655_v23 = vadd.f32 %v3925_v0, %v5442_v42  ;;  %4406 = vmatprep.mubr.f32.mxu1 %v3272_v17  ;;  %v3277_v17 = vld [vmem:[%s4636_s22 + $0x159] sm:$0xff]  ;;  %v3278_v6 = vld [vmem:[%s4636_s22 + $0x169] sm:$0xff] }
 0x142   : > { %v4005_v34 = vpop.f32.mrf.mxu0  ;;  %4484 = vmatmul.mubr.f32.gmra.mxu0 %v3319_v62  ;;  %v649_v39 = vpop.f32.mrf.mxu1 }
 0x143   : > { %v5700_v31 = vadd.f32 %v4005_v34, %v655_v23  ;;  %v650_v22 = vadd.f32 %v649_v39, %v5451_v48  ;;  %4486 = vmatprep.mubr.f32.mxu0 %v3320_v18  ;;  %v3325_v18 = vld [vmem:[%s4636_s22 + $0x15a] sm:$0xff]  ;;  %v3326_v34 = vld [vmem:[%s4636_s22 + $0x16a] sm:$0xff] }
 0x144   : > { %v923_v2 = vpop.f32.mrf.mxu0  ;;  %v3928_v3 = vpop.f32.mrf.mxu1  ;;  %4407 = vmatmul.mubr.f32.gmra.mxu1 %v3273_v59 }
 0x145   : > { %v5705_v42 = vadd.f32 %v923_v2, %v650_v22  ;;  %v665_v15 = vadd.f32 %v3928_v3, %v5465_v27  ;;  %4409 = vmatprep.mubr.f32.mxu1 %v3274_v46  ;;  %v3279_v46 = vld [vmem:[%s4636_s22 + $0x171] sm:$0xff] }
 0x146   : > { %v4008_v36 = vpop.f32.mrf.mxu0  ;;  %4487 = vmatmul.mubr.f32.gmra.mxu0 %v3321_v14  ;;  %v659_v5 = vpop.f32.mrf.mxu1  ;;  %v3327_v3 = vld [vmem:[%s4636_s22 + $0x172] sm:$0xff] }
 0x147   : > { %v5710_v48 = vadd.f32 %v4008_v36, %v665_v15  ;;  %v660_v52 = vadd.f32 %v659_v5, %v5474_v33  ;;  %4489 = vmatprep.mubr.f32.mxu0 %v3322_v29 }
 0x148   : > { %v933_v32 = vpop.f32.mrf.mxu0  ;;  %v3931_v38 = vpop.f32.mrf.mxu1  ;;  %4410 = vmatmul.mubr.f32.gmra.mxu1 %v3275_v19 }
 0x149   : > { %v5715_v27 = vadd.f32 %v933_v32, %v660_v52  ;;  %v675_v4 = vadd.f32 %v3931_v38, %v5488_v49  ;;  %4412 = vmatprep.mubr.f32.mxu1 %v3276_v44  ;;  %v3282_v44 = vld [vmem:[%s4636_s22 + $0x199] sm:$0xff] }
 0x14a   : > { %v4011_v8 = vpop.f32.mrf.mxu0  ;;  %4490 = vmatmul.mubr.f32.gmra.mxu0 %v3323_v57  ;;  %v669_v62 = vpop.f32.mrf.mxu1  ;;  %v3330_v38 = vld [vmem:[%s4636_s22 + $0x19a] sm:$0xff] }
 0x14b   : > { %v5720_v33 = vadd.f32 %v4011_v8, %v675_v4  ;;  %v670_v0 = vadd.f32 %v669_v62, %v5497_v24  ;;  %4492 = vmatprep.mubr.f32.mxu0 %v3324_v1  ;;  %v3283_v1 = vld [vmem:[%s4636_s22 + $0x1a1] sm:$0xff] }
 0x14c   : > { %v943_v23 = vpop.f32.mrf.mxu0  ;;  %v3934_v59 = vpop.f32.mrf.mxu1  ;;  %4413 = vmatmul.mubr.f32.gmra.mxu1 %v3277_v17 }
 0x14d   : > { %v5725_v39 = vadd.f32 %v943_v23, %v670_v0  ;;  %v685_v49 = vadd.f32 %v3934_v59, %v5511_v51  ;;  %4415 = vmatprep.mubr.f32.mxu1 %v3278_v6 }
 0x14e   : > { %v4014_v22 = vpop.f32.mrf.mxu0  ;;  %4493 = vmatmul.mubr.f32.gmra.mxu0 %v3325_v18  ;;  %v679_v14 = vpop.f32.mrf.mxu1 }
 0x14f   : > { %v5729_v2 = vadd.f32 %v4014_v22, %v685_v49  ;;  %v680_v24 = vadd.f32 %v679_v14, %v5520_v9  ;;  %4495 = vmatprep.mubr.f32.mxu0 %v3326_v34 }
 0x150   : > { %v953_v29 = vpop.f32.mrf.mxu0  ;;  %v3937_v15 = vpop.f32.mrf.mxu1  ;;  %4416 = vmatmul.mubr.f32.gmra.mxu1 %v3279_v46 }
 0x151   : > { %v5733_v19 = vadd.f32 %v953_v29, %v680_v24  ;;  %v695_v51 = vadd.f32 %v3937_v15, %v5534_v16  ;;  %4418 = vmatprep.mubr.f32.mxu1 %v5356_v54 }
 0x152   : > { %v4017_v36 = vpop.f32.mrf.mxu0  ;;  %4496 = vmatmul.mubr.f32.gmra.mxu0 %v3327_v3  ;;  %v689_v5 = vpop.f32.mrf.mxu1 }
 0x153   : > { %v5738_v52 = vadd.f32 %v4017_v36, %v695_v51  ;;  %v690_v9 = vadd.f32 %v689_v5, %v5543_v37  ;;  %4498 = vmatprep.mubr.f32.mxu0 %v5576_v45  ;;  %v3331_v45 = vld [vmem:[%s4636_s22 + $0x1a2] sm:$0xff] }
 0x154   : > { %v963_v57 = vpop.f32.mrf.mxu0  ;;  %v3940_v32 = vpop.f32.mrf.mxu1  ;;  %4419 = vmatmul.mubr.f32.gmra.mxu1 %v5363_v25 }
 0x155   : > { %v5744_v16 = vadd.f32 %v963_v57, %v690_v9  ;;  %v705_v54 = vadd.f32 %v3940_v32, %v5557_v47  ;;  %4421 = vmatprep.mubr.f32.mxu1 %v3282_v44 }
 0x156   : > { %v4020_v4 = vpop.f32.mrf.mxu0  ;;  %4499 = vmatmul.mubr.f32.gmra.mxu0 %v5580_v58  ;;  %v699_v17 = vpop.f32.mrf.mxu1 }
 0x157   : > { %v5749_v8 = vadd.f32 %v4020_v4, %v705_v54  ;;  %v700_v37 = vadd.f32 %v699_v17, %v5566_v50  ;;  %4501 = vmatprep.mubr.f32.mxu0 %v3330_v38 }
 0x158   : > { %v973_v62 = vpop.f32.mrf.mxu0  ;;  %v3943_v6 = vpop.f32.mrf.mxu1  ;;  %4422 = vmatmul.mubr.f32.gmra.mxu1 %v3283_v1 }
 0x159   : > { %v5753_v25 = vadd.f32 %v973_v62, %v700_v37  ;;  %v715_v0 = vadd.f32 %v3943_v6, %v5583_v7 }
 0x15a   : > { %v4023_v47 = vpop.f32.mrf.mxu0  ;;  %4502 = vmatmul.mubr.f32.gmra.mxu0 %v3331_v45  ;;  %v709_v18 = vpop.f32.mrf.mxu1 }
 0x15b   : > { %v5756_v23 = vadd.f32 %v4023_v47, %v715_v0  ;;  %v710_v58 = vadd.f32 %v709_v18, %v5594_v35 }
 0x15c   : > { %v983_v59 = vpop.f32.mrf.mxu0  ;;  %v4058_v34 = vpop.f32.mrf.mxu1 }
 0x15d   : > { %v5759_v49 = vadd.f32 %v983_v59, %v710_v58  ;;  %v1300_v50 = vadd.f32 %v4058_v34, %v5610_v12 }
 0x15e   : > { %v4138_v46 = vpop.f32.mrf.mxu0  ;;  %v1140_v22 = vpop.f32.mrf.mxu1 }
 0x15f   : > { %v5762_v14 = vadd.f32 %v4138_v46, %v1300_v50  ;;  %v1299_v24 = vadd.f32 %v1140_v22, %v5615_v13 }
 0x160   : > { %v1446_v7 = vpop.f32.mrf.mxu0  ;;  %v4061_v3 = vpop.f32.mrf.mxu1 }
 0x161   : > { %v5765_v29 = vadd.f32 %v1446_v7, %v1299_v24  ;;  %v1302_v15 = vadd.f32 %v4061_v3, %v5620_v21 }
 0x162   : > { %v4141_v51 = vpop.f32.mrf.mxu0  ;;  %v1150_v35 = vpop.f32.mrf.mxu1 }
 0x163   : > { %v5768_v36 = vadd.f32 %v4141_v51, %v1302_v15  ;;  %v1301_v5 = vadd.f32 %v1150_v35, %v5625_v55 }
 0x164   : > { %v1456_v44 = vpop.f32.mrf.mxu0  ;;  %v4064_v12 = vpop.f32.mrf.mxu1 }
 0x165   : > { %v5771_v9 = vadd.f32 %v1456_v44, %v1301_v5  ;;  %v1304_v57 = vadd.f32 %v4064_v12, %v5630_v63 }
 0x166   : > { %v4144_v32 = vpop.f32.mrf.mxu0  ;;  %v1160_v13 = vpop.f32.mrf.mxu1 }
 0x167   : > { %v5774_v38 = vadd.f32 %v4144_v32, %v1304_v57  ;;  %v1303_v54 = vadd.f32 %v1160_v13, %v5635_v28 }
 0x168   : > { %v1466_v1 = vpop.f32.mrf.mxu0  ;;  %v4067_v21 = vpop.f32.mrf.mxu1 }
 0x169   : > { %v5777_v4 = vadd.f32 %v1466_v1, %v1303_v54  ;;  %v1306_v17 = vadd.f32 %v4067_v21, %v5640_v56 }
 0x16a   : > { %v4147_v37 = vpop.f32.mrf.mxu0  ;;  %v1170_v55 = vpop.f32.mrf.mxu1 }
 0x16b   : > { %v5780_v45 = vadd.f32 %v4147_v37, %v1306_v17  ;;  %v1305_v62 = vadd.f32 %v1170_v55, %v5645_v60 }
 0x16c   : > { %v1476_v6 = vpop.f32.mrf.mxu0  ;;  %v4070_v63 = vpop.f32.mrf.mxu1 }
 0x16d   : > { %v5783_v0 = vadd.f32 %v1476_v6, %v1305_v62  ;;  %v1308_v47 = vadd.f32 %v4070_v63, %v5650_v40 }
 0x16e   : > { %v4150_v18 = vpop.f32.mrf.mxu0  ;;  %v1180_v28 = vpop.f32.mrf.mxu1 }
 0x16f   : > { %v5786_v58 = vadd.f32 %v4150_v18, %v1308_v47  ;;  %v1307_v59 = vadd.f32 %v1180_v28, %v5655_v53 }
 0x170   : > { %v1486_v34 = vpop.f32.mrf.mxu0  ;;  %v4073_v56 = vpop.f32.mrf.mxu1 }
 0x171   : > { %v5789_v50 = vadd.f32 %v1486_v34, %v1307_v59  ;;  %v1310_v46 = vadd.f32 %v4073_v56, %v5660_v61 }
 0x172   : > { %v4153_v22 = vpop.f32.mrf.mxu0  ;;  %v1190_v60 = vpop.f32.mrf.mxu1 }
 0x173   : > { %v5792_v24 = vadd.f32 %v4153_v22, %v1310_v46  ;;  %v1309_v7 = vadd.f32 %v1190_v60, %v5665_v26 }
 0x174   : > { %v1496_v3 = vpop.f32.mrf.mxu0  ;;  %v4076_v40 = vpop.f32.mrf.mxu1 }
 0x175   : > { %v5795_v15 = vadd.f32 %v1496_v3, %v1309_v7  ;;  %v1312_v51 = vadd.f32 %v4076_v40, %v5670_v20 }
 0x176   : > { %v4156_v35 = vpop.f32.mrf.mxu0  ;;  %v1200_v53 = vpop.f32.mrf.mxu1 }
 0x177   : > { %v5798_v5 = vadd.f32 %v4156_v35, %v1312_v51  ;;  %v1311_v44 = vadd.f32 %v1200_v53, %v5675_v10 }
 0x178   : > { %v1506_v12 = vpop.f32.mrf.mxu0  ;;  %v4079_v61 = vpop.f32.mrf.mxu1 }
 0x179   : > { %v5801_v57 = vadd.f32 %v1506_v12, %v1311_v44  ;;  %v1314_v32 = vadd.f32 %v4079_v61, %v5680_v43 }
 0x17a   : > { %v4159_v13 = vpop.f32.mrf.mxu0  ;;  %v1210_v26 = vpop.f32.mrf.mxu1 }
 0x17b   : > { %v5804_v54 = vadd.f32 %v4159_v13, %v1314_v32  ;;  %v1313_v1 = vadd.f32 %v1210_v26, %v5685_v30 }
 0x17c   : > { %v1516_v21 = vpop.f32.mrf.mxu0  ;;  %v4082_v20 = vpop.f32.mrf.mxu1 }
 0x17d   : > { %v5807_v17 = vadd.f32 %v1516_v21, %v1313_v1  ;;  %v1316_v37 = vadd.f32 %v4082_v20, %v5690_v41 }
 0x17e   : > { %v4162_v55 = vpop.f32.mrf.mxu0  ;;  %v1220_v10 = vpop.f32.mrf.mxu1 }
 0x17f   : > { %v5810_v62 = vadd.f32 %v4162_v55, %v1316_v37  ;;  %v1315_v6 = vadd.f32 %v1220_v10, %v5695_v11 }
 0x180   : > { %v1526_v63 = vpop.f32.mrf.mxu0  ;;  %v4085_v43 = vpop.f32.mrf.mxu1 }
 0x181   : > { %v5813_v47 = vadd.f32 %v1526_v63, %v1315_v6  ;;  %v1318_v18 = vadd.f32 %v4085_v43, %v5700_v31 }
 0x182   : > { %v4165_v28 = vpop.f32.mrf.mxu0  ;;  %v1230_v30 = vpop.f32.mrf.mxu1 }
 0x183   : > { %v5816_v59 = vadd.f32 %v4165_v28, %v1318_v18  ;;  %v1317_v34 = vadd.f32 %v1230_v30, %v5705_v42 }
 0x184   : > { %v1536_v56 = vpop.f32.mrf.mxu0  ;;  %v4088_v41 = vpop.f32.mrf.mxu1 }
 0x185   : > { %6244 = vst [vmem:[#allocation2_spill] sm:$0xff] %v5816_v59  ;;  %v5819_v46 = vadd.f32 %v1536_v56, %v1317_v34  ;;  %v1320_v22 = vadd.f32 %v4088_v41, %v5710_v48 }
 0x186   : > { %v4168_v60 = vpop.f32.mrf.mxu0  ;;  %v1240_v11 = vpop.f32.mrf.mxu1 }
 0x187   : > { %6245 = vst [vmem:[#allocation3_spill] sm:$0xff] %v5819_v46  ;;  %v5822_v7 = vadd.f32 %v4168_v60, %v1320_v22  ;;  %v1319_v3 = vadd.f32 %v1240_v11, %v5715_v27 }
 0x188   : > { %v1546_v40 = vpop.f32.mrf.mxu0  ;;  %v4091_v31 = vpop.f32.mrf.mxu1 }
 0x189   : > { %6246 = vst [vmem:[#allocation4_spill] sm:$0xff] %v5822_v7  ;;  %v5825_v51 = vadd.f32 %v1546_v40, %v1319_v3  ;;  %v1322_v35 = vadd.f32 %v4091_v31, %v5720_v33 }
 0x18a   : > { %v4171_v53 = vpop.f32.mrf.mxu0  ;;  %v1250_v42 = vpop.f32.mrf.mxu1 }
 0x18b   : > { %6247 = vst [vmem:[#allocation5_spill] sm:$0xff] %v5825_v51  ;;  %v5828_v44 = vadd.f32 %v4171_v53, %v1322_v35  ;;  %v1321_v12 = vadd.f32 %v1250_v42, %v5725_v39 }
 0x18c   : > { %v1556_v61 = vpop.f32.mrf.mxu0  ;;  %v4094_v48 = vpop.f32.mrf.mxu1 }
 0x18d   : > { %6248 = vst [vmem:[#allocation6_spill] sm:$0xff] %v5828_v44  ;;  %v5831_v32 = vadd.f32 %v1556_v61, %v1321_v12  ;;  %v1324_v13 = vadd.f32 %v4094_v48, %v5729_v2 }
 0x18e   : > { %v4174_v26 = vpop.f32.mrf.mxu0  ;;  %v1260_v27 = vpop.f32.mrf.mxu1 }
 0x18f   : > { %6249 = vst [vmem:[#allocation7_spill] sm:$0xff] %v5831_v32  ;;  %v5834_v1 = vadd.f32 %v4174_v26, %v1324_v13  ;;  %v1323_v21 = vadd.f32 %v1260_v27, %v5733_v19 }
 0x190   : > { %v1566_v20 = vpop.f32.mrf.mxu0  ;;  %v4097_v33 = vpop.f32.mrf.mxu1 }
 0x191   : > { %6250 = vst [vmem:[#allocation8_spill] sm:$0xff] %v5834_v1  ;;  %v5837_v37 = vadd.f32 %v1566_v20, %v1323_v21  ;;  %v1326_v55 = vadd.f32 %v4097_v33, %v5738_v52 }
 0x192   : > { %v4177_v10 = vpop.f32.mrf.mxu0  ;;  %v1270_v39 = vpop.f32.mrf.mxu1 }
 0x193   : > { %6251 = vst [vmem:[#allocation9_spill] sm:$0xff] %v5837_v37  ;;  %v5840_v6 = vadd.f32 %v4177_v10, %v1326_v55  ;;  %v1325_v63 = vadd.f32 %v1270_v39, %v5744_v16 }
 0x194   : > { %v1576_v43 = vpop.f32.mrf.mxu0  ;;  %v4100_v2 = vpop.f32.mrf.mxu1 }
 0x195   : > { %6252 = vst [vmem:[#allocation10_spill] sm:$0xff] %v5840_v6  ;;  %v5843_v18 = vadd.f32 %v1576_v43, %v1325_v63  ;;  %v1328_v28 = vadd.f32 %v4100_v2, %v5749_v8 }
 0x196   : > { %v4180_v30 = vpop.f32.mrf.mxu0  ;;  %v1280_v19 = vpop.f32.mrf.mxu1 }
 0x197   : > { %6253 = vst [vmem:[#allocation11_spill] sm:$0xff] %v5843_v18  ;;  %v5846_v34 = vadd.f32 %v4180_v30, %v1328_v28  ;;  %v1327_v56 = vadd.f32 %v1280_v19, %v5753_v25 }
 0x198   : > { %v1586_v41 = vpop.f32.mrf.mxu0  ;;  %v4103_v52 = vpop.f32.mrf.mxu1 }
 0x199   : > { %6254 = vst [vmem:[#allocation12_spill] sm:$0xff] %v5846_v34  ;;  %v5849_v22 = vadd.f32 %v1586_v41, %v1327_v56  ;;  %v1330_v60 = vadd.f32 %v4103_v52, %v5756_v23 }
 0x19a   : > { %v4183_v11 = vpop.f32.mrf.mxu0  ;;  %v1290_v16 = vpop.f32.mrf.mxu1 }
 0x19b   : > { %6255 = vst [vmem:[#allocation13_spill] sm:$0xff] %v5849_v22  ;;  %v5852_v3 = vadd.f32 %v4183_v11, %v1330_v60  ;;  %v1329_v40 = vadd.f32 %v1290_v16, %v5759_v49 }
 0x19c   : > { %v1596_v31 = vpop.f32.mrf.mxu0  ;;  %v4218_v8 = vpop.f32.mrf.mxu1 }
 0x19d   : > { %6256 = vst [vmem:[#allocation14_spill] sm:$0xff] %v5852_v3  ;;  %v5855_v35 = vadd.f32 %v1596_v31, %v1329_v40 }
 0x19e   : > { %v5857_v53 = vpop.f32.mrf.mxu0  ;;  %v1752_v42 = vpop.f32.mrf.mxu1 }
 0x19f   : > { %6257 = vst [vmem:[#allocation15_spill] sm:$0xff] %v5855_v35 }
 0x1a0   : > { %v5859_v25 = vpop.f32.mrf.mxu0  ;;  %v4221_v12 = vpop.f32.mrf.mxu1 }
 0x1a2   : > { %v5861_v61 = vpop.f32.mrf.mxu0  ;;  %v5863_v48 = vpop.f32.mrf.mxu1 }
 0x1a4   : > { %v5865_v23 = vpop.f32.mrf.mxu0  ;;  %v5867_v13 = vpop.f32.mrf.mxu1 }
 0x1a6   : > { %v5869_v26 = vpop.f32.mrf.mxu0  ;;  %v5871_v49 = vpop.f32.mrf.mxu1 }
 0x1a8   : > { %v5873_v27 = vpop.f32.mrf.mxu0  ;;  %v5875_v21 = vpop.f32.mrf.mxu1 }
 0x1aa   : > { %v5877_v20 = vpop.f32.mrf.mxu0  ;;  %v5879_v33 = vpop.f32.mrf.mxu1 }
 0x1ac   : > { %v5881_v55 = vpop.f32.mrf.mxu0  ;;  %v5883_v10 = vpop.f32.mrf.mxu1 }
 0x1ae   : > { %v5885_v39 = vpop.f32.mrf.mxu0  ;;  %v5887_v63 = vpop.f32.mrf.mxu1 }
 0x1b0   : > { %v5889_v43 = vpop.f32.mrf.mxu0  ;;  %v5891_v2 = vpop.f32.mrf.mxu1 }
 0x1b2   : > { %v5893_v28 = vpop.f32.mrf.mxu0  ;;  %v5895_v30 = vpop.f32.mrf.mxu1 }
 0x1b4   : > { %v5897_v19 = vpop.f32.mrf.mxu0  ;;  %v5899_v56 = vpop.f32.mrf.mxu1 }
 0x1b6   : > { %v5901_v41 = vpop.f32.mrf.mxu0  ;;  %v5903_v52 = vpop.f32.mrf.mxu1 }
 0x1b8   : > { %v5905_v60 = vpop.f32.mrf.mxu0  ;;  %v5907_v11 = vpop.f32.mrf.mxu1 }
 0x1ba   : > { %v5909_v16 = vpop.f32.mrf.mxu0  ;;  %v5911_v40 = vpop.f32.mrf.mxu1 }
 0x1bc   : > { %v5913_v31 = vpop.f32.mrf.mxu0  ;;  %v5915_v35 = vpop.f32.mrf.mxu1 }
 0x1be   : > { %v5917_v3 = vpop.f32.mrf.mxu0  ;;  %v5919_v22 = vpop.f32.mrf.mxu1 }
 0x1c0   : > { %v5921_v34 = vpop.f32.mrf.mxu0  ;;  %v5923_v18 = vpop.f32.mrf.mxu1 }
 0x1c1   : > { %6258 = vst [vmem:[#allocation16_spill] sm:$0xff] %v5921_v34  ;;  %6259 = vst [vmem:[#allocation17_spill] sm:$0xff] %v5923_v18 }
 0x1c2   : > { %v5925_v6 = vpop.f32.mrf.mxu0  ;;  %v5927_v37 = vpop.f32.mrf.mxu1 }
 0x1c3   : > { %6260 = vst [vmem:[#allocation18_spill] sm:$0xff] %v5925_v6  ;;  %6261 = vst [vmem:[#allocation19_spill] sm:$0xff] %v5927_v37 }
 0x1c4   : > { %v5929_v1 = vpop.f32.mrf.mxu0  ;;  %v5931_v32 = vpop.f32.mrf.mxu1 }
 0x1c5   : > { %6262 = vst [vmem:[#allocation20_spill] sm:$0xff] %v5929_v1  ;;  %6263 = vst [vmem:[#allocation21_spill] sm:$0xff] %v5931_v32 }
 0x1c6   : > { %v5933_v44 = vpop.f32.mrf.mxu0  ;;  %v5935_v51 = vpop.f32.mrf.mxu1 }
 0x1c7   : > { %6264 = vst [vmem:[#allocation22_spill] sm:$0xff] %v5933_v44  ;;  %6265 = vst [vmem:[#allocation23_spill] sm:$0xff] %v5935_v51 }
 0x1c8   : > { %v5937_v7 = vpop.f32.mrf.mxu0  ;;  %v5939_v46 = vpop.f32.mrf.mxu1 }
 0x1c9   : > { %6266 = vst [vmem:[#allocation24_spill] sm:$0xff] %v5937_v7  ;;  %6267 = vst [vmem:[#allocation25_spill] sm:$0xff] %v5939_v46 }
 0x1ca   : > { %v5941_v59 = vpop.f32.mrf.mxu0  ;;  %v5943_v34 = vpop.f32.mrf.mxu1 }
 0x1cb   : > { %6268 = vst [vmem:[#allocation26_spill] sm:$0xff] %v5941_v59  ;;  %6269 = vst [vmem:[#allocation27_spill] sm:$0xff] %v5943_v34 }
 0x1cc   : > { %v5945_v18 = vpop.f32.mrf.mxu0  ;;  %v5947_v6 = vpop.f32.mrf.mxu1 }
 0x1cd   : > { %6270 = vst [vmem:[#allocation28_spill] sm:$0xff] %v5945_v18  ;;  %6271 = vst [vmem:[#allocation29_spill] sm:$0xff] %v5947_v6 }
 0x1ce   : > { %v5949_v37 = vpop.f32.mrf.mxu0  ;;  %v5951_v1 = vpop.f32.mrf.mxu1 }
 0x1cf   : > { %6272 = vst [vmem:[#allocation30_spill] sm:$0xff] %v5949_v37  ;;  %6273 = vst [vmem:[#allocation31_spill] sm:$0xff] %v5951_v1  ;;  %v1912_v37 = vadd.f32 %v4218_v8, %v5762_v14  ;;  %v1913_v8 = vadd.f32 %v5863_v48, %v5771_v9 }
 0x1d0   : > { %v5953_v32 = vpop.f32.mrf.mxu0  ;;  %v5955_v44 = vpop.f32.mrf.mxu1 }
 0x1d1   : > { %6274 = vst [vmem:[#allocation32_spill] sm:$0xff] %v5953_v32  ;;  %v1911_v32 = vadd.f32 %v1752_v42, %v5765_v29  ;;  %v1916_v29 = vadd.f32 %v5867_v13, %v5774_v38 }
 0x1d2   : > { %v5957_v51 = vpop.f32.mrf.mxu0  ;;  %v5959_v7 = vpop.f32.mrf.mxu1 }
 0x1d3   : > { %6275 = vst [vmem:[#allocation33_spill] sm:$0xff] %v5957_v51  ;;  %6276 = vst [vmem:[#allocation34_spill] sm:$0xff] %v5959_v7  ;;  %v2218_v14 = vadd.f32 %v5859_v25, %v1911_v32  ;;  %v1915_v32 = vadd.f32 %v5871_v49, %v5777_v4  ;;  %v2223_v13 = vadd.f32 %v5869_v26, %v1916_v29 }
 0x1d4   : > { %v5961_v46 = vpop.f32.mrf.mxu0  ;;  %v5963_v59 = vpop.f32.mrf.mxu1  ;;  %v1917_v26 = vadd.f32 %v5879_v33, %v5783_v0 }
 0x1d5   : > { %6277 = vst [vmem:[#allocation35_spill] sm:$0xff] %v5961_v46  ;;  %6278 = vst [vmem:[#allocation36_spill] sm:$0xff] %v5963_v59  ;;  %v2219_v46 = vadd.f32 %v5857_v53, %v1912_v37  ;;  %v1914_v59 = vadd.f32 %v4221_v12, %v5768_v36 }
 0x1d6   : > { %v5965_v34 = vpop.f32.mrf.mxu0  ;;  %v5967_v18 = vpop.f32.mrf.mxu1 }
 0x1d7   : > { %6279 = vst [vmem:[#allocation37_spill] sm:$0xff] %v5965_v34  ;;  %6280 = vst [vmem:[#allocation38_spill] sm:$0xff] %v5967_v18  ;;  %v2221_v36 = vadd.f32 %v5861_v61, %v1914_v59 }
 0x1d8   : > { %v5970_v6 = vpop.f32.mrf.mxu0  ;;  %v5972_v1 = vpop.f32.mrf.mxu1 }
 0x1d9   : > { %6281 = vst [vmem:[#allocation39_spill] sm:$0xff] %v5970_v6 }
 0x1da   : > { %v5975_v51 = vpop.f32.mrf.mxu0  ;;  %v5977_v7 = vpop.f32.mrf.mxu1 }
 0x1db   : > { %6282 = vst [vmem:[#allocation40_spill] sm:$0xff] %v5975_v51  ;;  %v5991_v51 = vld [vmem:[%s6152_s2] ss:$0 sm:$0xff] }
 0x1dc   : > { %v5981_v34 = vpop.f32.mrf.mxu0  ;;  %v4378_v18 = vpop.f32.mrf.mxu1 }
 0x1dd   : > { %6283 = vst [vmem:[#allocation41_spill] sm:$0xff] %v5981_v34  ;;  %v2525_v6 = vadd.f32 %v4378_v18, %v2219_v46  ;;  %v2220_v18 = vadd.f32 %v5865_v23, %v1913_v8  ;;  %v1918_v34 = vadd.f32 %v5875_v21, %v5780_v45 }
 0x1de   : > { %v4458_v42 = vpop.f32.mrf.mxu0  ;;  %v2365_v37 = vpop.f32.mrf.mxu1 }
 0x1df   : > { %v2831_v53 = vadd.f32 %v4458_v42, %v2525_v6  ;;  %v2524_v12 = vadd.f32 %v2365_v37, %v2218_v14  ;;  %v2222_v14 = vadd.f32 %v5873_v27, %v1915_v32 }
 0x1e0   : > { %v2671_v9 = vpop.f32.mrf.mxu0  ;;  %v4381_v46 = vpop.f32.mrf.mxu1 }
 0x1e1   : > { %v2870_v38 = vadd.f32 %v5991_v51, %v2831_v53  ;;  %v2830_v25 = vadd.f32 %v2671_v9, %v2524_v12  ;;  %v2527_v48 = vadd.f32 %v4381_v46, %v2221_v36  ;;  %v2225_v36 = vadd.f32 %v5877_v20, %v1918_v34 }
 0x1e2   : > { %v4461_v4 = vpop.f32.mrf.mxu0  ;;  %v2375_v59 = vpop.f32.mrf.mxu1  ;;  %v1920_v53 = vadd.f32 %v5883_v10, %v5786_v58  ;;  %v2224_v46 = vadd.f32 %v5881_v55, %v1917_v26 }
 0x1e3   : > { %v2902_v6 = vmax.f32 %v2870_v38, 0.0  ;;  %v2869_v61 = vadd.f32 %v5991_v51, %v2830_v25  ;;  %v2833_v23 = vadd.f32 %v4461_v4, %v2527_v48  ;;  %v2526_v49 = vadd.f32 %v2375_v59, %v2220_v18 }
 0x1e4   : > { %v2681_v45 = vpop.f32.mrf.mxu0  ;;  %v4384_v21 = vpop.f32.mrf.mxu1  ;;  %v1919_v18 = vadd.f32 %v5887_v63, %v5789_v50  ;;  %v2227_v48 = vadd.f32 %v5885_v39, %v1920_v53 }
 0x1e5   : > { %2934 = vst [vmem:[%s6005_s19 + $0x8] sm:$0xff] %v2902_v6  ;;  %v2901_v8 = vmax.f32 %v2869_v61, 0.0  ;;  %v2872_v29 = vadd.f32 %v5991_v51, %v2833_v23  ;;  %v2832_v42 = vadd.f32 %v2681_v45, %v2526_v49  ;;  %v2529_v37 = vadd.f32 %v4384_v21, %v2223_v13 }
 0x1e6   : > { %v4464_v12 = vpop.f32.mrf.mxu0  ;;  %v2385_v9 = vpop.f32.mrf.mxu1  ;;  %v1922_v13 = vadd.f32 %v5891_v2, %v5792_v24  ;;  %v2226_v61 = vadd.f32 %v5889_v43, %v1919_v18  ;;  %v1921_v23 = vadd.f32 %v5895_v30, %v5795_v15  ;;  %v1924_v21 = vadd.f32 %v5899_v56, %v5798_v5 }
 0x1e7   : > { %2933 = vst [vmem:[%s6005_s19] sm:$0xff] %v2901_v8  ;;  %v2904_v27 = vmax.f32 %v2872_v29, 0.0  ;;  %v2871_v0 = vadd.f32 %v5991_v51, %v2832_v42  ;;  %v2835_v33 = vadd.f32 %v4464_v12, %v2529_v37  ;;  %v2528_v32 = vadd.f32 %v2385_v9, %v2222_v14 }
 0x1e8   : > { %v2691_v38 = vpop.f32.mrf.mxu0  ;;  %v4387_v25 = vpop.f32.mrf.mxu1  ;;  %v2229_v45 = vadd.f32 %v5893_v28, %v1922_v13  ;;  %v2228_v37 = vadd.f32 %v5897_v19, %v1921_v23  ;;  %v6284_v23 = vld [vmem:[#allocation2_spill] sm:$0xff] }
 0x1e9   : > { %2936 = vst [vmem:[%s6005_s19 + $0x18] sm:$0xff] %v2904_v27  ;;  %v2903_v34 = vmax.f32 %v2871_v0, 0.0  ;;  %v2874_v58 = vadd.f32 %v5991_v51, %v2835_v33  ;;  %v2834_v20 = vadd.f32 %v2691_v38, %v2528_v32  ;;  %v2531_v10 = vadd.f32 %v4387_v25, %v2225_v36 }
 0x1ea   : > { %v4467_v4 = vpop.f32.mrf.mxu0  ;;  %v2395_v59 = vpop.f32.mrf.mxu1  ;;  %v1923_v36 = vadd.f32 %v5903_v52, %v5801_v57  ;;  %v2231_v27 = vadd.f32 %v5901_v41, %v1924_v21  ;;  %v1926_v0 = vadd.f32 %v5907_v11, %v5804_v54  ;;  %v1925_v38 = vadd.f32 %v5911_v40, %v5807_v17  ;;  %v6287_v21 = vld [vmem:[#allocation3_spill] sm:$0xff] }
 0x1eb   : > { %2935 = vst [vmem:[%s6005_s19 + $0x10] sm:$0xff] %v2903_v34  ;;  %v2906_v55 = vmax.f32 %v2874_v58, 0.0  ;;  %v2873_v50 = vadd.f32 %v5991_v51, %v2834_v20  ;;  %v2837_v63 = vadd.f32 %v4467_v4, %v2531_v10  ;;  %v2530_v6 = vadd.f32 %v2395_v59, %v2224_v46 }
 0x1ec   : > { %v2701_v49 = vpop.f32.mrf.mxu0  ;;  %v4390_v14 = vpop.f32.mrf.mxu1  ;;  %v2230_v18 = vadd.f32 %v5905_v60, %v1923_v36  ;;  %v2233_v20 = vadd.f32 %v5909_v16, %v1926_v0  ;;  %v1928_v10 = vadd.f32 %v5915_v35, %v5810_v62  ;;  %v2232_v59 = vadd.f32 %v5913_v31, %v1925_v38  ;;  %v6289_v36 = vld [vmem:[#allocation18_spill] sm:$0xff] }
 0x1ed   : > { %2938 = vst [vmem:[%s6005_s19 + $0x28] sm:$0xff] %v2906_v55  ;;  %v2905_v39 = vmax.f32 %v2873_v50, 0.0  ;;  %v2876_v24 = vadd.f32 %v5991_v51, %v2837_v63  ;;  %v2836_v2 = vadd.f32 %v2701_v49, %v2530_v6  ;;  %v2533_v26 = vadd.f32 %v4390_v14, %v2227_v48  ;;  %v6285_v49 = vld [vmem:[#allocation17_spill] sm:$0xff] }
 0x1ee   : > { %v4470_v8 = vpop.f32.mrf.mxu0  ;;  %v2405_v29 = vpop.f32.mrf.mxu1  ;;  %v1927_v55 = vadd.f32 %v5919_v22, %v5813_v47  ;;  %v1930_v14 = vadd.f32 %v6285_v49, %v6284_v23 }
 0x1ef   : > { %2937 = vst [vmem:[%s6005_s19 + $0x20] sm:$0xff] %v2905_v39  ;;  %v2908_v43 = vmax.f32 %v2876_v24, 0.0  ;;  %v2875_v15 = vadd.f32 %v5991_v51, %v2836_v2  ;;  %v2839_v30 = vadd.f32 %v4470_v8, %v2533_v26  ;;  %v2532_v42 = vadd.f32 %v2405_v29, %v2226_v61  ;;  %v6286_v26 = vld [vmem:[#allocation16_spill] sm:$0xff]  ;;  %v6288_v8 = vld [vmem:[#allocation19_spill] sm:$0xff] }
 0x1f0   : > { %v2711_v53 = vpop.f32.mrf.mxu0  ;;  %v4393_v12 = vpop.f32.mrf.mxu1  ;;  %v2235_v61 = vadd.f32 %v5917_v3, %v1928_v10  ;;  %v1929_v29 = vadd.f32 %v6288_v8, %v6287_v21  ;;  %v6296_v10 = vld [vmem:[#allocation6_spill] sm:$0xff] }
 0x1f1   : > { %2940 = vst [vmem:[%s6005_s19 + $0x38] sm:$0xff] %v2908_v43  ;;  %v2907_v28 = vmax.f32 %v2875_v15, 0.0  ;;  %v2878_v5 = vadd.f32 %v5991_v51, %v2839_v30  ;;  %v2838_v56 = vadd.f32 %v2711_v53, %v2532_v42  ;;  %v2535_v9 = vadd.f32 %v4393_v12, %v2229_v45  ;;  %v6290_v12 = vld [vmem:[#allocation4_spill] sm:$0xff] }
 0x1f2   : > { %v4473_v33 = vpop.f32.mrf.mxu0  ;;  %v2415_v32 = vpop.f32.mrf.mxu1  ;;  %v2234_v45 = vadd.f32 %v6286_v26, %v1927_v55  ;;  %v2237_v53 = vadd.f32 %v6289_v36, %v1930_v14 }
 0x1f3   : > { %2939 = vst [vmem:[%s6005_s19 + $0x30] sm:$0xff] %v2907_v28  ;;  %v2910_v19 = vmax.f32 %v2878_v5, 0.0  ;;  %v2877_v57 = vadd.f32 %v5991_v51, %v2838_v56  ;;  %v2841_v52 = vadd.f32 %v4473_v33, %v2535_v9  ;;  %v2534_v46 = vadd.f32 %v2415_v32, %v2228_v37  ;;  %v6291_v28 = vld [vmem:[#allocation21_spill] sm:$0xff] }
 0x1f4   : > { %v2721_v25 = vpop.f32.mrf.mxu0  ;;  %v4396_v34 = vpop.f32.mrf.mxu1  ;;  %v1932_v5 = vadd.f32 %v6291_v28, %v6290_v12 }
 0x1f5   : > { %2942 = vst [vmem:[%s6005_s19 + $0x48] sm:$0xff] %v2910_v19  ;;  %v2909_v41 = vmax.f32 %v2877_v57, 0.0  ;;  %v2880_v54 = vadd.f32 %v5991_v51, %v2841_v52  ;;  %v2840_v11 = vadd.f32 %v2721_v25, %v2534_v46  ;;  %v2537_v58 = vadd.f32 %v4396_v34, %v2231_v27  ;;  %v6292_v19 = vld [vmem:[#allocation20_spill] sm:$0xff]  ;;  %v6293_v52 = vld [vmem:[#allocation5_spill] sm:$0xff]  ;;  %v6294_v46 = vld [vmem:[#allocation23_spill] sm:$0xff] }
 0x1f6   : > { %v4476_v48 = vpop.f32.mrf.mxu0  ;;  %v2425_v13 = vpop.f32.mrf.mxu1  ;;  %v2236_v57 = vadd.f32 %v6292_v19, %v1929_v29 }
 0x1f7   : > { %2941 = vst [vmem:[%s6005_s19 + $0x40] sm:$0xff] %v2909_v41  ;;  %v2912_v60 = vmax.f32 %v2880_v54, 0.0  ;;  %v2879_v17 = vadd.f32 %v5991_v51, %v2840_v11  ;;  %v2843_v40 = vadd.f32 %v4476_v48, %v2537_v58  ;;  %v2536_v4 = vadd.f32 %v2425_v13, %v2230_v18  ;;  %v6295_v58 = vld [vmem:[#allocation22_spill] sm:$0xff]  ;;  %v6297_v48 = vld [vmem:[#allocation25_spill] sm:$0xff] }
 0x1f8   : > { %v2731_v50 = vpop.f32.mrf.mxu0  ;;  %v4399_v63 = vpop.f32.mrf.mxu1  ;;  %v1931_v18 = vadd.f32 %v6294_v46, %v6293_v52  ;;  %v1934_v13 = vadd.f32 %v6297_v48, %v6296_v10 }
 0x1f9   : > { %2944 = vst [vmem:[%s6005_s19 + $0x58] sm:$0xff] %v2912_v60  ;;  %v2911_v16 = vmax.f32 %v2879_v17, 0.0  ;;  %v2882_v62 = vadd.f32 %v5991_v51, %v2843_v40  ;;  %v2842_v35 = vadd.f32 %v2731_v50, %v2536_v4  ;;  %v2539_v6 = vadd.f32 %v4399_v63, %v2233_v20  ;;  %v6298_v50 = vld [vmem:[#allocation24_spill] sm:$0xff] }
 0x1fa   : > { %v4479_v39 = vpop.f32.mrf.mxu0  ;;  %v2435_v24 = vpop.f32.mrf.mxu1  ;;  %v2239_v20 = vadd.f32 %v6295_v58, %v1932_v5  ;;  %v2238_v63 = vadd.f32 %v6298_v50, %v1931_v18 }
 0x1fb   : > { %2943 = vst [vmem:[%s6005_s19 + $0x50] sm:$0xff] %v2911_v16  ;;  %v2914_v31 = vmax.f32 %v2882_v62, 0.0  ;;  %v2881_v47 = vadd.f32 %v5991_v51, %v2842_v35  ;;  %v2845_v22 = vadd.f32 %v4479_v39, %v2539_v6  ;;  %v2538_v2 = vadd.f32 %v2435_v24, %v2232_v59  ;;  %v6299_v16 = vld [vmem:[#allocation7_spill] sm:$0xff]  ;;  %v6301_v24 = vld [vmem:[#allocation26_spill] sm:$0xff] }
 0x1fc   : > { %v2741_v43 = vpop.f32.mrf.mxu0  ;;  %v4402_v15 = vpop.f32.mrf.mxu1  ;;  %v6300_v62 = vld [vmem:[#allocation27_spill] sm:$0xff] }
 0x1fd   : > { %2946 = vst [vmem:[%s6005_s19 + $0x68] sm:$0xff] %v2914_v31  ;;  %v2913_v3 = vmax.f32 %v2881_v47, 0.0  ;;  %v2884_v30 = vadd.f32 %v5991_v51, %v2845_v22  ;;  %v2844_v42 = vadd.f32 %v2741_v43, %v2538_v2  ;;  %v2541_v37 = vadd.f32 %v4402_v15, %v2235_v61  ;;  %v6302_v47 = vld [vmem:[#allocation8_spill] sm:$0xff]  ;;  %v6303_v22 = vld [vmem:[#allocation29_spill] sm:$0xff] }
 0x1fe   : > { %v4482_v56 = vpop.f32.mrf.mxu0  ;;  %v2445_v9 = vpop.f32.mrf.mxu1  ;;  %v1933_v35 = vadd.f32 %v6300_v62, %v6299_v16  ;;  %v2241_v31 = vadd.f32 %v6301_v24, %v1934_v13  ;;  %v1936_v2 = vadd.f32 %v6303_v22, %v6302_v47  ;;  %v6304_v15 = vld [vmem:[#allocation28_spill] sm:$0xff]  ;;  %v6312_v13 = vld [vmem:[#allocation33_spill] sm:$0xff] }
 0x1ff   : > { %2945 = vst [vmem:[%s6005_s19 + $0x60] sm:$0xff] %v2913_v3  ;;  %v2916_v27 = vmax.f32 %v2884_v30, 0.0  ;;  %v2883_v0 = vadd.f32 %v5991_v51, %v2844_v42  ;;  %v2847_v33 = vadd.f32 %v4482_v56, %v2541_v37  ;;  %v2540_v32 = vadd.f32 %v2445_v9, %v2234_v45  ;;  %v6305_v30 = vld [vmem:[#allocation9_spill] sm:$0xff]  ;;  %v6306_v42 = vld [vmem:[#allocation31_spill] sm:$0xff]  ;;  %v6307_v9 = vld [vmem:[#allocation30_spill] sm:$0xff] }
 0x200   : > { %v2751_v38 = vpop.f32.mrf.mxu0  ;;  %v4405_v25 = vpop.f32.mrf.mxu1  ;;  %v2240_v3 = vadd.f32 %v6304_v15, %v1933_v35  ;;  %v1935_v37 = vadd.f32 %v6306_v42, %v6305_v30  ;;  %v6315_v35 = vld [vmem:[#allocation35_spill] sm:$0xff] }
 0x201   : > { %2948 = vst [vmem:[%s6005_s19 + $0x78] sm:$0xff] %v2916_v27  ;;  %v2915_v34 = vmax.f32 %v2883_v0, 0.0  ;;  %v2886_v41 = vadd.f32 %v5991_v51, %v2847_v33  ;;  %v2846_v54 = vadd.f32 %v2751_v38, %v2540_v32  ;;  %v2543_v11 = vadd.f32 %v4405_v25, %v2237_v53  ;;  %v6308_v0 = vld [vmem:[#allocation10_spill] sm:$0xff]  ;;  %v6309_v38 = vld [vmem:[#allocation32_spill] sm:$0xff]  ;;  %v6320_v42 = vld [vmem:[#allocation39_spill] sm:$0xff] }
 0x202   : > { %v4485_v60 = vpop.f32.mrf.mxu0  ;;  %v2455_v17 = vpop.f32.mrf.mxu1  ;;  %v2243_v27 = vadd.f32 %v6307_v9, %v1936_v2  ;;  %v1938_v33 = vadd.f32 %v5955_v44, %v6308_v0  ;;  %v2242_v25 = vadd.f32 %v6309_v38, %v1935_v37  ;;  %v6318_v2 = vld [vmem:[#allocation37_spill] sm:$0xff] }
 0x203   : > { %2947 = vst [vmem:[%s6005_s19 + $0x70] sm:$0xff] %v2915_v34  ;;  %v2918_v40 = vmax.f32 %v2886_v41, 0.0  ;;  %v2885_v4 = vadd.f32 %v5991_v51, %v2846_v54  ;;  %v2849_v59 = vadd.f32 %v4485_v60, %v2543_v11  ;;  %v2542_v55 = vadd.f32 %v2455_v17, %v2236_v57  ;;  %v6310_v34 = vld [vmem:[#allocation11_spill] sm:$0xff]  ;;  %v6311_v41 = vld [vmem:[#allocation34_spill] sm:$0xff]  ;;  %v6313_v17 = vld [vmem:[#allocation12_spill] sm:$0xff] }
 0x204   : > { %v2761_v6 = vpop.f32.mrf.mxu0  ;;  %v4408_v61 = vpop.f32.mrf.mxu1  ;;  %v1937_v54 = vadd.f32 %v6311_v41, %v6310_v34  ;;  %v2245_v60 = vadd.f32 %v6312_v13, %v1938_v33 }
 0x205   : > { %2950 = vst [vmem:[%s6005_s19 + $0x88] sm:$0xff] %v2918_v40  ;;  %v2917_v23 = vmax.f32 %v2885_v4, 0.0  ;;  %v2888_v49 = vadd.f32 %v5991_v51, %v2849_v59  ;;  %v2848_v14 = vadd.f32 %v2761_v6, %v2542_v55  ;;  %v2545_v39 = vadd.f32 %v4408_v61, %v2239_v20  ;;  %v6314_v40 = vld [vmem:[#allocation36_spill] sm:$0xff]  ;;  %v6316_v61 = vld [vmem:[#allocation13_spill] sm:$0xff] }
 0x206   : > { %v4488_v26 = vpop.f32.mrf.mxu0  ;;  %v2465_v45 = vpop.f32.mrf.mxu1  ;;  %v1940_v4 = vadd.f32 %v6314_v40, %v6313_v17  ;;  %v2244_v6 = vadd.f32 %v6315_v35, %v1937_v54 }
 0x207   : > { %2949 = vst [vmem:[%s6005_s19 + $0x80] sm:$0xff] %v2917_v23  ;;  %v2920_v21 = vmax.f32 %v2888_v49, 0.0  ;;  %v2887_v8 = vadd.f32 %v5991_v51, %v2848_v14  ;;  %v2851_v29 = vadd.f32 %v4488_v26, %v2545_v39  ;;  %v2544_v43 = vadd.f32 %v2465_v45, %v2238_v63  ;;  %v6317_v23 = vld [vmem:[#allocation38_spill] sm:$0xff] }
 0x208   : > { %v2771_v36 = vpop.f32.mrf.mxu0  ;;  %v4411_v53 = vpop.f32.mrf.mxu1  ;;  %v1939_v49 = vadd.f32 %v6317_v23, %v6316_v61  ;;  %v2247_v26 = vadd.f32 %v6318_v2, %v1940_v4  ;;  %v6319_v45 = vld [vmem:[#allocation14_spill] sm:$0xff] }
 0x209   : > { %2952 = vst [vmem:[%s6005_s19 + $0x98] sm:$0xff] %v2920_v21  ;;  %v2919_v12 = vmax.f32 %v2887_v8, 0.0  ;;  %v2890_v28 = vadd.f32 %v5991_v51, %v2851_v29  ;;  %v2850_v5 = vadd.f32 %v2771_v36, %v2544_v43  ;;  %v2547_v56 = vadd.f32 %v4411_v53, %v2241_v31  ;;  %v6321_v36 = vld [vmem:[#allocation15_spill] sm:$0xff] }
 0x20a   : > { %v4491_v32 = vpop.f32.mrf.mxu0  ;;  %v2475_v19 = vpop.f32.mrf.mxu1  ;;  %v1942_v21 = vadd.f32 %v5972_v1, %v6319_v45  ;;  %v2246_v37 = vadd.f32 %v6320_v42, %v1939_v49  ;;  %v1941_v53 = vadd.f32 %v5977_v7, %v6321_v36 }
 0x20b   : > { %2951 = vst [vmem:[%s6005_s19 + $0x90] sm:$0xff] %v2919_v12  ;;  %v2922_v57 = vmax.f32 %v2890_v28, 0.0  ;;  %v2889_v52 = vadd.f32 %v5991_v51, %v2850_v5  ;;  %v2853_v46 = vadd.f32 %v4491_v32, %v2547_v56  ;;  %v2546_v18 = vadd.f32 %v2475_v19, %v2240_v3 }
 0x20c   : > { %v2781_v11 = vpop.f32.mrf.mxu0  ;;  %v4414_v58 = vpop.f32.mrf.mxu1 }
 0x20d   : > { %2954 = vst [vmem:[%s6005_s19 + $0xa8] sm:$0xff] %v2922_v57  ;;  %v2921_v20 = vmax.f32 %v2889_v52, 0.0  ;;  %v2892_v44 = vadd.f32 %v5991_v51, %v2853_v46  ;;  %v2852_v10 = vadd.f32 %v2781_v11, %v2546_v18  ;;  %v2549_v48 = vadd.f32 %v4414_v58, %v2243_v27  ;;  %v6322_v27 = vld [vmem:[#allocation40_spill] sm:$0xff]  ;;  %v6323_v46 = vld [vmem:[#allocation41_spill] sm:$0xff] }
 0x20e   : > { %v4494_v59 = vpop.f32.mrf.mxu0  ;;  %v2485_v55 = vpop.f32.mrf.mxu1  ;;  %v2249_v0 = vadd.f32 %v6322_v27, %v1942_v21  ;;  %v2248_v18 = vadd.f32 %v6323_v46, %v1941_v53 }
 0x20f   : > { %2953 = vst [vmem:[%s6005_s19 + $0xa0] sm:$0xff] %v2921_v20  ;;  %v2924_v50 = vmax.f32 %v2892_v44, 0.0  ;;  %v2891_v63 = vadd.f32 %v5991_v51, %v2852_v10  ;;  %v2855_v16 = vadd.f32 %v4494_v59, %v2549_v48  ;;  %v2548_v62 = vadd.f32 %v2485_v55, %v2242_v25 }
 0x210   : > { %v2791_v14 = vpop.f32.mrf.mxu0  ;;  %v4417_v39 = vpop.f32.mrf.mxu1 }
 0x211   : > { %2956 = vst [vmem:[%s6005_s19 + $0xb8] sm:$0xff] %v2924_v50  ;;  %v2923_v24 = vmax.f32 %v2891_v63, 0.0  ;;  %v2894_v31 = vadd.f32 %v5991_v51, %v2855_v16  ;;  %v2854_v47 = vadd.f32 %v2791_v14, %v2548_v62  ;;  %v2551_v22 = vadd.f32 %v4417_v39, %v2245_v60 }
 0x212   : > { %v4497_v8 = vpop.f32.mrf.mxu0  ;;  %v2495_v29 = vpop.f32.mrf.mxu1 }
 0x213   : > { %2955 = vst [vmem:[%s6005_s19 + $0xb0] sm:$0xff] %v2923_v24  ;;  %v2926_v43 = vmax.f32 %v2894_v31, 0.0  ;;  %v2893_v15 = vadd.f32 %v5991_v51, %v2854_v47  ;;  %v2857_v3 = vadd.f32 %v4497_v8, %v2551_v22  ;;  %v2550_v30 = vadd.f32 %v2495_v29, %v2244_v6 }
 0x214   : > { %v2801_v12 = vpop.f32.mrf.mxu0  ;;  %v4420_v28 = vpop.f32.mrf.mxu1 }
 0x215   : > { %2958 = vst [vmem:[%s6005_s19 + $0xc8] sm:$0xff] %v2926_v43  ;;  %v2925_v5 = vmax.f32 %v2893_v15, 0.0  ;;  %v2896_v1 = vadd.f32 %v5991_v51, %v2857_v3  ;;  %v2856_v56 = vadd.f32 %v2801_v12, %v2550_v30  ;;  %v2553_v9 = vadd.f32 %v4420_v28, %v2247_v26 }
 0x216   : > { %v4500_v33 = vpop.f32.mrf.mxu0  ;;  %v2505_v32 = vpop.f32.mrf.mxu1 }
 0x217   : > { %2957 = vst [vmem:[%s6005_s19 + $0xc0] sm:$0xff] %v2925_v5  ;;  %v2928_v19 = vmax.f32 %v2896_v1, 0.0  ;;  %v2895_v57 = vadd.f32 %v5991_v51, %v2856_v56  ;;  %v2859_v52 = vadd.f32 %v4500_v33, %v2553_v9  ;;  %v2552_v7 = vadd.f32 %v2505_v32, %v2246_v37 }
 0x218   : > { %v2811_v38 = vpop.f32.mrf.mxu0  ;;  %v4423_v25 = vpop.f32.mrf.mxu1 }
 0x219   : > { %2960 = vst [vmem:[%s6005_s19 + $0xd8] sm:$0xff] %v2928_v19  ;;  %v2927_v34 = vmax.f32 %v2895_v57, 0.0  ;;  %v2898_v41 = vadd.f32 %v5991_v51, %v2859_v52  ;;  %v2858_v54 = vadd.f32 %v2811_v38, %v2552_v7  ;;  %v2555_v11 = vadd.f32 %v4423_v25, %v2249_v0 }
 0x21a   : > { %v4503_v58 = vpop.f32.mrf.mxu0  ;;  %v2515_v20 = vpop.f32.mrf.mxu1 }
 0x21b   : > { %2959 = vst [vmem:[%s6005_s19 + $0xd0] sm:$0xff] %v2927_v34  ;;  %v2930_v44 = vmax.f32 %v2898_v41, 0.0  ;;  %v2897_v10 = vadd.f32 %v5991_v51, %v2858_v54  ;;  %v2861_v48 = vadd.f32 %v4503_v58, %v2555_v11  ;;  %v2554_v13 = vadd.f32 %v2515_v20, %v2248_v18 }
 0x21c   : > { %v2821_v60 = vpop.f32.mrf.mxu0 }
 0x21d   : > { %2962 = vst [vmem:[%s6005_s19 + $0xe8] sm:$0xff] %v2930_v44  ;;  %v2929_v17 = vmax.f32 %v2897_v10, 0.0  ;;  %v2900_v40 = vadd.f32 %v5991_v51, %v2861_v48  ;;  %v2860_v4 = vadd.f32 %v2821_v60, %v2554_v13 }
 0x21f   : > { %2961 = vst [vmem:[%s6005_s19 + $0xe0] sm:$0xff] %v2929_v17  ;;  %v2932_v59 = vmax.f32 %v2900_v40, 0.0  ;;  %v2899_v55 = vadd.f32 %v5991_v51, %v2860_v4 }
 0x221   : > { %2964 = vst [vmem:[%s6005_s19 + $0xf8] sm:$0xff] %v2932_v59  ;;  %v2931_v50 = vmax.f32 %v2899_v55, 0.0 }
 0x223   : > { %2963 = vst [vmem:[%s6005_s19 + $0xf0] sm:$0xff] %v2931_v50 }
 0x224 PF: > { %s13_s12 = sadd.s32 1, %s4551_s12  }
 0x225   : > { %p10_p4 = scmp.ge.s32.totalorder %s13_s12, 4  }
 0x227   :  { %12 = sbr.rel (!%p10_p4) target bundleno = 1 (0x1), region = 72 }

// kernel: simple_conv_forward.5
= control target key start
LH: loop header
LB: loop body
LE: loop exit
PB: predicated region body
PF: predicated region fallthrough
CT: control target
= control target key end

     0   :  { %s5950_s12 = smov 0   ;;  %s8671_s0 = inlined_call_operand.vmem [shape: f32[2,5,5,512], index: 0, kind: input, shape index: {}]   ;;  %s8672_s1 = inlined_call_operand.vmem [shape: f32[9,128,128], index: 1, kind: input, shape index: {}]   ;;  %s8673_s2 = inlined_call_operand.vmem [shape: f32[1,128], index: 2, kind: input, shape index: {}]   ;;  %s8674_s3 = inlined_call_operand.vmem [shape: f32[2,4,4,128], index: 3, kind: output, shape index: {}]  }
   0x1 LB: > { %s3477_s13 = sadd.s32 4294967295, %s5926_s12   ;;  %p3481_p0 = scmp.ge.s32.totalorder %s5926_s12, 1  ;;  %s5926_s12 = sphi %s5950_s12, %s13_s12  }
   0x2   : > { %p137_p1 = scmp.lt.s32.totalorder %s5926_s12, 3 }
   0x4   : > { %p138_p2 = pnand %p3481_p0, %p137_p1 }
   0x6   : > { %141 = sbr.rel (%p138_p2) target bundleno = 825 (0x339), region = 32 }
   0xb   : > { %v5961_v0 = vld [vmem:[%s8672_s1 + $0xf8] sm:$0xff]  ;;  %v5928_v2 = vmov 0.0   ;;  %v5971_v3 = vld [vmem:[%s8672_s1 + $0xf0] sm:$0xff]  ;;  %v5982_v5 = vld [vmem:[%s8672_s1 + $0xe8] sm:$0xff]  ;;  %p161_p3 = scmp.lt.s32.totalorder %s3477_s13, 1  ;;  %vm5929_vm0 = vmmov 0  }
   0xc   : > { %v187_v1 = vld [vmem:[%s8672_s1 + $0x78] sm:$0xff]  ;;  %4649 = vmatprep.subr.mxu0 %v5928_v2  ;;  %4684 = vmatprep.subr.mxu1 %v5928_v2  ;;  %v186_v4 = vld [vmem:[%s8672_s1 + $0x70] sm:$0xff]  ;;  %v185_v6 = vld [vmem:[%s8672_s1 + $0x68] sm:$0xff] }
   0xd   : > { %4650 = vmatpush3.msra.mxu0 %v5961_v0  ;;  %4685 = vmatpush3.msra.mxu1 %v187_v1  ;;  %v5993_v7 = vld [vmem:[%s8672_s1 + $0xe0] sm:$0xff]  ;;  %v6004_v9 = vld [vmem:[%s8672_s1 + $0xd8] sm:$0xff]  ;;  %v6015_v11 = vld [vmem:[%s8672_s1 + $0xd0] sm:$0xff]  ;;  %s8781_s13 = smov (!%p161_p3, %s3477_s13), 1 }
   0xe   : > { %4651 = vmatprep.subr.mxu0 %v5928_v2  ;;  %4686 = vmatprep.subr.mxu1 %v5928_v2  ;;  %v184_v8 = vld [vmem:[%s8672_s1 + $0x60] sm:$0xff]  ;;  %v183_v10 = vld [vmem:[%s8672_s1 + $0x58] sm:$0xff]  ;;  %v182_v12 = vld [vmem:[%s8672_s1 + $0x50] sm:$0xff]  ;;  %s5909_s16 = smul.u32 160, %s8781_s13  ;;  %s4036_s25 = sshll.u32 %s8781_s13, 4 }
   0xf   : > { %4652 = vmatpush3.msra.mxu0 %v5971_v3  ;;  %4687 = vmatpush3.msra.mxu1 %v186_v4  ;;  %v6026_v13 = vld [vmem:[%s8672_s1 + $0xc8] sm:$0xff]  ;;  %v6037_v15 = vld [vmem:[%s8672_s1 + $0xc0] sm:$0xff]  ;;  %v6048_v17 = vld [vmem:[%s8672_s1 + $0xb8] sm:$0xff]  ;;  %s7746_s9 = scalar_lea.vmem %s8674_s3, %s4036_s25 }
  0x10   : > { %4653 = vmatprep.subr.mxu0 %v5928_v2  ;;  %4688 = vmatprep.subr.mxu1 %v5928_v2  ;;  %v181_v14 = vld [vmem:[%s8672_s1 + $0x48] sm:$0xff]  ;;  %v180_v16 = vld [vmem:[%s8672_s1 + $0x40] sm:$0xff]  ;;  %v179_v18 = vld [vmem:[%s8672_s1 + $0x38] sm:$0xff]  ;;  %s6129_s27 = scalar_lea.vmem %s8671_s0, %s5909_s16 }
  0x11   : > { %4654 = vmatpush3.msra.mxu0 %v5982_v5  ;;  %4689 = vmatpush3.msra.mxu1 %v185_v6  ;;  %v6061_v19 = vld [vmem:[%s8672_s1 + $0xb0] sm:$0xff]  ;;  %v6072_v21 = vld [vmem:[%s8672_s1 + $0xa8] sm:$0xff]  ;;  %v6087_v23 = vld [vmem:[%s8672_s1 + $0xa0] sm:$0xff] }
  0x12   : > { %4655 = vmatprep.subr.mxu0 %v5928_v2  ;;  %4690 = vmatprep.subr.mxu1 %v5928_v2  ;;  %v178_v20 = vld [vmem:[%s8672_s1 + $0x30] sm:$0xff]  ;;  %v177_v22 = vld [vmem:[%s8672_s1 + $0x28] sm:$0xff]  ;;  %v176_v24 = vld [vmem:[%s8672_s1 + $0x20] sm:$0xff] }
  0x13   : > { %4656 = vmatpush3.msra.mxu0 %v5993_v7  ;;  %4691 = vmatpush3.msra.mxu1 %v184_v8  ;;  %v6098_v25 = vld [vmem:[%s8672_s1 + $0x98] sm:$0xff]  ;;  %v6110_v27 = vld [vmem:[%s8672_s1 + $0x90] sm:$0xff]  ;;  %v6121_v29 = vld [vmem:[%s8672_s1 + $0x88] sm:$0xff] }
  0x14   : > { %4657 = vmatprep.subr.mxu0 %v5928_v2  ;;  %4692 = vmatprep.subr.mxu1 %v5928_v2  ;;  %v175_v26 = vld [vmem:[%s8672_s1 + $0x18] sm:$0xff]  ;;  %v174_v28 = vld [vmem:[%s8672_s1 + $0x10] sm:$0xff]  ;;  %v173_v30 = vld [vmem:[%s8672_s1 + $0x8] sm:$0xff] }
  0x15   : > { %4658 = vmatpush3.msra.mxu0 %v6004_v9  ;;  %4693 = vmatpush3.msra.mxu1 %v183_v10  ;;  %v6137_v31 = vld [vmem:[%s8672_s1 + $0x80] sm:$0xff]  ;;  %v188_v33 = vld [vmem:[%s6129_s27 + $0x8] sm:$0xf]  ;;  %v6153_v35 = vld [vmem:[%s8672_s1 + $0x178] sm:$0xff] }
  0x16   : > { %4659 = vmatprep.subr.mxu0 %v5928_v2  ;;  %4694 = vmatprep.subr.mxu1 %v5928_v2  ;;  %v172_v32 = vld [vmem:[%s8672_s1] sm:$0xff]  ;;  %v6158_v36 = vld [vmem:[%s8672_s1 + $0x1f8] sm:$0xff]  ;;  %v6167_v37 = vld [vmem:[%s8672_s1 + $0x170] sm:$0xff] }
  0x17   : > { %4660 = vmatpush3.msra.mxu0 %v6015_v11  ;;  %4695 = vmatpush3.msra.mxu1 %v182_v12  ;;  %v171_v34 = vld [vmem:[%s6129_s27] sm:$0xf]  ;;  %v6172_v38 = vld [vmem:[%s8672_s1 + $0x1f0] sm:$0xff]  ;;  %v6181_v39 = vld [vmem:[%s8672_s1 + $0x168] sm:$0xff] }
  0x18   : > { %4661 = vmatprep.subr.mxu0 %v5928_v2  ;;  %4696 = vmatprep.subr.mxu1 %v5928_v2  ;;  %v6186_v40 = vld [vmem:[%s8672_s1 + $0x1e8] sm:$0xff]  ;;  %v6195_v41 = vld [vmem:[%s8672_s1 + $0x160] sm:$0xff]  ;;  %v6209_v43 = vld [vmem:[%s8672_s1 + $0x158] sm:$0xff] }
  0x19   : > { %4662 = vmatpush3.msra.mxu0 %v6026_v13  ;;  %4697 = vmatpush3.msra.mxu1 %v181_v14  ;;  %v6200_v42 = vld [vmem:[%s8672_s1 + $0x1e0] sm:$0xff]  ;;  %v6214_v44 = vld [vmem:[%s8672_s1 + $0x1d8] sm:$0xff]  ;;  %v6223_v45 = vld [vmem:[%s8672_s1 + $0x150] sm:$0xff] }
  0x1a   : > { %4663 = vmatprep.subr.mxu0 %v5928_v2  ;;  %4698 = vmatprep.subr.mxu1 %v5928_v2  ;;  %v6228_v46 = vld [vmem:[%s8672_s1 + $0x1d0] sm:$0xff]  ;;  %v6237_v47 = vld [vmem:[%s8672_s1 + $0x148] sm:$0xff]  ;;  %v6251_v49 = vld [vmem:[%s8672_s1 + $0x140] sm:$0xff] }
  0x1b   : > { %4664 = vmatpush3.msra.mxu0 %v6037_v15  ;;  %4699 = vmatpush3.msra.mxu1 %v180_v16  ;;  %v6242_v48 = vld [vmem:[%s8672_s1 + $0x1c8] sm:$0xff]  ;;  %v6256_v50 = vld [vmem:[%s8672_s1 + $0x1c0] sm:$0xff]  ;;  %v6265_v51 = vld [vmem:[%s8672_s1 + $0x138] sm:$0xff] }
  0x1c   : > { %4665 = vmatprep.subr.mxu0 %v5928_v2  ;;  %4700 = vmatprep.subr.mxu1 %v5928_v2  ;;  %v6270_v52 = vld [vmem:[%s8672_s1 + $0x1b8] sm:$0xff]  ;;  %v6279_v53 = vld [vmem:[%s8672_s1 + $0x130] sm:$0xff]  ;;  %v6293_v55 = vld [vmem:[%s8672_s1 + $0x128] sm:$0xff] }
  0x1d   : > { %4666 = vmatpush3.msra.mxu0 %v6048_v17  ;;  %4701 = vmatpush3.msra.mxu1 %v179_v18  ;;  %v6284_v54 = vld [vmem:[%s8672_s1 + $0x1b0] sm:$0xff]  ;;  %v6298_v56 = vld [vmem:[%s8672_s1 + $0x1a8] sm:$0xff]  ;;  %v6307_v57 = vld [vmem:[%s8672_s1 + $0x120] sm:$0xff] }
  0x1e   : > { %4667 = vmatprep.subr.mxu0 %v5928_v2  ;;  %4702 = vmatprep.subr.mxu1 %v5928_v2  ;;  %v6312_v58 = vld [vmem:[%s8672_s1 + $0x1a0] sm:$0xff]  ;;  %v6321_v59 = vld [vmem:[%s8672_s1 + $0x118] sm:$0xff]  ;;  %v6335_v61 = vld [vmem:[%s8672_s1 + $0x110] sm:$0xff] }
  0x1f   : > { %4668 = vmatpush3.msra.mxu0 %v6061_v19  ;;  %4703 = vmatpush3.msra.mxu1 %v178_v20  ;;  %v6326_v60 = vld [vmem:[%s8672_s1 + $0x198] sm:$0xff]  ;;  %v6340_v62 = vld [vmem:[%s8672_s1 + $0x190] sm:$0xff]  ;;  %v346_v63 = vld [vmem:[%s6129_s27] sm:$0x1e] }
  0x20   : > { %4669 = vmatprep.subr.mxu0 %v5928_v2  ;;  %4704 = vmatprep.subr.mxu1 %v5928_v2  ;;  %8710 = vst [vmem:[#allocation2_spill] sm:$0xff] %v6326_v60  ;;  %8711 = vst [vmem:[#allocation3_spill] sm:$0xff] %v6340_v62  ;;  %v6350_v1 = vld [vmem:[%s8672_s1 + $0x108] sm:$0xff]  ;;  %v6364_v6 = vld [vmem:[%s8672_s1 + $0x100] sm:$0xff]  ;;  %v365_v8 = vrot.slane %v346_v63, 1 }
  0x21   : > { %4670 = vmatpush3.msra.mxu0 %v6072_v21  ;;  %4705 = vmatpush3.msra.mxu1 %v177_v22  ;;  %v6355_v4 = vld [vmem:[%s8672_s1 + $0x188] sm:$0xff]  ;;  %v6371_v10 = vld [vmem:[%s8672_s1 + $0x180] sm:$0xff]  ;;  %v438_v12 = vld [vmem:[%s6129_s27 + $0x10] sm:$0xf] }
  0x22   : > { %4671 = vmatprep.subr.mxu0 %v5928_v2  ;;  %4706 = vmatprep.subr.mxu1 %v5928_v2  ;;  %8712 = vst [vmem:[#allocation4_spill] sm:$0xff] %v6355_v4  ;;  %8713 = vst [vmem:[#allocation5_spill] sm:$0xff] %v6371_v10  ;;  %v6383_v14 = vld [vmem:[%s8672_s1 + $0x278] sm:$0xff]  ;;  %v6395_v18 = vld [vmem:[%s8672_s1 + $0x270] sm:$0xff] }
  0x23   : > { %4672 = vmatpush3.msra.mxu0 %v6087_v23  ;;  %4707 = vmatpush3.msra.mxu1 %v176_v24  ;;  %v3564_v16 = vld [vmem:[%s8672_s1 + $0x2f8] sm:$0xff]  ;;  %v3563_v20 = vld [vmem:[%s8672_s1 + $0x2f0] sm:$0xff]  ;;  %v6406_v22 = vld [vmem:[%s8672_s1 + $0x268] sm:$0xff] }
  0x24   : > { %4673 = vmatprep.subr.mxu0 %v5928_v2  ;;  %4708 = vmatprep.subr.mxu1 %v5928_v2  ;;  %v3562_v24 = vld [vmem:[%s8672_s1 + $0x2e8] sm:$0xff] }
  0x25   : > { %4674 = vmatpush3.msra.mxu0 %v6098_v25  ;;  %4709 = vmatpush3.msra.mxu1 %v175_v26  ;;  %v6417_v26 = vld [vmem:[%s8672_s1 + $0x260] sm:$0xff]  ;;  %v6450_v63 = vld [vmem:[%s8672_s1 + $0x248] sm:$0xff] }
  0x26   : > { %4675 = vmatprep.subr.mxu0 %v5928_v2  ;;  %4710 = vmatprep.subr.mxu1 %v5928_v2 }
  0x27   : > { %4676 = vmatpush3.msra.mxu0 %v6110_v27  ;;  %4711 = vmatpush3.msra.mxu1 %v174_v28  ;;  %v3561_v28 = vld [vmem:[%s8672_s1 + $0x2e0] sm:$0xff] }
  0x28   : > { %4677 = vmatprep.subr.mxu0 %v5928_v2  ;;  %4712 = vmatprep.subr.mxu1 %v5928_v2 }
  0x29   : > { %4678 = vmatpush3.msra.mxu0 %v6121_v29  ;;  %4713 = vmatpush3.msra.mxu1 %v173_v30  ;;  %v6428_v30 = vld [vmem:[%s8672_s1 + $0x258] sm:$0xff] }
  0x2a   : > { %4679 = vmatprep.subr.mxu0 %v5928_v2  ;;  %4714 = vmatprep.subr.mxu1 %v5928_v2 }
  0x2b   : > { %4680 = vmatpush3.msra.mxu0 %v6137_v31  ;;  %4681 = vmatprep.mubr.msk.f32.mxu0 %vm5929_vm0, %v5928_v2 }
  0x2c   : > { %4715 = vmatpush3.msra.mxu1 %v172_v32  ;;  %4682 = vmatmul.mubr.f32.vlgmr.msra.gmra.mxu0 %v188_v33  ;;  %v3560_v32 = vld [vmem:[%s8672_s1 + $0x2d8] sm:$0xff]  ;;  %v6439_v33 = vld [vmem:[%s8672_s1 + $0x250] sm:$0xff] }
  0x2d   : > { %4716 = vmatprep.mubr.msk.f32.mxu1 %vm5929_vm0, %v5928_v2  ;;  %4719 = vmatprep.subr.mxu0 %v5928_v2 }
  0x2e   : > { %4754 = vmatprep.subr.mxu1 %v5928_v2  ;;  %4717 = vmatmul.mubr.f32.vlgmr.msra.gmra.mxu1 %v171_v34  ;;  %v3559_v34 = vld [vmem:[%s8672_s1 + $0x2d0] sm:$0xff] }
  0x2f   : > { %4720 = vmatpush3.msra.mxu0 %v6153_v35  ;;  %4755 = vmatpush3.msra.mxu1 %v6158_v36 }
  0x30   : > { %4721 = vmatprep.subr.mxu0 %v5928_v2  ;;  %4756 = vmatprep.subr.mxu1 %v5928_v2 }
  0x31   : > { %4722 = vmatpush3.msra.mxu0 %v6167_v37  ;;  %4757 = vmatpush3.msra.mxu1 %v6172_v38 }
  0x32   : > { %4723 = vmatprep.subr.mxu0 %v5928_v2  ;;  %4758 = vmatprep.subr.mxu1 %v5928_v2 }
  0x33   : > { %4724 = vmatpush3.msra.mxu0 %v6181_v39  ;;  %4759 = vmatpush3.msra.mxu1 %v6186_v40 }
  0x34   : > { %4725 = vmatprep.subr.mxu0 %v5928_v2  ;;  %4760 = vmatprep.subr.mxu1 %v5928_v2 }
  0x35   : > { %4726 = vmatpush3.msra.mxu0 %v6195_v41  ;;  %4761 = vmatpush3.msra.mxu1 %v6200_v42 }
  0x36   : > { %4727 = vmatprep.subr.mxu0 %v5928_v2  ;;  %4762 = vmatprep.subr.mxu1 %v5928_v2 }
  0x37   : > { %4728 = vmatpush3.msra.mxu0 %v6209_v43  ;;  %4763 = vmatpush3.msra.mxu1 %v6214_v44 }
  0x38   : > { %4729 = vmatprep.subr.mxu0 %v5928_v2  ;;  %4764 = vmatprep.subr.mxu1 %v5928_v2 }
  0x39   : > { %4730 = vmatpush3.msra.mxu0 %v6223_v45  ;;  %4765 = vmatpush3.msra.mxu1 %v6228_v46 }
  0x3a   : > { %4731 = vmatprep.subr.mxu0 %v5928_v2  ;;  %4766 = vmatprep.subr.mxu1 %v5928_v2 }
  0x3b   : > { %4732 = vmatpush3.msra.mxu0 %v6237_v47  ;;  %4767 = vmatpush3.msra.mxu1 %v6242_v48 }
  0x3c   : > { %4733 = vmatprep.subr.mxu0 %v5928_v2  ;;  %4768 = vmatprep.subr.mxu1 %v5928_v2 }
  0x3d   : > { %4734 = vmatpush3.msra.mxu0 %v6251_v49  ;;  %4769 = vmatpush3.msra.mxu1 %v6256_v50 }
  0x3e   : > { %4735 = vmatprep.subr.mxu0 %v5928_v2  ;;  %4770 = vmatprep.subr.mxu1 %v5928_v2 }
  0x3f   : > { %4736 = vmatpush3.msra.mxu0 %v6265_v51  ;;  %4771 = vmatpush3.msra.mxu1 %v6270_v52 }
  0x40   : > { %4737 = vmatprep.subr.mxu0 %v5928_v2  ;;  %4772 = vmatprep.subr.mxu1 %v5928_v2 }
  0x41   : > { %4738 = vmatpush3.msra.mxu0 %v6279_v53  ;;  %4773 = vmatpush3.msra.mxu1 %v6284_v54 }
  0x42   : > { %4739 = vmatprep.subr.mxu0 %v5928_v2  ;;  %4774 = vmatprep.subr.mxu1 %v5928_v2 }
  0x43   : > { %4740 = vmatpush3.msra.mxu0 %v6293_v55  ;;  %4775 = vmatpush3.msra.mxu1 %v6298_v56 }
  0x44   : > { %4741 = vmatprep.subr.mxu0 %v5928_v2  ;;  %4776 = vmatprep.subr.mxu1 %v5928_v2 }
  0x45   : > { %4742 = vmatpush3.msra.mxu0 %v6307_v57  ;;  %4777 = vmatpush3.msra.mxu1 %v6312_v58 }
  0x46   : > { %4743 = vmatprep.subr.mxu0 %v5928_v2  ;;  %4778 = vmatprep.subr.mxu1 %v5928_v2 }
  0x47   : > { %4744 = vmatpush3.msra.mxu0 %v6321_v59  ;;  %4779 = vmatpush3.msra.mxu1 %v6326_v60  ;;  %v616_v60 = vld [vmem:[%s6129_s27 + $0x10] sm:$0x1e] }
  0x48   : > { %4745 = vmatprep.subr.mxu0 %v5928_v2  ;;  %4780 = vmatprep.subr.mxu1 %v5928_v2 }
  0x49   : > { %4746 = vmatpush3.msra.mxu0 %v6335_v61  ;;  %4781 = vmatpush3.msra.mxu1 %v6340_v62  ;;  %v3550_v62 = vld [vmem:[%s8672_s1 + $0x288] sm:$0xff] }
  0x4a   : > { %4747 = vmatprep.subr.mxu0 %v5928_v2  ;;  %4782 = vmatprep.subr.mxu1 %v5928_v2 }
  0x4b   : > { %4748 = vmatpush3.msra.mxu0 %v6350_v1  ;;  %4783 = vmatpush3.msra.mxu1 %v6355_v4  ;;  %v3551_v4 = vld [vmem:[%s8672_s1 + $0x290] sm:$0xff] }
  0x4c   : > { %4749 = vmatprep.subr.mxu0 %v5928_v2  ;;  %4784 = vmatprep.subr.mxu1 %v5928_v2 }
  0x4d   : > { %4750 = vmatpush3.msra.mxu0 %v6364_v6  ;;  %4751 = vmatprep.mubr.msk.f32.mxu0 %vm5929_vm0, %v5928_v2 }
  0x4e   : > { %4785 = vmatpush3.msra.mxu1 %v6371_v10  ;;  %4752 = vmatmul.mubr.f32.vlgmr.msra.gmra.mxu0 %v365_v8  ;;  %v3558_v8 = vld [vmem:[%s8672_s1 + $0x2c8] sm:$0xff]  ;;  %v3552_v10 = vld [vmem:[%s8672_s1 + $0x298] sm:$0xff] }
  0x4f   : > { %4786 = vmatprep.mubr.msk.f32.mxu1 %vm5929_vm0, %v5928_v2  ;;  %4789 = vmatprep.subr.mxu0 %v5928_v2 }
  0x50   : > { %4824 = vmatprep.subr.mxu1 %v5928_v2  ;;  %4787 = vmatmul.mubr.f32.vlgmr.msra.gmra.mxu1 %v438_v12  ;;  %v6461_v12 = vld [vmem:[%s8672_s1 + $0x240] sm:$0xff] }
  0x51   : > { %4790 = vmatpush3.msra.mxu0 %v6383_v14  ;;  %4825 = vmatpush3.msra.mxu1 %v3564_v16  ;;  %v3557_v16 = vld [vmem:[%s8672_s1 + $0x2c0] sm:$0xff] }
  0x52   : > { %4791 = vmatprep.subr.mxu0 %v5928_v2  ;;  %4826 = vmatprep.subr.mxu1 %v5928_v2 }
  0x53   : > { %4792 = vmatpush3.msra.mxu0 %v6395_v18  ;;  %4827 = vmatpush3.msra.mxu1 %v3563_v20  ;;  %v6472_v20 = vld [vmem:[%s8672_s1 + $0x238] sm:$0xff] }
  0x54   : > { %4793 = vmatprep.subr.mxu0 %v5928_v2  ;;  %4828 = vmatprep.subr.mxu1 %v5928_v2 }
  0x55   : > { %4794 = vmatpush3.msra.mxu0 %v6406_v22  ;;  %4829 = vmatpush3.msra.mxu1 %v3562_v24  ;;  %v3556_v24 = vld [vmem:[%s8672_s1 + $0x2b8] sm:$0xff] }
  0x56   : > { %4795 = vmatprep.subr.mxu0 %v5928_v2  ;;  %4830 = vmatprep.subr.mxu1 %v5928_v2 }
  0x57   : > { %4796 = vmatpush3.msra.mxu0 %v6417_v26  ;;  %4831 = vmatpush3.msra.mxu1 %v3561_v28  ;;  %v6483_v28 = vld [vmem:[%s8672_s1 + $0x230] sm:$0xff] }
  0x58   : > { %4797 = vmatprep.subr.mxu0 %v5928_v2  ;;  %4832 = vmatprep.subr.mxu1 %v5928_v2 }
  0x59   : > { %4798 = vmatpush3.msra.mxu0 %v6428_v30  ;;  %4833 = vmatpush3.msra.mxu1 %v3560_v32  ;;  %v3555_v32 = vld [vmem:[%s8672_s1 + $0x2b0] sm:$0xff] }
  0x5a   : > { %4799 = vmatprep.subr.mxu0 %v5928_v2  ;;  %4834 = vmatprep.subr.mxu1 %v5928_v2 }
  0x5b   : > { %4800 = vmatpush3.msra.mxu0 %v6439_v33  ;;  %4835 = vmatpush3.msra.mxu1 %v3559_v34  ;;  %v6494_v34 = vld [vmem:[%s8672_s1 + $0x228] sm:$0xff] }
  0x5c   : > { %4801 = vmatprep.subr.mxu0 %v5928_v2  ;;  %4836 = vmatprep.subr.mxu1 %v5928_v2 }
  0x5d   : > { %4802 = vmatpush3.msra.mxu0 %v6450_v63  ;;  %4837 = vmatpush3.msra.mxu1 %v3558_v8  ;;  %v3554_v8 = vld [vmem:[%s8672_s1 + $0x2a8] sm:$0xff] }
  0x5e   : > { %4803 = vmatprep.subr.mxu0 %v5928_v2  ;;  %4838 = vmatprep.subr.mxu1 %v5928_v2 }
  0x5f   : > { %4804 = vmatpush3.msra.mxu0 %v6461_v12  ;;  %4839 = vmatpush3.msra.mxu1 %v3557_v16  ;;  %v6505_v16 = vld [vmem:[%s8672_s1 + $0x220] sm:$0xff] }
  0x60   : > { %4805 = vmatprep.subr.mxu0 %v5928_v2  ;;  %4840 = vmatprep.subr.mxu1 %v5928_v2  ;;  %8714 = vst [vmem:[#allocation6_spill] sm:$0xff] %v6505_v16 }
  0x61   : > { %4806 = vmatpush3.msra.mxu0 %v6472_v20  ;;  %4841 = vmatpush3.msra.mxu1 %v3556_v24  ;;  %v3553_v24 = vld [vmem:[%s8672_s1 + $0x2a0] sm:$0xff] }
  0x62   : > { %4807 = vmatprep.subr.mxu0 %v5928_v2  ;;  %4842 = vmatprep.subr.mxu1 %v5928_v2 }
  0x63   : > { %4808 = vmatpush3.msra.mxu0 %v6483_v28  ;;  %4843 = vmatpush3.msra.mxu1 %v3555_v32  ;;  %v6516_v32 = vld [vmem:[%s8672_s1 + $0x218] sm:$0xff] }
  0x64   : > { %4809 = vmatprep.subr.mxu0 %v5928_v2  ;;  %4844 = vmatprep.subr.mxu1 %v5928_v2  ;;  %8715 = vst [vmem:[#allocation7_spill] sm:$0xff] %v6516_v32 }
  0x65   : > { %4810 = vmatpush3.msra.mxu0 %v6494_v34  ;;  %4845 = vmatpush3.msra.mxu1 %v3554_v8  ;;  %v6527_v8 = vld [vmem:[%s8672_s1 + $0x210] sm:$0xff] }
  0x66   : > { %4811 = vmatprep.subr.mxu0 %v5928_v2  ;;  %4846 = vmatprep.subr.mxu1 %v5928_v2 }
  0x67   : > { %4812 = vmatpush3.msra.mxu0 %v6505_v16  ;;  %4847 = vmatpush3.msra.mxu1 %v3553_v24  ;;  %v6538_v24 = vld [vmem:[%s8672_s1 + $0x208] sm:$0xff]  ;;  %v527_v16 = vld [vmem:[%s6129_s27 + $0x18] sm:$0xf] }
  0x68   : > { %4813 = vmatprep.subr.mxu0 %v5928_v2  ;;  %4848 = vmatprep.subr.mxu1 %v5928_v2  ;;  %8716 = vst [vmem:[#allocation8_spill] sm:$0xff] %v6538_v24 }
  0x69   : > { %4814 = vmatpush3.msra.mxu0 %v6516_v32  ;;  %4849 = vmatpush3.msra.mxu1 %v3552_v10  ;;  %v6550_v10 = vld [vmem:[%s8672_s1 + $0x200] sm:$0xff] }
  0x6a   : > { %4815 = vmatprep.subr.mxu0 %v5928_v2  ;;  %4850 = vmatprep.subr.mxu1 %v5928_v2  ;;  %8717 = vst [vmem:[#allocation9_spill] sm:$0xff] %v6550_v10  ;;  %v3549_v32 = vld [vmem:[%s8672_s1 + $0x280] sm:$0xff] }
  0x6b   : > { %4816 = vmatpush3.msra.mxu0 %v6527_v8  ;;  %4851 = vmatpush3.msra.mxu1 %v3551_v4  ;;  %v635_v4 = vrot.slane %v616_v60, 1  ;;  %v6577_v60 = vld [vmem:[%s8672_s1 + $0x370] sm:$0xff] }
  0x6c   : > { %4817 = vmatprep.subr.mxu0 %v5928_v2  ;;  %4852 = vmatprep.subr.mxu1 %v5928_v2  ;;  %8719 = vst [vmem:[#allocation11_spill] sm:$0xff] %v6577_v60 }
  0x6d   : > { %4818 = vmatpush3.msra.mxu0 %v6538_v24  ;;  %4853 = vmatpush3.msra.mxu1 %v3550_v62  ;;  %v6565_v62 = vld [vmem:[%s8672_s1 + $0x378] sm:$0xff] }
  0x6e   : > { %4819 = vmatprep.subr.mxu0 %v5928_v2  ;;  %4854 = vmatprep.subr.mxu1 %v5928_v2  ;;  %8718 = vst [vmem:[#allocation10_spill] sm:$0xff] %v6565_v62  ;;  %v3598_v24 = vld [vmem:[%s8672_s1 + $0x3f8] sm:$0xff] }
  0x6f   : > { %4820 = vmatpush3.msra.mxu0 %v6550_v10  ;;  %4821 = vmatprep.mubr.msk.f32.mxu0 %vm5929_vm0, %v5928_v2  ;;  %v3565_v10 = vld [vmem:[%s6129_s27 + $0x20] sm:$0xf] }
  0x70   : > { %4855 = vmatpush3.msra.mxu1 %v3549_v32  ;;  %4822 = vmatmul.mubr.f32.vlgmr.msra.gmra.mxu0 %v527_v16  ;;  %v3597_v16 = vld [vmem:[%s8672_s1 + $0x3f0] sm:$0xff]  ;;  %v6588_v32 = vld [vmem:[%s8672_s1 + $0x368] sm:$0xff] }
  0x71   : > { %4856 = vmatprep.mubr.msk.f32.mxu1 %vm5929_vm0, %v5928_v2  ;;  %4859 = vmatprep.subr.mxu0 %v5928_v2  ;;  %8720 = vst [vmem:[#allocation12_spill] sm:$0xff] %v6588_v32 }
  0x72   : > { %4894 = vmatprep.subr.mxu1 %v5928_v2  ;;  %4857 = vmatmul.mubr.f32.vlgmr.msra.gmra.mxu1 %v635_v4  ;;  %v3596_v4 = vld [vmem:[%s8672_s1 + $0x3e8] sm:$0xff] }
  0x73   : > { %4860 = vmatpush3.msra.mxu0 %v6565_v62  ;;  %4895 = vmatpush3.msra.mxu1 %v3598_v24  ;;  %v6599_v24 = vld [vmem:[%s8672_s1 + $0x360] sm:$0xff] }
  0x74   : > { %4861 = vmatprep.subr.mxu0 %v5928_v2  ;;  %4896 = vmatprep.subr.mxu1 %v5928_v2  ;;  %8721 = vst [vmem:[#allocation13_spill] sm:$0xff] %v6599_v24  ;;  %v3595_v62 = vld [vmem:[%s8672_s1 + $0x3e0] sm:$0xff] }
  0x75   : > { %4862 = vmatpush3.msra.mxu0 %v6577_v60  ;;  %4897 = vmatpush3.msra.mxu1 %v3597_v16  ;;  %v6610_v16 = vld [vmem:[%s8672_s1 + $0x358] sm:$0xff] }
  0x76   : > { %4863 = vmatprep.subr.mxu0 %v5928_v2  ;;  %4898 = vmatprep.subr.mxu1 %v5928_v2  ;;  %8722 = vst [vmem:[#allocation14_spill] sm:$0xff] %v6610_v16  ;;  %v3594_v60 = vld [vmem:[%s8672_s1 + $0x3d8] sm:$0xff] }
  0x77   : > { %4864 = vmatpush3.msra.mxu0 %v6588_v32  ;;  %4899 = vmatpush3.msra.mxu1 %v3596_v4  ;;  %v6621_v4 = vld [vmem:[%s8672_s1 + $0x350] sm:$0xff] }
  0x78   : > { %4865 = vmatprep.subr.mxu0 %v5928_v2  ;;  %4900 = vmatprep.subr.mxu1 %v5928_v2  ;;  %8723 = vst [vmem:[#allocation15_spill] sm:$0xff] %v6621_v4  ;;  %v3593_v32 = vld [vmem:[%s8672_s1 + $0x3d0] sm:$0xff] }
  0x79   : > { %4866 = vmatpush3.msra.mxu0 %v6599_v24  ;;  %4901 = vmatpush3.msra.mxu1 %v3595_v62  ;;  %v6632_v62 = vld [vmem:[%s8672_s1 + $0x348] sm:$0xff] }
  0x7a   : > { %4867 = vmatprep.subr.mxu0 %v5928_v2  ;;  %4902 = vmatprep.subr.mxu1 %v5928_v2  ;;  %8724 = vst [vmem:[#allocation16_spill] sm:$0xff] %v6632_v62  ;;  %v3592_v24 = vld [vmem:[%s8672_s1 + $0x3c8] sm:$0xff] }
  0x7b   : > { %4868 = vmatpush3.msra.mxu0 %v6610_v16  ;;  %4903 = vmatpush3.msra.mxu1 %v3594_v60  ;;  %v6643_v60 = vld [vmem:[%s8672_s1 + $0x340] sm:$0xff] }
  0x7c   : > { %4869 = vmatprep.subr.mxu0 %v5928_v2  ;;  %4904 = vmatprep.subr.mxu1 %v5928_v2  ;;  %8725 = vst [vmem:[#allocation17_spill] sm:$0xff] %v6643_v60  ;;  %v3591_v16 = vld [vmem:[%s8672_s1 + $0x3c0] sm:$0xff] }
  0x7d   : > { %4870 = vmatpush3.msra.mxu0 %v6621_v4  ;;  %4905 = vmatpush3.msra.mxu1 %v3593_v32  ;;  %v6654_v32 = vld [vmem:[%s8672_s1 + $0x338] sm:$0xff] }
  0x7e   : > { %4871 = vmatprep.subr.mxu0 %v5928_v2  ;;  %4906 = vmatprep.subr.mxu1 %v5928_v2  ;;  %8726 = vst [vmem:[#allocation18_spill] sm:$0xff] %v6654_v32  ;;  %v3590_v4 = vld [vmem:[%s8672_s1 + $0x3b8] sm:$0xff] }
  0x7f   : > { %4872 = vmatpush3.msra.mxu0 %v6632_v62  ;;  %4907 = vmatpush3.msra.mxu1 %v3592_v24  ;;  %v6665_v24 = vld [vmem:[%s8672_s1 + $0x330] sm:$0xff] }
  0x80   : > { %4873 = vmatprep.subr.mxu0 %v5928_v2  ;;  %4908 = vmatprep.subr.mxu1 %v5928_v2  ;;  %8727 = vst [vmem:[#allocation19_spill] sm:$0xff] %v6665_v24  ;;  %v3589_v62 = vld [vmem:[%s8672_s1 + $0x3b0] sm:$0xff] }
  0x81   : > { %4874 = vmatpush3.msra.mxu0 %v6643_v60  ;;  %4909 = vmatpush3.msra.mxu1 %v3591_v16  ;;  %v6676_v16 = vld [vmem:[%s8672_s1 + $0x328] sm:$0xff] }
  0x82   : > { %4875 = vmatprep.subr.mxu0 %v5928_v2  ;;  %4910 = vmatprep.subr.mxu1 %v5928_v2  ;;  %8728 = vst [vmem:[#allocation20_spill] sm:$0xff] %v6676_v16  ;;  %v3588_v60 = vld [vmem:[%s8672_s1 + $0x3a8] sm:$0xff] }
  0x83   : > { %4876 = vmatpush3.msra.mxu0 %v6654_v32  ;;  %4911 = vmatpush3.msra.mxu1 %v3590_v4  ;;  %v6687_v4 = vld [vmem:[%s8672_s1 + $0x320] sm:$0xff] }
  0x84   : > { %4877 = vmatprep.subr.mxu0 %v5928_v2  ;;  %4912 = vmatprep.subr.mxu1 %v5928_v2  ;;  %8729 = vst [vmem:[#allocation21_spill] sm:$0xff] %v6687_v4  ;;  %v3587_v32 = vld [vmem:[%s8672_s1 + $0x3a0] sm:$0xff] }
  0x85   : > { %4878 = vmatpush3.msra.mxu0 %v6665_v24  ;;  %4913 = vmatpush3.msra.mxu1 %v3589_v62  ;;  %v6698_v62 = vld [vmem:[%s8672_s1 + $0x318] sm:$0xff] }
  0x86   : > { %4879 = vmatprep.subr.mxu0 %v5928_v2  ;;  %4914 = vmatprep.subr.mxu1 %v5928_v2  ;;  %8730 = vst [vmem:[#allocation22_spill] sm:$0xff] %v6698_v62  ;;  %v3586_v24 = vld [vmem:[%s8672_s1 + $0x398] sm:$0xff] }
  0x87   : > { %4880 = vmatpush3.msra.mxu0 %v6676_v16  ;;  %4915 = vmatpush3.msra.mxu1 %v3588_v60  ;;  %v6709_v60 = vld [vmem:[%s8672_s1 + $0x310] sm:$0xff] }
  0x88   : > { %4881 = vmatprep.subr.mxu0 %v5928_v2  ;;  %4916 = vmatprep.subr.mxu1 %v5928_v2  ;;  %v3585_v16 = vld [vmem:[%s8672_s1 + $0x390] sm:$0xff] }
  0x89   : > { %4882 = vmatpush3.msra.mxu0 %v6687_v4  ;;  %4917 = vmatpush3.msra.mxu1 %v3587_v32  ;;  %v6720_v32 = vld [vmem:[%s8672_s1 + $0x308] sm:$0xff] }
  0x8a   : > { %4883 = vmatprep.subr.mxu0 %v5928_v2  ;;  %4918 = vmatprep.subr.mxu1 %v5928_v2  ;;  %v3584_v4 = vld [vmem:[%s8672_s1 + $0x388] sm:$0xff] }
  0x8b   : > { %4884 = vmatpush3.msra.mxu0 %v6698_v62  ;;  %4919 = vmatpush3.msra.mxu1 %v3586_v24  ;;  %v6731_v24 = vld [vmem:[%s8672_s1 + $0x300] sm:$0xff] }
  0x8c   : > { %4885 = vmatprep.subr.mxu0 %v5928_v2  ;;  %4920 = vmatprep.subr.mxu1 %v5928_v2  ;;  %8731 = vst [vmem:[#allocation23_spill] sm:$0xff] %v6731_v24  ;;  %v3583_v62 = vld [vmem:[%s8672_s1 + $0x380] sm:$0xff] }
  0x8d   : > { %4886 = vmatpush3.msra.mxu0 %v6709_v60  ;;  %4921 = vmatpush3.msra.mxu1 %v3585_v16  ;;  %v3582_v16 = vld [vmem:[%s6129_s27 + $0x28] sm:$0xf] }
  0x8e   : > { %4887 = vmatprep.subr.mxu0 %v5928_v2  ;;  %4922 = vmatprep.subr.mxu1 %v5928_v2 }
  0x8f   : > { %4888 = vmatpush3.msra.mxu0 %v6720_v32  ;;  %4923 = vmatpush3.msra.mxu1 %v3584_v4  ;;  %v6747_v4 = vld [vmem:[%s8672_s1 + $0x478] sm:$0xff] }
  0x90   : > { %4889 = vmatprep.subr.mxu0 %v5928_v2  ;;  %4924 = vmatprep.subr.mxu1 %v5928_v2 }
  0x91   : > { %4890 = vmatpush3.msra.mxu0 %v6731_v24  ;;  %4891 = vmatprep.mubr.msk.f32.mxu0 %vm5929_vm0, %v5928_v2  ;;  %v6756_v24 = vld [vmem:[%s8672_s1 + $0x470] sm:$0xff] }
  0x92   : > { %4925 = vmatpush3.msra.mxu1 %v3583_v62  ;;  %4892 = vmatmul.mubr.f32.vlgmr.msra.gmra.mxu0 %v3565_v10  ;;  %v6765_v10 = vld [vmem:[%s8672_s1 + $0x468] sm:$0xff]  ;;  %v3599_v62 = vld [vmem:[%s6129_s27 + $0x20] sm:$0x1e] }
  0x93   : > { %4926 = vmatprep.mubr.msk.f32.mxu1 %vm5929_vm0, %v5928_v2  ;;  %4929 = vmatprep.subr.mxu0 %v5928_v2 }
  0x94   : > { %4964 = vmatprep.subr.mxu1 %v5928_v2  ;;  %4927 = vmatmul.mubr.f32.vlgmr.msra.gmra.mxu1 %v3582_v16  ;;  %v906_v16 = vrot.slane %v3599_v62, 1  ;;  %v6897_v62 = vld [vmem:[%s8672_s1 + $0x78] sm:$0xff] }
  0x95   : > { %4930 = vmatpush3.msra.mxu0 %v6747_v4  ;;  %4965 = vmatpush3.msra.mxu1 %v5961_v0  ;;  %v6774_v0 = vld [vmem:[%s8672_s1 + $0x460] sm:$0xff] }
  0x96   : > { %4931 = vmatprep.subr.mxu0 %v5928_v2  ;;  %4966 = vmatprep.subr.mxu1 %v5928_v2 }
  0x97   : > { %4932 = vmatpush3.msra.mxu0 %v6756_v24  ;;  %4967 = vmatpush3.msra.mxu1 %v5971_v3  ;;  %v6783_v3 = vld [vmem:[%s8672_s1 + $0x458] sm:$0xff] }
  0x98   : > { %4933 = vmatprep.subr.mxu0 %v5928_v2  ;;  %4968 = vmatprep.subr.mxu1 %v5928_v2 }
  0x99   : > { %4934 = vmatpush3.msra.mxu0 %v6765_v10  ;;  %4969 = vmatpush3.msra.mxu1 %v5982_v5  ;;  %v6792_v5 = vld [vmem:[%s8672_s1 + $0x450] sm:$0xff] }
  0x9a   : > { %4935 = vmatprep.subr.mxu0 %v5928_v2  ;;  %4970 = vmatprep.subr.mxu1 %v5928_v2 }
  0x9b   : > { %4936 = vmatpush3.msra.mxu0 %v6774_v0  ;;  %4971 = vmatpush3.msra.mxu1 %v5993_v7  ;;  %v6801_v7 = vld [vmem:[%s8672_s1 + $0x448] sm:$0xff] }
  0x9c   : > { %4937 = vmatprep.subr.mxu0 %v5928_v2  ;;  %4972 = vmatprep.subr.mxu1 %v5928_v2 }
  0x9d   : > { %4938 = vmatpush3.msra.mxu0 %v6783_v3  ;;  %4973 = vmatpush3.msra.mxu1 %v6004_v9  ;;  %v6810_v9 = vld [vmem:[%s8672_s1 + $0x440] sm:$0xff] }
  0x9e   : > { %4939 = vmatprep.subr.mxu0 %v5928_v2  ;;  %4974 = vmatprep.subr.mxu1 %v5928_v2 }
  0x9f   : > { %4940 = vmatpush3.msra.mxu0 %v6792_v5  ;;  %4975 = vmatpush3.msra.mxu1 %v6015_v11  ;;  %v6819_v11 = vld [vmem:[%s8672_s1 + $0x438] sm:$0xff] }
  0xa0   : > { %4941 = vmatprep.subr.mxu0 %v5928_v2  ;;  %4976 = vmatprep.subr.mxu1 %v5928_v2 }
  0xa1   : > { %4942 = vmatpush3.msra.mxu0 %v6801_v7  ;;  %4977 = vmatpush3.msra.mxu1 %v6026_v13  ;;  %v6828_v13 = vld [vmem:[%s8672_s1 + $0x430] sm:$0xff] }
  0xa2   : > { %4943 = vmatprep.subr.mxu0 %v5928_v2  ;;  %4978 = vmatprep.subr.mxu1 %v5928_v2 }
  0xa3   : > { %4944 = vmatpush3.msra.mxu0 %v6810_v9  ;;  %4979 = vmatpush3.msra.mxu1 %v6037_v15  ;;  %v6837_v15 = vld [vmem:[%s8672_s1 + $0x428] sm:$0xff] }
  0xa4   : > { %4945 = vmatprep.subr.mxu0 %v5928_v2  ;;  %4980 = vmatprep.subr.mxu1 %v5928_v2 }
  0xa5   : > { %4946 = vmatpush3.msra.mxu0 %v6819_v11  ;;  %4981 = vmatpush3.msra.mxu1 %v6048_v17  ;;  %v6846_v17 = vld [vmem:[%s8672_s1 + $0x420] sm:$0xff] }
  0xa6   : > { %4947 = vmatprep.subr.mxu0 %v5928_v2  ;;  %4982 = vmatprep.subr.mxu1 %v5928_v2 }
  0xa7   : > { %4948 = vmatpush3.msra.mxu0 %v6828_v13  ;;  %4983 = vmatpush3.msra.mxu1 %v6061_v19  ;;  %v6855_v19 = vld [vmem:[%s8672_s1 + $0x418] sm:$0xff] }
  0xa8   : > { %4949 = vmatprep.subr.mxu0 %v5928_v2  ;;  %4984 = vmatprep.subr.mxu1 %v5928_v2 }
  0xa9   : > { %4950 = vmatpush3.msra.mxu0 %v6837_v15  ;;  %4985 = vmatpush3.msra.mxu1 %v6072_v21  ;;  %v6864_v21 = vld [vmem:[%s8672_s1 + $0x410] sm:$0xff] }
  0xaa   : > { %4951 = vmatprep.subr.mxu0 %v5928_v2  ;;  %4986 = vmatprep.subr.mxu1 %v5928_v2 }
  0xab   : > { %4952 = vmatpush3.msra.mxu0 %v6846_v17  ;;  %4987 = vmatpush3.msra.mxu1 %v6087_v23  ;;  %v6874_v23 = vld [vmem:[%s8672_s1 + $0x408] sm:$0xff] }
  0xac   : > { %4953 = vmatprep.subr.mxu0 %v5928_v2  ;;  %4988 = vmatprep.subr.mxu1 %v5928_v2 }
  0xad   : > { %4954 = vmatpush3.msra.mxu0 %v6855_v19  ;;  %4989 = vmatpush3.msra.mxu1 %v6098_v25  ;;  %v6883_v25 = vld [vmem:[%s8672_s1 + $0x400] sm:$0xff] }
  0xae   : > { %4955 = vmatprep.subr.mxu0 %v5928_v2  ;;  %4990 = vmatprep.subr.mxu1 %v5928_v2 }
  0xaf   : > { %4956 = vmatpush3.msra.mxu0 %v6864_v21  ;;  %4991 = vmatpush3.msra.mxu1 %v6110_v27  ;;  %v3618_v27 = vld [vmem:[%s6129_s27 + $0x28] sm:$0xf] }
  0xb0   : > { %4957 = vmatprep.subr.mxu0 %v5928_v2  ;;  %4992 = vmatprep.subr.mxu1 %v5928_v2 }
  0xb1   : > { %4958 = vmatpush3.msra.mxu0 %v6874_v23  ;;  %4993 = vmatpush3.msra.mxu1 %v6121_v29  ;;  %v6906_v29 = vld [vmem:[%s8672_s1 + $0x70] sm:$0xff] }
  0xb2   : > { %4959 = vmatprep.subr.mxu0 %v5928_v2  ;;  %4994 = vmatprep.subr.mxu1 %v5928_v2 }
  0xb3   : > { %4960 = vmatpush3.msra.mxu0 %v6883_v25  ;;  %4961 = vmatprep.mubr.msk.f32.mxu0 %vm5929_vm0, %v5928_v2 }
  0xb4   : > { %4995 = vmatpush3.msra.mxu1 %v6137_v31  ;;  %4962 = vmatmul.mubr.f32.vlgmr.msra.gmra.mxu0 %v906_v16  ;;  %v6915_v31 = vld [vmem:[%s8672_s1 + $0x68] sm:$0xff]  ;;  %v3635_v16 = vld [vmem:[%s6129_s27 + $0x20] sm:$0x1e] }
  0xb5   : > { %4996 = vmatprep.mubr.msk.f32.mxu1 %vm5929_vm0, %v5928_v2  ;;  %4999 = vmatprep.subr.mxu0 %v5928_v2 }
  0xb6   : > { %5034 = vmatprep.subr.mxu1 %v5928_v2  ;;  %4997 = vmatmul.mubr.f32.vlgmr.msra.gmra.mxu1 %v3618_v27  ;;  %v3617_v27 = vld [vmem:[%s6129_s27 + $0x20] sm:$0xf] }
  0xb7   : > { %5000 = vmatpush3.msra.mxu0 %v6897_v62  ;;  %5035 = vmatpush3.msra.mxu1 %v6153_v35  ;;  %v6924_v35 = vld [vmem:[%s8672_s1 + $0x60] sm:$0xff] }
  0xb8   : > { %5001 = vmatprep.subr.mxu0 %v5928_v2  ;;  %5036 = vmatprep.subr.mxu1 %v5928_v2 }
  0xb9   : > { %5002 = vmatpush3.msra.mxu0 %v6906_v29  ;;  %5037 = vmatpush3.msra.mxu1 %v6167_v37  ;;  %v6933_v37 = vld [vmem:[%s8672_s1 + $0x58] sm:$0xff] }
  0xba   : > { %5003 = vmatprep.subr.mxu0 %v5928_v2  ;;  %5038 = vmatprep.subr.mxu1 %v5928_v2 }
  0xbb   : > { %5004 = vmatpush3.msra.mxu0 %v6915_v31  ;;  %5039 = vmatpush3.msra.mxu1 %v6181_v39  ;;  %v6942_v39 = vld [vmem:[%s8672_s1 + $0x50] sm:$0xff] }
  0xbc   : > { %5005 = vmatprep.subr.mxu0 %v5928_v2  ;;  %5040 = vmatprep.subr.mxu1 %v5928_v2 }
  0xbd   : > { %5006 = vmatpush3.msra.mxu0 %v6924_v35  ;;  %5041 = vmatpush3.msra.mxu1 %v6195_v41  ;;  %v6951_v41 = vld [vmem:[%s8672_s1 + $0x48] sm:$0xff] }
  0xbe   : > { %5007 = vmatprep.subr.mxu0 %v5928_v2  ;;  %5042 = vmatprep.subr.mxu1 %v5928_v2 }
  0xbf   : > { %5008 = vmatpush3.msra.mxu0 %v6933_v37  ;;  %5043 = vmatpush3.msra.mxu1 %v6209_v43  ;;  %v6960_v43 = vld [vmem:[%s8672_s1 + $0x40] sm:$0xff] }
  0xc0   : > { %5009 = vmatprep.subr.mxu0 %v5928_v2  ;;  %5044 = vmatprep.subr.mxu1 %v5928_v2 }
  0xc1   : > { %5010 = vmatpush3.msra.mxu0 %v6942_v39  ;;  %5045 = vmatpush3.msra.mxu1 %v6223_v45  ;;  %v6969_v45 = vld [vmem:[%s8672_s1 + $0x38] sm:$0xff] }
  0xc2   : > { %5011 = vmatprep.subr.mxu0 %v5928_v2  ;;  %5046 = vmatprep.subr.mxu1 %v5928_v2 }
  0xc3   : > { %5012 = vmatpush3.msra.mxu0 %v6951_v41  ;;  %5047 = vmatpush3.msra.mxu1 %v6237_v47  ;;  %v6978_v47 = vld [vmem:[%s8672_s1 + $0x30] sm:$0xff] }
  0xc4   : > { %5013 = vmatprep.subr.mxu0 %v5928_v2  ;;  %5048 = vmatprep.subr.mxu1 %v5928_v2 }
  0xc5   : > { %5014 = vmatpush3.msra.mxu0 %v6960_v43  ;;  %5049 = vmatpush3.msra.mxu1 %v6251_v49  ;;  %v6987_v49 = vld [vmem:[%s8672_s1 + $0x28] sm:$0xff] }
  0xc6   : > { %5015 = vmatprep.subr.mxu0 %v5928_v2  ;;  %5050 = vmatprep.subr.mxu1 %v5928_v2 }
  0xc7   : > { %5016 = vmatpush3.msra.mxu0 %v6969_v45  ;;  %5051 = vmatpush3.msra.mxu1 %v6265_v51  ;;  %v6996_v51 = vld [vmem:[%s8672_s1 + $0x20] sm:$0xff] }
  0xc8   : > { %5017 = vmatprep.subr.mxu0 %v5928_v2  ;;  %5052 = vmatprep.subr.mxu1 %v5928_v2 }
  0xc9   : > { %5018 = vmatpush3.msra.mxu0 %v6978_v47  ;;  %5053 = vmatpush3.msra.mxu1 %v6279_v53  ;;  %v7005_v53 = vld [vmem:[%s8672_s1 + $0x18] sm:$0xff] }
  0xca   : > { %5019 = vmatprep.subr.mxu0 %v5928_v2  ;;  %5054 = vmatprep.subr.mxu1 %v5928_v2 }
  0xcb   : > { %5020 = vmatpush3.msra.mxu0 %v6987_v49  ;;  %5055 = vmatpush3.msra.mxu1 %v6293_v55  ;;  %v7014_v55 = vld [vmem:[%s8672_s1 + $0x10] sm:$0xff] }
  0xcc   : > { %5021 = vmatprep.subr.mxu0 %v5928_v2  ;;  %5056 = vmatprep.subr.mxu1 %v5928_v2 }
  0xcd   : > { %5022 = vmatpush3.msra.mxu0 %v6996_v51  ;;  %5057 = vmatpush3.msra.mxu1 %v6307_v57  ;;  %v7023_v57 = vld [vmem:[%s8672_s1 + $0x8] sm:$0xff] }
  0xce   : > { %5023 = vmatprep.subr.mxu0 %v5928_v2  ;;  %5058 = vmatprep.subr.mxu1 %v5928_v2 }
  0xcf   : > { %5024 = vmatpush3.msra.mxu0 %v7005_v53  ;;  %5059 = vmatpush3.msra.mxu1 %v6321_v59  ;;  %v7033_v59 = vld [vmem:[%s8672_s1] sm:$0xff] }
  0xd0   : > { %5025 = vmatprep.subr.mxu0 %v5928_v2  ;;  %5060 = vmatprep.subr.mxu1 %v5928_v2 }
  0xd1   : > { %5026 = vmatpush3.msra.mxu0 %v7014_v55  ;;  %5061 = vmatpush3.msra.mxu1 %v6335_v61  ;;  %v1181_v61 = vrot.slane %v3635_v16, 1  ;;  %v7173_v16 = vld [vmem:[%s8672_s1 + $0x2c8] sm:$0xff] }
  0xd2   : > { %5027 = vmatprep.subr.mxu0 %v5928_v2  ;;  %5062 = vmatprep.subr.mxu1 %v5928_v2 }
  0xd3   : > { %5028 = vmatpush3.msra.mxu0 %v7023_v57  ;;  %5063 = vmatpush3.msra.mxu1 %v6350_v1  ;;  %v8738_v1 = vld [vmem:[#allocation5_spill] sm:$0xff] }
  0xd4   : > { %5029 = vmatprep.subr.mxu0 %v5928_v2  ;;  %5064 = vmatprep.subr.mxu1 %v5928_v2 }
  0xd5   : > { %5030 = vmatpush3.msra.mxu0 %v7033_v59  ;;  %5031 = vmatprep.mubr.msk.f32.mxu0 %vm5929_vm0, %v5928_v2 }
  0xd6   : > { %5065 = vmatpush3.msra.mxu1 %v6364_v6  ;;  %5032 = vmatmul.mubr.f32.vlgmr.msra.gmra.mxu0 %v3617_v27  ;;  %v3669_v6 = vld [vmem:[%s6129_s27 + $0x38] sm:$0xf]  ;;  %v8745_v27 = vld [vmem:[#allocation15_spill] sm:$0xff] }
  0xd7   : > { %5066 = vmatprep.mubr.msk.f32.mxu1 %vm5929_vm0, %v5928_v2  ;;  %5069 = vmatprep.subr.mxu0 %v5928_v2 }
  0xd8   : > { %5104 = vmatprep.subr.mxu1 %v5928_v2  ;;  %5067 = vmatmul.mubr.f32.vlgmr.msra.gmra.mxu1 %v1181_v61  ;;  %v7182_v61 = vld [vmem:[%s8672_s1 + $0x2c0] sm:$0xff] }
  0xd9   : > { %5070 = vmatpush3.msra.mxu0 %v6158_v36  ;;  %5105 = vmatpush3.msra.mxu1 %v6383_v14  ;;  %v8739_v14 = vld [vmem:[#allocation9_spill] sm:$0xff] }
  0xda   : > { %5071 = vmatprep.subr.mxu0 %v5928_v2  ;;  %5106 = vmatprep.subr.mxu1 %v5928_v2 }
  0xdb   : > { %5072 = vmatpush3.msra.mxu0 %v6172_v38  ;;  %5107 = vmatpush3.msra.mxu1 %v6395_v18  ;;  %v7119_v18 = vld [vmem:[%s8672_s1 + $0x2f8] sm:$0xff] }
  0xdc   : > { %5073 = vmatprep.subr.mxu0 %v5928_v2  ;;  %5108 = vmatprep.subr.mxu1 %v5928_v2 }
  0xdd   : > { %5074 = vmatpush3.msra.mxu0 %v6186_v40  ;;  %5109 = vmatpush3.msra.mxu1 %v6406_v22  ;;  %v7128_v22 = vld [vmem:[%s8672_s1 + $0x2f0] sm:$0xff] }
  0xde   : > { %5075 = vmatprep.subr.mxu0 %v5928_v2  ;;  %5110 = vmatprep.subr.mxu1 %v5928_v2 }
  0xdf   : > { %5076 = vmatpush3.msra.mxu0 %v6200_v42  ;;  %5111 = vmatpush3.msra.mxu1 %v6417_v26  ;;  %v8732_v42 = vld [vmem:[#allocation6_spill] sm:$0xff] }
  0xe0   : > { %5077 = vmatprep.subr.mxu0 %v5928_v2  ;;  %5112 = vmatprep.subr.mxu1 %v5928_v2  ;;  %v8740_v26 = vld [vmem:[#allocation10_spill] sm:$0xff] }
  0xe1   : > { %5078 = vmatpush3.msra.mxu0 %v6214_v44  ;;  %5113 = vmatpush3.msra.mxu1 %v6428_v30  ;;  %v7137_v30 = vld [vmem:[%s8672_s1 + $0x2e8] sm:$0xff] }
  0xe2   : > { %5079 = vmatprep.subr.mxu0 %v5928_v2  ;;  %5114 = vmatprep.subr.mxu1 %v5928_v2 }
  0xe3   : > { %5080 = vmatpush3.msra.mxu0 %v6228_v46  ;;  %5115 = vmatpush3.msra.mxu1 %v6439_v33  ;;  %v8741_v33 = vld [vmem:[#allocation11_spill] sm:$0xff] }
  0xe4   : > { %5081 = vmatprep.subr.mxu0 %v5928_v2  ;;  %5116 = vmatprep.subr.mxu1 %v5928_v2 }
  0xe5   : > { %5082 = vmatpush3.msra.mxu0 %v6242_v48  ;;  %5117 = vmatpush3.msra.mxu1 %v6450_v63  ;;  %v8733_v48 = vld [vmem:[#allocation2_spill] sm:$0xff] }
  0xe6   : > { %5083 = vmatprep.subr.mxu0 %v5928_v2  ;;  %5118 = vmatprep.subr.mxu1 %v5928_v2  ;;  %v7146_v63 = vld [vmem:[%s8672_s1 + $0x2e0] sm:$0xff] }
  0xe7   : > { %5084 = vmatpush3.msra.mxu0 %v6256_v50  ;;  %5119 = vmatpush3.msra.mxu1 %v6461_v12  ;;  %v8734_v50 = vld [vmem:[#allocation7_spill] sm:$0xff]  ;;  %v8742_v12 = vld [vmem:[#allocation12_spill] sm:$0xff] }
  0xe8   : > { %5085 = vmatprep.subr.mxu0 %v5928_v2  ;;  %5120 = vmatprep.subr.mxu1 %v5928_v2 }
  0xe9   : > { %5086 = vmatpush3.msra.mxu0 %v6270_v52  ;;  %5121 = vmatpush3.msra.mxu1 %v6472_v20  ;;  %v8735_v52 = vld [vmem:[#allocation3_spill] sm:$0xff]  ;;  %v7155_v20 = vld [vmem:[%s8672_s1 + $0x2d8] sm:$0xff] }
  0xea   : > { %5087 = vmatprep.subr.mxu0 %v5928_v2  ;;  %5122 = vmatprep.subr.mxu1 %v5928_v2 }
  0xeb   : > { %5088 = vmatpush3.msra.mxu0 %v6284_v54  ;;  %5123 = vmatpush3.msra.mxu1 %v6483_v28  ;;  %v8736_v54 = vld [vmem:[#allocation4_spill] sm:$0xff]  ;;  %v8743_v28 = vld [vmem:[#allocation13_spill] sm:$0xff] }
  0xec   : > { %5089 = vmatprep.subr.mxu0 %v5928_v2  ;;  %5124 = vmatprep.subr.mxu1 %v5928_v2  ;;  %v272_v36 = vpop.f32.mrf.mxu0 }
  0xed   : > { %5090 = vmatpush3.msra.mxu0 %v6298_v56  ;;  %5125 = vmatpush3.msra.mxu1 %v6494_v34  ;;  %v8737_v56 = vld [vmem:[#allocation8_spill] sm:$0xff] }
  0xee   : > { %5091 = vmatprep.subr.mxu0 %v5928_v2  ;;  %5126 = vmatprep.subr.mxu1 %v5928_v2  ;;  %v342_v38 = vpop.f32.mrf.mxu1  ;;  %v4683_v40 = vpop.f32.mrf.mxu0  ;;  %v7164_v34 = vld [vmem:[%s8672_s1 + $0x2d0] sm:$0xff] }
  0xef   : > { %5092 = vmatpush3.msra.mxu0 %v6312_v58  ;;  %5127 = vmatpush3.msra.mxu1 %v8732_v42  ;;  %v7094_v44 = vadd.f32 %v342_v38, %v272_v36  ;;  %v3652_v58 = vld [vmem:[%s6129_s27 + $0x30] sm:$0xf]  ;;  %v7191_v38 = vld [vmem:[%s8672_s1 + $0x2b8] sm:$0xff] }
  0xf0   : > { %5093 = vmatprep.subr.mxu0 %v5928_v2  ;;  %5128 = vmatprep.subr.mxu1 %v5928_v2  ;;  %v4718_v46 = vpop.f32.mrf.mxu1  ;;  %v8746_v36 = vld [vmem:[#allocation16_spill] sm:$0xff]  ;;  %v8747_v40 = vld [vmem:[#allocation17_spill] sm:$0xff] }
  0xf1   : > { %5094 = vmatpush3.msra.mxu0 %v8733_v48  ;;  %5129 = vmatpush3.msra.mxu1 %v8734_v50  ;;  %v7200_v42 = vld [vmem:[%s8672_s1 + $0x2b0] sm:$0xff]  ;;  %v8748_v46 = vld [vmem:[#allocation18_spill] sm:$0xff]  ;;  %v7209_v48 = vld [vmem:[%s8672_s1 + $0x2a8] sm:$0xff] }
  0xf2   : > { %5095 = vmatprep.subr.mxu0 %v5928_v2  ;;  %5130 = vmatprep.subr.mxu1 %v5928_v2  ;;  %v8749_v50 = vld [vmem:[#allocation19_spill] sm:$0xff] }
  0xf3   : > { %5096 = vmatpush3.msra.mxu0 %v8735_v52  ;;  %5131 = vmatpush3.msra.mxu1 %v6527_v8  ;;  %v8744_v8 = vld [vmem:[#allocation14_spill] sm:$0xff] }
  0xf4   : > { %5097 = vmatprep.subr.mxu0 %v5928_v2  ;;  %5132 = vmatprep.subr.mxu1 %v5928_v2  ;;  %v7218_v52 = vld [vmem:[%s8672_s1 + $0x2a0] sm:$0xff] }
  0xf5   : > { %5098 = vmatpush3.msra.mxu0 %v8736_v54  ;;  %5133 = vmatpush3.msra.mxu1 %v8737_v56  ;;  %v8750_v56 = vld [vmem:[#allocation20_spill] sm:$0xff] }
  0xf6   : > { %5099 = vmatprep.subr.mxu0 %v5928_v2  ;;  %5134 = vmatprep.subr.mxu1 %v5928_v2 }
  0xf7   : > { %5100 = vmatpush3.msra.mxu0 %v8738_v1  ;;  %5101 = vmatprep.mubr.msk.f32.mxu0 %vm5929_vm0, %v5928_v2  ;;  %v7228_v1 = vld [vmem:[%s8672_s1 + $0x298] sm:$0xff] }
  0xf8   : > { %5135 = vmatpush3.msra.mxu1 %v8739_v14  ;;  %5102 = vmatmul.mubr.f32.vlgmr.msra.gmra.mxu0 %v3652_v58 }
  0xf9   : > { %5136 = vmatprep.mubr.msk.f32.mxu1 %vm5929_vm0, %v5928_v2  ;;  %5139 = vmatprep.subr.mxu0 %v5928_v2 }
  0xfa   : > { %5174 = vmatprep.subr.mxu1 %v5928_v2  ;;  %5137 = vmatmul.mubr.f32.vlgmr.msra.gmra.mxu1 %v3669_v6 }
  0xfb   : > { %5140 = vmatpush3.msra.mxu0 %v7119_v18  ;;  %5175 = vmatpush3.msra.mxu1 %v8740_v26  ;;  %v8751_v26 = vld [vmem:[#allocation21_spill] sm:$0xff] }
  0xfc   : > { %5141 = vmatprep.subr.mxu0 %v5928_v2  ;;  %5176 = vmatprep.subr.mxu1 %v5928_v2 }
  0xfd   : > { %5142 = vmatpush3.msra.mxu0 %v7128_v22  ;;  %5177 = vmatpush3.msra.mxu1 %v8741_v33 }
  0xfe   : > { %5143 = vmatprep.subr.mxu0 %v5928_v2  ;;  %5178 = vmatprep.subr.mxu1 %v5928_v2 }
  0xff   : > { %5144 = vmatpush3.msra.mxu0 %v7137_v30  ;;  %5179 = vmatpush3.msra.mxu1 %v8742_v12 }
 0x100   : > { %5145 = vmatprep.subr.mxu0 %v5928_v2  ;;  %5180 = vmatprep.subr.mxu1 %v5928_v2 }
 0x101   : > { %5146 = vmatpush3.msra.mxu0 %v7146_v63  ;;  %5181 = vmatpush3.msra.mxu1 %v8743_v28  ;;  %v8752_v28 = vld [vmem:[#allocation22_spill] sm:$0xff] }
 0x102   : > { %5147 = vmatprep.subr.mxu0 %v5928_v2  ;;  %5182 = vmatprep.subr.mxu1 %v5928_v2 }
 0x103   : > { %5148 = vmatpush3.msra.mxu0 %v7155_v20  ;;  %5183 = vmatpush3.msra.mxu1 %v8744_v8  ;;  %v3686_v8 = vld [vmem:[%s6129_s27 + $0x30] sm:$0x1e] }
 0x104   : > { %5149 = vmatprep.subr.mxu0 %v5928_v2  ;;  %5184 = vmatprep.subr.mxu1 %v5928_v2 }
 0x105   : > { %5150 = vmatpush3.msra.mxu0 %v7164_v34  ;;  %5185 = vmatpush3.msra.mxu1 %v8745_v27  ;;  %v7249_v27 = vld [vmem:[%s8672_s1 + $0x288] sm:$0xff] }
 0x106   : > { %5151 = vmatprep.subr.mxu0 %v5928_v2  ;;  %5186 = vmatprep.subr.mxu1 %v5928_v2 }
 0x107   : > { %5152 = vmatpush3.msra.mxu0 %v7173_v16  ;;  %5187 = vmatpush3.msra.mxu1 %v8746_v36  ;;  %v7258_v36 = vld [vmem:[%s8672_s1 + $0x280] sm:$0xff] }
 0x108   : > { %5153 = vmatprep.subr.mxu0 %v5928_v2  ;;  %5188 = vmatprep.subr.mxu1 %v5928_v2 }
 0x109   : > { %5154 = vmatpush3.msra.mxu0 %v7182_v61  ;;  %5189 = vmatpush3.msra.mxu1 %v8747_v40  ;;  %v1448_v40 = vrot.slane %v3686_v8, 1 }
 0x10a   : > { %5155 = vmatprep.subr.mxu0 %v5928_v2  ;;  %5190 = vmatprep.subr.mxu1 %v5928_v2 }
 0x10b   : > { %5156 = vmatpush3.msra.mxu0 %v7191_v38  ;;  %5191 = vmatpush3.msra.mxu1 %v8748_v46  ;;  %v8753_v46 = vld [vmem:[#allocation23_spill] sm:$0xff] }
 0x10c   : > { %5157 = vmatprep.subr.mxu0 %v5928_v2  ;;  %5192 = vmatprep.subr.mxu1 %v5928_v2 }
 0x10d   : > { %5158 = vmatpush3.msra.mxu0 %v7200_v42  ;;  %5193 = vmatpush3.msra.mxu1 %v8749_v50  ;;  %v7272_v50 = vld [vmem:[%s8672_s1 + $0x3f8] sm:$0xff] }
 0x10e   : > { %5159 = vmatprep.subr.mxu0 %v5928_v2  ;;  %5194 = vmatprep.subr.mxu1 %v5928_v2  ;;  %v433_v54 = vpop.f32.mrf.mxu0 }
 0x10f   : > { %5160 = vmatpush3.msra.mxu0 %v7209_v48  ;;  %5195 = vmatpush3.msra.mxu1 %v8750_v56  ;;  %v437_v58 = vadd.f32 %v433_v54, %v7094_v44  ;;  %v7239_v44 = vld [vmem:[%s8672_s1 + $0x290] sm:$0xff]  ;;  %v7290_v54 = vld [vmem:[%s8672_s1 + $0x3e8] sm:$0xff] }
 0x110   : > { %5161 = vmatprep.subr.mxu0 %v5928_v2  ;;  %5196 = vmatprep.subr.mxu1 %v5928_v2  ;;  %v522_v6 = vpop.f32.mrf.mxu1  ;;  %v4753_v14 = vpop.f32.mrf.mxu0 }
 0x111   : > { %5162 = vmatpush3.msra.mxu0 %v7218_v52  ;;  %5197 = vmatpush3.msra.mxu1 %v8751_v26  ;;  %v7232_v33 = vadd.f32 %v522_v6, %v437_v58  ;;  %v3737_v26 = vld [vmem:[%s6129_s27 + $0x40] sm:$0x1e] }
 0x112   : > { %5163 = vmatprep.subr.mxu0 %v5928_v2  ;;  %5198 = vmatprep.subr.mxu1 %v5928_v2  ;;  %v4788_v12 = vpop.f32.mrf.mxu1 }
 0x113   : > { %5164 = vmatpush3.msra.mxu0 %v7228_v1  ;;  %5199 = vmatpush3.msra.mxu1 %v8752_v28  ;;  %v3720_v12 = vld [vmem:[%s6129_s27 + $0x48] sm:$0xf]  ;;  %v7426_v28 = vld [vmem:[%s8672_s1 + $0xf8] sm:$0xff] }
 0x114   : > { %5165 = vmatprep.subr.mxu0 %v5928_v2  ;;  %5200 = vmatprep.subr.mxu1 %v5928_v2 }
 0x115   : > { %5166 = vmatpush3.msra.mxu0 %v7239_v44  ;;  %5201 = vmatpush3.msra.mxu1 %v6709_v60  ;;  %v3703_v60 = vld [vmem:[%s6129_s27 + $0x40] sm:$0xf] }
 0x116   : > { %5167 = vmatprep.subr.mxu0 %v5928_v2  ;;  %5202 = vmatprep.subr.mxu1 %v5928_v2 }
 0x117   : > { %5168 = vmatpush3.msra.mxu0 %v7249_v27  ;;  %5203 = vmatpush3.msra.mxu1 %v6720_v32  ;;  %v7281_v32 = vld [vmem:[%s8672_s1 + $0x3f0] sm:$0xff] }
 0x118   : > { %5169 = vmatprep.subr.mxu0 %v5928_v2  ;;  %5204 = vmatprep.subr.mxu1 %v5928_v2 }
 0x119   : > { %5170 = vmatpush3.msra.mxu0 %v7258_v36  ;;  %5171 = vmatprep.mubr.msk.f32.mxu0 %vm5929_vm0, %v5928_v2 }
 0x11a   : > { %5205 = vmatpush3.msra.mxu1 %v8753_v46  ;;  %5172 = vmatmul.mubr.f32.vlgmr.msra.gmra.mxu0 %v1448_v40 }
 0x11b   : > { %5206 = vmatprep.mubr.msk.f32.mxu1 %vm5929_vm0, %v5928_v2  ;;  %5209 = vmatprep.subr.mxu0 %v5928_v2 }
 0x11c   : > { %5244 = vmatprep.subr.mxu1 %v5928_v2  ;;  %5207 = vmatmul.mubr.f32.vlgmr.msra.gmra.mxu1 %v3703_v60 }
 0x11d   : > { %5210 = vmatpush3.msra.mxu0 %v7272_v50  ;;  %5245 = vmatpush3.msra.mxu1 %v6747_v4  ;;  %v7299_v4 = vld [vmem:[%s8672_s1 + $0x3e0] sm:$0xff] }
 0x11e   : > { %5211 = vmatprep.subr.mxu0 %v5928_v2  ;;  %5246 = vmatprep.subr.mxu1 %v5928_v2 }
 0x11f   : > { %5212 = vmatpush3.msra.mxu0 %v7281_v32  ;;  %5247 = vmatpush3.msra.mxu1 %v6756_v24  ;;  %v7308_v24 = vld [vmem:[%s8672_s1 + $0x3d8] sm:$0xff] }
 0x120   : > { %5213 = vmatprep.subr.mxu0 %v5928_v2  ;;  %5248 = vmatprep.subr.mxu1 %v5928_v2 }
 0x121   : > { %5214 = vmatpush3.msra.mxu0 %v7290_v54  ;;  %5249 = vmatpush3.msra.mxu1 %v6765_v10  ;;  %v7317_v10 = vld [vmem:[%s8672_s1 + $0x3d0] sm:$0xff] }
 0x122   : > { %5215 = vmatprep.subr.mxu0 %v5928_v2  ;;  %5250 = vmatprep.subr.mxu1 %v5928_v2 }
 0x123   : > { %5216 = vmatpush3.msra.mxu0 %v7299_v4  ;;  %5251 = vmatpush3.msra.mxu1 %v6774_v0  ;;  %v7326_v0 = vld [vmem:[%s8672_s1 + $0x3c8] sm:$0xff] }
 0x124   : > { %5217 = vmatprep.subr.mxu0 %v5928_v2  ;;  %5252 = vmatprep.subr.mxu1 %v5928_v2 }
 0x125   : > { %5218 = vmatpush3.msra.mxu0 %v7308_v24  ;;  %5253 = vmatpush3.msra.mxu1 %v6783_v3  ;;  %v7335_v3 = vld [vmem:[%s8672_s1 + $0x3c0] sm:$0xff] }
 0x126   : > { %5219 = vmatprep.subr.mxu0 %v5928_v2  ;;  %5254 = vmatprep.subr.mxu1 %v5928_v2 }
 0x127   : > { %5220 = vmatpush3.msra.mxu0 %v7317_v10  ;;  %5255 = vmatpush3.msra.mxu1 %v6792_v5  ;;  %v7344_v5 = vld [vmem:[%s8672_s1 + $0x3b8] sm:$0xff] }
 0x128   : > { %5221 = vmatprep.subr.mxu0 %v5928_v2  ;;  %5256 = vmatprep.subr.mxu1 %v5928_v2 }
 0x129   : > { %5222 = vmatpush3.msra.mxu0 %v7326_v0  ;;  %5257 = vmatpush3.msra.mxu1 %v6801_v7  ;;  %v7353_v7 = vld [vmem:[%s8672_s1 + $0x3b0] sm:$0xff] }
 0x12a   : > { %5223 = vmatprep.subr.mxu0 %v5928_v2  ;;  %5258 = vmatprep.subr.mxu1 %v5928_v2 }
 0x12b   : > { %5224 = vmatpush3.msra.mxu0 %v7335_v3  ;;  %5259 = vmatpush3.msra.mxu1 %v6810_v9  ;;  %v7362_v9 = vld [vmem:[%s8672_s1 + $0x3a8] sm:$0xff] }
 0x12c   : > { %5225 = vmatprep.subr.mxu0 %v5928_v2  ;;  %5260 = vmatprep.subr.mxu1 %v5928_v2 }
 0x12d   : > { %5226 = vmatpush3.msra.mxu0 %v7344_v5  ;;  %5261 = vmatpush3.msra.mxu1 %v6819_v11  ;;  %v7371_v11 = vld [vmem:[%s8672_s1 + $0x3a0] sm:$0xff] }
 0x12e   : > { %5227 = vmatprep.subr.mxu0 %v5928_v2  ;;  %5262 = vmatprep.subr.mxu1 %v5928_v2 }
 0x12f   : > { %5228 = vmatpush3.msra.mxu0 %v7353_v7  ;;  %5263 = vmatpush3.msra.mxu1 %v6828_v13  ;;  %v7382_v13 = vld [vmem:[%s8672_s1 + $0x398] sm:$0xff] }
 0x130   : > { %5229 = vmatprep.subr.mxu0 %v5928_v2  ;;  %5264 = vmatprep.subr.mxu1 %v5928_v2  ;;  %v7373_v56 = vpop.f32.mrf.mxu0 }
 0x131   : > { %5230 = vmatpush3.msra.mxu0 %v7362_v9  ;;  %5265 = vmatpush3.msra.mxu1 %v6837_v15  ;;  %v7393_v15 = vld [vmem:[%s8672_s1 + $0x390] sm:$0xff] }
 0x132   : > { %5231 = vmatprep.subr.mxu0 %v5928_v2  ;;  %5266 = vmatprep.subr.mxu1 %v5928_v2  ;;  %v7384_v58 = vpop.f32.mrf.mxu1  ;;  %v4823_v6 = vpop.f32.mrf.mxu0 }
 0x133   : > { %5232 = vmatpush3.msra.mxu0 %v7371_v11  ;;  %5267 = vmatpush3.msra.mxu1 %v6846_v17  ;;  %v7402_v17 = vld [vmem:[%s8672_s1 + $0x388] sm:$0xff] }
 0x134   : > { %5233 = vmatprep.subr.mxu0 %v5928_v2  ;;  %5268 = vmatprep.subr.mxu1 %v5928_v2  ;;  %v4858_v14 = vpop.f32.mrf.mxu1  ;;  %v3757_v6 = vld [vmem:[%s6129_s27 + $0x48] sm:$0xf] }
 0x135   : > { %5234 = vmatpush3.msra.mxu0 %v7382_v13  ;;  %5269 = vmatpush3.msra.mxu1 %v6855_v19  ;;  %v7412_v19 = vld [vmem:[%s8672_s1 + $0x380] sm:$0xff]  ;;  %v7580_v14 = vld [vmem:[%s8672_s1 + $0x178] sm:$0xff] }
 0x136   : > { %5235 = vmatprep.subr.mxu0 %v5928_v2  ;;  %5270 = vmatprep.subr.mxu1 %v5928_v2 }
 0x137   : > { %5236 = vmatpush3.msra.mxu0 %v7393_v15  ;;  %5271 = vmatpush3.msra.mxu1 %v6864_v21  ;;  %v1716_v21 = vrot.slane %v3737_v26, 1  ;;  %v3806_v26 = vld [vmem:[%s8672_s1 + $0x1f0] sm:$0xff] }
 0x138   : > { %5237 = vmatprep.subr.mxu0 %v5928_v2  ;;  %5272 = vmatprep.subr.mxu1 %v5928_v2 }
 0x139   : > { %5238 = vmatpush3.msra.mxu0 %v7402_v17  ;;  %5273 = vmatpush3.msra.mxu1 %v6874_v23  ;;  %v7435_v23 = vld [vmem:[%s8672_s1 + $0xf0] sm:$0xff] }
 0x13a   : > { %5239 = vmatprep.subr.mxu0 %v5928_v2  ;;  %5274 = vmatprep.subr.mxu1 %v5928_v2 }
 0x13b   : > { %5240 = vmatpush3.msra.mxu0 %v7412_v19  ;;  %5241 = vmatprep.mubr.msk.f32.mxu0 %vm5929_vm0, %v5928_v2 }
 0x13c   : > { %5275 = vmatpush3.msra.mxu1 %v6883_v25  ;;  %5242 = vmatmul.mubr.f32.vlgmr.msra.gmra.mxu0 %v3720_v12  ;;  %v7444_v25 = vld [vmem:[%s8672_s1 + $0xe8] sm:$0xff] }
 0x13d   : > { %5276 = vmatprep.mubr.msk.f32.mxu1 %vm5929_vm0, %v5928_v2  ;;  %5279 = vmatprep.subr.mxu0 %v5928_v2  ;;  %v7603_v12 = vld [vmem:[%s8672_s1 + $0x168] sm:$0xff] }
 0x13e   : > { %5314 = vmatprep.subr.mxu1 %v5928_v2  ;;  %5277 = vmatmul.mubr.f32.vlgmr.msra.gmra.mxu1 %v1716_v21  ;;  %v3805_v21 = vld [vmem:[%s8672_s1 + $0x1e8] sm:$0xff] }
 0x13f   : > { %5280 = vmatpush3.msra.mxu0 %v7426_v28  ;;  %5315 = vmatpush3.msra.mxu1 %v6897_v62  ;;  %v7453_v62 = vld [vmem:[%s8672_s1 + $0xe0] sm:$0xff] }
 0x140   : > { %5281 = vmatprep.subr.mxu0 %v5928_v2  ;;  %5316 = vmatprep.subr.mxu1 %v5928_v2 }
 0x141   : > { %5282 = vmatpush3.msra.mxu0 %v7435_v23  ;;  %5317 = vmatpush3.msra.mxu1 %v6906_v29  ;;  %v7462_v29 = vld [vmem:[%s8672_s1 + $0xd8] sm:$0xff] }
 0x142   : > { %5283 = vmatprep.subr.mxu0 %v5928_v2  ;;  %5318 = vmatprep.subr.mxu1 %v5928_v2 }
 0x143   : > { %5284 = vmatpush3.msra.mxu0 %v7444_v25  ;;  %5319 = vmatpush3.msra.mxu1 %v6915_v31  ;;  %v7471_v31 = vld [vmem:[%s8672_s1 + $0xd0] sm:$0xff] }
 0x144   : > { %5285 = vmatprep.subr.mxu0 %v5928_v2  ;;  %5320 = vmatprep.subr.mxu1 %v5928_v2 }
 0x145   : > { %5286 = vmatpush3.msra.mxu0 %v7453_v62  ;;  %5321 = vmatpush3.msra.mxu1 %v6924_v35  ;;  %v7480_v35 = vld [vmem:[%s8672_s1 + $0xc8] sm:$0xff] }
 0x146   : > { %5287 = vmatprep.subr.mxu0 %v5928_v2  ;;  %5322 = vmatprep.subr.mxu1 %v5928_v2 }
 0x147   : > { %5288 = vmatpush3.msra.mxu0 %v7462_v29  ;;  %5323 = vmatpush3.msra.mxu1 %v6933_v37  ;;  %v7489_v37 = vld [vmem:[%s8672_s1 + $0xc0] sm:$0xff] }
 0x148   : > { %5289 = vmatprep.subr.mxu0 %v5928_v2  ;;  %5324 = vmatprep.subr.mxu1 %v5928_v2 }
 0x149   : > { %5290 = vmatpush3.msra.mxu0 %v7471_v31  ;;  %5325 = vmatpush3.msra.mxu1 %v6942_v39  ;;  %v7498_v39 = vld [vmem:[%s8672_s1 + $0xb8] sm:$0xff] }
 0x14a   : > { %5291 = vmatprep.subr.mxu0 %v5928_v2  ;;  %5326 = vmatprep.subr.mxu1 %v5928_v2 }
 0x14b   : > { %5292 = vmatpush3.msra.mxu0 %v7480_v35  ;;  %5327 = vmatpush3.msra.mxu1 %v6951_v41  ;;  %v7507_v41 = vld [vmem:[%s8672_s1 + $0xb0] sm:$0xff] }
 0x14c   : > { %5293 = vmatprep.subr.mxu0 %v5928_v2  ;;  %5328 = vmatprep.subr.mxu1 %v5928_v2 }
 0x14d   : > { %5294 = vmatpush3.msra.mxu0 %v7489_v37  ;;  %5329 = vmatpush3.msra.mxu1 %v6960_v43  ;;  %v7516_v43 = vld [vmem:[%s8672_s1 + $0xa8] sm:$0xff] }
 0x14e   : > { %5295 = vmatprep.subr.mxu0 %v5928_v2  ;;  %5330 = vmatprep.subr.mxu1 %v5928_v2 }
 0x14f   : > { %5296 = vmatpush3.msra.mxu0 %v7498_v39  ;;  %5331 = vmatpush3.msra.mxu1 %v6969_v45  ;;  %v7525_v45 = vld [vmem:[%s8672_s1 + $0xa0] sm:$0xff] }
 0x150   : > { %5297 = vmatprep.subr.mxu0 %v5928_v2  ;;  %5332 = vmatprep.subr.mxu1 %v5928_v2 }
 0x151   : > { %5298 = vmatpush3.msra.mxu0 %v7507_v41  ;;  %5333 = vmatpush3.msra.mxu1 %v6978_v47  ;;  %v7536_v47 = vld [vmem:[%s8672_s1 + $0x98] sm:$0xff] }
 0x152   : > { %5299 = vmatprep.subr.mxu0 %v5928_v2  ;;  %5334 = vmatprep.subr.mxu1 %v5928_v2  ;;  %v7527_v8 = vpop.f32.mrf.mxu0 }
 0x153   : > { %5300 = vmatpush3.msra.mxu0 %v7516_v43  ;;  %5335 = vmatpush3.msra.mxu1 %v6987_v49  ;;  %v7547_v49 = vld [vmem:[%s8672_s1 + $0x90] sm:$0xff] }
 0x154   : > { %5301 = vmatprep.subr.mxu0 %v5928_v2  ;;  %5336 = vmatprep.subr.mxu1 %v5928_v2  ;;  %v7538_v40 = vpop.f32.mrf.mxu1  ;;  %v4893_v60 = vpop.f32.mrf.mxu0 }
 0x155   : > { %5302 = vmatpush3.msra.mxu0 %v7525_v45  ;;  %5337 = vmatpush3.msra.mxu1 %v6996_v51  ;;  %v7556_v51 = vld [vmem:[%s8672_s1 + $0x88] sm:$0xff]  ;;  %v7614_v60 = vld [vmem:[%s8672_s1 + $0x160] sm:$0xff] }
 0x156   : > { %5303 = vmatprep.subr.mxu0 %v5928_v2  ;;  %5338 = vmatprep.subr.mxu1 %v5928_v2  ;;  %v4928_v46 = vpop.f32.mrf.mxu1  ;;  %8754 = vst [vmem:[#allocation6_spill] sm:$0xff] %v7614_v60 }
 0x157   : > { %5304 = vmatpush3.msra.mxu0 %v7536_v47  ;;  %5339 = vmatpush3.msra.mxu1 %v7005_v53  ;;  %v7565_v53 = vld [vmem:[%s8672_s1 + $0x80] sm:$0xff] }
 0x158   : > { %5305 = vmatprep.subr.mxu0 %v5928_v2  ;;  %5340 = vmatprep.subr.mxu1 %v5928_v2  ;;  %v3804_v46 = vld [vmem:[%s8672_s1 + $0x1e0] sm:$0xff] }
 0x159   : > { %5306 = vmatpush3.msra.mxu0 %v7547_v49  ;;  %5341 = vmatpush3.msra.mxu1 %v7014_v55  ;;  %v3756_v55 = vld [vmem:[%s6129_s27 + $0x40] sm:$0xf] }
 0x15a   : > { %5307 = vmatprep.subr.mxu0 %v5928_v2  ;;  %5342 = vmatprep.subr.mxu1 %v5928_v2 }
 0x15b   : > { %5308 = vmatpush3.msra.mxu0 %v7556_v51  ;;  %5343 = vmatpush3.msra.mxu1 %v7023_v57  ;;  %v3807_v57 = vld [vmem:[%s8672_s1 + $0x1f8] sm:$0xff] }
 0x15c   : > { %5309 = vmatprep.subr.mxu0 %v5928_v2  ;;  %5344 = vmatprep.subr.mxu1 %v5928_v2 }
 0x15d   : > { %5310 = vmatpush3.msra.mxu0 %v7565_v53  ;;  %5311 = vmatprep.mubr.msk.f32.mxu0 %vm5929_vm0, %v5928_v2 }
 0x15e   : > { %5345 = vmatpush3.msra.mxu1 %v7033_v59  ;;  %5312 = vmatmul.mubr.f32.vlgmr.msra.gmra.mxu0 %v3757_v6  ;;  %v7592_v59 = vld [vmem:[%s8672_s1 + $0x170] sm:$0xff]  ;;  %v7625_v6 = vld [vmem:[%s8672_s1 + $0x158] sm:$0xff] }
 0x15f   : > { %5346 = vmatprep.mubr.msk.f32.mxu1 %vm5929_vm0, %v5928_v2  ;;  %5349 = vmatprep.subr.mxu0 %v5928_v2  ;;  %8755 = vst [vmem:[#allocation2_spill] sm:$0xff] %v7625_v6 }
 0x160   : > { %5384 = vmatprep.subr.mxu1 %v5928_v2  ;;  %5347 = vmatmul.mubr.f32.vlgmr.msra.gmra.mxu1 %v3756_v55  ;;  %v3803_v55 = vld [vmem:[%s8672_s1 + $0x1d8] sm:$0xff] }
 0x161   : > { %5350 = vmatpush3.msra.mxu0 %v7580_v14  ;;  %5385 = vmatpush3.msra.mxu1 %v3807_v57  ;;  %v7636_v57 = vld [vmem:[%s8672_s1 + $0x150] sm:$0xff] }
 0x162   : > { %5351 = vmatprep.subr.mxu0 %v5928_v2  ;;  %5386 = vmatprep.subr.mxu1 %v5928_v2  ;;  %8756 = vst [vmem:[#allocation7_spill] sm:$0xff] %v7636_v57 }
 0x163   : > { %5352 = vmatpush3.msra.mxu0 %v7592_v59  ;;  %5387 = vmatpush3.msra.mxu1 %v3806_v26  ;;  %v3802_v26 = vld [vmem:[%s8672_s1 + $0x1d0] sm:$0xff] }
 0x164   : > { %5353 = vmatprep.subr.mxu0 %v5928_v2  ;;  %5388 = vmatprep.subr.mxu1 %v5928_v2 }
 0x165   : > { %5354 = vmatpush3.msra.mxu0 %v7603_v12  ;;  %5389 = vmatpush3.msra.mxu1 %v3805_v21  ;;  %v615_v21 = vadd.f32 %v7373_v56, %v7232_v33  ;;  %v7660_v33 = vld [vmem:[%s8672_s1 + $0x140] sm:$0xff] }
 0x166   : > { %5355 = vmatprep.subr.mxu0 %v5928_v2  ;;  %5390 = vmatprep.subr.mxu1 %v5928_v2  ;;  %8757 = vst [vmem:[#allocation3_spill] sm:$0xff] %v7660_v33  ;;  %v3800_v56 = vld [vmem:[%s8672_s1 + $0x1c0] sm:$0xff] }
 0x167   : > { %5356 = vmatpush3.msra.mxu0 %v7614_v60  ;;  %5391 = vmatpush3.msra.mxu1 %v3804_v46  ;;  %v7649_v46 = vld [vmem:[%s8672_s1 + $0x148] sm:$0xff] }
 0x168   : > { %5357 = vmatprep.subr.mxu0 %v5928_v2  ;;  %5392 = vmatprep.subr.mxu1 %v5928_v2  ;;  %v3801_v60 = vld [vmem:[%s8672_s1 + $0x1c8] sm:$0xff] }
 0x169   : > { %5358 = vmatpush3.msra.mxu0 %v7625_v6  ;;  %5393 = vmatpush3.msra.mxu1 %v3803_v55  ;;  %v707_v55 = vadd.f32 %v7384_v58, %v615_v21  ;;  %v7684_v58 = vld [vmem:[%s8672_s1 + $0x130] sm:$0xff]  ;;  %v3797_v21 = vld [vmem:[%s8672_s1 + $0x1a8] sm:$0xff] }
 0x16a   : > { %5359 = vmatprep.subr.mxu0 %v5928_v2  ;;  %5394 = vmatprep.subr.mxu1 %v5928_v2  ;;  %8759 = vst [vmem:[#allocation8_spill] sm:$0xff] %v7684_v58 }
 0x16b   : > { %5360 = vmatpush3.msra.mxu0 %v7636_v57  ;;  %5395 = vmatpush3.msra.mxu1 %v3802_v26  ;;  %v7672_v26 = vld [vmem:[%s8672_s1 + $0x138] sm:$0xff]  ;;  %v797_v6 = vadd.f32 %v7527_v8, %v707_v55  ;;  %v7695_v8 = vld [vmem:[%s8672_s1 + $0x128] sm:$0xff]  ;;  %v3796_v55 = vld [vmem:[%s8672_s1 + $0x1a0] sm:$0xff] }
 0x16c   : > { %5361 = vmatprep.subr.mxu0 %v5928_v2  ;;  %5396 = vmatprep.subr.mxu1 %v5928_v2  ;;  %8758 = vst [vmem:[#allocation4_spill] sm:$0xff] %v7672_v26  ;;  %v3799_v57 = vld [vmem:[%s8672_s1 + $0x1b8] sm:$0xff]  ;;  %8760 = vst [vmem:[#allocation5_spill] sm:$0xff] %v7695_v8 }
 0x16d   : > { %5362 = vmatpush3.msra.mxu0 %v7649_v46  ;;  %5397 = vmatpush3.msra.mxu1 %v3801_v60  ;;  %v3798_v60 = vld [vmem:[%s8672_s1 + $0x1b0] sm:$0xff] }
 0x16e   : > { %5363 = vmatprep.subr.mxu0 %v5928_v2  ;;  %5398 = vmatprep.subr.mxu1 %v5928_v2 }
 0x16f   : > { %5364 = vmatpush3.msra.mxu0 %v7660_v33  ;;  %5399 = vmatpush3.msra.mxu1 %v3800_v56  ;;  %v886_v56 = vadd.f32 %v7538_v40, %v797_v6  ;;  %v7715_v40 = vld [vmem:[%s8673_s2] ss:$0 sm:$0xff] }
 0x170   : > { %5365 = vmatprep.subr.mxu0 %v5928_v2  ;;  %5400 = vmatprep.subr.mxu1 %v5928_v2  ;;  %8762 = vst [vmem:[#allocation10_spill] sm:$0xff] %v7715_v40 }
 0x171   : > { %5366 = vmatpush3.msra.mxu0 %v7672_v26  ;;  %5401 = vmatpush3.msra.mxu1 %v3799_v57  ;;  %v7707_v57 = vld [vmem:[%s8672_s1 + $0x120] sm:$0xff] }
 0x172   : > { %5367 = vmatprep.subr.mxu0 %v5928_v2  ;;  %5402 = vmatprep.subr.mxu1 %v5928_v2  ;;  %8761 = vst [vmem:[#allocation9_spill] sm:$0xff] %v7707_v57 }
 0x173   : > { %5368 = vmatpush3.msra.mxu0 %v7684_v58  ;;  %5403 = vmatpush3.msra.mxu1 %v3798_v60  ;;  %v7724_v60 = vld [vmem:[%s8672_s1 + $0x118] sm:$0xff] }
 0x174   : > { %5369 = vmatprep.subr.mxu0 %v5928_v2  ;;  %5404 = vmatprep.subr.mxu1 %v5928_v2  ;;  %v974_v26 = vpop.f32.mrf.mxu0  ;;  %v3795_v58 = vld [vmem:[%s8672_s1 + $0x198] sm:$0xff] }
 0x175   : > { %5370 = vmatpush3.msra.mxu0 %v7695_v8  ;;  %5405 = vmatpush3.msra.mxu1 %v3797_v21  ;;  %v978_v6 = vadd.f32 %v974_v26, %v886_v56  ;;  %v7738_v21 = vld [vmem:[%s8672_s1 + $0x110] sm:$0xff] }
 0x176   : > { %5371 = vmatprep.subr.mxu0 %v5928_v2  ;;  %5406 = vmatprep.subr.mxu1 %v5928_v2  ;;  %v7729_v33 = vpop.f32.mrf.mxu1  ;;  %v4963_v8 = vpop.f32.mrf.mxu0  ;;  %v3794_v56 = vld [vmem:[%s8672_s1 + $0x190] sm:$0xff] }
 0x177   : > { %5372 = vmatpush3.msra.mxu0 %v7707_v57  ;;  %5407 = vmatpush3.msra.mxu1 %v3796_v55  ;;  %v986_v26 = vadd.f32 %v7715_v40, %v978_v6  ;;  %v3774_v6 = vld [vmem:[%s6129_s27 + $0x40] sm:$0x1e]  ;;  %v7755_v40 = vld [vmem:[%s8672_s1 + $0x108] sm:$0xff] }
 0x178   : > { %5373 = vmatprep.subr.mxu0 %v5928_v2  ;;  %5408 = vmatprep.subr.mxu1 %v5928_v2  ;;  %v4998_v8 = vpop.f32.mrf.mxu1  ;;  %v3793_v57 = vld [vmem:[%s8672_s1 + $0x188] sm:$0xff] }
 0x179   : > { %5374 = vmatpush3.msra.mxu0 %v7724_v60  ;;  %5409 = vmatpush3.msra.mxu1 %v3795_v58  ;;  %v987_v55 = vmax.f32 %v986_v26, 0.0  ;;  %v7767_v58 = vld [vmem:[%s8672_s1 + $0x100] sm:$0xff]  ;;  %v1992_v26 = vrot.slane %v3774_v6, 1  ;;  %v7800_v6 = vld [vmem:[%s8672_s1 + $0x268] sm:$0xff] }
 0x17a   : > { %5375 = vmatprep.subr.mxu0 %v5928_v2  ;;  %5410 = vmatprep.subr.mxu1 %v5928_v2  ;;  %v3792_v8 = vld [vmem:[%s8672_s1 + $0x180] sm:$0xff] }
 0x17b   : > { %5376 = vmatpush3.msra.mxu0 %v7738_v21  ;;  %5411 = vmatpush3.msra.mxu1 %v3794_v56  ;;  %988 = vst [vmem:[%s7746_s9] sm:$0xf] %v987_v55  ;;  %v3791_v56 = vld [vmem:[%s6129_s27 + $0x50] sm:$0xf] }
 0x17c   : > { %5377 = vmatprep.subr.mxu0 %v5928_v2  ;;  %5412 = vmatprep.subr.mxu1 %v5928_v2  ;;  %v7791_v55 = vld [vmem:[%s8672_s1 + $0x270] sm:$0xff] }
 0x17d   : > { %5378 = vmatpush3.msra.mxu0 %v7755_v40  ;;  %5413 = vmatpush3.msra.mxu1 %v3793_v57  ;;  %v7782_v57 = vld [vmem:[%s8672_s1 + $0x278] sm:$0xff] }
 0x17e   : > { %5379 = vmatprep.subr.mxu0 %v5928_v2  ;;  %5414 = vmatprep.subr.mxu1 %v5928_v2 }
 0x17f   : > { %5380 = vmatpush3.msra.mxu0 %v7767_v58  ;;  %5381 = vmatprep.mubr.msk.f32.mxu0 %vm5929_vm0, %v5928_v2 }
 0x180   : > { %5415 = vmatpush3.msra.mxu1 %v3792_v8  ;;  %5382 = vmatmul.mubr.f32.vlgmr.msra.gmra.mxu0 %v1992_v26 }
 0x181   : > { %5416 = vmatprep.mubr.msk.f32.mxu1 %vm5929_vm0, %v5928_v2  ;;  %5419 = vmatprep.subr.mxu0 %v5928_v2 }
 0x182   : > { %5454 = vmatprep.subr.mxu1 %v5928_v2  ;;  %5417 = vmatmul.mubr.f32.vlgmr.msra.gmra.mxu1 %v3791_v56 }
 0x183   : > { %5420 = vmatpush3.msra.mxu0 %v7782_v57  ;;  %5455 = vmatpush3.msra.mxu1 %v7119_v18  ;;  %v7809_v18 = vld [vmem:[%s8672_s1 + $0x260] sm:$0xff] }
 0x184   : > { %5421 = vmatprep.subr.mxu0 %v5928_v2  ;;  %5456 = vmatprep.subr.mxu1 %v5928_v2 }
 0x185   : > { %5422 = vmatpush3.msra.mxu0 %v7791_v55  ;;  %5457 = vmatpush3.msra.mxu1 %v7128_v22  ;;  %v7818_v22 = vld [vmem:[%s8672_s1 + $0x258] sm:$0xff] }
 0x186   : > { %5423 = vmatprep.subr.mxu0 %v5928_v2  ;;  %5458 = vmatprep.subr.mxu1 %v5928_v2 }
 0x187   : > { %5424 = vmatpush3.msra.mxu0 %v7800_v6  ;;  %5459 = vmatpush3.msra.mxu1 %v7137_v30  ;;  %v7827_v30 = vld [vmem:[%s8672_s1 + $0x250] sm:$0xff] }
 0x188   : > { %5425 = vmatprep.subr.mxu0 %v5928_v2  ;;  %5460 = vmatprep.subr.mxu1 %v5928_v2 }
 0x189   : > { %5426 = vmatpush3.msra.mxu0 %v7809_v18  ;;  %5461 = vmatpush3.msra.mxu1 %v7146_v63  ;;  %v7836_v63 = vld [vmem:[%s8672_s1 + $0x248] sm:$0xff] }
 0x18a   : > { %5427 = vmatprep.subr.mxu0 %v5928_v2  ;;  %5462 = vmatprep.subr.mxu1 %v5928_v2 }
 0x18b   : > { %5428 = vmatpush3.msra.mxu0 %v7818_v22  ;;  %5463 = vmatpush3.msra.mxu1 %v7155_v20  ;;  %v7845_v20 = vld [vmem:[%s8672_s1 + $0x240] sm:$0xff] }
 0x18c   : > { %5429 = vmatprep.subr.mxu0 %v5928_v2  ;;  %5464 = vmatprep.subr.mxu1 %v5928_v2 }
 0x18d   : > { %5430 = vmatpush3.msra.mxu0 %v7827_v30  ;;  %5465 = vmatpush3.msra.mxu1 %v7164_v34  ;;  %v7854_v34 = vld [vmem:[%s8672_s1 + $0x238] sm:$0xff] }
 0x18e   : > { %5431 = vmatprep.subr.mxu0 %v5928_v2  ;;  %5466 = vmatprep.subr.mxu1 %v5928_v2 }
 0x18f   : > { %5432 = vmatpush3.msra.mxu0 %v7836_v63  ;;  %5467 = vmatpush3.msra.mxu1 %v7173_v16  ;;  %v7863_v16 = vld [vmem:[%s8672_s1 + $0x230] sm:$0xff] }
 0x190   : > { %5433 = vmatprep.subr.mxu0 %v5928_v2  ;;  %5468 = vmatprep.subr.mxu1 %v5928_v2  ;;  %8763 = vst [vmem:[#allocation11_spill] sm:$0xff] %v7863_v16 }
 0x191   : > { %5434 = vmatpush3.msra.mxu0 %v7845_v20  ;;  %5469 = vmatpush3.msra.mxu1 %v7182_v61  ;;  %v7872_v61 = vld [vmem:[%s8672_s1 + $0x228] sm:$0xff] }
 0x192   : > { %5435 = vmatprep.subr.mxu0 %v5928_v2  ;;  %5470 = vmatprep.subr.mxu1 %v5928_v2  ;;  %8764 = vst [vmem:[#allocation12_spill] sm:$0xff] %v7872_v61 }
 0x193   : > { %5436 = vmatpush3.msra.mxu0 %v7854_v34  ;;  %5471 = vmatpush3.msra.mxu1 %v7191_v38  ;;  %v7881_v38 = vld [vmem:[%s8672_s1 + $0x220] sm:$0xff] }
 0x194   : > { %5437 = vmatprep.subr.mxu0 %v5928_v2  ;;  %5472 = vmatprep.subr.mxu1 %v5928_v2 }
 0x195   : > { %5438 = vmatpush3.msra.mxu0 %v7863_v16  ;;  %5473 = vmatpush3.msra.mxu1 %v7200_v42  ;;  %v7891_v42 = vld [vmem:[%s8672_s1 + $0x218] sm:$0xff] }
 0x196   : > { %5439 = vmatprep.subr.mxu0 %v5928_v2  ;;  %5474 = vmatprep.subr.mxu1 %v5928_v2  ;;  %v1159_v26 = vpop.f32.mrf.mxu0 }
 0x197   : > { %5440 = vmatpush3.msra.mxu0 %v7872_v61  ;;  %5475 = vmatpush3.msra.mxu1 %v7209_v48  ;;  %v1160_v8 = vadd.f32 %v1159_v26, %v7729_v33  ;;  %v7902_v48 = vld [vmem:[%s8672_s1 + $0x210] sm:$0xff]  ;;  %v3808_v26 = vld [vmem:[%s6129_s27 + $0x58] sm:$0xf] }
 0x198   : > { %5441 = vmatprep.subr.mxu0 %v5928_v2  ;;  %5476 = vmatprep.subr.mxu1 %v5928_v2  ;;  %v1249_v56 = vpop.f32.mrf.mxu1  ;;  %v5033_v16 = vpop.f32.mrf.mxu0 }
 0x199   : > { %5442 = vmatpush3.msra.mxu0 %v7881_v38  ;;  %5477 = vmatpush3.msra.mxu1 %v7218_v52  ;;  %v7895_v61 = vadd.f32 %v1249_v56, %v1160_v8  ;;  %v7911_v52 = vld [vmem:[%s8672_s1 + $0x208] sm:$0xff]  ;;  %v3825_v16 = vld [vmem:[%s6129_s27 + $0x50] sm:$0x1e]  ;;  %v7935_v8 = vld [vmem:[%s8672_s1 + $0x378] sm:$0xff] }
 0x19a   : > { %5443 = vmatprep.subr.mxu0 %v5928_v2  ;;  %5478 = vmatprep.subr.mxu1 %v5928_v2  ;;  %v5068_v33 = vpop.f32.mrf.mxu1 }
 0x19b   : > { %5444 = vmatpush3.msra.mxu0 %v7891_v42  ;;  %5479 = vmatpush3.msra.mxu1 %v7228_v1  ;;  %v7921_v1 = vld [vmem:[%s8672_s1 + $0x200] sm:$0xff] }
 0x19c   : > { %5445 = vmatprep.subr.mxu0 %v5928_v2  ;;  %5480 = vmatprep.subr.mxu1 %v5928_v2 }
 0x19d   : > { %5446 = vmatpush3.msra.mxu0 %v7902_v48  ;;  %5481 = vmatpush3.msra.mxu1 %v7239_v44  ;;  %v2259_v44 = vrot.slane %v3825_v16, 1 }
 0x19e   : > { %5447 = vmatprep.subr.mxu0 %v5928_v2  ;;  %5482 = vmatprep.subr.mxu1 %v5928_v2 }
 0x19f   : > { %5448 = vmatpush3.msra.mxu0 %v7911_v52  ;;  %5483 = vmatpush3.msra.mxu1 %v7249_v27  ;;  %v7944_v27 = vld [vmem:[%s8672_s1 + $0x370] sm:$0xff] }
 0x1a0   : > { %5449 = vmatprep.subr.mxu0 %v5928_v2  ;;  %5484 = vmatprep.subr.mxu1 %v5928_v2 }
 0x1a1   : > { %5450 = vmatpush3.msra.mxu0 %v7921_v1  ;;  %5451 = vmatprep.mubr.msk.f32.mxu0 %vm5929_vm0, %v5928_v2 }
 0x1a2   : > { %5485 = vmatpush3.msra.mxu1 %v7258_v36  ;;  %5452 = vmatmul.mubr.f32.vlgmr.msra.gmra.mxu0 %v3808_v26  ;;  %v7953_v36 = vld [vmem:[%s8672_s1 + $0x368] sm:$0xff] }
 0x1a3   : > { %5486 = vmatprep.mubr.msk.f32.mxu1 %vm5929_vm0, %v5928_v2  ;;  %5489 = vmatprep.subr.mxu0 %v5928_v2 }
 0x1a4   : > { %5524 = vmatprep.subr.mxu1 %v5928_v2  ;;  %5487 = vmatmul.mubr.f32.vlgmr.msra.gmra.mxu1 %v2259_v44  ;;  %v3842_v44 = vld [vmem:[%s6129_s27 + $0x60] sm:$0xf] }
 0x1a5   : > { %5490 = vmatpush3.msra.mxu0 %v7935_v8  ;;  %5525 = vmatpush3.msra.mxu1 %v7272_v50  ;;  %v7962_v50 = vld [vmem:[%s8672_s1 + $0x360] sm:$0xff] }
 0x1a6   : > { %5491 = vmatprep.subr.mxu0 %v5928_v2  ;;  %5526 = vmatprep.subr.mxu1 %v5928_v2 }
 0x1a7   : > { %5492 = vmatpush3.msra.mxu0 %v7944_v27  ;;  %5527 = vmatpush3.msra.mxu1 %v7281_v32  ;;  %v7971_v32 = vld [vmem:[%s8672_s1 + $0x358] sm:$0xff] }
 0x1a8   : > { %5493 = vmatprep.subr.mxu0 %v5928_v2  ;;  %5528 = vmatprep.subr.mxu1 %v5928_v2 }
 0x1a9   : > { %5494 = vmatpush3.msra.mxu0 %v7953_v36  ;;  %5529 = vmatpush3.msra.mxu1 %v7290_v54  ;;  %v7980_v54 = vld [vmem:[%s8672_s1 + $0x350] sm:$0xff] }
 0x1aa   : > { %5495 = vmatprep.subr.mxu0 %v5928_v2  ;;  %5530 = vmatprep.subr.mxu1 %v5928_v2 }
 0x1ab   : > { %5496 = vmatpush3.msra.mxu0 %v7962_v50  ;;  %5531 = vmatpush3.msra.mxu1 %v7299_v4  ;;  %v7989_v4 = vld [vmem:[%s8672_s1 + $0x348] sm:$0xff] }
 0x1ac   : > { %5497 = vmatprep.subr.mxu0 %v5928_v2  ;;  %5532 = vmatprep.subr.mxu1 %v5928_v2 }
 0x1ad   : > { %5498 = vmatpush3.msra.mxu0 %v7971_v32  ;;  %5533 = vmatpush3.msra.mxu1 %v7308_v24  ;;  %v7998_v24 = vld [vmem:[%s8672_s1 + $0x340] sm:$0xff] }
 0x1ae   : > { %5499 = vmatprep.subr.mxu0 %v5928_v2  ;;  %5534 = vmatprep.subr.mxu1 %v5928_v2 }
 0x1af   : > { %5500 = vmatpush3.msra.mxu0 %v7980_v54  ;;  %5535 = vmatpush3.msra.mxu1 %v7317_v10  ;;  %v8007_v10 = vld [vmem:[%s8672_s1 + $0x338] sm:$0xff] }
 0x1b0   : > { %5501 = vmatprep.subr.mxu0 %v5928_v2  ;;  %5536 = vmatprep.subr.mxu1 %v5928_v2 }
 0x1b1   : > { %5502 = vmatpush3.msra.mxu0 %v7989_v4  ;;  %5537 = vmatpush3.msra.mxu1 %v7326_v0  ;;  %v8016_v0 = vld [vmem:[%s8672_s1 + $0x330] sm:$0xff] }
 0x1b2   : > { %5503 = vmatprep.subr.mxu0 %v5928_v2  ;;  %5538 = vmatprep.subr.mxu1 %v5928_v2 }
 0x1b3   : > { %5504 = vmatpush3.msra.mxu0 %v7998_v24  ;;  %5539 = vmatpush3.msra.mxu1 %v7335_v3  ;;  %v8025_v3 = vld [vmem:[%s8672_s1 + $0x328] sm:$0xff] }
 0x1b4   : > { %5505 = vmatprep.subr.mxu0 %v5928_v2  ;;  %5540 = vmatprep.subr.mxu1 %v5928_v2 }
 0x1b5   : > { %5506 = vmatpush3.msra.mxu0 %v8007_v10  ;;  %5541 = vmatpush3.msra.mxu1 %v7344_v5  ;;  %v8034_v5 = vld [vmem:[%s8672_s1 + $0x320] sm:$0xff] }
 0x1b6   : > { %5507 = vmatprep.subr.mxu0 %v5928_v2  ;;  %5542 = vmatprep.subr.mxu1 %v5928_v2 }
 0x1b7   : > { %5508 = vmatpush3.msra.mxu0 %v8016_v0  ;;  %5543 = vmatpush3.msra.mxu1 %v7353_v7  ;;  %v8045_v7 = vld [vmem:[%s8672_s1 + $0x318] sm:$0xff] }
 0x1b8   : > { %5509 = vmatprep.subr.mxu0 %v5928_v2  ;;  %5544 = vmatprep.subr.mxu1 %v5928_v2  ;;  %v8036_v56 = vpop.f32.mrf.mxu0 }
 0x1b9   : > { %5510 = vmatpush3.msra.mxu0 %v8025_v3  ;;  %5545 = vmatpush3.msra.mxu1 %v7362_v9  ;;  %v8056_v9 = vld [vmem:[%s8672_s1 + $0x310] sm:$0xff] }
 0x1ba   : > { %5511 = vmatprep.subr.mxu0 %v5928_v2  ;;  %5546 = vmatprep.subr.mxu1 %v5928_v2  ;;  %v8047_v33 = vpop.f32.mrf.mxu1  ;;  %v5103_v16 = vpop.f32.mrf.mxu0 }
 0x1bb   : > { %5512 = vmatpush3.msra.mxu0 %v8034_v5  ;;  %5547 = vmatpush3.msra.mxu1 %v7371_v11  ;;  %v8065_v11 = vld [vmem:[%s8672_s1 + $0x308] sm:$0xff]  ;;  %v8089_v16 = vld [vmem:[%s8672_s1 + $0x478] sm:$0xff] }
 0x1bc   : > { %5513 = vmatprep.subr.mxu0 %v5928_v2  ;;  %5548 = vmatprep.subr.mxu1 %v5928_v2  ;;  %v5138_v26 = vpop.f32.mrf.mxu1 }
 0x1bd   : > { %5514 = vmatpush3.msra.mxu0 %v8045_v7  ;;  %5549 = vmatpush3.msra.mxu1 %v7382_v13  ;;  %v8074_v13 = vld [vmem:[%s8672_s1 + $0x300] sm:$0xff] }
 0x1be   : > { %5515 = vmatprep.subr.mxu0 %v5928_v2  ;;  %5550 = vmatprep.subr.mxu1 %v5928_v2 }
 0x1bf   : > { %5516 = vmatpush3.msra.mxu0 %v8056_v9  ;;  %5551 = vmatpush3.msra.mxu1 %v7393_v15  ;;  %v3859_v15 = vld [vmem:[%s6129_s27 + $0x68] sm:$0xf] }
 0x1c0   : > { %5517 = vmatprep.subr.mxu0 %v5928_v2  ;;  %5552 = vmatprep.subr.mxu1 %v5928_v2 }
 0x1c1   : > { %5518 = vmatpush3.msra.mxu0 %v8065_v11  ;;  %5553 = vmatpush3.msra.mxu1 %v7402_v17  ;;  %v8098_v17 = vld [vmem:[%s8672_s1 + $0x470] sm:$0xff] }
 0x1c2   : > { %5519 = vmatprep.subr.mxu0 %v5928_v2  ;;  %5554 = vmatprep.subr.mxu1 %v5928_v2 }
 0x1c3   : > { %5520 = vmatpush3.msra.mxu0 %v8074_v13  ;;  %5521 = vmatprep.mubr.msk.f32.mxu0 %vm5929_vm0, %v5928_v2 }
 0x1c4   : > { %5555 = vmatpush3.msra.mxu1 %v7412_v19  ;;  %5522 = vmatmul.mubr.f32.vlgmr.msra.gmra.mxu0 %v3842_v44  ;;  %v8107_v19 = vld [vmem:[%s8672_s1 + $0x468] sm:$0xff] }
 0x1c5   : > { %5556 = vmatprep.mubr.msk.f32.mxu1 %vm5929_vm0, %v5928_v2  ;;  %5559 = vmatprep.subr.mxu0 %v5928_v2 }
 0x1c6   : > { %5594 = vmatprep.subr.mxu1 %v5928_v2  ;;  %5557 = vmatmul.mubr.f32.vlgmr.msra.gmra.mxu1 %v3859_v15 }
 0x1c7   : > { %5560 = vmatpush3.msra.mxu0 %v8089_v16  ;;  %5595 = vmatpush3.msra.mxu1 %v7426_v28  ;;  %v8116_v28 = vld [vmem:[%s8672_s1 + $0x460] sm:$0xff] }
 0x1c8   : > { %5561 = vmatprep.subr.mxu0 %v5928_v2  ;;  %5596 = vmatprep.subr.mxu1 %v5928_v2 }
 0x1c9   : > { %5562 = vmatpush3.msra.mxu0 %v8098_v17  ;;  %5597 = vmatpush3.msra.mxu1 %v7435_v23  ;;  %v8125_v23 = vld [vmem:[%s8672_s1 + $0x458] sm:$0xff] }
 0x1ca   : > { %5563 = vmatprep.subr.mxu0 %v5928_v2  ;;  %5598 = vmatprep.subr.mxu1 %v5928_v2 }
 0x1cb   : > { %5564 = vmatpush3.msra.mxu0 %v8107_v19  ;;  %5599 = vmatpush3.msra.mxu1 %v7444_v25  ;;  %v8134_v25 = vld [vmem:[%s8672_s1 + $0x450] sm:$0xff] }
 0x1cc   : > { %5565 = vmatprep.subr.mxu0 %v5928_v2  ;;  %5600 = vmatprep.subr.mxu1 %v5928_v2 }
 0x1cd   : > { %5566 = vmatpush3.msra.mxu0 %v8116_v28  ;;  %5601 = vmatpush3.msra.mxu1 %v7453_v62  ;;  %v8143_v62 = vld [vmem:[%s8672_s1 + $0x448] sm:$0xff] }
 0x1ce   : > { %5567 = vmatprep.subr.mxu0 %v5928_v2  ;;  %5602 = vmatprep.subr.mxu1 %v5928_v2 }
 0x1cf   : > { %5568 = vmatpush3.msra.mxu0 %v8125_v23  ;;  %5603 = vmatpush3.msra.mxu1 %v7462_v29  ;;  %v8152_v29 = vld [vmem:[%s8672_s1 + $0x440] sm:$0xff] }
 0x1d0   : > { %5569 = vmatprep.subr.mxu0 %v5928_v2  ;;  %5604 = vmatprep.subr.mxu1 %v5928_v2 }
 0x1d1   : > { %5570 = vmatpush3.msra.mxu0 %v8134_v25  ;;  %5605 = vmatpush3.msra.mxu1 %v7471_v31  ;;  %v8161_v31 = vld [vmem:[%s8672_s1 + $0x438] sm:$0xff] }
 0x1d2   : > { %5571 = vmatprep.subr.mxu0 %v5928_v2  ;;  %5606 = vmatprep.subr.mxu1 %v5928_v2 }
 0x1d3   : > { %5572 = vmatpush3.msra.mxu0 %v8143_v62  ;;  %5607 = vmatpush3.msra.mxu1 %v7480_v35  ;;  %v8170_v35 = vld [vmem:[%s8672_s1 + $0x430] sm:$0xff] }
 0x1d4   : > { %5573 = vmatprep.subr.mxu0 %v5928_v2  ;;  %5608 = vmatprep.subr.mxu1 %v5928_v2  ;;  %8765 = vst [vmem:[#allocation13_spill] sm:$0xff] %v8170_v35 }
 0x1d5   : > { %5574 = vmatpush3.msra.mxu0 %v8152_v29  ;;  %5609 = vmatpush3.msra.mxu1 %v7489_v37  ;;  %v8179_v37 = vld [vmem:[%s8672_s1 + $0x428] sm:$0xff] }
 0x1d6   : > { %5575 = vmatprep.subr.mxu0 %v5928_v2  ;;  %5610 = vmatprep.subr.mxu1 %v5928_v2  ;;  %8766 = vst [vmem:[#allocation14_spill] sm:$0xff] %v8179_v37 }
 0x1d7   : > { %5576 = vmatpush3.msra.mxu0 %v8161_v31  ;;  %5611 = vmatpush3.msra.mxu1 %v7498_v39  ;;  %v8188_v39 = vld [vmem:[%s8672_s1 + $0x420] sm:$0xff] }
 0x1d8   : > { %5577 = vmatprep.subr.mxu0 %v5928_v2  ;;  %5612 = vmatprep.subr.mxu1 %v5928_v2 }
 0x1d9   : > { %5578 = vmatpush3.msra.mxu0 %v8170_v35  ;;  %5613 = vmatpush3.msra.mxu1 %v7507_v41  ;;  %v8199_v41 = vld [vmem:[%s8672_s1 + $0x418] sm:$0xff]  ;;  %v3876_v35 = vld [vmem:[%s6129_s27 + $0x60] sm:$0x1e] }
 0x1da   : > { %5579 = vmatprep.subr.mxu0 %v5928_v2  ;;  %5614 = vmatprep.subr.mxu1 %v5928_v2  ;;  %v8190_v26 = vpop.f32.mrf.mxu0 }
 0x1db   : > { %5580 = vmatpush3.msra.mxu0 %v8179_v37  ;;  %5615 = vmatpush3.msra.mxu1 %v7516_v43  ;;  %v8210_v43 = vld [vmem:[%s8672_s1 + $0x410] sm:$0xff] }
 0x1dc   : > { %5581 = vmatprep.subr.mxu0 %v5928_v2  ;;  %5616 = vmatprep.subr.mxu1 %v5928_v2  ;;  %v8201_v44 = vpop.f32.mrf.mxu1  ;;  %v5173_v15 = vpop.f32.mrf.mxu0 }
 0x1dd   : > { %5582 = vmatpush3.msra.mxu0 %v8188_v39  ;;  %5617 = vmatpush3.msra.mxu1 %v7525_v45  ;;  %v8220_v45 = vld [vmem:[%s8672_s1 + $0x408] sm:$0xff]  ;;  %v2624_v15 = vld [vmem:[%s8672_s1 + $0x60] sm:$0xff] }
 0x1de   : > { %5583 = vmatprep.subr.mxu0 %v5928_v2  ;;  %5618 = vmatprep.subr.mxu1 %v5928_v2  ;;  %v5208_v37 = vpop.f32.mrf.mxu1 }
 0x1df   : > { %5584 = vmatpush3.msra.mxu0 %v8199_v41  ;;  %5619 = vmatpush3.msra.mxu1 %v7536_v47  ;;  %v8229_v47 = vld [vmem:[%s8672_s1 + $0x400] sm:$0xff]  ;;  %v2527_v37 = vrot.slane %v3876_v35, 1  ;;  %v2627_v35 = vld [vmem:[%s8672_s1 + $0x78] sm:$0xff] }
 0x1e0   : > { %5585 = vmatprep.subr.mxu0 %v5928_v2  ;;  %5620 = vmatprep.subr.mxu1 %v5928_v2 }
 0x1e1   : > { %5586 = vmatpush3.msra.mxu0 %v8210_v43  ;;  %5621 = vmatpush3.msra.mxu1 %v7547_v49  ;;  %v3896_v49 = vld [vmem:[%s6129_s27 + $0x68] sm:$0xf] }
 0x1e2   : > { %5587 = vmatprep.subr.mxu0 %v5928_v2  ;;  %5622 = vmatprep.subr.mxu1 %v5928_v2 }
 0x1e3   : > { %5588 = vmatpush3.msra.mxu0 %v8220_v45  ;;  %5623 = vmatpush3.msra.mxu1 %v7556_v51  ;;  %v2626_v51 = vld [vmem:[%s8672_s1 + $0x70] sm:$0xff] }
 0x1e4   : > { %5589 = vmatprep.subr.mxu0 %v5928_v2  ;;  %5624 = vmatprep.subr.mxu1 %v5928_v2 }
 0x1e5   : > { %5590 = vmatpush3.msra.mxu0 %v8229_v47  ;;  %5591 = vmatprep.mubr.msk.f32.mxu0 %vm5929_vm0, %v5928_v2 }
 0x1e6   : > { %5625 = vmatpush3.msra.mxu1 %v7565_v53  ;;  %5592 = vmatmul.mubr.f32.vlgmr.msra.gmra.mxu0 %v2527_v37  ;;  %v2625_v53 = vld [vmem:[%s8672_s1 + $0x68] sm:$0xff]  ;;  %v2622_v37 = vld [vmem:[%s8672_s1 + $0x50] sm:$0xff] }
 0x1e7   : > { %5626 = vmatprep.mubr.msk.f32.mxu1 %vm5929_vm0, %v5928_v2  ;;  %5629 = vmatprep.subr.mxu0 %v5928_v2 }
 0x1e8   : > { %5664 = vmatprep.subr.mxu1 %v5928_v2  ;;  %5627 = vmatmul.mubr.f32.vlgmr.msra.gmra.mxu1 %v3896_v49  ;;  %v8768_v49 = vld [vmem:[#allocation2_spill] sm:$0xff] }
 0x1e9   : > { %5630 = vmatpush3.msra.mxu0 %v2627_v35  ;;  %5665 = vmatpush3.msra.mxu1 %v7580_v14  ;;  %v2623_v14 = vld [vmem:[%s8672_s1 + $0x58] sm:$0xff]  ;;  %v2621_v35 = vld [vmem:[%s8672_s1 + $0x48] sm:$0xff] }
 0x1ea   : > { %5631 = vmatprep.subr.mxu0 %v5928_v2  ;;  %5666 = vmatprep.subr.mxu1 %v5928_v2 }
 0x1eb   : > { %5632 = vmatpush3.msra.mxu0 %v2626_v51  ;;  %5667 = vmatpush3.msra.mxu1 %v7592_v59  ;;  %v8767_v59 = vld [vmem:[#allocation6_spill] sm:$0xff]  ;;  %v8769_v51 = vld [vmem:[#allocation7_spill] sm:$0xff] }
 0x1ec   : > { %5633 = vmatprep.subr.mxu0 %v5928_v2  ;;  %5668 = vmatprep.subr.mxu1 %v5928_v2 }
 0x1ed   : > { %5634 = vmatpush3.msra.mxu0 %v2625_v53  ;;  %5669 = vmatpush3.msra.mxu1 %v7603_v12  ;;  %v1341_v12 = vadd.f32 %v8036_v56, %v7895_v61  ;;  %v2620_v61 = vld [vmem:[%s8672_s1 + $0x40] sm:$0xff]  ;;  %v2619_v53 = vld [vmem:[%s8672_s1 + $0x38] sm:$0xff] }
 0x1ee   : > { %5635 = vmatprep.subr.mxu0 %v5928_v2  ;;  %5670 = vmatprep.subr.mxu1 %v5928_v2 }
 0x1ef   : > { %5636 = vmatpush3.msra.mxu0 %v2624_v15  ;;  %5671 = vmatpush3.msra.mxu1 %v8767_v59  ;;  %v1429_v56 = vadd.f32 %v8047_v33, %v1341_v12  ;;  %v8771_v33 = vld [vmem:[#allocation4_spill] sm:$0xff]  ;;  %v2616_v12 = vld [vmem:[%s8672_s1 + $0x20] sm:$0xff] }
 0x1f0   : > { %5637 = vmatprep.subr.mxu0 %v5928_v2  ;;  %5672 = vmatprep.subr.mxu1 %v5928_v2 }
 0x1f1   : > { %5638 = vmatpush3.msra.mxu0 %v2623_v14  ;;  %5673 = vmatpush3.msra.mxu1 %v8768_v49  ;;  %v1520_v15 = vadd.f32 %v8190_v26, %v1429_v56  ;;  %v8770_v14 = vld [vmem:[#allocation3_spill] sm:$0xff] }
 0x1f2   : > { %5639 = vmatprep.subr.mxu0 %v5928_v2  ;;  %5674 = vmatprep.subr.mxu1 %v5928_v2  ;;  %v2617_v26 = vld [vmem:[%s8672_s1 + $0x28] sm:$0xff] }
 0x1f3   : > { %5640 = vmatpush3.msra.mxu0 %v2622_v37  ;;  %5675 = vmatpush3.msra.mxu1 %v8769_v51  ;;  %v1609_v59 = vadd.f32 %v8201_v44, %v1520_v15  ;;  %v8772_v37 = vld [vmem:[#allocation8_spill] sm:$0xff]  ;;  %v2615_v44 = vld [vmem:[%s8672_s1 + $0x18] sm:$0xff] }
 0x1f4   : > { %5641 = vmatprep.subr.mxu0 %v5928_v2  ;;  %5676 = vmatprep.subr.mxu1 %v5928_v2 }
 0x1f5   : > { %5642 = vmatpush3.msra.mxu0 %v2621_v35  ;;  %5677 = vmatpush3.msra.mxu1 %v7649_v46  ;;  %v2618_v46 = vld [vmem:[%s8672_s1 + $0x30] sm:$0xff]  ;;  %v8773_v35 = vld [vmem:[#allocation5_spill] sm:$0xff] }
 0x1f6   : > { %5643 = vmatprep.subr.mxu0 %v5928_v2  ;;  %5678 = vmatprep.subr.mxu1 %v5928_v2 }
 0x1f7   : > { %5644 = vmatpush3.msra.mxu0 %v2620_v61  ;;  %5679 = vmatpush3.msra.mxu1 %v8770_v14  ;;  %v2614_v14 = vld [vmem:[%s8672_s1 + $0x10] sm:$0xff] }
 0x1f8   : > { %5645 = vmatprep.subr.mxu0 %v5928_v2  ;;  %5680 = vmatprep.subr.mxu1 %v5928_v2 }
 0x1f9   : > { %5646 = vmatpush3.msra.mxu0 %v2619_v53  ;;  %5681 = vmatpush3.msra.mxu1 %v8771_v33  ;;  %v8774_v53 = vld [vmem:[#allocation9_spill] sm:$0xff]  ;;  %v8775_v33 = vld [vmem:[#allocation10_spill] sm:$0xff] }
 0x1fa   : > { %5647 = vmatprep.subr.mxu0 %v5928_v2  ;;  %5682 = vmatprep.subr.mxu1 %v5928_v2 }
 0x1fb   : > { %5648 = vmatpush3.msra.mxu0 %v2618_v46  ;;  %5683 = vmatpush3.msra.mxu1 %v8772_v37 }
 0x1fc   : > { %5649 = vmatprep.subr.mxu0 %v5928_v2  ;;  %5684 = vmatprep.subr.mxu1 %v5928_v2  ;;  %v1693_v49 = vpop.f32.mrf.mxu0 }
 0x1fd   : > { %5650 = vmatpush3.msra.mxu0 %v2617_v26  ;;  %5685 = vmatpush3.msra.mxu1 %v8773_v35  ;;  %v1697_v51 = vadd.f32 %v1693_v49, %v1609_v59  ;;  %v2613_v59 = vld [vmem:[%s8672_s1 + $0x8] sm:$0xff]  ;;  %v3895_v49 = vld [vmem:[%s6129_s27 + $0x60] sm:$0xf]  ;;  %v3946_v35 = vld [vmem:[%s8672_s1 + $0x1f8] sm:$0xff] }
 0x1fe   : > { %5651 = vmatprep.subr.mxu0 %v5928_v2  ;;  %5686 = vmatprep.subr.mxu1 %v5928_v2  ;;  %v1784_v61 = vpop.f32.mrf.mxu1  ;;  %v5243_v56 = vpop.f32.mrf.mxu0 }
 0x1ff   : > { %5652 = vmatpush3.msra.mxu0 %v2616_v12  ;;  %5687 = vmatpush3.msra.mxu1 %v8774_v53  ;;  %v1788_v15 = vadd.f32 %v1784_v61, %v1697_v51  ;;  %v3913_v12 = vld [vmem:[%s6129_s27 + $0x60] sm:$0x1e]  ;;  %v8777_v61 = vld [vmem:[#allocation12_spill] sm:$0xff]  ;;  %v3934_v56 = vld [vmem:[%s8672_s1 + $0x198] sm:$0xff] }
 0x200   : > { %5653 = vmatprep.subr.mxu0 %v5928_v2  ;;  %5688 = vmatprep.subr.mxu1 %v5928_v2  ;;  %v5278_v46 = vpop.f32.mrf.mxu1  ;;  %v3943_v51 = vld [vmem:[%s8672_s1 + $0x1e0] sm:$0xff] }
 0x201   : > { %5654 = vmatpush3.msra.mxu0 %v2615_v44  ;;  %5689 = vmatpush3.msra.mxu1 %v7724_v60  ;;  %v1796_v26 = vadd.f32 %v8775_v33, %v1788_v15  ;;  %v2612_v60 = vld [vmem:[%s8672_s1] sm:$0xff]  ;;  %v3933_v46 = vld [vmem:[%s8672_s1 + $0x190] sm:$0xff] }
 0x202   : > { %5655 = vmatprep.subr.mxu0 %v5928_v2  ;;  %5690 = vmatprep.subr.mxu1 %v5928_v2  ;;  %v3935_v44 = vld [vmem:[%s8672_s1 + $0x1a0] sm:$0xff] }
 0x203   : > { %5656 = vmatpush3.msra.mxu0 %v2614_v14  ;;  %5691 = vmatpush3.msra.mxu1 %v7738_v21  ;;  %v1797_v37 = vmax.f32 %v1796_v26, 0.0  ;;  %v2803_v21 = vrot.slane %v3913_v12, 1  ;;  %v3930_v26 = vld [vmem:[%s6129_s27 + $0x70] sm:$0xf] }
 0x204   : > { %5657 = vmatprep.subr.mxu0 %v5928_v2  ;;  %5692 = vmatprep.subr.mxu1 %v5928_v2 }
 0x205   : > { %5658 = vmatpush3.msra.mxu0 %v2613_v59  ;;  %5693 = vmatpush3.msra.mxu1 %v7755_v40  ;;  %3755 = vst [vmem:[%s7746_s9 + $0x4] sm:$0xf] %v1797_v37  ;;  %v3945_v40 = vld [vmem:[%s8672_s1 + $0x1f0] sm:$0xff]  ;;  %v3980_v59 = vld [vmem:[%s8672_s1 + $0x2f8] sm:$0xff]  ;;  %v3977_v37 = vld [vmem:[%s8672_s1 + $0x2e0] sm:$0xff] }
 0x206   : > { %5659 = vmatprep.subr.mxu0 %v5928_v2  ;;  %5694 = vmatprep.subr.mxu1 %v5928_v2 }
 0x207   : > { %5660 = vmatpush3.msra.mxu0 %v2612_v60  ;;  %5661 = vmatprep.mubr.msk.f32.mxu0 %vm5929_vm0, %v5928_v2 }
 0x208   : > { %5695 = vmatpush3.msra.mxu1 %v7767_v58  ;;  %5662 = vmatmul.mubr.f32.vlgmr.msra.gmra.mxu0 %v3895_v49  ;;  %v3944_v58 = vld [vmem:[%s8672_s1 + $0x1e8] sm:$0xff] }
 0x209   : > { %5696 = vmatprep.mubr.msk.f32.mxu1 %vm5929_vm0, %v5928_v2  ;;  %5699 = vmatprep.subr.mxu0 %v5928_v2 }
 0x20a   : > { %5734 = vmatprep.subr.mxu1 %v5928_v2  ;;  %5697 = vmatmul.mubr.f32.vlgmr.msra.gmra.mxu1 %v2803_v21 }
 0x20b   : > { %5700 = vmatpush3.msra.mxu0 %v3946_v35  ;;  %5735 = vmatpush3.msra.mxu1 %v7782_v57  ;;  %v3942_v57 = vld [vmem:[%s8672_s1 + $0x1d8] sm:$0xff] }
 0x20c   : > { %5701 = vmatprep.subr.mxu0 %v5928_v2  ;;  %5736 = vmatprep.subr.mxu1 %v5928_v2 }
 0x20d   : > { %5702 = vmatpush3.msra.mxu0 %v3945_v40  ;;  %5737 = vmatpush3.msra.mxu1 %v7791_v55  ;;  %v3941_v55 = vld [vmem:[%s8672_s1 + $0x1d0] sm:$0xff] }
 0x20e   : > { %5703 = vmatprep.subr.mxu0 %v5928_v2  ;;  %5738 = vmatprep.subr.mxu1 %v5928_v2  ;;  %v3964_v40 = vld [vmem:[%s6129_s27 + $0x70] sm:$0x1e] }
 0x20f   : > { %5704 = vmatpush3.msra.mxu0 %v3944_v58  ;;  %5739 = vmatpush3.msra.mxu1 %v7800_v6  ;;  %v3940_v6 = vld [vmem:[%s8672_s1 + $0x1c8] sm:$0xff]  ;;  %v3070_v58 = vrot.slane %v3964_v40, 1 }
 0x210   : > { %5705 = vmatprep.subr.mxu0 %v5928_v2  ;;  %5740 = vmatprep.subr.mxu1 %v5928_v2 }
 0x211   : > { %5706 = vmatpush3.msra.mxu0 %v3943_v51  ;;  %5741 = vmatpush3.msra.mxu1 %v7809_v18  ;;  %v3939_v18 = vld [vmem:[%s8672_s1 + $0x1c0] sm:$0xff]  ;;  %v4014_v51 = vld [vmem:[%s8672_s1 + $0x3f8] sm:$0xff] }
 0x212   : > { %5707 = vmatprep.subr.mxu0 %v5928_v2  ;;  %5742 = vmatprep.subr.mxu1 %v5928_v2 }
 0x213   : > { %5708 = vmatpush3.msra.mxu0 %v3942_v57  ;;  %5743 = vmatpush3.msra.mxu1 %v7818_v22  ;;  %v3938_v22 = vld [vmem:[%s8672_s1 + $0x1b8] sm:$0xff]  ;;  %v4011_v57 = vld [vmem:[%s8672_s1 + $0x3e0] sm:$0xff] }
 0x214   : > { %5709 = vmatprep.subr.mxu0 %v5928_v2  ;;  %5744 = vmatprep.subr.mxu1 %v5928_v2 }
 0x215   : > { %5710 = vmatpush3.msra.mxu0 %v3941_v55  ;;  %5745 = vmatpush3.msra.mxu1 %v7827_v30  ;;  %v3937_v30 = vld [vmem:[%s8672_s1 + $0x1b0] sm:$0xff]  ;;  %v4003_v55 = vld [vmem:[%s8672_s1 + $0x3a0] sm:$0xff] }
 0x216   : > { %5711 = vmatprep.subr.mxu0 %v5928_v2  ;;  %5746 = vmatprep.subr.mxu1 %v5928_v2 }
 0x217   : > { %5712 = vmatpush3.msra.mxu0 %v3940_v6  ;;  %5747 = vmatpush3.msra.mxu1 %v7836_v63  ;;  %v3936_v63 = vld [vmem:[%s8672_s1 + $0x1a8] sm:$0xff]  ;;  %v8779_v6 = vld [vmem:[#allocation14_spill] sm:$0xff] }
 0x218   : > { %5713 = vmatprep.subr.mxu0 %v5928_v2  ;;  %5748 = vmatprep.subr.mxu1 %v5928_v2 }
 0x219   : > { %5714 = vmatpush3.msra.mxu0 %v3939_v18  ;;  %5749 = vmatpush3.msra.mxu1 %v7845_v20  ;;  %v8776_v20 = vld [vmem:[#allocation11_spill] sm:$0xff]  ;;  %v4002_v18 = vld [vmem:[%s8672_s1 + $0x398] sm:$0xff] }
 0x21a   : > { %5715 = vmatprep.subr.mxu0 %v5928_v2  ;;  %5750 = vmatprep.subr.mxu1 %v5928_v2 }
 0x21b   : > { %5716 = vmatpush3.msra.mxu0 %v3938_v22  ;;  %5751 = vmatpush3.msra.mxu1 %v7854_v34 }
 0x21c   : > { %5717 = vmatprep.subr.mxu0 %v5928_v2  ;;  %5752 = vmatprep.subr.mxu1 %v5928_v2 }
 0x21d   : > { %5718 = vmatpush3.msra.mxu0 %v3937_v30  ;;  %5753 = vmatpush3.msra.mxu1 %v8776_v20 }
 0x21e   : > { %5719 = vmatprep.subr.mxu0 %v5928_v2  ;;  %5754 = vmatprep.subr.mxu1 %v5928_v2  ;;  %v1900_v34 = vpop.f32.mrf.mxu0 }
 0x21f   : > { %5720 = vmatpush3.msra.mxu0 %v3936_v63  ;;  %5755 = vmatpush3.msra.mxu1 %v8777_v61  ;;  %v4001_v63 = vld [vmem:[%s8672_s1 + $0x390] sm:$0xff]  ;;  %v3998_v61 = vld [vmem:[%s6129_s27 + $0x88] sm:$0xf] }
 0x220   : > { %5721 = vmatprep.subr.mxu0 %v5928_v2  ;;  %5756 = vmatprep.subr.mxu1 %v5928_v2  ;;  %v1970_v53 = vpop.f32.mrf.mxu1  ;;  %v5313_v15 = vpop.f32.mrf.mxu0 }
 0x221   : > { %5722 = vmatpush3.msra.mxu0 %v3935_v44  ;;  %5757 = vmatpush3.msra.mxu1 %v7881_v38  ;;  %v8426_v14 = vadd.f32 %v1970_v53, %v1900_v34  ;;  %v3932_v38 = vld [vmem:[%s8672_s1 + $0x188] sm:$0xff]  ;;  %v4015_v44 = vld [vmem:[%s6129_s27 + $0x80] sm:$0x1e] }
 0x222   : > { %5723 = vmatprep.subr.mxu0 %v5928_v2  ;;  %5758 = vmatprep.subr.mxu1 %v5928_v2  ;;  %v5348_v33 = vpop.f32.mrf.mxu1  ;;  %v3338_v34 = vrot.slane %v4015_v44, 1 }
 0x223   : > { %5724 = vmatpush3.msra.mxu0 %v3934_v56  ;;  %5759 = vmatpush3.msra.mxu1 %v7891_v42  ;;  %v3931_v42 = vld [vmem:[%s8672_s1 + $0x180] sm:$0xff] }
 0x224   : > { %5725 = vmatprep.subr.mxu0 %v5928_v2  ;;  %5760 = vmatprep.subr.mxu1 %v5928_v2 }
 0x225   : > { %5726 = vmatpush3.msra.mxu0 %v3933_v46  ;;  %5761 = vmatpush3.msra.mxu1 %v7902_v48  ;;  %v3947_v48 = vld [vmem:[%s6129_s27 + $0x78] sm:$0xf] }
 0x226   : > { %5727 = vmatprep.subr.mxu0 %v5928_v2  ;;  %5762 = vmatprep.subr.mxu1 %v5928_v2 }
 0x227   : > { %5728 = vmatpush3.msra.mxu0 %v3932_v38  ;;  %5763 = vmatpush3.msra.mxu1 %v7911_v52  ;;  %v3979_v52 = vld [vmem:[%s8672_s1 + $0x2f0] sm:$0xff] }
 0x228   : > { %5729 = vmatprep.subr.mxu0 %v5928_v2  ;;  %5764 = vmatprep.subr.mxu1 %v5928_v2 }
 0x229   : > { %5730 = vmatpush3.msra.mxu0 %v3931_v42  ;;  %5731 = vmatprep.mubr.msk.f32.mxu0 %vm5929_vm0, %v5928_v2 }
 0x22a   : > { %5765 = vmatpush3.msra.mxu1 %v7921_v1  ;;  %5732 = vmatmul.mubr.f32.vlgmr.msra.gmra.mxu0 %v3930_v26  ;;  %v3978_v1 = vld [vmem:[%s8672_s1 + $0x2e8] sm:$0xff] }
 0x22b   : > { %5766 = vmatprep.mubr.msk.f32.mxu1 %vm5929_vm0, %v5928_v2  ;;  %5769 = vmatprep.subr.mxu0 %v5928_v2 }
 0x22c   : > { %5804 = vmatprep.subr.mxu1 %v5928_v2  ;;  %5767 = vmatmul.mubr.f32.vlgmr.msra.gmra.mxu1 %v3947_v48 }
 0x22d   : > { %5770 = vmatpush3.msra.mxu0 %v3980_v59  ;;  %5805 = vmatpush3.msra.mxu1 %v7935_v8  ;;  %v3976_v8 = vld [vmem:[%s8672_s1 + $0x2d8] sm:$0xff] }
 0x22e   : > { %5771 = vmatprep.subr.mxu0 %v5928_v2  ;;  %5806 = vmatprep.subr.mxu1 %v5928_v2 }
 0x22f   : > { %5772 = vmatpush3.msra.mxu0 %v3979_v52  ;;  %5807 = vmatpush3.msra.mxu1 %v7944_v27  ;;  %v3975_v27 = vld [vmem:[%s8672_s1 + $0x2d0] sm:$0xff] }
 0x230   : > { %5773 = vmatprep.subr.mxu0 %v5928_v2  ;;  %5808 = vmatprep.subr.mxu1 %v5928_v2 }
 0x231   : > { %5774 = vmatpush3.msra.mxu0 %v3978_v1  ;;  %5809 = vmatpush3.msra.mxu1 %v7953_v36  ;;  %v3974_v36 = vld [vmem:[%s8672_s1 + $0x2c8] sm:$0xff] }
 0x232   : > { %5775 = vmatprep.subr.mxu0 %v5928_v2  ;;  %5810 = vmatprep.subr.mxu1 %v5928_v2 }
 0x233   : > { %5776 = vmatpush3.msra.mxu0 %v3977_v37  ;;  %5811 = vmatpush3.msra.mxu1 %v7962_v50  ;;  %v3973_v50 = vld [vmem:[%s8672_s1 + $0x2c0] sm:$0xff] }
 0x234   : > { %5777 = vmatprep.subr.mxu0 %v5928_v2  ;;  %5812 = vmatprep.subr.mxu1 %v5928_v2 }
 0x235   : > { %5778 = vmatpush3.msra.mxu0 %v3976_v8  ;;  %5813 = vmatpush3.msra.mxu1 %v7971_v32  ;;  %v3972_v32 = vld [vmem:[%s8672_s1 + $0x2b8] sm:$0xff] }
 0x236   : > { %5779 = vmatprep.subr.mxu0 %v5928_v2  ;;  %5814 = vmatprep.subr.mxu1 %v5928_v2 }
 0x237   : > { %5780 = vmatpush3.msra.mxu0 %v3975_v27  ;;  %5815 = vmatpush3.msra.mxu1 %v7980_v54  ;;  %v3971_v54 = vld [vmem:[%s8672_s1 + $0x2b0] sm:$0xff] }
 0x238   : > { %5781 = vmatprep.subr.mxu0 %v5928_v2  ;;  %5816 = vmatprep.subr.mxu1 %v5928_v2 }
 0x239   : > { %5782 = vmatpush3.msra.mxu0 %v3974_v36  ;;  %5817 = vmatpush3.msra.mxu1 %v7989_v4  ;;  %v3970_v4 = vld [vmem:[%s8672_s1 + $0x2a8] sm:$0xff] }
 0x23a   : > { %5783 = vmatprep.subr.mxu0 %v5928_v2  ;;  %5818 = vmatprep.subr.mxu1 %v5928_v2 }
 0x23b   : > { %5784 = vmatpush3.msra.mxu0 %v3973_v50  ;;  %5819 = vmatpush3.msra.mxu1 %v7998_v24  ;;  %v3969_v24 = vld [vmem:[%s8672_s1 + $0x2a0] sm:$0xff] }
 0x23c   : > { %5785 = vmatprep.subr.mxu0 %v5928_v2  ;;  %5820 = vmatprep.subr.mxu1 %v5928_v2 }
 0x23d   : > { %5786 = vmatpush3.msra.mxu0 %v3972_v32  ;;  %5821 = vmatpush3.msra.mxu1 %v8007_v10 }
 0x23e   : > { %5787 = vmatprep.subr.mxu0 %v5928_v2  ;;  %5822 = vmatprep.subr.mxu1 %v5928_v2 }
 0x23f   : > { %5788 = vmatpush3.msra.mxu0 %v3971_v54  ;;  %5823 = vmatpush3.msra.mxu1 %v8016_v0  ;;  %v3968_v0 = vld [vmem:[%s8672_s1 + $0x298] sm:$0xff] }
 0x240   : > { %5789 = vmatprep.subr.mxu0 %v5928_v2  ;;  %5824 = vmatprep.subr.mxu1 %v5928_v2  ;;  %v2060_v10 = vpop.f32.mrf.mxu0 }
 0x241   : > { %5790 = vmatpush3.msra.mxu0 %v3970_v4  ;;  %5825 = vmatpush3.msra.mxu1 %v8025_v3  ;;  %v2064_v12 = vadd.f32 %v2060_v10, %v8426_v14  ;;  %v3967_v3 = vld [vmem:[%s8672_s1 + $0x290] sm:$0xff] }
 0x242   : > { %5791 = vmatprep.subr.mxu0 %v5928_v2  ;;  %5826 = vmatprep.subr.mxu1 %v5928_v2  ;;  %v2148_v60 = vpop.f32.mrf.mxu1  ;;  %v5383_v49 = vpop.f32.mrf.mxu0 }
 0x243   : > { %5792 = vmatpush3.msra.mxu0 %v3969_v24  ;;  %5827 = vmatpush3.msra.mxu1 %v8034_v5  ;;  %v8531_v21 = vadd.f32 %v2148_v60, %v2064_v12  ;;  %v3966_v5 = vld [vmem:[%s8672_s1 + $0x288] sm:$0xff] }
 0x244   : > { %5793 = vmatprep.subr.mxu0 %v5928_v2  ;;  %5828 = vmatprep.subr.mxu1 %v5928_v2  ;;  %v5418_v35 = vpop.f32.mrf.mxu1 }
 0x245   : > { %5794 = vmatpush3.msra.mxu0 %v3968_v0  ;;  %5829 = vmatpush3.msra.mxu1 %v8045_v7  ;;  %v3965_v7 = vld [vmem:[%s8672_s1 + $0x280] sm:$0xff] }
 0x246   : > { %5795 = vmatprep.subr.mxu0 %v5928_v2  ;;  %5830 = vmatprep.subr.mxu1 %v5928_v2 }
 0x247   : > { %5796 = vmatpush3.msra.mxu0 %v3967_v3  ;;  %5831 = vmatpush3.msra.mxu1 %v8056_v9  ;;  %v3981_v9 = vld [vmem:[%s6129_s27 + $0x80] sm:$0xf] }
 0x248   : > { %5797 = vmatprep.subr.mxu0 %v5928_v2  ;;  %5832 = vmatprep.subr.mxu1 %v5928_v2 }
 0x249   : > { %5798 = vmatpush3.msra.mxu0 %v3966_v5  ;;  %5833 = vmatpush3.msra.mxu1 %v8065_v11  ;;  %v4013_v11 = vld [vmem:[%s8672_s1 + $0x3f0] sm:$0xff] }
 0x24a   : > { %5799 = vmatprep.subr.mxu0 %v5928_v2  ;;  %5834 = vmatprep.subr.mxu1 %v5928_v2 }
 0x24b   : > { %5800 = vmatpush3.msra.mxu0 %v3965_v7  ;;  %5801 = vmatprep.mubr.msk.f32.mxu0 %vm5929_vm0, %v5928_v2 }
 0x24c   : > { %5835 = vmatpush3.msra.mxu1 %v8074_v13  ;;  %5802 = vmatmul.mubr.f32.vlgmr.msra.gmra.mxu0 %v3070_v58  ;;  %v4012_v13 = vld [vmem:[%s8672_s1 + $0x3e8] sm:$0xff] }
 0x24d   : > { %5836 = vmatprep.mubr.msk.f32.mxu1 %vm5929_vm0, %v5928_v2  ;;  %5839 = vmatprep.subr.mxu0 %v5928_v2 }
 0x24e   : > { %5874 = vmatprep.subr.mxu1 %v5928_v2  ;;  %5837 = vmatmul.mubr.f32.vlgmr.msra.gmra.mxu1 %v3981_v9 }
 0x24f   : > { %5840 = vmatpush3.msra.mxu0 %v4014_v51  ;;  %5875 = vmatpush3.msra.mxu1 %v8089_v16  ;;  %v4010_v16 = vld [vmem:[%s8672_s1 + $0x3d8] sm:$0xff] }
 0x250   : > { %5841 = vmatprep.subr.mxu0 %v5928_v2  ;;  %5876 = vmatprep.subr.mxu1 %v5928_v2 }
 0x251   : > { %5842 = vmatpush3.msra.mxu0 %v4013_v11  ;;  %5877 = vmatpush3.msra.mxu1 %v8098_v17  ;;  %v4009_v17 = vld [vmem:[%s8672_s1 + $0x3d0] sm:$0xff] }
 0x252   : > { %5843 = vmatprep.subr.mxu0 %v5928_v2  ;;  %5878 = vmatprep.subr.mxu1 %v5928_v2 }
 0x253   : > { %5844 = vmatpush3.msra.mxu0 %v4012_v13  ;;  %5879 = vmatpush3.msra.mxu1 %v8107_v19  ;;  %v4008_v19 = vld [vmem:[%s8672_s1 + $0x3c8] sm:$0xff] }
 0x254   : > { %5845 = vmatprep.subr.mxu0 %v5928_v2  ;;  %5880 = vmatprep.subr.mxu1 %v5928_v2 }
 0x255   : > { %5846 = vmatpush3.msra.mxu0 %v4011_v57  ;;  %5881 = vmatpush3.msra.mxu1 %v8116_v28  ;;  %v4007_v28 = vld [vmem:[%s8672_s1 + $0x3c0] sm:$0xff] }
 0x256   : > { %5847 = vmatprep.subr.mxu0 %v5928_v2  ;;  %5882 = vmatprep.subr.mxu1 %v5928_v2 }
 0x257   : > { %5848 = vmatpush3.msra.mxu0 %v4010_v16  ;;  %5883 = vmatpush3.msra.mxu1 %v8125_v23  ;;  %v4006_v23 = vld [vmem:[%s8672_s1 + $0x3b8] sm:$0xff] }
 0x258   : > { %5849 = vmatprep.subr.mxu0 %v5928_v2  ;;  %5884 = vmatprep.subr.mxu1 %v5928_v2 }
 0x259   : > { %5850 = vmatpush3.msra.mxu0 %v4009_v17  ;;  %5885 = vmatpush3.msra.mxu1 %v8134_v25  ;;  %v4005_v25 = vld [vmem:[%s8672_s1 + $0x3b0] sm:$0xff] }
 0x25a   : > { %5851 = vmatprep.subr.mxu0 %v5928_v2  ;;  %5886 = vmatprep.subr.mxu1 %v5928_v2 }
 0x25b   : > { %5852 = vmatpush3.msra.mxu0 %v4008_v19  ;;  %5887 = vmatpush3.msra.mxu1 %v8143_v62  ;;  %v4004_v62 = vld [vmem:[%s8672_s1 + $0x3a8] sm:$0xff] }
 0x25c   : > { %5853 = vmatprep.subr.mxu0 %v5928_v2  ;;  %5888 = vmatprep.subr.mxu1 %v5928_v2 }
 0x25d   : > { %5854 = vmatpush3.msra.mxu0 %v4007_v28  ;;  %5889 = vmatpush3.msra.mxu1 %v8152_v29  ;;  %v8778_v29 = vld [vmem:[#allocation13_spill] sm:$0xff] }
 0x25e   : > { %5855 = vmatprep.subr.mxu0 %v5928_v2  ;;  %5890 = vmatprep.subr.mxu1 %v5928_v2 }
 0x25f   : > { %5856 = vmatpush3.msra.mxu0 %v4006_v23  ;;  %5891 = vmatpush3.msra.mxu1 %v8161_v31 }
 0x260   : > { %5857 = vmatprep.subr.mxu0 %v5928_v2  ;;  %5892 = vmatprep.subr.mxu1 %v5928_v2 }
 0x261   : > { %5858 = vmatpush3.msra.mxu0 %v4005_v25  ;;  %5893 = vmatpush3.msra.mxu1 %v8778_v29 }
 0x262   : > { %5859 = vmatprep.subr.mxu0 %v5928_v2  ;;  %5894 = vmatprep.subr.mxu1 %v5928_v2  ;;  %v2236_v31 = vpop.f32.mrf.mxu0 }
 0x263   : > { %5860 = vmatpush3.msra.mxu0 %v4004_v62  ;;  %5895 = vmatpush3.msra.mxu1 %v8779_v6  ;;  %v2240_v15 = vadd.f32 %v2236_v31, %v8531_v21 }
 0x264   : > { %5861 = vmatprep.subr.mxu0 %v5928_v2  ;;  %5896 = vmatprep.subr.mxu1 %v5928_v2  ;;  %v2327_v22 = vpop.f32.mrf.mxu1  ;;  %v5453_v30 = vpop.f32.mrf.mxu0 }
 0x265   : > { %5862 = vmatpush3.msra.mxu0 %v4003_v55  ;;  %5897 = vmatpush3.msra.mxu1 %v8188_v39  ;;  %v4000_v39 = vld [vmem:[%s8672_s1 + $0x388] sm:$0xff]  ;;  %v2331_v14 = vadd.f32 %v2327_v22, %v2240_v15 }
 0x266   : > { %5863 = vmatprep.subr.mxu0 %v5928_v2  ;;  %5898 = vmatprep.subr.mxu1 %v5928_v2  ;;  %v5488_v20 = vpop.f32.mrf.mxu1 }
 0x267   : > { %5864 = vmatpush3.msra.mxu0 %v4002_v18  ;;  %5899 = vmatpush3.msra.mxu1 %v8199_v41  ;;  %v3999_v41 = vld [vmem:[%s8672_s1 + $0x380] sm:$0xff] }
 0x268   : > { %5865 = vmatprep.subr.mxu0 %v5928_v2  ;;  %5900 = vmatprep.subr.mxu1 %v5928_v2 }
 0x269   : > { %5866 = vmatpush3.msra.mxu0 %v4001_v63  ;;  %5901 = vmatpush3.msra.mxu1 %v8210_v43 }
 0x26a   : > { %5867 = vmatprep.subr.mxu0 %v5928_v2  ;;  %5902 = vmatprep.subr.mxu1 %v5928_v2 }
 0x26b   : > { %5868 = vmatpush3.msra.mxu0 %v4000_v39  ;;  %5903 = vmatpush3.msra.mxu1 %v8220_v45 }
 0x26c   : > { %5869 = vmatprep.subr.mxu0 %v5928_v2  ;;  %5904 = vmatprep.subr.mxu1 %v5928_v2 }
 0x26d   : > { %5870 = vmatpush3.msra.mxu0 %v3999_v41  ;;  %5871 = vmatprep.mubr.msk.f32.mxu0 %vm5929_vm0, %v5928_v2 }
 0x26e   : > { %5905 = vmatpush3.msra.mxu1 %v8229_v47  ;;  %5906 = vmatprep.mubr.msk.f32.mxu1 %vm5929_vm0, %v5928_v2  ;;  %v3893_v47 = vld [vmem:[%s8673_s2] ss:$0 sm:$0xff] }
 0x26f   : > { %5872 = vmatmul.mubr.f32.vlgmr.msra.gmra.mxu0 %v3998_v61  ;;  %5907 = vmatmul.mubr.f32.vlgmr.msra.gmra.mxu1 %v3338_v34 }
 0x284   : > { %v2416_v43 = vpop.f32.mrf.mxu0 }
 0x285   : > { %v2420_v46 = vadd.f32 %v2416_v43, %v2331_v14 }
 0x286   : > { %v2504_v45 = vpop.f32.mrf.mxu1  ;;  %v5523_v56 = vpop.f32.mrf.mxu0 }
 0x287   : > { %v2508_v33 = vadd.f32 %v2504_v45, %v2420_v46 }
 0x288   : > { %v5558_v53 = vpop.f32.mrf.mxu1 }
 0x2a6   : > { %v2595_v38 = vpop.f32.mrf.mxu0 }
 0x2a7   : > { %v2599_v42 = vadd.f32 %v2595_v38, %v2508_v33 }
 0x2a8   : > { %v2711_v26 = vpop.f32.mrf.mxu1  ;;  %v5593_v2 = vpop.f32.mrf.mxu0 }
 0x2a9   : > { %v2607_v48 = vadd.f32 %v3893_v47, %v2599_v42 }
 0x2aa   : > { %v5628_v59 = vpop.f32.mrf.mxu1 }
 0x2ab   : > { %v2608_v52 = vmax.f32 %v2607_v48, 0.0 }
 0x2ad   : > { %3894 = vst [vmem:[%s7746_s9 + $0x8] sm:$0xf] %v2608_v52 }
 0x2c8   : > { %v2781_v1 = vpop.f32.mrf.mxu0 }
 0x2c9   : > { %v2782_v37 = vadd.f32 %v2781_v1, %v2711_v26 }
 0x2ca   : > { %v2871_v8 = vpop.f32.mrf.mxu1  ;;  %v5663_v27 = vpop.f32.mrf.mxu0 }
 0x2cb   : > { %v2875_v36 = vadd.f32 %v2871_v8, %v2782_v37 }
 0x2cc   : > { %v5698_v50 = vpop.f32.mrf.mxu1 }
 0x2ea   : > { %v2959_v32 = vpop.f32.mrf.mxu0 }
 0x2eb   : > { %v2963_v49 = vadd.f32 %v2959_v32, %v2875_v36 }
 0x2ec   : > { %v3047_v54 = vpop.f32.mrf.mxu1  ;;  %v5733_v4 = vpop.f32.mrf.mxu0 }
 0x2ed   : > { %v3051_v21 = vadd.f32 %v3047_v54, %v2963_v49 }
 0x2ee   : > { %v5768_v24 = vpop.f32.mrf.mxu1 }
 0x30c   : > { %v3138_v10 = vpop.f32.mrf.mxu0 }
 0x30d   : > { %v3142_v3 = vadd.f32 %v3138_v10, %v3051_v21 }
 0x30e   : > { %v3227_v12 = vpop.f32.mrf.mxu1  ;;  %v5803_v0 = vpop.f32.mrf.mxu0 }
 0x30f   : > { %v3231_v35 = vadd.f32 %v3227_v12, %v3142_v3 }
 0x310   : > { %v5838_v60 = vpop.f32.mrf.mxu1 }
 0x32f   : > { %v3315_v40 = vpop.f32.mrf.mxu0  ;;  %v3406_v5 = vpop.f32.mrf.mxu1 }
 0x330   : > { %v3319_v7 = vadd.f32 %v3315_v40, %v3231_v35 }
 0x331   : > { %v5873_v58 = vpop.f32.mrf.mxu0  ;;  %v5908_v9 = vpop.f32.mrf.mxu1 }
 0x332   : > { %v3410_v51 = vadd.f32 %v3406_v5, %v3319_v7 }
 0x334   : > { %v3418_v11 = vadd.f32 %v3893_v47, %v3410_v51 }
 0x336   : > { %v3419_v13 = vmax.f32 %v3418_v11, 0.0 }
 0x338   : > { %4033 = vst [vmem:[%s7746_s9 + $0xc] sm:$0xf] %v3419_v13 }
 0x339 PF: > { %s13_s12 = sadd.s32 1, %s5926_s12  }
 0x33a   : > { %p10_p4 = scmp.ge.s32.totalorder %s13_s12, 4  }
 0x33c   :  { %12 = sbr.rel (!%p10_p4) target bundleno = 1 (0x1), region = 77 }

</bundles_post_ra>
